<compile_context>
chip_gen: v7x
topology: tpu7x:2x2x1
jax: 0.10.0
libtpu: 0.0.40
codegen_flags: <defaults>
</compile_context>

<pallas_src>
import functools

import numpy as np
import jax
import jax.numpy as jnp
from jax.experimental import pallas as pl
from jax.experimental.pallas import tpu as pltpu

_BF16 = jnp.bfloat16
_F32 = jnp.float32


# ------------------------------ fused kernel ------------------------------

def _fused_net_kernel(
    patches_ref,   # [4*R1, 25]        bf16  corner-ordered 5x5 im2col of input
    tapmask_ref,   # [R1, 25]          f32   conv2 tap validity masks
    w1_ref,        # [25, 32]          bf16
    b1_ref,        # [1, 32]           f32
    w2_ref,        # [25, 32, 64]      bf16
    b2_ref,        # [1, 64]           f32
    wf1_hbm,       # [H4*W4, 64, 512]  bf16  (HBM; prefetched in-kernel)
    bf1_ref,       # [1, 512]          f32
    wf2_hbm,       # [512, 256]        bf16  (HBM; prefetched in-kernel)
    bf2_ref,       # [1, 256]          f32
    wf3_hbm,       # [256, 128]        bf16  (HBM; prefetched in-kernel)
    bf3_ref,       # [1, 128]          f32
    out_ref,       # [B, 128]          f32
    wf1_vmem,      # scratch [H4*W4, 64, 512] bf16
    wf2_vmem,      # scratch [512, 256]       bf16
    wf3_vmem,      # scratch [256, 128]       bf16
    dma_sem,       # scratch DMA semaphores (3,)
    p1pad_ref,     # scratch [2*PAD+R1, 32]   f32
    c2pad_ref,     # scratch [R1+EXT, 64]     f32
    m2_ref,        # scratch [R1, 64]         f32
    *, B, H2, W2, PAD,
):
    R1 = B * H2 * W2
    H4, W4 = H2 // 2, W2 // 2

    # --- Kick off FC-weight prefetch (HBM -> VMEM) so it overlaps the conv
    #     tower; each .wait() sits right before the weight's first use.
    cp_f1 = pltpu.make_async_copy(wf1_hbm, wf1_vmem, dma_sem.at[0])
    cp_f2 = pltpu.make_async_copy(wf2_hbm, wf2_vmem, dma_sem.at[1])
    cp_f3 = pltpu.make_async_copy(wf3_hbm, wf3_vmem, dma_sem.at[2])
    cp_f1.start()
    cp_f2.start()
    cp_f3.start()

    # --- conv1 (one GEMM) + bias + ReLU; MaxPool2d(2,2) is a max over the 4
    #     contiguous corner row-blocks (patch rows were ordered (corner,b,y,x)).
    c1 = jnp.dot(patches_ref[...], w1_ref[...], preferred_element_type=_F32)
    c1 = jnp.maximum(c1 + b1_ref[...], 0.0)                       # [4*R1, 32]
    p1 = jnp.maximum(jnp.maximum(c1[0:R1], c1[R1:2 * R1]),
                     jnp.maximum(c1[2 * R1:3 * R1], c1[3 * R1:4 * R1]))

    # Stage pooled activations, zero-padded along rows, for shifted-tap reads.
    p1pad_ref[...] = jnp.zeros_like(p1pad_ref)
    p1pad_ref[PAD:PAD + R1, :] = p1

    # --- conv2 = 25 accumulated row-shifted matmuls + bias + ReLU.
    #     Row r of p1 is pixel (b, y, x); tap (dy, dx) is a constant row shift
    #     s = (dy-2)*W2 + (dx-2), zeroed at the image borders by the tap mask
    #     (the centre tap needs no mask).
    acc = jnp.zeros((R1, 64), _F32)
    for t in range(25):
        dy, dx = t // 5, t % 5
        s = (dy - 2) * W2 + (dx - 2)
        view = p1pad_ref[PAD + s:PAD + s + R1, :]                 # [R1, 32]
        if dy == 2 and dx == 2:
            tap = view.astype(_BF16)
        else:
            tap = (view * tapmask_ref[:, t:t + 1]).astype(_BF16)
        acc = acc + jnp.dot(tap, w2_ref[t], preferred_element_type=_F32)
    c2 = jnp.maximum(acc + b2_ref[...], 0.0)                      # [R1, 64]

    # --- MaxPool2d(2,2): window max via 4 row-shifted views of a padded copy;
    #     only rows with even (y, x) are consumed below.
    c2pad_ref[...] = jnp.zeros_like(c2pad_ref)
    c2pad_ref[0:R1, :] = c2
    m2_ref[...] = jnp.maximum(
        jnp.maximum(c2pad_ref[0:R1, :], c2pad_ref[1:R1 + 1, :]),
        jnp.maximum(c2pad_ref[W2:R1 + W2, :], c2pad_ref[W2 + 1:R1 + W2 + 1, :]))

    # --- fc1 + ReLU.  The NCHW flatten is folded into fc1: each pooled spatial
    #     position r contributes its [B, 64] channel rows against the matching
    #     [64, 512] slab of the pre-permuted fc1 weight.
    cp_f1.wait()
    h = jnp.zeros((B, 512), _F32)
    for r in range(H4 * W4):
        yo, xo = r // W4, r % W4
        v = 2 * yo * W2 + 2 * xo
        rows = jnp.concatenate(
            [m2_ref[b * H2 * W2 + v:b * H2 * W2 + v + 1, :] for b in range(B)],
            axis=0).astype(_BF16)                                 # [B, 64]
        h = h + jnp.dot(rows, wf1_vmem[r], preferred_element_type=_F32)
    h = jnp.maximum(h + bf1_ref[...], 0.0)                        # [B, 512]

    # --- fc2 + ReLU ---
    cp_f2.wait()
    h = jnp.dot(h.astype(_BF16), wf2_vmem[...], preferred_element_type=_F32)
    h = jnp.maximum(h + bf2_ref[...], 0.0)                        # [B, 256]

    # --- fc3 (lane-dense final store, padded to 128 outputs) ---
    cp_f3.wait()
    out_ref[...] = jnp.dot(h.astype(_BF16), wf3_vmem[...],
                           preferred_element_type=_F32) + bf3_ref[...]


# ------------------------------ wrapper glue ------------------------------

def _im2col_corner_ordered(x_nchw):
    """5x5 'same' patches of the raw input, rows ordered (pool corner, b, yo, xo).

    Returns [4 * B * (H//2) * (W//2), 25]; tap order (dy, dx) row-major matches
    w1.reshape(25, 32).
    """
    B, _, H, W = x_nchw.shape
    H2, W2 = H // 2, W // 2
    xp = jnp.pad(x_nchw[:, 0], ((0, 0), (2, 2), (2, 2)))
    taps = jnp.stack([xp[:, dy:dy + H, dx:dx + W]
                      for dy in range(5) for dx in range(5)], axis=-1)  # [B,H,W,25]
    t6 = taps.reshape(B, H2, 2, W2, 2, 25)              # (b, yo, cy, xo, cx, t)
    t6 = jnp.transpose(t6, (2, 4, 0, 1, 3, 5))          # (cy, cx, b, yo, xo, t)
    return t6.reshape(4 * B * H2 * W2, 25)


def _conv2_tap_masks(B, H2, W2):
    """[R1, 25] border-validity masks for conv2's row-shifted taps (static)."""
    R1 = B * H2 * W2
    r = np.arange(R1)
    y = (r % (H2 * W2)) // W2
    x = r % W2
    cols = []
    for t in range(25):
        oy, ox = t // 5 - 2, t % 5 - 2
        ok = (y + oy >= 0) & (y + oy < H2) & (x + ox >= 0) & (x + ox < W2)
        cols.append(ok.astype(np.float32))
    return jnp.asarray(np.stack(cols, axis=1), dtype=_F32)


def pack_params(params, H, W, action_dim):
    """One-time re-layout of NET parameters for the fused kernel.

    Conv weights -> tap-major [25, Cin, Cout]; fc1 rows permuted from the PyTorch
    NCHW-flatten order (c, y, x) to the kernel's (y*W4+x, c) order; fc3 padded to
    128 output lanes. Matmul weights are cast to bf16 (f32 accumulation in-kernel).
    """
    H4, W4 = H // 4, W // 4
    w1 = params["w1"].reshape(25, 32).astype(_BF16)
    w2 = params["w2"].reshape(25, 32, 64).astype(_BF16)
    wf1 = params["wf1"].reshape(64, H4 * W4, 512)          # rows (c, y*W4+x)
    wf1k = jnp.transpose(wf1, (1, 0, 2)).astype(_BF16)     # [y*W4+x, c, 512]
    a = action_dim
    wf3p = jnp.zeros((256, 128), _F32).at[:, :a].set(params["wf3"]).astype(_BF16)
    bf3p = jnp.zeros((1, 128), _F32).at[0, :a].set(params["bf3"])
    return {
        "w1": w1, "b1": params["b1"].reshape(1, 32).astype(_F32),
        "w2": w2, "b2": params["b2"].reshape(1, 64).astype(_F32),
        "wf1": wf1k, "bf1": params["bf1"].reshape(1, 512).astype(_F32),
        "wf2": params["wf2"].astype(_BF16),
        "bf2": params["bf2"].reshape(1, 256).astype(_F32),
        "wf3": wf3p, "bf3": bf3p,
    }


def net_forward(x_nchw, kparams, *, action_dim):
    """Equivalent of NET.forward, fused into a single Pallas kernel."""
    B, _, H, W = x_nchw.shape
    assert H % 4 == 0 and W % 4 == 0
    H2, W2 = H // 2, W // 2
    R1 = B * H2 * W2
    PAD = ((2 * W2 + 2 + 7) // 8) * 8       # row guard for shifted conv2 taps
    EXT = ((W2 + 1 + 7) // 8) * 8           # row guard for the pool2 views

    patches = _im2col_corner_ordered(x_nchw).astype(_BF16)   # thin XLA glue on raw input
    tapmask = _conv2_tap_masks(B, H2, W2)                    # trace-time constant

    vmem = pl.BlockSpec(memory_space=pltpu.MemorySpace.VMEM)
    hbm = pl.BlockSpec(memory_space=pl.ANY)                  # FC weights: in-kernel DMA
    kernel = functools.partial(_fused_net_kernel, B=B, H2=H2, W2=W2, PAD=PAD)
    # TODO(synk): for large training batches add a 'parallel' grid axis over rows
    # (tiles sized against v7x's 64 MiB VMEM) so both v7x TensorCores are used;
    # at B=2 a single grid-less invocation is latency-optimal.
    out = pl.pallas_call(
        kernel,
        out_shape=jax.ShapeDtypeStruct((B, 128), _F32),
        in_specs=[vmem, vmem,                 # patches, tapmask
                  vmem, vmem, vmem, vmem,     # w1, b1, w2, b2
                  hbm, vmem,                  # wf1 (HBM), bf1
                  hbm, vmem,                  # wf2 (HBM), bf2
                  hbm, vmem],                 # wf3 (HBM), bf3
        out_specs=vmem,
        scratch_shapes=[
            pltpu.VMEM(kparams["wf1"].shape, _BF16),   # prefetched fc1 weight
            pltpu.VMEM(kparams["wf2"].shape, _BF16),   # prefetched fc2 weight
            pltpu.VMEM(kparams["wf3"].shape, _BF16),   # prefetched fc3 weight
            pltpu.SemaphoreType.DMA((3,)),             # one sem per weight DMA
            pltpu.VMEM((2 * PAD + R1, 32), _F32),      # padded pool1 activations
            pltpu.VMEM((R1 + EXT, 64), _F32),          # padded conv2 activations
            pltpu.VMEM((R1, 64), _F32),                # pool2 window maxima
        ],
    )(patches, tapmask,
      kparams["w1"], kparams["b1"], kparams["w2"], kparams["b2"],
      kparams["wf1"], kparams["bf1"], kparams["wf2"], kparams["bf2"],
      kparams["wf3"], kparams["bf3"])
    return out[:, :action_dim]


# ------------------------- params & pure-JAX reference -------------------------

def init_params(key, H, W, action_dim):
    """Deterministic synthetic parameters with NET.__init__'s shapes.

    Conv weights HWIO [5,5,Cin,Cout]; linear weights [in, out]; fc1's input
    ordering follows the PyTorch NCHW flatten.
    """
    ks = jax.random.split(key, 10)
    feat = (H // 4) * (W // 4) * 64
    s = 0.05
    return {
        "w1": s * jax.random.normal(ks[0], (5, 5, 1, 32), _F32),
        "b1": s * jax.random.normal(ks[1], (32,), _F32),
        "w2": s * jax.random.normal(ks[2], (5, 5, 32, 64), _F32),
        "b2": s * jax.random.normal(ks[3], (64,), _F32),
        "wf1": s * jax.random.normal(ks[4], (feat, 512), _F32),
        "bf1": s * jax.random.normal(ks[5], (512,), _F32),
        "wf2": s * jax.random.normal(ks[6], (512, 256), _F32),
        "bf2": s * jax.random.normal(ks[7], (256,), _F32),
        "wf3": s * jax.random.normal(ks[8], (256, action_dim), _F32),
        "bf3": s * jax.random.normal(ks[9], (action_dim,), _F32),
    }


def reference_forward(x_nchw, p):
    x = jnp.transpose(x_nchw, (0, 2, 3, 1))

    def conv(h, w, b):
        y = jax.lax.conv_general_dilated(
            h, w, window_strides=(1, 1), padding="SAME",
            dimension_numbers=("NHWC", "HWIO", "NHWC"))
        return jax.nn.relu(y + b)

    def pool(h):
        return jax.lax.reduce_window(h, -jnp.inf, jax.lax.max,
                                     (1, 2, 2, 1), (1, 2, 2, 1), "VALID")

    h = pool(conv(x, p["w1"], p["b1"]))
    h = pool(conv(h, p["w2"], p["b2"]))
    f = jnp.transpose(h, (0, 3, 1, 2)).reshape(x.shape[0], -1)   # NCHW flatten
    h = jax.nn.relu(f @ p["wf1"] + p["bf1"])
    h = jax.nn.relu(h @ p["wf2"] + p["bf2"])
    return h @ p["wf3"] + p["bf3"]


if __name__ == "__main__":
    B, H, W, A = 2, 16, 16, 4          # observation 16x16, 4 actions
    key = jax.random.PRNGKey(0)
    k_x, k_p = jax.random.split(key)
    x = jax.random.normal(k_x, (B, 1, H, W), _F32)
    params = init_params(k_p, H, W, A)
    kparams = pack_params(params, H, W, A)     # one-time re-layout (outside jit)

    fwd = jax.jit(functools.partial(net_forward, action_dim=A))
    out = jax.block_until_ready(fwd(x, kparams))
    ref = jax.block_until_ready(reference_forward(x, params))

    assert out.shape == (B, A), out.shape
    assert bool(jnp.all(jnp.isfinite(out)))
    err = float(jnp.max(jnp.abs(out - ref)))
    assert err < 5e-2, err
    print("KERNEL_OK")
</pallas_src>

<mosaic_0001>
module attributes {stable_mosaic.version = 11 : i64} {
  func.func @_fused_net_kernel(%arg0: memref<512x25xbf16, #tpu.memory_space<vmem>>, %arg1: memref<128x25xf32, #tpu.memory_space<vmem>>, %arg2: memref<25x32xbf16, #tpu.memory_space<vmem>>, %arg3: memref<1x32xf32, #tpu.memory_space<vmem>>, %arg4: memref<25x32x64xbf16, #tpu.memory_space<vmem>>, %arg5: memref<1x64xf32, #tpu.memory_space<vmem>>, %arg6: memref<16x64x512xbf16, #tpu.memory_space<any>>, %arg7: memref<1x512xf32, #tpu.memory_space<vmem>>, %arg8: memref<512x256xbf16, #tpu.memory_space<any>>, %arg9: memref<1x256xf32, #tpu.memory_space<vmem>>, %arg10: memref<256x128xbf16, #tpu.memory_space<any>>, %arg11: memref<1x128xf32, #tpu.memory_space<vmem>>, %arg12: memref<2x128xf32, #tpu.memory_space<vmem>>, %arg13: memref<16x64x512xbf16, #tpu.memory_space<vmem>>, %arg14: memref<512x256xbf16, #tpu.memory_space<vmem>>, %arg15: memref<256x128xbf16, #tpu.memory_space<vmem>>, %arg16: memref<3x!tpu.dma_semaphore, #tpu.memory_space<semaphore_mem>>, %arg17: memref<176x32xf32, #tpu.memory_space<vmem>>, %arg18: memref<144x64xf32, #tpu.memory_space<vmem>>, %arg19: memref<128x64xf32, #tpu.memory_space<vmem>>) attributes {dimension_semantics = [], scalar_prefetch = 0 : i64, scratch_operands = 7 : i64, tpu.core_type = #tpu.core_type<tc>} {
    %c0_i32 = arith.constant 0 : i32
    %0 = tpu.memref_slice %arg16[%c0_i32] : memref<3x!tpu.dma_semaphore, #tpu.memory_space<semaphore_mem>> -> memref<1x!tpu.dma_semaphore, #tpu.memory_space<semaphore_mem>>
    %1 = tpu.memref_squeeze %0 : memref<1x!tpu.dma_semaphore, #tpu.memory_space<semaphore_mem>> -> memref<!tpu.dma_semaphore, #tpu.memory_space<semaphore_mem>>
    tpu.enqueue_dma source(%arg6 : memref<16x64x512xbf16, #tpu.memory_space<any>>) target(%arg13 : memref<16x64x512xbf16, #tpu.memory_space<vmem>>) target_semaphore(%1 : memref<!tpu.dma_semaphore, #tpu.memory_space<semaphore_mem>>)
    %c1_i32 = arith.constant 1 : i32
    %2 = tpu.memref_slice %arg16[%c1_i32] : memref<3x!tpu.dma_semaphore, #tpu.memory_space<semaphore_mem>> -> memref<1x!tpu.dma_semaphore, #tpu.memory_space<semaphore_mem>>
    %3 = tpu.memref_squeeze %2 : memref<1x!tpu.dma_semaphore, #tpu.memory_space<semaphore_mem>> -> memref<!tpu.dma_semaphore, #tpu.memory_space<semaphore_mem>>
    tpu.enqueue_dma source(%arg8 : memref<512x256xbf16, #tpu.memory_space<any>>) target(%arg14 : memref<512x256xbf16, #tpu.memory_space<vmem>>) target_semaphore(%3 : memref<!tpu.dma_semaphore, #tpu.memory_space<semaphore_mem>>)
    %c2_i32 = arith.constant 2 : i32
    %4 = tpu.memref_slice %arg16[%c2_i32] : memref<3x!tpu.dma_semaphore, #tpu.memory_space<semaphore_mem>> -> memref<1x!tpu.dma_semaphore, #tpu.memory_space<semaphore_mem>>
    %5 = tpu.memref_squeeze %4 : memref<1x!tpu.dma_semaphore, #tpu.memory_space<semaphore_mem>> -> memref<!tpu.dma_semaphore, #tpu.memory_space<semaphore_mem>>
    tpu.enqueue_dma source(%arg10 : memref<256x128xbf16, #tpu.memory_space<any>>) target(%arg15 : memref<256x128xbf16, #tpu.memory_space<vmem>>) target_semaphore(%5 : memref<!tpu.dma_semaphore, #tpu.memory_space<semaphore_mem>>)
    %c0 = arith.constant 0 : index
    %c0_0 = arith.constant 0 : index
    %6 = vector.load %arg0[%c0, %c0_0] : memref<512x25xbf16, #tpu.memory_space<vmem>>, vector<512x25xbf16>
    %c0_1 = arith.constant 0 : index
    %c0_2 = arith.constant 0 : index
    %7 = vector.load %arg2[%c0_1, %c0_2] : memref<25x32xbf16, #tpu.memory_space<vmem>>, vector<25x32xbf16>
    %cst = arith.constant dense<0.000000e+00> : vector<512x32xf32>
    %8 = tpu.matmul %6, %7, %cst {dimension_numbers = #tpu.dot_dimension_numbers<[1], [0], [0], [1], [0, 0, 1, 1], [], []>} : vector<512x25xbf16>, vector<25x32xbf16>, vector<512x32xf32> -> vector<512x32xf32>
    %c0_3 = arith.constant 0 : index
    %c0_4 = arith.constant 0 : index
    %9 = vector.load %arg3[%c0_3, %c0_4] : memref<1x32xf32, #tpu.memory_space<vmem>>, vector<1x32xf32>
    %10 = vector.broadcast %9 : vector<1x32xf32> to vector<512x32xf32>
    %11 = arith.addf %8, %10 : vector<512x32xf32>
    %cst_5 = arith.constant 0.000000e+00 : f32
    %12 = vector.broadcast %cst_5 : f32 to vector<512x32xf32>
    %13 = arith.maximumf %11, %12 : vector<512x32xf32>
    %14 = vector.extract_strided_slice %13 {offsets = [0, 0], sizes = [128, 32], strides = [1, 1]} : vector<512x32xf32> to vector<128x32xf32>
    %15 = vector.extract_strided_slice %13 {offsets = [128, 0], sizes = [128, 32], strides = [1, 1]} : vector<512x32xf32> to vector<128x32xf32>
    %16 = arith.maximumf %14, %15 : vector<128x32xf32>
    %17 = vector.extract_strided_slice %13 {offsets = [256, 0], sizes = [128, 32], strides = [1, 1]} : vector<512x32xf32> to vector<128x32xf32>
    %18 = vector.extract_strided_slice %13 {offsets = [384, 0], sizes = [128, 32], strides = [1, 1]} : vector<512x32xf32> to vector<128x32xf32>
    %19 = arith.maximumf %17, %18 : vector<128x32xf32>
    %20 = arith.maximumf %16, %19 : vector<128x32xf32>
    %cst_6 = arith.constant 0.000000e+00 : f32
    %21 = vector.broadcast %cst_6 : f32 to vector<176x32xf32>
    %c0_7 = arith.constant 0 : index
    %c0_8 = arith.constant 0 : index
    %22 = vector.load %arg17[%c0_7, %c0_8] : memref<176x32xf32, #tpu.memory_space<vmem>>, vector<176x32xf32>
    tpu.vector_store %arg17[%c0_7, %c0_8], %21 {strides = array<i32>} : memref<176x32xf32, #tpu.memory_space<vmem>>, vector<176x32xf32>,
    %c24 = arith.constant 24 : index
    %c0_9 = arith.constant 0 : index
    %23 = vector.load %arg17[%c24, %c0_9] : memref<176x32xf32, #tpu.memory_space<vmem>>, vector<128x32xf32>
    tpu.vector_store %arg17[%c24, %c0_9], %20 {strides = array<i32>} : memref<176x32xf32, #tpu.memory_space<vmem>>, vector<128x32xf32>,
    %cst_10 = arith.constant 0.000000e+00 : f32
    %24 = vector.broadcast %cst_10 : f32 to vector<128x64xf32>
    %c6 = arith.constant 6 : index
    %c0_11 = arith.constant 0 : index
    %25 = vector.load %arg17[%c6, %c0_11] : memref<176x32xf32, #tpu.memory_space<vmem>>, vector<128x32xf32>
    %c0_12 = arith.constant 0 : index
    %c0_13 = arith.constant 0 : index
    %26 = vector.load %arg1[%c0_12, %c0_13] : memref<128x25xf32, #tpu.memory_space<vmem>>, vector<128x1xf32>
    %27 = vector.broadcast %26 : vector<128x1xf32> to vector<128x32xf32>
    %28 = arith.mulf %25, %27 : vector<128x32xf32>
    %29 = arith.truncf %28 : vector<128x32xf32> to vector<128x32xbf16>
    %c0_14 = arith.constant 0 : index
    %c0_15 = arith.constant 0 : index
    %c0_16 = arith.constant 0 : index
    %30 = vector.load %arg4[%c0_14, %c0_15, %c0_16] : memref<25x32x64xbf16, #tpu.memory_space<vmem>>, vector<1x32x64xbf16>
    %31 = vector.shape_cast %30 : vector<1x32x64xbf16> to vector<32x64xbf16>
    %cst_17 = arith.constant dense<0.000000e+00> : vector<128x64xf32>
    %32 = tpu.matmul %29, %31, %cst_17 {dimension_numbers = #tpu.dot_dimension_numbers<[1], [0], [0], [1], [0, 0, 1, 1], [], []>} : vector<128x32xbf16>, vector<32x64xbf16>, vector<128x64xf32> -> vector<128x64xf32>
    %33 = arith.addf %24, %32 : vector<128x64xf32>
    %c7 = arith.constant 7 : index
    %c0_18 = arith.constant 0 : index
    %34 = vector.load %arg17[%c7, %c0_18] : memref<176x32xf32, #tpu.memory_space<vmem>>, vector<128x32xf32>
    %c0_19 = arith.constant 0 : index
    %c1 = arith.constant 1 : index
    %35 = vector.load %arg1[%c0_19, %c1] : memref<128x25xf32, #tpu.memory_space<vmem>>, vector<128x1xf32>
    %36 = vector.broadcast %35 : vector<128x1xf32> to vector<128x32xf32>
    %37 = arith.mulf %34, %36 : vector<128x32xf32>
    %38 = arith.truncf %37 : vector<128x32xf32> to vector<128x32xbf16>
    %c1_20 = arith.constant 1 : index
    %c0_21 = arith.constant 0 : index
    %c0_22 = arith.constant 0 : index
    %39 = vector.load %arg4[%c1_20, %c0_21, %c0_22] : memref<25x32x64xbf16, #tpu.memory_space<vmem>>, vector<1x32x64xbf16>
    %40 = vector.shape_cast %39 : vector<1x32x64xbf16> to vector<32x64xbf16>
    %cst_23 = arith.constant dense<0.000000e+00> : vector<128x64xf32>
    %41 = tpu.matmul %38, %40, %cst_23 {dimension_numbers = #tpu.dot_dimension_numbers<[1], [0], [0], [1], [0, 0, 1, 1], [], []>} : vector<128x32xbf16>, vector<32x64xbf16>, vector<128x64xf32> -> vector<128x64xf32>
    %42 = arith.addf %33, %41 : vector<128x64xf32>
    %c8 = arith.constant 8 : index
    %c0_24 = arith.constant 0 : index
    %43 = vector.load %arg17[%c8, %c0_24] : memref<176x32xf32, #tpu.memory_space<vmem>>, vector<128x32xf32>
    %c0_25 = arith.constant 0 : index
    %c2 = arith.constant 2 : index
    %44 = vector.load %arg1[%c0_25, %c2] : memref<128x25xf32, #tpu.memory_space<vmem>>, vector<128x1xf32>
    %45 = vector.broadcast %44 : vector<128x1xf32> to vector<128x32xf32>
    %46 = arith.mulf %43, %45 : vector<128x32xf32>
    %47 = arith.truncf %46 : vector<128x32xf32> to vector<128x32xbf16>
    %c2_26 = arith.constant 2 : index
    %c0_27 = arith.constant 0 : index
    %c0_28 = arith.constant 0 : index
    %48 = vector.load %arg4[%c2_26, %c0_27, %c0_28] : memref<25x32x64xbf16, #tpu.memory_space<vmem>>, vector<1x32x64xbf16>
    %49 = vector.shape_cast %48 : vector<1x32x64xbf16> to vector<32x64xbf16>
    %cst_29 = arith.constant dense<0.000000e+00> : vector<128x64xf32>
    %50 = tpu.matmul %47, %49, %cst_29 {dimension_numbers = #tpu.dot_dimension_numbers<[1], [0], [0], [1], [0, 0, 1, 1], [], []>} : vector<128x32xbf16>, vector<32x64xbf16>, vector<128x64xf32> -> vector<128x64xf32>
    %51 = arith.addf %42, %50 : vector<128x64xf32>
    %c9 = arith.constant 9 : index
    %c0_30 = arith.constant 0 : index
    %52 = vector.load %arg17[%c9, %c0_30] : memref<176x32xf32, #tpu.memory_space<vmem>>, vector<128x32xf32>
    %c0_31 = arith.constant 0 : index
    %c3 = arith.constant 3 : index
    %53 = vector.load %arg1[%c0_31, %c3] : memref<128x25xf32, #tpu.memory_space<vmem>>, vector<128x1xf32>
    %54 = vector.broadcast %53 : vector<128x1xf32> to vector<128x32xf32>
    %55 = arith.mulf %52, %54 : vector<128x32xf32>
    %56 = arith.truncf %55 : vector<128x32xf32> to vector<128x32xbf16>
    %c3_32 = arith.constant 3 : index
    %c0_33 = arith.constant 0 : index
    %c0_34 = arith.constant 0 : index
    %57 = vector.load %arg4[%c3_32, %c0_33, %c0_34] : memref<25x32x64xbf16, #tpu.memory_space<vmem>>, vector<1x32x64xbf16>
    %58 = vector.shape_cast %57 : vector<1x32x64xbf16> to vector<32x64xbf16>
    %cst_35 = arith.constant dense<0.000000e+00> : vector<128x64xf32>
    %59 = tpu.matmul %56, %58, %cst_35 {dimension_numbers = #tpu.dot_dimension_numbers<[1], [0], [0], [1], [0, 0, 1, 1], [], []>} : vector<128x32xbf16>, vector<32x64xbf16>, vector<128x64xf32> -> vector<128x64xf32>
    %60 = arith.addf %51, %59 : vector<128x64xf32>
    %c10 = arith.constant 10 : index
    %c0_36 = arith.constant 0 : index
    %61 = vector.load %arg17[%c10, %c0_36] : memref<176x32xf32, #tpu.memory_space<vmem>>, vector<128x32xf32>
    %c0_37 = arith.constant 0 : index
    %c4 = arith.constant 4 : index
    %62 = vector.load %arg1[%c0_37, %c4] : memref<128x25xf32, #tpu.memory_space<vmem>>, vector<128x1xf32>
    %63 = vector.broadcast %62 : vector<128x1xf32> to vector<128x32xf32>
    %64 = arith.mulf %61, %63 : vector<128x32xf32>
    %65 = arith.truncf %64 : vector<128x32xf32> to vector<128x32xbf16>
    %c4_38 = arith.constant 4 : index
    %c0_39 = arith.constant 0 : index
    %c0_40 = arith.constant 0 : index
    %66 = vector.load %arg4[%c4_38, %c0_39, %c0_40] : memref<25x32x64xbf16, #tpu.memory_space<vmem>>, vector<1x32x64xbf16>
    %67 = vector.shape_cast %66 : vector<1x32x64xbf16> to vector<32x64xbf16>
    %cst_41 = arith.constant dense<0.000000e+00> : vector<128x64xf32>
    %68 = tpu.matmul %65, %67, %cst_41 {dimension_numbers = #tpu.dot_dimension_numbers<[1], [0], [0], [1], [0, 0, 1, 1], [], []>} : vector<128x32xbf16>, vector<32x64xbf16>, vector<128x64xf32> -> vector<128x64xf32>
    %69 = arith.addf %60, %68 : vector<128x64xf32>
    %c14 = arith.constant 14 : index
    %c0_42 = arith.constant 0 : index
    %70 = vector.load %arg17[%c14, %c0_42] : memref<176x32xf32, #tpu.memory_space<vmem>>, vector<128x32xf32>
    %c0_43 = arith.constant 0 : index
    %c5 = arith.constant 5 : index
    %71 = vector.load %arg1[%c0_43, %c5] : memref<128x25xf32, #tpu.memory_space<vmem>>, vector<128x1xf32>
    %72 = vector.broadcast %71 : vector<128x1xf32> to vector<128x32xf32>
    %73 = arith.mulf %70, %72 : vector<128x32xf32>
    %74 = arith.truncf %73 : vector<128x32xf32> to vector<128x32xbf16>
    %c5_44 = arith.constant 5 : index
    %c0_45 = arith.constant 0 : index
    %c0_46 = arith.constant 0 : index
    %75 = vector.load %arg4[%c5_44, %c0_45, %c0_46] : memref<25x32x64xbf16, #tpu.memory_space<vmem>>, vector<1x32x64xbf16>
    %76 = vector.shape_cast %75 : vector<1x32x64xbf16> to vector<32x64xbf16>
    %cst_47 = arith.constant dense<0.000000e+00> : vector<128x64xf32>
    %77 = tpu.matmul %74, %76, %cst_47 {dimension_numbers = #tpu.dot_dimension_numbers<[1], [0], [0], [1], [0, 0, 1, 1], [], []>} : vector<128x32xbf16>, vector<32x64xbf16>, vector<128x64xf32> -> vector<128x64xf32>
    %78 = arith.addf %69, %77 : vector<128x64xf32>
    %c15 = arith.constant 15 : index
    %c0_48 = arith.constant 0 : index
    %79 = vector.load %arg17[%c15, %c0_48] : memref<176x32xf32, #tpu.memory_space<vmem>>, vector<128x32xf32>
    %c0_49 = arith.constant 0 : index
    %c6_50 = arith.constant 6 : index
    %80 = vector.load %arg1[%c0_49, %c6_50] : memref<128x25xf32, #tpu.memory_space<vmem>>, vector<128x1xf32>
    %81 = vector.broadcast %80 : vector<128x1xf32> to vector<128x32xf32>
    %82 = arith.mulf %79, %81 : vector<128x32xf32>
    %83 = arith.truncf %82 : vector<128x32xf32> to vector<128x32xbf16>
    %c6_51 = arith.constant 6 : index
    %c0_52 = arith.constant 0 : index
    %c0_53 = arith.constant 0 : index
    %84 = vector.load %arg4[%c6_51, %c0_52, %c0_53] : memref<25x32x64xbf16, #tpu.memory_space<vmem>>, vector<1x32x64xbf16>
    %85 = vector.shape_cast %84 : vector<1x32x64xbf16> to vector<32x64xbf16>
    %cst_54 = arith.constant dense<0.000000e+00> : vector<128x64xf32>
    %86 = tpu.matmul %83, %85, %cst_54 {dimension_numbers = #tpu.dot_dimension_numbers<[1], [0], [0], [1], [0, 0, 1, 1], [], []>} : vector<128x32xbf16>, vector<32x64xbf16>, vector<128x64xf32> -> vector<128x64xf32>
    %87 = arith.addf %78, %86 : vector<128x64xf32>
    %c16 = arith.constant 16 : index
    %c0_55 = arith.constant 0 : index
    %88 = vector.load %arg17[%c16, %c0_55] : memref<176x32xf32, #tpu.memory_space<vmem>>, vector<128x32xf32>
    %c0_56 = arith.constant 0 : index
    %c7_57 = arith.constant 7 : index
    %89 = vector.load %arg1[%c0_56, %c7_57] : memref<128x25xf32, #tpu.memory_space<vmem>>, vector<128x1xf32>
    %90 = vector.broadcast %89 : vector<128x1xf32> to vector<128x32xf32>
    %91 = arith.mulf %88, %90 : vector<128x32xf32>
    %92 = arith.truncf %91 : vector<128x32xf32> to vector<128x32xbf16>
    %c7_58 = arith.constant 7 : index
    %c0_59 = arith.constant 0 : index
    %c0_60 = arith.constant 0 : index
    %93 = vector.load %arg4[%c7_58, %c0_59, %c0_60] : memref<25x32x64xbf16, #tpu.memory_space<vmem>>, vector<1x32x64xbf16>
    %94 = vector.shape_cast %93 : vector<1x32x64xbf16> to vector<32x64xbf16>
    %cst_61 = arith.constant dense<0.000000e+00> : vector<128x64xf32>
    %95 = tpu.matmul %92, %94, %cst_61 {dimension_numbers = #tpu.dot_dimension_numbers<[1], [0], [0], [1], [0, 0, 1, 1], [], []>} : vector<128x32xbf16>, vector<32x64xbf16>, vector<128x64xf32> -> vector<128x64xf32>
    %96 = arith.addf %87, %95 : vector<128x64xf32>
    %c17 = arith.constant 17 : index
    %c0_62 = arith.constant 0 : index
    %97 = vector.load %arg17[%c17, %c0_62] : memref<176x32xf32, #tpu.memory_space<vmem>>, vector<128x32xf32>
    %c0_63 = arith.constant 0 : index
    %c8_64 = arith.constant 8 : index
    %98 = vector.load %arg1[%c0_63, %c8_64] : memref<128x25xf32, #tpu.memory_space<vmem>>, vector<128x1xf32>
    %99 = vector.broadcast %98 : vector<128x1xf32> to vector<128x32xf32>
    %100 = arith.mulf %97, %99 : vector<128x32xf32>
    %101 = arith.truncf %100 : vector<128x32xf32> to vector<128x32xbf16>
    %c8_65 = arith.constant 8 : index
    %c0_66 = arith.constant 0 : index
    %c0_67 = arith.constant 0 : index
    %102 = vector.load %arg4[%c8_65, %c0_66, %c0_67] : memref<25x32x64xbf16, #tpu.memory_space<vmem>>, vector<1x32x64xbf16>
    %103 = vector.shape_cast %102 : vector<1x32x64xbf16> to vector<32x64xbf16>
    %cst_68 = arith.constant dense<0.000000e+00> : vector<128x64xf32>
    %104 = tpu.matmul %101, %103, %cst_68 {dimension_numbers = #tpu.dot_dimension_numbers<[1], [0], [0], [1], [0, 0, 1, 1], [], []>} : vector<128x32xbf16>, vector<32x64xbf16>, vector<128x64xf32> -> vector<128x64xf32>
    %105 = arith.addf %96, %104 : vector<128x64xf32>
    %c18 = arith.constant 18 : index
    %c0_69 = arith.constant 0 : index
    %106 = vector.load %arg17[%c18, %c0_69] : memref<176x32xf32, #tpu.memory_space<vmem>>, vector<128x32xf32>
    %c0_70 = arith.constant 0 : index
    %c9_71 = arith.constant 9 : index
    %107 = vector.load %arg1[%c0_70, %c9_71] : memref<128x25xf32, #tpu.memory_space<vmem>>, vector<128x1xf32>
    %108 = vector.broadcast %107 : vector<128x1xf32> to vector<128x32xf32>
    %109 = arith.mulf %106, %108 : vector<128x32xf32>
    %110 = arith.truncf %109 : vector<128x32xf32> to vector<128x32xbf16>
    %c9_72 = arith.constant 9 : index
    %c0_73 = arith.constant 0 : index
    %c0_74 = arith.constant 0 : index
    %111 = vector.load %arg4[%c9_72, %c0_73, %c0_74] : memref<25x32x64xbf16, #tpu.memory_space<vmem>>, vector<1x32x64xbf16>
    %112 = vector.shape_cast %111 : vector<1x32x64xbf16> to vector<32x64xbf16>
    %cst_75 = arith.constant dense<0.000000e+00> : vector<128x64xf32>
    %113 = tpu.matmul %110, %112, %cst_75 {dimension_numbers = #tpu.dot_dimension_numbers<[1], [0], [0], [1], [0, 0, 1, 1], [], []>} : vector<128x32xbf16>, vector<32x64xbf16>, vector<128x64xf32> -> vector<128x64xf32>
    %114 = arith.addf %105, %113 : vector<128x64xf32>
    %c22 = arith.constant 22 : index
    %c0_76 = arith.constant 0 : index
    %115 = vector.load %arg17[%c22, %c0_76] : memref<176x32xf32, #tpu.memory_space<vmem>>, vector<128x32xf32>
    %c0_77 = arith.constant 0 : index
    %c10_78 = arith.constant 10 : index
    %116 = vector.load %arg1[%c0_77, %c10_78] : memref<128x25xf32, #tpu.memory_space<vmem>>, vector<128x1xf32>
    %117 = vector.broadcast %116 : vector<128x1xf32> to vector<128x32xf32>
    %118 = arith.mulf %115, %117 : vector<128x32xf32>
    %119 = arith.truncf %118 : vector<128x32xf32> to vector<128x32xbf16>
    %c10_79 = arith.constant 10 : index
    %c0_80 = arith.constant 0 : index
    %c0_81 = arith.constant 0 : index
    %120 = vector.load %arg4[%c10_79, %c0_80, %c0_81] : memref<25x32x64xbf16, #tpu.memory_space<vmem>>, vector<1x32x64xbf16>
    %121 = vector.shape_cast %120 : vector<1x32x64xbf16> to vector<32x64xbf16>
    %cst_82 = arith.constant dense<0.000000e+00> : vector<128x64xf32>
    %122 = tpu.matmul %119, %121, %cst_82 {dimension_numbers = #tpu.dot_dimension_numbers<[1], [0], [0], [1], [0, 0, 1, 1], [], []>} : vector<128x32xbf16>, vector<32x64xbf16>, vector<128x64xf32> -> vector<128x64xf32>
    %123 = arith.addf %114, %122 : vector<128x64xf32>
    %c23 = arith.constant 23 : index
    %c0_83 = arith.constant 0 : index
    %124 = vector.load %arg17[%c23, %c0_83] : memref<176x32xf32, #tpu.memory_space<vmem>>, vector<128x32xf32>
    %c0_84 = arith.constant 0 : index
    %c11 = arith.constant 11 : index
    %125 = vector.load %arg1[%c0_84, %c11] : memref<128x25xf32, #tpu.memory_space<vmem>>, vector<128x1xf32>
    %126 = vector.broadcast %125 : vector<128x1xf32> to vector<128x32xf32>
    %127 = arith.mulf %124, %126 : vector<128x32xf32>
    %128 = arith.truncf %127 : vector<128x32xf32> to vector<128x32xbf16>
    %c11_85 = arith.constant 11 : index
    %c0_86 = arith.constant 0 : index
    %c0_87 = arith.constant 0 : index
    %129 = vector.load %arg4[%c11_85, %c0_86, %c0_87] : memref<25x32x64xbf16, #tpu.memory_space<vmem>>, vector<1x32x64xbf16>
    %130 = vector.shape_cast %129 : vector<1x32x64xbf16> to vector<32x64xbf16>
    %cst_88 = arith.constant dense<0.000000e+00> : vector<128x64xf32>
    %131 = tpu.matmul %128, %130, %cst_88 {dimension_numbers = #tpu.dot_dimension_numbers<[1], [0], [0], [1], [0, 0, 1, 1], [], []>} : vector<128x32xbf16>, vector<32x64xbf16>, vector<128x64xf32> -> vector<128x64xf32>
    %132 = arith.addf %123, %131 : vector<128x64xf32>
    %c24_89 = arith.constant 24 : index
    %c0_90 = arith.constant 0 : index
    %133 = vector.load %arg17[%c24_89, %c0_90] : memref<176x32xf32, #tpu.memory_space<vmem>>, vector<128x32xf32>
    %134 = arith.truncf %133 : vector<128x32xf32> to vector<128x32xbf16>
    %c12 = arith.constant 12 : index
    %c0_91 = arith.constant 0 : index
    %c0_92 = arith.constant 0 : index
    %135 = vector.load %arg4[%c12, %c0_91, %c0_92] : memref<25x32x64xbf16, #tpu.memory_space<vmem>>, vector<1x32x64xbf16>
    %136 = vector.shape_cast %135 : vector<1x32x64xbf16> to vector<32x64xbf16>
    %cst_93 = arith.constant dense<0.000000e+00> : vector<128x64xf32>
    %137 = tpu.matmul %134, %136, %cst_93 {dimension_numbers = #tpu.dot_dimension_numbers<[1], [0], [0], [1], [0, 0, 1, 1], [], []>} : vector<128x32xbf16>, vector<32x64xbf16>, vector<128x64xf32> -> vector<128x64xf32>
    %138 = arith.addf %132, %137 : vector<128x64xf32>
    %c25 = arith.constant 25 : index
    %c0_94 = arith.constant 0 : index
    %139 = vector.load %arg17[%c25, %c0_94] : memref<176x32xf32, #tpu.memory_space<vmem>>, vector<128x32xf32>
    %c0_95 = arith.constant 0 : index
    %c13 = arith.constant 13 : index
    %140 = vector.load %arg1[%c0_95, %c13] : memref<128x25xf32, #tpu.memory_space<vmem>>, vector<128x1xf32>
    %141 = vector.broadcast %140 : vector<128x1xf32> to vector<128x32xf32>
    %142 = arith.mulf %139, %141 : vector<128x32xf32>
    %143 = arith.truncf %142 : vector<128x32xf32> to vector<128x32xbf16>
    %c13_96 = arith.constant 13 : index
    %c0_97 = arith.constant 0 : index
    %c0_98 = arith.constant 0 : index
    %144 = vector.load %arg4[%c13_96, %c0_97, %c0_98] : memref<25x32x64xbf16, #tpu.memory_space<vmem>>, vector<1x32x64xbf16>
    %145 = vector.shape_cast %144 : vector<1x32x64xbf16> to vector<32x64xbf16>
    %cst_99 = arith.constant dense<0.000000e+00> : vector<128x64xf32>
    %146 = tpu.matmul %143, %145, %cst_99 {dimension_numbers = #tpu.dot_dimension_numbers<[1], [0], [0], [1], [0, 0, 1, 1], [], []>} : vector<128x32xbf16>, vector<32x64xbf16>, vector<128x64xf32> -> vector<128x64xf32>
    %147 = arith.addf %138, %146 : vector<128x64xf32>
    %c26 = arith.constant 26 : index
    %c0_100 = arith.constant 0 : index
    %148 = vector.load %arg17[%c26, %c0_100] : memref<176x32xf32, #tpu.memory_space<vmem>>, vector<128x32xf32>
    %c0_101 = arith.constant 0 : index
    %c14_102 = arith.constant 14 : index
    %149 = vector.load %arg1[%c0_101, %c14_102] : memref<128x25xf32, #tpu.memory_space<vmem>>, vector<128x1xf32>
    %150 = vector.broadcast %149 : vector<128x1xf32> to vector<128x32xf32>
    %151 = arith.mulf %148, %150 : vector<128x32xf32>
    %152 = arith.truncf %151 : vector<128x32xf32> to vector<128x32xbf16>
    %c14_103 = arith.constant 14 : index
    %c0_104 = arith.constant 0 : index
    %c0_105 = arith.constant 0 : index
    %153 = vector.load %arg4[%c14_103, %c0_104, %c0_105] : memref<25x32x64xbf16, #tpu.memory_space<vmem>>, vector<1x32x64xbf16>
    %154 = vector.shape_cast %153 : vector<1x32x64xbf16> to vector<32x64xbf16>
    %cst_106 = arith.constant dense<0.000000e+00> : vector<128x64xf32>
    %155 = tpu.matmul %152, %154, %cst_106 {dimension_numbers = #tpu.dot_dimension_numbers<[1], [0], [0], [1], [0, 0, 1, 1], [], []>} : vector<128x32xbf16>, vector<32x64xbf16>, vector<128x64xf32> -> vector<128x64xf32>
    %156 = arith.addf %147, %155 : vector<128x64xf32>
    %c30 = arith.constant 30 : index
    %c0_107 = arith.constant 0 : index
    %157 = vector.load %arg17[%c30, %c0_107] : memref<176x32xf32, #tpu.memory_space<vmem>>, vector<128x32xf32>
    %c0_108 = arith.constant 0 : index
    %c15_109 = arith.constant 15 : index
    %158 = vector.load %arg1[%c0_108, %c15_109] : memref<128x25xf32, #tpu.memory_space<vmem>>, vector<128x1xf32>
    %159 = vector.broadcast %158 : vector<128x1xf32> to vector<128x32xf32>
    %160 = arith.mulf %157, %159 : vector<128x32xf32>
    %161 = arith.truncf %160 : vector<128x32xf32> to vector<128x32xbf16>
    %c15_110 = arith.constant 15 : index
    %c0_111 = arith.constant 0 : index
    %c0_112 = arith.constant 0 : index
    %162 = vector.load %arg4[%c15_110, %c0_111, %c0_112] : memref<25x32x64xbf16, #tpu.memory_space<vmem>>, vector<1x32x64xbf16>
    %163 = vector.shape_cast %162 : vector<1x32x64xbf16> to vector<32x64xbf16>
    %cst_113 = arith.constant dense<0.000000e+00> : vector<128x64xf32>
    %164 = tpu.matmul %161, %163, %cst_113 {dimension_numbers = #tpu.dot_dimension_numbers<[1], [0], [0], [1], [0, 0, 1, 1], [], []>} : vector<128x32xbf16>, vector<32x64xbf16>, vector<128x64xf32> -> vector<128x64xf32>
    %165 = arith.addf %156, %164 : vector<128x64xf32>
    %c31 = arith.constant 31 : index
    %c0_114 = arith.constant 0 : index
    %166 = vector.load %arg17[%c31, %c0_114] : memref<176x32xf32, #tpu.memory_space<vmem>>, vector<128x32xf32>
    %c0_115 = arith.constant 0 : index
    %c16_116 = arith.constant 16 : index
    %167 = vector.load %arg1[%c0_115, %c16_116] : memref<128x25xf32, #tpu.memory_space<vmem>>, vector<128x1xf32>
    %168 = vector.broadcast %167 : vector<128x1xf32> to vector<128x32xf32>
    %169 = arith.mulf %166, %168 : vector<128x32xf32>
    %170 = arith.truncf %169 : vector<128x32xf32> to vector<128x32xbf16>
    %c16_117 = arith.constant 16 : index
    %c0_118 = arith.constant 0 : index
    %c0_119 = arith.constant 0 : index
    %171 = vector.load %arg4[%c16_117, %c0_118, %c0_119] : memref<25x32x64xbf16, #tpu.memory_space<vmem>>, vector<1x32x64xbf16>
    %172 = vector.shape_cast %171 : vector<1x32x64xbf16> to vector<32x64xbf16>
    %cst_120 = arith.constant dense<0.000000e+00> : vector<128x64xf32>
    %173 = tpu.matmul %170, %172, %cst_120 {dimension_numbers = #tpu.dot_dimension_numbers<[1], [0], [0], [1], [0, 0, 1, 1], [], []>} : vector<128x32xbf16>, vector<32x64xbf16>, vector<128x64xf32> -> vector<128x64xf32>
    %174 = arith.addf %165, %173 : vector<128x64xf32>
    %c32 = arith.constant 32 : index
    %c0_121 = arith.constant 0 : index
    %175 = vector.load %arg17[%c32, %c0_121] : memref<176x32xf32, #tpu.memory_space<vmem>>, vector<128x32xf32>
    %c0_122 = arith.constant 0 : index
    %c17_123 = arith.constant 17 : index
    %176 = vector.load %arg1[%c0_122, %c17_123] : memref<128x25xf32, #tpu.memory_space<vmem>>, vector<128x1xf32>
    %177 = vector.broadcast %176 : vector<128x1xf32> to vector<128x32xf32>
    %178 = arith.mulf %175, %177 : vector<128x32xf32>
    %179 = arith.truncf %178 : vector<128x32xf32> to vector<128x32xbf16>
    %c17_124 = arith.constant 17 : index
    %c0_125 = arith.constant 0 : index
    %c0_126 = arith.constant 0 : index
    %180 = vector.load %arg4[%c17_124, %c0_125, %c0_126] : memref<25x32x64xbf16, #tpu.memory_space<vmem>>, vector<1x32x64xbf16>
    %181 = vector.shape_cast %180 : vector<1x32x64xbf16> to vector<32x64xbf16>
    %cst_127 = arith.constant dense<0.000000e+00> : vector<128x64xf32>
    %182 = tpu.matmul %179, %181, %cst_127 {dimension_numbers = #tpu.dot_dimension_numbers<[1], [0], [0], [1], [0, 0, 1, 1], [], []>} : vector<128x32xbf16>, vector<32x64xbf16>, vector<128x64xf32> -> vector<128x64xf32>
    %183 = arith.addf %174, %182 : vector<128x64xf32>
    %c33 = arith.constant 33 : index
    %c0_128 = arith.constant 0 : index
    %184 = vector.load %arg17[%c33, %c0_128] : memref<176x32xf32, #tpu.memory_space<vmem>>, vector<128x32xf32>
    %c0_129 = arith.constant 0 : index
    %c18_130 = arith.constant 18 : index
    %185 = vector.load %arg1[%c0_129, %c18_130] : memref<128x25xf32, #tpu.memory_space<vmem>>, vector<128x1xf32>
    %186 = vector.broadcast %185 : vector<128x1xf32> to vector<128x32xf32>
    %187 = arith.mulf %184, %186 : vector<128x32xf32>
    %188 = arith.truncf %187 : vector<128x32xf32> to vector<128x32xbf16>
    %c18_131 = arith.constant 18 : index
    %c0_132 = arith.constant 0 : index
    %c0_133 = arith.constant 0 : index
    %189 = vector.load %arg4[%c18_131, %c0_132, %c0_133] : memref<25x32x64xbf16, #tpu.memory_space<vmem>>, vector<1x32x64xbf16>
    %190 = vector.shape_cast %189 : vector<1x32x64xbf16> to vector<32x64xbf16>
    %cst_134 = arith.constant dense<0.000000e+00> : vector<128x64xf32>
    %191 = tpu.matmul %188, %190, %cst_134 {dimension_numbers = #tpu.dot_dimension_numbers<[1], [0], [0], [1], [0, 0, 1, 1], [], []>} : vector<128x32xbf16>, vector<32x64xbf16>, vector<128x64xf32> -> vector<128x64xf32>
    %192 = arith.addf %183, %191 : vector<128x64xf32>
    %c34 = arith.constant 34 : index
    %c0_135 = arith.constant 0 : index
    %193 = vector.load %arg17[%c34, %c0_135] : memref<176x32xf32, #tpu.memory_space<vmem>>, vector<128x32xf32>
    %c0_136 = arith.constant 0 : index
    %c19 = arith.constant 19 : index
    %194 = vector.load %arg1[%c0_136, %c19] : memref<128x25xf32, #tpu.memory_space<vmem>>, vector<128x1xf32>
    %195 = vector.broadcast %194 : vector<128x1xf32> to vector<128x32xf32>
    %196 = arith.mulf %193, %195 : vector<128x32xf32>
    %197 = arith.truncf %196 : vector<128x32xf32> to vector<128x32xbf16>
    %c19_137 = arith.constant 19 : index
    %c0_138 = arith.constant 0 : index
    %c0_139 = arith.constant 0 : index
    %198 = vector.load %arg4[%c19_137, %c0_138, %c0_139] : memref<25x32x64xbf16, #tpu.memory_space<vmem>>, vector<1x32x64xbf16>
    %199 = vector.shape_cast %198 : vector<1x32x64xbf16> to vector<32x64xbf16>
    %cst_140 = arith.constant dense<0.000000e+00> : vector<128x64xf32>
    %200 = tpu.matmul %197, %199, %cst_140 {dimension_numbers = #tpu.dot_dimension_numbers<[1], [0], [0], [1], [0, 0, 1, 1], [], []>} : vector<128x32xbf16>, vector<32x64xbf16>, vector<128x64xf32> -> vector<128x64xf32>
    %201 = arith.addf %192, %200 : vector<128x64xf32>
    %c38 = arith.constant 38 : index
    %c0_141 = arith.constant 0 : index
    %202 = vector.load %arg17[%c38, %c0_141] : memref<176x32xf32, #tpu.memory_space<vmem>>, vector<128x32xf32>
    %c0_142 = arith.constant 0 : index
    %c20 = arith.constant 20 : index
    %203 = vector.load %arg1[%c0_142, %c20] : memref<128x25xf32, #tpu.memory_space<vmem>>, vector<128x1xf32>
    %204 = vector.broadcast %203 : vector<128x1xf32> to vector<128x32xf32>
    %205 = arith.mulf %202, %204 : vector<128x32xf32>
    %206 = arith.truncf %205 : vector<128x32xf32> to vector<128x32xbf16>
    %c20_143 = arith.constant 20 : index
    %c0_144 = arith.constant 0 : index
    %c0_145 = arith.constant 0 : index
    %207 = vector.load %arg4[%c20_143, %c0_144, %c0_145] : memref<25x32x64xbf16, #tpu.memory_space<vmem>>, vector<1x32x64xbf16>
    %208 = vector.shape_cast %207 : vector<1x32x64xbf16> to vector<32x64xbf16>
    %cst_146 = arith.constant dense<0.000000e+00> : vector<128x64xf32>
    %209 = tpu.matmul %206, %208, %cst_146 {dimension_numbers = #tpu.dot_dimension_numbers<[1], [0], [0], [1], [0, 0, 1, 1], [], []>} : vector<128x32xbf16>, vector<32x64xbf16>, vector<128x64xf32> -> vector<128x64xf32>
    %210 = arith.addf %201, %209 : vector<128x64xf32>
    %c39 = arith.constant 39 : index
    %c0_147 = arith.constant 0 : index
    %211 = vector.load %arg17[%c39, %c0_147] : memref<176x32xf32, #tpu.memory_space<vmem>>, vector<128x32xf32>
    %c0_148 = arith.constant 0 : index
    %c21 = arith.constant 21 : index
    %212 = vector.load %arg1[%c0_148, %c21] : memref<128x25xf32, #tpu.memory_space<vmem>>, vector<128x1xf32>
    %213 = vector.broadcast %212 : vector<128x1xf32> to vector<128x32xf32>
    %214 = arith.mulf %211, %213 : vector<128x32xf32>
    %215 = arith.truncf %214 : vector<128x32xf32> to vector<128x32xbf16>
    %c21_149 = arith.constant 21 : index
    %c0_150 = arith.constant 0 : index
    %c0_151 = arith.constant 0 : index
    %216 = vector.load %arg4[%c21_149, %c0_150, %c0_151] : memref<25x32x64xbf16, #tpu.memory_space<vmem>>, vector<1x32x64xbf16>
    %217 = vector.shape_cast %216 : vector<1x32x64xbf16> to vector<32x64xbf16>
    %cst_152 = arith.constant dense<0.000000e+00> : vector<128x64xf32>
    %218 = tpu.matmul %215, %217, %cst_152 {dimension_numbers = #tpu.dot_dimension_numbers<[1], [0], [0], [1], [0, 0, 1, 1], [], []>} : vector<128x32xbf16>, vector<32x64xbf16>, vector<128x64xf32> -> vector<128x64xf32>
    %219 = arith.addf %210, %218 : vector<128x64xf32>
    %c40 = arith.constant 40 : index
    %c0_153 = arith.constant 0 : index
    %220 = vector.load %arg17[%c40, %c0_153] : memref<176x32xf32, #tpu.memory_space<vmem>>, vector<128x32xf32>
    %c0_154 = arith.constant 0 : index
    %c22_155 = arith.constant 22 : index
    %221 = vector.load %arg1[%c0_154, %c22_155] : memref<128x25xf32, #tpu.memory_space<vmem>>, vector<128x1xf32>
    %222 = vector.broadcast %221 : vector<128x1xf32> to vector<128x32xf32>
    %223 = arith.mulf %220, %222 : vector<128x32xf32>
    %224 = arith.truncf %223 : vector<128x32xf32> to vector<128x32xbf16>
    %c22_156 = arith.constant 22 : index
    %c0_157 = arith.constant 0 : index
    %c0_158 = arith.constant 0 : index
    %225 = vector.load %arg4[%c22_156, %c0_157, %c0_158] : memref<25x32x64xbf16, #tpu.memory_space<vmem>>, vector<1x32x64xbf16>
    %226 = vector.shape_cast %225 : vector<1x32x64xbf16> to vector<32x64xbf16>
    %cst_159 = arith.constant dense<0.000000e+00> : vector<128x64xf32>
    %227 = tpu.matmul %224, %226, %cst_159 {dimension_numbers = #tpu.dot_dimension_numbers<[1], [0], [0], [1], [0, 0, 1, 1], [], []>} : vector<128x32xbf16>, vector<32x64xbf16>, vector<128x64xf32> -> vector<128x64xf32>
    %228 = arith.addf %219, %227 : vector<128x64xf32>
    %c41 = arith.constant 41 : index
    %c0_160 = arith.constant 0 : index
    %229 = vector.load %arg17[%c41, %c0_160] : memref<176x32xf32, #tpu.memory_space<vmem>>, vector<128x32xf32>
    %c0_161 = arith.constant 0 : index
    %c23_162 = arith.constant 23 : index
    %230 = vector.load %arg1[%c0_161, %c23_162] : memref<128x25xf32, #tpu.memory_space<vmem>>, vector<128x1xf32>
    %231 = vector.broadcast %230 : vector<128x1xf32> to vector<128x32xf32>
    %232 = arith.mulf %229, %231 : vector<128x32xf32>
    %233 = arith.truncf %232 : vector<128x32xf32> to vector<128x32xbf16>
    %c23_163 = arith.constant 23 : index
    %c0_164 = arith.constant 0 : index
    %c0_165 = arith.constant 0 : index
    %234 = vector.load %arg4[%c23_163, %c0_164, %c0_165] : memref<25x32x64xbf16, #tpu.memory_space<vmem>>, vector<1x32x64xbf16>
    %235 = vector.shape_cast %234 : vector<1x32x64xbf16> to vector<32x64xbf16>
    %cst_166 = arith.constant dense<0.000000e+00> : vector<128x64xf32>
    %236 = tpu.matmul %233, %235, %cst_166 {dimension_numbers = #tpu.dot_dimension_numbers<[1], [0], [0], [1], [0, 0, 1, 1], [], []>} : vector<128x32xbf16>, vector<32x64xbf16>, vector<128x64xf32> -> vector<128x64xf32>
    %237 = arith.addf %228, %236 : vector<128x64xf32>
    %c42 = arith.constant 42 : index
    %c0_167 = arith.constant 0 : index
    %238 = vector.load %arg17[%c42, %c0_167] : memref<176x32xf32, #tpu.memory_space<vmem>>, vector<128x32xf32>
    %c0_168 = arith.constant 0 : index
    %c24_169 = arith.constant 24 : index
    %239 = vector.load %arg1[%c0_168, %c24_169] : memref<128x25xf32, #tpu.memory_space<vmem>>, vector<128x1xf32>
    %240 = vector.broadcast %239 : vector<128x1xf32> to vector<128x32xf32>
    %241 = arith.mulf %238, %240 : vector<128x32xf32>
    %242 = arith.truncf %241 : vector<128x32xf32> to vector<128x32xbf16>
    %c24_170 = arith.constant 24 : index
    %c0_171 = arith.constant 0 : index
    %c0_172 = arith.constant 0 : index
    %243 = vector.load %arg4[%c24_170, %c0_171, %c0_172] : memref<25x32x64xbf16, #tpu.memory_space<vmem>>, vector<1x32x64xbf16>
    %244 = vector.shape_cast %243 : vector<1x32x64xbf16> to vector<32x64xbf16>
    %cst_173 = arith.constant dense<0.000000e+00> : vector<128x64xf32>
    %245 = tpu.matmul %242, %244, %cst_173 {dimension_numbers = #tpu.dot_dimension_numbers<[1], [0], [0], [1], [0, 0, 1, 1], [], []>} : vector<128x32xbf16>, vector<32x64xbf16>, vector<128x64xf32> -> vector<128x64xf32>
    %246 = arith.addf %237, %245 : vector<128x64xf32>
    %c0_174 = arith.constant 0 : index
    %c0_175 = arith.constant 0 : index
    %247 = vector.load %arg5[%c0_174, %c0_175] : memref<1x64xf32, #tpu.memory_space<vmem>>, vector<1x64xf32>
    %248 = vector.broadcast %247 : vector<1x64xf32> to vector<128x64xf32>
    %249 = arith.addf %246, %248 : vector<128x64xf32>
    %cst_176 = arith.constant 0.000000e+00 : f32
    %250 = vector.broadcast %cst_176 : f32 to vector<128x64xf32>
    %251 = arith.maximumf %249, %250 : vector<128x64xf32>
    %cst_177 = arith.constant 0.000000e+00 : f32
    %252 = vector.broadcast %cst_177 : f32 to vector<144x64xf32>
    %c0_178 = arith.constant 0 : index
    %c0_179 = arith.constant 0 : index
    %253 = vector.load %arg18[%c0_178, %c0_179] : memref<144x64xf32, #tpu.memory_space<vmem>>, vector<144x64xf32>
    tpu.vector_store %arg18[%c0_178, %c0_179], %252 {strides = array<i32>} : memref<144x64xf32, #tpu.memory_space<vmem>>, vector<144x64xf32>,
    %c0_180 = arith.constant 0 : index
    %c0_181 = arith.constant 0 : index
    %254 = vector.load %arg18[%c0_180, %c0_181] : memref<144x64xf32, #tpu.memory_space<vmem>>, vector<128x64xf32>
    tpu.vector_store %arg18[%c0_180, %c0_181], %251 {strides = array<i32>} : memref<144x64xf32, #tpu.memory_space<vmem>>, vector<128x64xf32>,
    %c0_182 = arith.constant 0 : index
    %c0_183 = arith.constant 0 : index
    %255 = vector.load %arg18[%c0_182, %c0_183] : memref<144x64xf32, #tpu.memory_space<vmem>>, vector<128x64xf32>
    %c1_184 = arith.constant 1 : index
    %c0_185 = arith.constant 0 : index
    %256 = vector.load %arg18[%c1_184, %c0_185] : memref<144x64xf32, #tpu.memory_space<vmem>>, vector<128x64xf32>
    %257 = arith.maximumf %255, %256 : vector<128x64xf32>
    %c8_186 = arith.constant 8 : index
    %c0_187 = arith.constant 0 : index
    %258 = vector.load %arg18[%c8_186, %c0_187] : memref<144x64xf32, #tpu.memory_space<vmem>>, vector<128x64xf32>
    %c9_188 = arith.constant 9 : index
    %c0_189 = arith.constant 0 : index
    %259 = vector.load %arg18[%c9_188, %c0_189] : memref<144x64xf32, #tpu.memory_space<vmem>>, vector<128x64xf32>
    %260 = arith.maximumf %258, %259 : vector<128x64xf32>
    %261 = arith.maximumf %257, %260 : vector<128x64xf32>
    %c0_190 = arith.constant 0 : index
    %c0_191 = arith.constant 0 : index
    %262 = vector.load %arg19[%c0_190, %c0_191] : memref<128x64xf32, #tpu.memory_space<vmem>>, vector<128x64xf32>
    tpu.vector_store %arg19[%c0_190, %c0_191], %261 {strides = array<i32>} : memref<128x64xf32, #tpu.memory_space<vmem>>, vector<128x64xf32>,
    %c0_i32_192 = arith.constant 0 : i32
    %263 = tpu.memref_slice %arg16[%c0_i32_192] : memref<3x!tpu.dma_semaphore, #tpu.memory_space<semaphore_mem>> -> memref<1x!tpu.dma_semaphore, #tpu.memory_space<semaphore_mem>>
    %264 = tpu.memref_squeeze %263 : memref<1x!tpu.dma_semaphore, #tpu.memory_space<semaphore_mem>> -> memref<!tpu.dma_semaphore, #tpu.memory_space<semaphore_mem>>
    tpu.wait_dma2 semaphore(%264 : memref<!tpu.dma_semaphore, #tpu.memory_space<semaphore_mem>>) src(%arg6 : memref<16x64x512xbf16, #tpu.memory_space<any>>) dst(%arg13 : memref<16x64x512xbf16, #tpu.memory_space<vmem>>)
    %cst_193 = arith.constant 0.000000e+00 : f32
    %265 = vector.broadcast %cst_193 : f32 to vector<2x512xf32>
    %c0_194 = arith.constant 0 : index
    %c0_195 = arith.constant 0 : index
    %266 = vector.load %arg19[%c0_194, %c0_195] : memref<128x64xf32, #tpu.memory_space<vmem>>, vector<1x64xf32>
    %c64 = arith.constant 64 : index
    %c0_196 = arith.constant 0 : index
    %267 = vector.load %arg19[%c64, %c0_196] : memref<128x64xf32, #tpu.memory_space<vmem>>, vector<1x64xf32>
    %268 = tpu.concatenate %266, %267 in 0 : vector<1x64xf32>, vector<1x64xf32> -> vector<2x64xf32>
    %269 = arith.truncf %268 : vector<2x64xf32> to vector<2x64xbf16>
    %c0_197 = arith.constant 0 : index
    %c0_198 = arith.constant 0 : index
    %c0_199 = arith.constant 0 : index
    %270 = vector.load %arg13[%c0_197, %c0_198, %c0_199] : memref<16x64x512xbf16, #tpu.memory_space<vmem>>, vector<1x64x512xbf16>
    %271 = vector.shape_cast %270 : vector<1x64x512xbf16> to vector<64x512xbf16>
    %cst_200 = arith.constant dense<0.000000e+00> : vector<2x512xf32>
    %272 = tpu.matmul %269, %271, %cst_200 {dimension_numbers = #tpu.dot_dimension_numbers<[1], [0], [0], [1], [0, 0, 1, 1], [], []>} : vector<2x64xbf16>, vector<64x512xbf16>, vector<2x512xf32> -> vector<2x512xf32>
    %273 = arith.addf %265, %272 : vector<2x512xf32>
    %c2_201 = arith.constant 2 : index
    %c0_202 = arith.constant 0 : index
    %274 = vector.load %arg19[%c2_201, %c0_202] : memref<128x64xf32, #tpu.memory_space<vmem>>, vector<1x64xf32>
    %c66 = arith.constant 66 : index
    %c0_203 = arith.constant 0 : index
    %275 = vector.load %arg19[%c66, %c0_203] : memref<128x64xf32, #tpu.memory_space<vmem>>, vector<1x64xf32>
    %276 = tpu.concatenate %274, %275 in 0 : vector<1x64xf32>, vector<1x64xf32> -> vector<2x64xf32>
    %277 = arith.truncf %276 : vector<2x64xf32> to vector<2x64xbf16>
    %c1_204 = arith.constant 1 : index
    %c0_205 = arith.constant 0 : index
    %c0_206 = arith.constant 0 : index
    %278 = vector.load %arg13[%c1_204, %c0_205, %c0_206] : memref<16x64x512xbf16, #tpu.memory_space<vmem>>, vector<1x64x512xbf16>
    %279 = vector.shape_cast %278 : vector<1x64x512xbf16> to vector<64x512xbf16>
    %cst_207 = arith.constant dense<0.000000e+00> : vector<2x512xf32>
    %280 = tpu.matmul %277, %279, %cst_207 {dimension_numbers = #tpu.dot_dimension_numbers<[1], [0], [0], [1], [0, 0, 1, 1], [], []>} : vector<2x64xbf16>, vector<64x512xbf16>, vector<2x512xf32> -> vector<2x512xf32>
    %281 = arith.addf %273, %280 : vector<2x512xf32>
    %c4_208 = arith.constant 4 : index
    %c0_209 = arith.constant 0 : index
    %282 = vector.load %arg19[%c4_208, %c0_209] : memref<128x64xf32, #tpu.memory_space<vmem>>, vector<1x64xf32>
    %c68 = arith.constant 68 : index
    %c0_210 = arith.constant 0 : index
    %283 = vector.load %arg19[%c68, %c0_210] : memref<128x64xf32, #tpu.memory_space<vmem>>, vector<1x64xf32>
    %284 = tpu.concatenate %282, %283 in 0 : vector<1x64xf32>, vector<1x64xf32> -> vector<2x64xf32>
    %285 = arith.truncf %284 : vector<2x64xf32> to vector<2x64xbf16>
    %c2_211 = arith.constant 2 : index
    %c0_212 = arith.constant 0 : index
    %c0_213 = arith.constant 0 : index
    %286 = vector.load %arg13[%c2_211, %c0_212, %c0_213] : memref<16x64x512xbf16, #tpu.memory_space<vmem>>, vector<1x64x512xbf16>
    %287 = vector.shape_cast %286 : vector<1x64x512xbf16> to vector<64x512xbf16>
    %cst_214 = arith.constant dense<0.000000e+00> : vector<2x512xf32>
    %288 = tpu.matmul %285, %287, %cst_214 {dimension_numbers = #tpu.dot_dimension_numbers<[1], [0], [0], [1], [0, 0, 1, 1], [], []>} : vector<2x64xbf16>, vector<64x512xbf16>, vector<2x512xf32> -> vector<2x512xf32>
    %289 = arith.addf %281, %288 : vector<2x512xf32>
    %c6_215 = arith.constant 6 : index
    %c0_216 = arith.constant 0 : index
    %290 = vector.load %arg19[%c6_215, %c0_216] : memref<128x64xf32, #tpu.memory_space<vmem>>, vector<1x64xf32>
    %c70 = arith.constant 70 : index
    %c0_217 = arith.constant 0 : index
    %291 = vector.load %arg19[%c70, %c0_217] : memref<128x64xf32, #tpu.memory_space<vmem>>, vector<1x64xf32>
    %292 = tpu.concatenate %290, %291 in 0 : vector<1x64xf32>, vector<1x64xf32> -> vector<2x64xf32>
    %293 = arith.truncf %292 : vector<2x64xf32> to vector<2x64xbf16>
    %c3_218 = arith.constant 3 : index
    %c0_219 = arith.constant 0 : index
    %c0_220 = arith.constant 0 : index
    %294 = vector.load %arg13[%c3_218, %c0_219, %c0_220] : memref<16x64x512xbf16, #tpu.memory_space<vmem>>, vector<1x64x512xbf16>
    %295 = vector.shape_cast %294 : vector<1x64x512xbf16> to vector<64x512xbf16>
    %cst_221 = arith.constant dense<0.000000e+00> : vector<2x512xf32>
    %296 = tpu.matmul %293, %295, %cst_221 {dimension_numbers = #tpu.dot_dimension_numbers<[1], [0], [0], [1], [0, 0, 1, 1], [], []>} : vector<2x64xbf16>, vector<64x512xbf16>, vector<2x512xf32> -> vector<2x512xf32>
    %297 = arith.addf %289, %296 : vector<2x512xf32>
    %c16_222 = arith.constant 16 : index
    %c0_223 = arith.constant 0 : index
    %298 = vector.load %arg19[%c16_222, %c0_223] : memref<128x64xf32, #tpu.memory_space<vmem>>, vector<1x64xf32>
    %c80 = arith.constant 80 : index
    %c0_224 = arith.constant 0 : index
    %299 = vector.load %arg19[%c80, %c0_224] : memref<128x64xf32, #tpu.memory_space<vmem>>, vector<1x64xf32>
    %300 = tpu.concatenate %298, %299 in 0 : vector<1x64xf32>, vector<1x64xf32> -> vector<2x64xf32>
    %301 = arith.truncf %300 : vector<2x64xf32> to vector<2x64xbf16>
    %c4_225 = arith.constant 4 : index
    %c0_226 = arith.constant 0 : index
    %c0_227 = arith.constant 0 : index
    %302 = vector.load %arg13[%c4_225, %c0_226, %c0_227] : memref<16x64x512xbf16, #tpu.memory_space<vmem>>, vector<1x64x512xbf16>
    %303 = vector.shape_cast %302 : vector<1x64x512xbf16> to vector<64x512xbf16>
    %cst_228 = arith.constant dense<0.000000e+00> : vector<2x512xf32>
    %304 = tpu.matmul %301, %303, %cst_228 {dimension_numbers = #tpu.dot_dimension_numbers<[1], [0], [0], [1], [0, 0, 1, 1], [], []>} : vector<2x64xbf16>, vector<64x512xbf16>, vector<2x512xf32> -> vector<2x512xf32>
    %305 = arith.addf %297, %304 : vector<2x512xf32>
    %c18_229 = arith.constant 18 : index
    %c0_230 = arith.constant 0 : index
    %306 = vector.load %arg19[%c18_229, %c0_230] : memref<128x64xf32, #tpu.memory_space<vmem>>, vector<1x64xf32>
    %c82 = arith.constant 82 : index
    %c0_231 = arith.constant 0 : index
    %307 = vector.load %arg19[%c82, %c0_231] : memref<128x64xf32, #tpu.memory_space<vmem>>, vector<1x64xf32>
    %308 = tpu.concatenate %306, %307 in 0 : vector<1x64xf32>, vector<1x64xf32> -> vector<2x64xf32>
    %309 = arith.truncf %308 : vector<2x64xf32> to vector<2x64xbf16>
    %c5_232 = arith.constant 5 : index
    %c0_233 = arith.constant 0 : index
    %c0_234 = arith.constant 0 : index
    %310 = vector.load %arg13[%c5_232, %c0_233, %c0_234] : memref<16x64x512xbf16, #tpu.memory_space<vmem>>, vector<1x64x512xbf16>
    %311 = vector.shape_cast %310 : vector<1x64x512xbf16> to vector<64x512xbf16>
    %cst_235 = arith.constant dense<0.000000e+00> : vector<2x512xf32>
    %312 = tpu.matmul %309, %311, %cst_235 {dimension_numbers = #tpu.dot_dimension_numbers<[1], [0], [0], [1], [0, 0, 1, 1], [], []>} : vector<2x64xbf16>, vector<64x512xbf16>, vector<2x512xf32> -> vector<2x512xf32>
    %313 = arith.addf %305, %312 : vector<2x512xf32>
    %c20_236 = arith.constant 20 : index
    %c0_237 = arith.constant 0 : index
    %314 = vector.load %arg19[%c20_236, %c0_237] : memref<128x64xf32, #tpu.memory_space<vmem>>, vector<1x64xf32>
    %c84 = arith.constant 84 : index
    %c0_238 = arith.constant 0 : index
    %315 = vector.load %arg19[%c84, %c0_238] : memref<128x64xf32, #tpu.memory_space<vmem>>, vector<1x64xf32>
    %316 = tpu.concatenate %314, %315 in 0 : vector<1x64xf32>, vector<1x64xf32> -> vector<2x64xf32>
    %317 = arith.truncf %316 : vector<2x64xf32> to vector<2x64xbf16>
    %c6_239 = arith.constant 6 : index
    %c0_240 = arith.constant 0 : index
    %c0_241 = arith.constant 0 : index
    %318 = vector.load %arg13[%c6_239, %c0_240, %c0_241] : memref<16x64x512xbf16, #tpu.memory_space<vmem>>, vector<1x64x512xbf16>
    %319 = vector.shape_cast %318 : vector<1x64x512xbf16> to vector<64x512xbf16>
    %cst_242 = arith.constant dense<0.000000e+00> : vector<2x512xf32>
    %320 = tpu.matmul %317, %319, %cst_242 {dimension_numbers = #tpu.dot_dimension_numbers<[1], [0], [0], [1], [0, 0, 1, 1], [], []>} : vector<2x64xbf16>, vector<64x512xbf16>, vector<2x512xf32> -> vector<2x512xf32>
    %321 = arith.addf %313, %320 : vector<2x512xf32>
    %c22_243 = arith.constant 22 : index
    %c0_244 = arith.constant 0 : index
    %322 = vector.load %arg19[%c22_243, %c0_244] : memref<128x64xf32, #tpu.memory_space<vmem>>, vector<1x64xf32>
    %c86 = arith.constant 86 : index
    %c0_245 = arith.constant 0 : index
    %323 = vector.load %arg19[%c86, %c0_245] : memref<128x64xf32, #tpu.memory_space<vmem>>, vector<1x64xf32>
    %324 = tpu.concatenate %322, %323 in 0 : vector<1x64xf32>, vector<1x64xf32> -> vector<2x64xf32>
    %325 = arith.truncf %324 : vector<2x64xf32> to vector<2x64xbf16>
    %c7_246 = arith.constant 7 : index
    %c0_247 = arith.constant 0 : index
    %c0_248 = arith.constant 0 : index
    %326 = vector.load %arg13[%c7_246, %c0_247, %c0_248] : memref<16x64x512xbf16, #tpu.memory_space<vmem>>, vector<1x64x512xbf16>
    %327 = vector.shape_cast %326 : vector<1x64x512xbf16> to vector<64x512xbf16>
    %cst_249 = arith.constant dense<0.000000e+00> : vector<2x512xf32>
    %328 = tpu.matmul %325, %327, %cst_249 {dimension_numbers = #tpu.dot_dimension_numbers<[1], [0], [0], [1], [0, 0, 1, 1], [], []>} : vector<2x64xbf16>, vector<64x512xbf16>, vector<2x512xf32> -> vector<2x512xf32>
    %329 = arith.addf %321, %328 : vector<2x512xf32>
    %c32_250 = arith.constant 32 : index
    %c0_251 = arith.constant 0 : index
    %330 = vector.load %arg19[%c32_250, %c0_251] : memref<128x64xf32, #tpu.memory_space<vmem>>, vector<1x64xf32>
    %c96 = arith.constant 96 : index
    %c0_252 = arith.constant 0 : index
    %331 = vector.load %arg19[%c96, %c0_252] : memref<128x64xf32, #tpu.memory_space<vmem>>, vector<1x64xf32>
    %332 = tpu.concatenate %330, %331 in 0 : vector<1x64xf32>, vector<1x64xf32> -> vector<2x64xf32>
    %333 = arith.truncf %332 : vector<2x64xf32> to vector<2x64xbf16>
    %c8_253 = arith.constant 8 : index
    %c0_254 = arith.constant 0 : index
    %c0_255 = arith.constant 0 : index
    %334 = vector.load %arg13[%c8_253, %c0_254, %c0_255] : memref<16x64x512xbf16, #tpu.memory_space<vmem>>, vector<1x64x512xbf16>
    %335 = vector.shape_cast %334 : vector<1x64x512xbf16> to vector<64x512xbf16>
    %cst_256 = arith.constant dense<0.000000e+00> : vector<2x512xf32>
    %336 = tpu.matmul %333, %335, %cst_256 {dimension_numbers = #tpu.dot_dimension_numbers<[1], [0], [0], [1], [0, 0, 1, 1], [], []>} : vector<2x64xbf16>, vector<64x512xbf16>, vector<2x512xf32> -> vector<2x512xf32>
    %337 = arith.addf %329, %336 : vector<2x512xf32>
    %c34_257 = arith.constant 34 : index
    %c0_258 = arith.constant 0 : index
    %338 = vector.load %arg19[%c34_257, %c0_258] : memref<128x64xf32, #tpu.memory_space<vmem>>, vector<1x64xf32>
    %c98 = arith.constant 98 : index
    %c0_259 = arith.constant 0 : index
    %339 = vector.load %arg19[%c98, %c0_259] : memref<128x64xf32, #tpu.memory_space<vmem>>, vector<1x64xf32>
    %340 = tpu.concatenate %338, %339 in 0 : vector<1x64xf32>, vector<1x64xf32> -> vector<2x64xf32>
    %341 = arith.truncf %340 : vector<2x64xf32> to vector<2x64xbf16>
    %c9_260 = arith.constant 9 : index
    %c0_261 = arith.constant 0 : index
    %c0_262 = arith.constant 0 : index
    %342 = vector.load %arg13[%c9_260, %c0_261, %c0_262] : memref<16x64x512xbf16, #tpu.memory_space<vmem>>, vector<1x64x512xbf16>
    %343 = vector.shape_cast %342 : vector<1x64x512xbf16> to vector<64x512xbf16>
    %cst_263 = arith.constant dense<0.000000e+00> : vector<2x512xf32>
    %344 = tpu.matmul %341, %343, %cst_263 {dimension_numbers = #tpu.dot_dimension_numbers<[1], [0], [0], [1], [0, 0, 1, 1], [], []>} : vector<2x64xbf16>, vector<64x512xbf16>, vector<2x512xf32> -> vector<2x512xf32>
    %345 = arith.addf %337, %344 : vector<2x512xf32>
    %c36 = arith.constant 36 : index
    %c0_264 = arith.constant 0 : index
    %346 = vector.load %arg19[%c36, %c0_264] : memref<128x64xf32, #tpu.memory_space<vmem>>, vector<1x64xf32>
    %c100 = arith.constant 100 : index
    %c0_265 = arith.constant 0 : index
    %347 = vector.load %arg19[%c100, %c0_265] : memref<128x64xf32, #tpu.memory_space<vmem>>, vector<1x64xf32>
    %348 = tpu.concatenate %346, %347 in 0 : vector<1x64xf32>, vector<1x64xf32> -> vector<2x64xf32>
    %349 = arith.truncf %348 : vector<2x64xf32> to vector<2x64xbf16>
    %c10_266 = arith.constant 10 : index
    %c0_267 = arith.constant 0 : index
    %c0_268 = arith.constant 0 : index
    %350 = vector.load %arg13[%c10_266, %c0_267, %c0_268] : memref<16x64x512xbf16, #tpu.memory_space<vmem>>, vector<1x64x512xbf16>
    %351 = vector.shape_cast %350 : vector<1x64x512xbf16> to vector<64x512xbf16>
    %cst_269 = arith.constant dense<0.000000e+00> : vector<2x512xf32>
    %352 = tpu.matmul %349, %351, %cst_269 {dimension_numbers = #tpu.dot_dimension_numbers<[1], [0], [0], [1], [0, 0, 1, 1], [], []>} : vector<2x64xbf16>, vector<64x512xbf16>, vector<2x512xf32> -> vector<2x512xf32>
    %353 = arith.addf %345, %352 : vector<2x512xf32>
    %c38_270 = arith.constant 38 : index
    %c0_271 = arith.constant 0 : index
    %354 = vector.load %arg19[%c38_270, %c0_271] : memref<128x64xf32, #tpu.memory_space<vmem>>, vector<1x64xf32>
    %c102 = arith.constant 102 : index
    %c0_272 = arith.constant 0 : index
    %355 = vector.load %arg19[%c102, %c0_272] : memref<128x64xf32, #tpu.memory_space<vmem>>, vector<1x64xf32>
    %356 = tpu.concatenate %354, %355 in 0 : vector<1x64xf32>, vector<1x64xf32> -> vector<2x64xf32>
    %357 = arith.truncf %356 : vector<2x64xf32> to vector<2x64xbf16>
    %c11_273 = arith.constant 11 : index
    %c0_274 = arith.constant 0 : index
    %c0_275 = arith.constant 0 : index
    %358 = vector.load %arg13[%c11_273, %c0_274, %c0_275] : memref<16x64x512xbf16, #tpu.memory_space<vmem>>, vector<1x64x512xbf16>
    %359 = vector.shape_cast %358 : vector<1x64x512xbf16> to vector<64x512xbf16>
    %cst_276 = arith.constant dense<0.000000e+00> : vector<2x512xf32>
    %360 = tpu.matmul %357, %359, %cst_276 {dimension_numbers = #tpu.dot_dimension_numbers<[1], [0], [0], [1], [0, 0, 1, 1], [], []>} : vector<2x64xbf16>, vector<64x512xbf16>, vector<2x512xf32> -> vector<2x512xf32>
    %361 = arith.addf %353, %360 : vector<2x512xf32>
    %c48 = arith.constant 48 : index
    %c0_277 = arith.constant 0 : index
    %362 = vector.load %arg19[%c48, %c0_277] : memref<128x64xf32, #tpu.memory_space<vmem>>, vector<1x64xf32>
    %c112 = arith.constant 112 : index
    %c0_278 = arith.constant 0 : index
    %363 = vector.load %arg19[%c112, %c0_278] : memref<128x64xf32, #tpu.memory_space<vmem>>, vector<1x64xf32>
    %364 = tpu.concatenate %362, %363 in 0 : vector<1x64xf32>, vector<1x64xf32> -> vector<2x64xf32>
    %365 = arith.truncf %364 : vector<2x64xf32> to vector<2x64xbf16>
    %c12_279 = arith.constant 12 : index
    %c0_280 = arith.constant 0 : index
    %c0_281 = arith.constant 0 : index
    %366 = vector.load %arg13[%c12_279, %c0_280, %c0_281] : memref<16x64x512xbf16, #tpu.memory_space<vmem>>, vector<1x64x512xbf16>
    %367 = vector.shape_cast %366 : vector<1x64x512xbf16> to vector<64x512xbf16>
    %cst_282 = arith.constant dense<0.000000e+00> : vector<2x512xf32>
    %368 = tpu.matmul %365, %367, %cst_282 {dimension_numbers = #tpu.dot_dimension_numbers<[1], [0], [0], [1], [0, 0, 1, 1], [], []>} : vector<2x64xbf16>, vector<64x512xbf16>, vector<2x512xf32> -> vector<2x512xf32>
    %369 = arith.addf %361, %368 : vector<2x512xf32>
    %c50 = arith.constant 50 : index
    %c0_283 = arith.constant 0 : index
    %370 = vector.load %arg19[%c50, %c0_283] : memref<128x64xf32, #tpu.memory_space<vmem>>, vector<1x64xf32>
    %c114 = arith.constant 114 : index
    %c0_284 = arith.constant 0 : index
    %371 = vector.load %arg19[%c114, %c0_284] : memref<128x64xf32, #tpu.memory_space<vmem>>, vector<1x64xf32>
    %372 = tpu.concatenate %370, %371 in 0 : vector<1x64xf32>, vector<1x64xf32> -> vector<2x64xf32>
    %373 = arith.truncf %372 : vector<2x64xf32> to vector<2x64xbf16>
    %c13_285 = arith.constant 13 : index
    %c0_286 = arith.constant 0 : index
    %c0_287 = arith.constant 0 : index
    %374 = vector.load %arg13[%c13_285, %c0_286, %c0_287] : memref<16x64x512xbf16, #tpu.memory_space<vmem>>, vector<1x64x512xbf16>
    %375 = vector.shape_cast %374 : vector<1x64x512xbf16> to vector<64x512xbf16>
    %cst_288 = arith.constant dense<0.000000e+00> : vector<2x512xf32>
    %376 = tpu.matmul %373, %375, %cst_288 {dimension_numbers = #tpu.dot_dimension_numbers<[1], [0], [0], [1], [0, 0, 1, 1], [], []>} : vector<2x64xbf16>, vector<64x512xbf16>, vector<2x512xf32> -> vector<2x512xf32>
    %377 = arith.addf %369, %376 : vector<2x512xf32>
    %c52 = arith.constant 52 : index
    %c0_289 = arith.constant 0 : index
    %378 = vector.load %arg19[%c52, %c0_289] : memref<128x64xf32, #tpu.memory_space<vmem>>, vector<1x64xf32>
    %c116 = arith.constant 116 : index
    %c0_290 = arith.constant 0 : index
    %379 = vector.load %arg19[%c116, %c0_290] : memref<128x64xf32, #tpu.memory_space<vmem>>, vector<1x64xf32>
    %380 = tpu.concatenate %378, %379 in 0 : vector<1x64xf32>, vector<1x64xf32> -> vector<2x64xf32>
    %381 = arith.truncf %380 : vector<2x64xf32> to vector<2x64xbf16>
    %c14_291 = arith.constant 14 : index
    %c0_292 = arith.constant 0 : index
    %c0_293 = arith.constant 0 : index
    %382 = vector.load %arg13[%c14_291, %c0_292, %c0_293] : memref<16x64x512xbf16, #tpu.memory_space<vmem>>, vector<1x64x512xbf16>
    %383 = vector.shape_cast %382 : vector<1x64x512xbf16> to vector<64x512xbf16>
    %cst_294 = arith.constant dense<0.000000e+00> : vector<2x512xf32>
    %384 = tpu.matmul %381, %383, %cst_294 {dimension_numbers = #tpu.dot_dimension_numbers<[1], [0], [0], [1], [0, 0, 1, 1], [], []>} : vector<2x64xbf16>, vector<64x512xbf16>, vector<2x512xf32> -> vector<2x512xf32>
    %385 = arith.addf %377, %384 : vector<2x512xf32>
    %c54 = arith.constant 54 : index
    %c0_295 = arith.constant 0 : index
    %386 = vector.load %arg19[%c54, %c0_295] : memref<128x64xf32, #tpu.memory_space<vmem>>, vector<1x64xf32>
    %c118 = arith.constant 118 : index
    %c0_296 = arith.constant 0 : index
    %387 = vector.load %arg19[%c118, %c0_296] : memref<128x64xf32, #tpu.memory_space<vmem>>, vector<1x64xf32>
    %388 = tpu.concatenate %386, %387 in 0 : vector<1x64xf32>, vector<1x64xf32> -> vector<2x64xf32>
    %389 = arith.truncf %388 : vector<2x64xf32> to vector<2x64xbf16>
    %c15_297 = arith.constant 15 : index
    %c0_298 = arith.constant 0 : index
    %c0_299 = arith.constant 0 : index
    %390 = vector.load %arg13[%c15_297, %c0_298, %c0_299] : memref<16x64x512xbf16, #tpu.memory_space<vmem>>, vector<1x64x512xbf16>
    %391 = vector.shape_cast %390 : vector<1x64x512xbf16> to vector<64x512xbf16>
    %cst_300 = arith.constant dense<0.000000e+00> : vector<2x512xf32>
    %392 = tpu.matmul %389, %391, %cst_300 {dimension_numbers = #tpu.dot_dimension_numbers<[1], [0], [0], [1], [0, 0, 1, 1], [], []>} : vector<2x64xbf16>, vector<64x512xbf16>, vector<2x512xf32> -> vector<2x512xf32>
    %393 = arith.addf %385, %392 : vector<2x512xf32>
    %c0_301 = arith.constant 0 : index
    %c0_302 = arith.constant 0 : index
    %394 = vector.load %arg7[%c0_301, %c0_302] : memref<1x512xf32, #tpu.memory_space<vmem>>, vector<1x512xf32>
    %395 = vector.broadcast %394 : vector<1x512xf32> to vector<2x512xf32>
    %396 = arith.addf %393, %395 : vector<2x512xf32>
    %cst_303 = arith.constant 0.000000e+00 : f32
    %397 = vector.broadcast %cst_303 : f32 to vector<2x512xf32>
    %398 = arith.maximumf %396, %397 : vector<2x512xf32>
    %c1_i32_304 = arith.constant 1 : i32
    %399 = tpu.memref_slice %arg16[%c1_i32_304] : memref<3x!tpu.dma_semaphore, #tpu.memory_space<semaphore_mem>> -> memref<1x!tpu.dma_semaphore, #tpu.memory_space<semaphore_mem>>
    %400 = tpu.memref_squeeze %399 : memref<1x!tpu.dma_semaphore, #tpu.memory_space<semaphore_mem>> -> memref<!tpu.dma_semaphore, #tpu.memory_space<semaphore_mem>>
    tpu.wait_dma2 semaphore(%400 : memref<!tpu.dma_semaphore, #tpu.memory_space<semaphore_mem>>) src(%arg8 : memref<512x256xbf16, #tpu.memory_space<any>>) dst(%arg14 : memref<512x256xbf16, #tpu.memory_space<vmem>>)
    %401 = arith.truncf %398 : vector<2x512xf32> to vector<2x512xbf16>
    %c0_305 = arith.constant 0 : index
    %c0_306 = arith.constant 0 : index
    %402 = vector.load %arg14[%c0_305, %c0_306] : memref<512x256xbf16, #tpu.memory_space<vmem>>, vector<512x256xbf16>
    %cst_307 = arith.constant dense<0.000000e+00> : vector<2x256xf32>
    %403 = tpu.matmul %401, %402, %cst_307 {dimension_numbers = #tpu.dot_dimension_numbers<[1], [0], [0], [1], [0, 0, 1, 1], [], []>} : vector<2x512xbf16>, vector<512x256xbf16>, vector<2x256xf32> -> vector<2x256xf32>
    %c0_308 = arith.constant 0 : index
    %c0_309 = arith.constant 0 : index
    %404 = vector.load %arg9[%c0_308, %c0_309] : memref<1x256xf32, #tpu.memory_space<vmem>>, vector<1x256xf32>
    %405 = vector.broadcast %404 : vector<1x256xf32> to vector<2x256xf32>
    %406 = arith.addf %403, %405 : vector<2x256xf32>
    %cst_310 = arith.constant 0.000000e+00 : f32
    %407 = vector.broadcast %cst_310 : f32 to vector<2x256xf32>
    %408 = arith.maximumf %406, %407 : vector<2x256xf32>
    %c2_i32_311 = arith.constant 2 : i32
    %409 = tpu.memref_slice %arg16[%c2_i32_311] : memref<3x!tpu.dma_semaphore, #tpu.memory_space<semaphore_mem>> -> memref<1x!tpu.dma_semaphore, #tpu.memory_space<semaphore_mem>>
    %410 = tpu.memref_squeeze %409 : memref<1x!tpu.dma_semaphore, #tpu.memory_space<semaphore_mem>> -> memref<!tpu.dma_semaphore, #tpu.memory_space<semaphore_mem>>
    tpu.wait_dma2 semaphore(%410 : memref<!tpu.dma_semaphore, #tpu.memory_space<semaphore_mem>>) src(%arg10 : memref<256x128xbf16, #tpu.memory_space<any>>) dst(%arg15 : memref<256x128xbf16, #tpu.memory_space<vmem>>)
    %411 = arith.truncf %408 : vector<2x256xf32> to vector<2x256xbf16>
    %c0_312 = arith.constant 0 : index
    %c0_313 = arith.constant 0 : index
    %412 = vector.load %arg15[%c0_312, %c0_313] : memref<256x128xbf16, #tpu.memory_space<vmem>>, vector<256x128xbf16>
    %cst_314 = arith.constant dense<0.000000e+00> : vector<2x128xf32>
    %413 = tpu.matmul %411, %412, %cst_314 {dimension_numbers = #tpu.dot_dimension_numbers<[1], [0], [0], [1], [0, 0, 1, 1], [], []>} : vector<2x256xbf16>, vector<256x128xbf16>, vector<2x128xf32> -> vector<2x128xf32>
    %c0_315 = arith.constant 0 : index
    %c0_316 = arith.constant 0 : index
    %414 = vector.load %arg11[%c0_315, %c0_316] : memref<1x128xf32, #tpu.memory_space<vmem>>, vector<1x128xf32>
    %415 = vector.broadcast %414 : vector<1x128xf32> to vector<2x128xf32>
    %416 = arith.addf %413, %415 : vector<2x128xf32>
    %c0_317 = arith.constant 0 : index
    %c0_318 = arith.constant 0 : index
    %417 = vector.load %arg12[%c0_317, %c0_318] : memref<2x128xf32, #tpu.memory_space<vmem>>, vector<2x128xf32>
    tpu.vector_store %arg12[%c0_317, %c0_318], %416 {strides = array<i32>} : memref<2x128xf32, #tpu.memory_space<vmem>>, vector<2x128xf32>,
    return
  }
}

</mosaic_0001>

<bundles_post_ra>
// kernel: net_forward.1
= control target key start
LH: loop header
LB: loop body
LE: loop exit
PB: predicated region body
PF: predicated region fallthrough
CT: control target
= control target key end

     0   :  { %17 = vsyncpa [#allocation10], 0  ;;  %s21634_s0 = inlined_call_operand.vmem [shape: bf16[512,25], index: 0, kind: input, shape index: {}]   ;;  %s21635_s1 = inlined_call_operand.vmem [shape: f32[128,25], index: 1, kind: input, shape index: {}]   ;;  %s21636_s2 = inlined_call_operand.vmem [shape: bf16[25,32], index: 2, kind: input, shape index: {}]   ;;  %s21637_s3 = inlined_call_operand.vmem [shape: f32[1,32], index: 3, kind: input, shape index: {}]   ;;  %s21638_s4 = inlined_call_operand.vmem [shape: bf16[25,32,64], index: 4, kind: input, shape index: {}]   ;;  %s21639_s5 = inlined_call_operand.vmem [shape: f32[1,64], index: 5, kind: input, shape index: {}]   ;;  %s21640_s6 = inlined_call_operand.vmem [shape: bf16[16,64,512], index: 6, kind: input, shape index: {}]   ;;  %s21641_s7 = inlined_call_operand.vmem [shape: f32[1,512], index: 7, kind: input, shape index: {}]   ;;  %s21642_s8 = inlined_call_operand.vmem [shape: bf16[512,256], index: 8, kind: input, shape index: {}]   ;;  %s21643_s9 = inlined_call_operand.vmem [shape: f32[1,256], index: 9, kind: input, shape index: {}]   ;;  %s21644_s10 = inlined_call_operand.vmem [shape: bf16[256,128], index: 10, kind: input, shape index: {}]   ;;  %s21645_s11 = inlined_call_operand.vmem [shape: f32[1,128], index: 11, kind: input, shape index: {}]   ;;  %s21646_s12 = inlined_call_operand.hbm [shape: f32[2,128], index: 12, kind: output, shape index: {}]  }
   0x1   :  { %v54_v0 = vld [vmem:[%s21640_s6] sm:$0xf]  ;;  %v56_v1 = vld [vmem:[%s21640_s6 + $0x10] sm:$0xf]  ;;  %v58_v2 = vld [vmem:[%s21640_s6 + $0x4] sm:$0xf] }
   0x2   :  { %55 = vst [vmem:[#allocation2] sm:$0xf] %v54_v0  ;;  %57 = vst [vmem:[#allocation2 + $0x4] sm:$0xf] %v56_v1  ;;  %v60_v3 = vld [vmem:[%s21640_s6 + $0x14] sm:$0xf] }
   0x3   :  { %v62_v4 = vld [vmem:[%s21640_s6 + $0x8] sm:$0xf]  ;;  %59 = vst [vmem:[#allocation2 + $0x8] sm:$0xf] %v58_v2  ;;  %61 = vst [vmem:[#allocation2 + $0xc] sm:$0xf] %v60_v3 }
   0x4   :  { %63 = vst [vmem:[#allocation2 + $0x10] sm:$0xf] %v62_v4  ;;  %v64_v5 = vld [vmem:[%s21640_s6 + $0x18] sm:$0xf]  ;;  %v66_v6 = vld [vmem:[%s21640_s6 + $0xc] sm:$0xf] }
   0x5   :  { %v68_v7 = vld [vmem:[%s21640_s6 + $0x1c] sm:$0xff]   ;;  %65 = vst [vmem:[#allocation2 + $0x14] sm:$0xf] %v64_v5  ;;  %67 = vst [vmem:[#allocation2 + $0x18] sm:$0xf] %v66_v6 }
   0x6   :  { %69 = vst [vmem:[#allocation2 + $0x1c] sm:$0xff] %v68_v7   ;;  %v72_v8 = vld [vmem:[%s21640_s6 + $0x30] sm:$0xf]  ;;  %v74_v9 = vld [vmem:[%s21640_s6 + $0x24] sm:$0xf]  ;;  %v84_v14 = vld [vmem:[%s21640_s6 + $0x3c] sm:$0xff]  }
   0x7   :  { %v76_v10 = vld [vmem:[%s21640_s6 + $0x34] sm:$0xf]  ;;  %73 = vst [vmem:[#allocation2 + $0x24] sm:$0xf] %v72_v8  ;;  %75 = vst [vmem:[#allocation2 + $0x28] sm:$0xf] %v74_v9 }
   0x8   :  { %77 = vst [vmem:[#allocation2 + $0x2c] sm:$0xf] %v76_v10  ;;  %v78_v11 = vld [vmem:[%s21640_s6 + $0x28] sm:$0xf]  ;;  %v80_v12 = vld [vmem:[%s21640_s6 + $0x38] sm:$0xf] }
   0x9   :  { %v82_v13 = vld [vmem:[%s21640_s6 + $0x2c] sm:$0xf]  ;;  %79 = vst [vmem:[#allocation2 + $0x30] sm:$0xf] %v78_v11  ;;  %81 = vst [vmem:[#allocation2 + $0x34] sm:$0xf] %v80_v12 }
   0xa   :  { %83 = vst [vmem:[#allocation2 + $0x38] sm:$0xf] %v82_v13  ;;  %v88_v15 = vld [vmem:[%s21640_s6 + $0x50] sm:$0xf]  ;;  %v90_v16 = vld [vmem:[%s21640_s6 + $0x44] sm:$0xf] }
   0xb   :  { %85 = vst [vmem:[#allocation2 + $0x3c] sm:$0xff] %v84_v14   ;;  %89 = vst [vmem:[#allocation2 + $0x44] sm:$0xf] %v88_v15  ;;  %v92_v17 = vld [vmem:[%s21640_s6 + $0x54] sm:$0xf]  ;;  %v100_v21 = vld [vmem:[%s21640_s6 + $0x5c] sm:$0xff]  }
   0xc   :  { %91 = vst [vmem:[#allocation2 + $0x48] sm:$0xf] %v90_v16  ;;  %v94_v18 = vld [vmem:[%s21640_s6 + $0x48] sm:$0xf]  ;;  %v96_v19 = vld [vmem:[%s21640_s6 + $0x58] sm:$0xf] }
   0xd   :  { %93 = vst [vmem:[#allocation2 + $0x4c] sm:$0xf] %v92_v17  ;;  %95 = vst [vmem:[#allocation2 + $0x50] sm:$0xf] %v94_v18  ;;  %v98_v20 = vld [vmem:[%s21640_s6 + $0x4c] sm:$0xf] }
   0xe   :  { %97 = vst [vmem:[#allocation2 + $0x54] sm:$0xf] %v96_v19  ;;  %v104_v22 = vld [vmem:[%s21640_s6 + $0x70] sm:$0xf]  ;;  %99 = vst [vmem:[#allocation2 + $0x58] sm:$0xf] %v98_v20 }
   0xf   :  { %101 = vst [vmem:[#allocation2 + $0x5c] sm:$0xff] %v100_v21   ;;  %105 = vst [vmem:[#allocation2 + $0x64] sm:$0xf] %v104_v22  ;;  %v106_v23 = vld [vmem:[%s21640_s6 + $0x64] sm:$0xf]  ;;  %v116_v28 = vld [vmem:[%s21640_s6 + $0x7c] sm:$0xff]  }
  0x10   :  { %v108_v24 = vld [vmem:[%s21640_s6 + $0x74] sm:$0xf]  ;;  %v110_v25 = vld [vmem:[%s21640_s6 + $0x68] sm:$0xf]  ;;  %107 = vst [vmem:[#allocation2 + $0x68] sm:$0xf] %v106_v23 }
  0x11   :  { %109 = vst [vmem:[#allocation2 + $0x6c] sm:$0xf] %v108_v24  ;;  %111 = vst [vmem:[#allocation2 + $0x70] sm:$0xf] %v110_v25  ;;  %v112_v26 = vld [vmem:[%s21640_s6 + $0x78] sm:$0xf] }
  0x12   :  { %v114_v27 = vld [vmem:[%s21640_s6 + $0x6c] sm:$0xf]  ;;  %113 = vst [vmem:[#allocation2 + $0x74] sm:$0xf] %v112_v26  ;;  %117 = vst [vmem:[#allocation2 + $0x7c] sm:$0xff] %v116_v28   ;;  %v132_v35 = vld [vmem:[%s21640_s6 + $0x9c] sm:$0xff]  }
  0x13   :  { %115 = vst [vmem:[#allocation2 + $0x78] sm:$0xf] %v114_v27  ;;  %v120_v29 = vld [vmem:[%s21640_s6 + $0x90] sm:$0xf]  ;;  %v122_v30 = vld [vmem:[%s21640_s6 + $0x84] sm:$0xf] }
  0x14   :  { %v124_v31 = vld [vmem:[%s21640_s6 + $0x94] sm:$0xf]  ;;  %121 = vst [vmem:[#allocation2 + $0x84] sm:$0xf] %v120_v29  ;;  %123 = vst [vmem:[#allocation2 + $0x88] sm:$0xf] %v122_v30 }
  0x15   :  { %125 = vst [vmem:[#allocation2 + $0x8c] sm:$0xf] %v124_v31  ;;  %v126_v32 = vld [vmem:[%s21640_s6 + $0x88] sm:$0xf]  ;;  %v128_v33 = vld [vmem:[%s21640_s6 + $0x98] sm:$0xf] }
  0x16   :  { %v130_v34 = vld [vmem:[%s21640_s6 + $0x8c] sm:$0xf]  ;;  %127 = vst [vmem:[#allocation2 + $0x90] sm:$0xf] %v126_v32  ;;  %129 = vst [vmem:[#allocation2 + $0x94] sm:$0xf] %v128_v33 }
  0x17   :  { %131 = vst [vmem:[#allocation2 + $0x98] sm:$0xf] %v130_v34  ;;  %v136_v36 = vld [vmem:[%s21640_s6 + $0xb0] sm:$0xf]  ;;  %v138_v37 = vld [vmem:[%s21640_s6 + $0xa4] sm:$0xf] }
  0x18   :  { %133 = vst [vmem:[#allocation2 + $0x9c] sm:$0xff] %v132_v35   ;;  %137 = vst [vmem:[#allocation2 + $0xa4] sm:$0xf] %v136_v36  ;;  %v140_v38 = vld [vmem:[%s21640_s6 + $0xb4] sm:$0xf]  ;;  %v148_v42 = vld [vmem:[%s21640_s6 + $0xbc] sm:$0xff]  }
  0x19   :  { %139 = vst [vmem:[#allocation2 + $0xa8] sm:$0xf] %v138_v37  ;;  %v142_v39 = vld [vmem:[%s21640_s6 + $0xa8] sm:$0xf]  ;;  %v144_v40 = vld [vmem:[%s21640_s6 + $0xb8] sm:$0xf] }
  0x1a   :  { %141 = vst [vmem:[#allocation2 + $0xac] sm:$0xf] %v140_v38  ;;  %143 = vst [vmem:[#allocation2 + $0xb0] sm:$0xf] %v142_v39  ;;  %v146_v41 = vld [vmem:[%s21640_s6 + $0xac] sm:$0xf] }
  0x1b   :  { %145 = vst [vmem:[#allocation2 + $0xb4] sm:$0xf] %v144_v40  ;;  %v152_v43 = vld [vmem:[%s21640_s6 + $0xd0] sm:$0xf]  ;;  %147 = vst [vmem:[#allocation2 + $0xb8] sm:$0xf] %v146_v41 }
  0x1c   :  { %149 = vst [vmem:[#allocation2 + $0xbc] sm:$0xff] %v148_v42   ;;  %153 = vst [vmem:[#allocation2 + $0xc4] sm:$0xf] %v152_v43  ;;  %v154_v44 = vld [vmem:[%s21640_s6 + $0xc4] sm:$0xf]  ;;  %v164_v49 = vld [vmem:[%s21640_s6 + $0xdc] sm:$0xff]  }
  0x1d   :  { %v156_v45 = vld [vmem:[%s21640_s6 + $0xd4] sm:$0xf]  ;;  %v158_v46 = vld [vmem:[%s21640_s6 + $0xc8] sm:$0xf]  ;;  %155 = vst [vmem:[#allocation2 + $0xc8] sm:$0xf] %v154_v44 }
  0x1e   :  { %157 = vst [vmem:[#allocation2 + $0xcc] sm:$0xf] %v156_v45  ;;  %159 = vst [vmem:[#allocation2 + $0xd0] sm:$0xf] %v158_v46  ;;  %v160_v47 = vld [vmem:[%s21640_s6 + $0xd8] sm:$0xf] }
  0x1f   :  { %v162_v48 = vld [vmem:[%s21640_s6 + $0xcc] sm:$0xf]  ;;  %161 = vst [vmem:[#allocation2 + $0xd4] sm:$0xf] %v160_v47  ;;  %165 = vst [vmem:[#allocation2 + $0xdc] sm:$0xff] %v164_v49   ;;  %v180_v56 = vld [vmem:[%s21640_s6 + $0xfc] sm:$0xff]  }
  0x20   :  { %163 = vst [vmem:[#allocation2 + $0xd8] sm:$0xf] %v162_v48  ;;  %v168_v50 = vld [vmem:[%s21640_s6 + $0xf0] sm:$0xf]  ;;  %v170_v51 = vld [vmem:[%s21640_s6 + $0xe4] sm:$0xf] }
  0x21   :  { %v172_v52 = vld [vmem:[%s21640_s6 + $0xf4] sm:$0xf]  ;;  %169 = vst [vmem:[#allocation2 + $0xe4] sm:$0xf] %v168_v50  ;;  %171 = vst [vmem:[#allocation2 + $0xe8] sm:$0xf] %v170_v51 }
  0x22   :  { %173 = vst [vmem:[#allocation2 + $0xec] sm:$0xf] %v172_v52  ;;  %v174_v53 = vld [vmem:[%s21640_s6 + $0xe8] sm:$0xf]  ;;  %v176_v54 = vld [vmem:[%s21640_s6 + $0xf8] sm:$0xf] }
  0x23   :  { %v178_v55 = vld [vmem:[%s21640_s6 + $0xec] sm:$0xf]  ;;  %175 = vst [vmem:[#allocation2 + $0xf0] sm:$0xf] %v174_v53  ;;  %177 = vst [vmem:[#allocation2 + $0xf4] sm:$0xf] %v176_v54 }
  0x24   :  { %179 = vst [vmem:[#allocation2 + $0xf8] sm:$0xf] %v178_v55  ;;  %v184_v57 = vld [vmem:[%s21640_s6 + $0x110] sm:$0xf]  ;;  %v186_v58 = vld [vmem:[%s21640_s6 + $0x104] sm:$0xf] }
  0x25   :  { %181 = vst [vmem:[#allocation2 + $0xfc] sm:$0xff] %v180_v56   ;;  %185 = vst [vmem:[#allocation2 + $0x104] sm:$0xf] %v184_v57  ;;  %v188_v59 = vld [vmem:[%s21640_s6 + $0x114] sm:$0xf]  ;;  %v196_v63 = vld [vmem:[%s21640_s6 + $0x11c] sm:$0xff]  }
  0x26   :  { %187 = vst [vmem:[#allocation2 + $0x108] sm:$0xf] %v186_v58  ;;  %v190_v60 = vld [vmem:[%s21640_s6 + $0x108] sm:$0xf]  ;;  %v192_v61 = vld [vmem:[%s21640_s6 + $0x118] sm:$0xf] }
  0x27   :  { %189 = vst [vmem:[#allocation2 + $0x10c] sm:$0xf] %v188_v59  ;;  %191 = vst [vmem:[#allocation2 + $0x110] sm:$0xf] %v190_v60  ;;  %v194_v62 = vld [vmem:[%s21640_s6 + $0x10c] sm:$0xf] }
  0x28   :  { %193 = vst [vmem:[#allocation2 + $0x114] sm:$0xf] %v192_v61  ;;  %v200_v0 = vld [vmem:[%s21640_s6 + $0x130] sm:$0xf]  ;;  %195 = vst [vmem:[#allocation2 + $0x118] sm:$0xf] %v194_v62 }
  0x29   :  { %197 = vst [vmem:[#allocation2 + $0x11c] sm:$0xff] %v196_v63   ;;  %201 = vst [vmem:[#allocation2 + $0x124] sm:$0xf] %v200_v0  ;;  %v202_v1 = vld [vmem:[%s21640_s6 + $0x124] sm:$0xf]  ;;  %v212_v6 = vld [vmem:[%s21640_s6 + $0x13c] sm:$0xff]  }
  0x2a   :  { %v204_v2 = vld [vmem:[%s21640_s6 + $0x134] sm:$0xf]  ;;  %v206_v3 = vld [vmem:[%s21640_s6 + $0x128] sm:$0xf]  ;;  %203 = vst [vmem:[#allocation2 + $0x128] sm:$0xf] %v202_v1 }
  0x2b   :  { %205 = vst [vmem:[#allocation2 + $0x12c] sm:$0xf] %v204_v2  ;;  %207 = vst [vmem:[#allocation2 + $0x130] sm:$0xf] %v206_v3  ;;  %v208_v4 = vld [vmem:[%s21640_s6 + $0x138] sm:$0xf] }
  0x2c   :  { %v210_v5 = vld [vmem:[%s21640_s6 + $0x12c] sm:$0xf]  ;;  %209 = vst [vmem:[#allocation2 + $0x134] sm:$0xf] %v208_v4  ;;  %213 = vst [vmem:[#allocation2 + $0x13c] sm:$0xff] %v212_v6   ;;  %v228_v13 = vld [vmem:[%s21640_s6 + $0x15c] sm:$0xff]  }
  0x2d   :  { %211 = vst [vmem:[#allocation2 + $0x138] sm:$0xf] %v210_v5  ;;  %v216_v7 = vld [vmem:[%s21640_s6 + $0x150] sm:$0xf]  ;;  %v218_v8 = vld [vmem:[%s21640_s6 + $0x144] sm:$0xf] }
  0x2e   :  { %v220_v9 = vld [vmem:[%s21640_s6 + $0x154] sm:$0xf]  ;;  %217 = vst [vmem:[#allocation2 + $0x144] sm:$0xf] %v216_v7  ;;  %219 = vst [vmem:[#allocation2 + $0x148] sm:$0xf] %v218_v8 }
  0x2f   :  { %221 = vst [vmem:[#allocation2 + $0x14c] sm:$0xf] %v220_v9  ;;  %v222_v10 = vld [vmem:[%s21640_s6 + $0x148] sm:$0xf]  ;;  %v224_v11 = vld [vmem:[%s21640_s6 + $0x158] sm:$0xf] }
  0x30   :  { %v226_v12 = vld [vmem:[%s21640_s6 + $0x14c] sm:$0xf]  ;;  %223 = vst [vmem:[#allocation2 + $0x150] sm:$0xf] %v222_v10  ;;  %225 = vst [vmem:[#allocation2 + $0x154] sm:$0xf] %v224_v11 }
  0x31   :  { %227 = vst [vmem:[#allocation2 + $0x158] sm:$0xf] %v226_v12  ;;  %v232_v14 = vld [vmem:[%s21640_s6 + $0x170] sm:$0xf]  ;;  %v234_v15 = vld [vmem:[%s21640_s6 + $0x164] sm:$0xf] }
  0x32   :  { %229 = vst [vmem:[#allocation2 + $0x15c] sm:$0xff] %v228_v13   ;;  %233 = vst [vmem:[#allocation2 + $0x164] sm:$0xf] %v232_v14  ;;  %v236_v16 = vld [vmem:[%s21640_s6 + $0x174] sm:$0xf]  ;;  %v244_v20 = vld [vmem:[%s21640_s6 + $0x17c] sm:$0xff]  }
  0x33   :  { %235 = vst [vmem:[#allocation2 + $0x168] sm:$0xf] %v234_v15  ;;  %v238_v17 = vld [vmem:[%s21640_s6 + $0x168] sm:$0xf]  ;;  %v240_v18 = vld [vmem:[%s21640_s6 + $0x178] sm:$0xf] }
  0x34   :  { %237 = vst [vmem:[#allocation2 + $0x16c] sm:$0xf] %v236_v16  ;;  %239 = vst [vmem:[#allocation2 + $0x170] sm:$0xf] %v238_v17  ;;  %v242_v19 = vld [vmem:[%s21640_s6 + $0x16c] sm:$0xf] }
  0x35   :  { %241 = vst [vmem:[#allocation2 + $0x174] sm:$0xf] %v240_v18  ;;  %v248_v21 = vld [vmem:[%s21640_s6 + $0x190] sm:$0xf]  ;;  %243 = vst [vmem:[#allocation2 + $0x178] sm:$0xf] %v242_v19 }
  0x36   :  { %245 = vst [vmem:[#allocation2 + $0x17c] sm:$0xff] %v244_v20   ;;  %249 = vst [vmem:[#allocation2 + $0x184] sm:$0xf] %v248_v21  ;;  %v250_v22 = vld [vmem:[%s21640_s6 + $0x184] sm:$0xf]  ;;  %v260_v27 = vld [vmem:[%s21640_s6 + $0x19c] sm:$0xff]  }
  0x37   :  { %v252_v23 = vld [vmem:[%s21640_s6 + $0x194] sm:$0xf]  ;;  %v254_v24 = vld [vmem:[%s21640_s6 + $0x188] sm:$0xf]  ;;  %251 = vst [vmem:[#allocation2 + $0x188] sm:$0xf] %v250_v22 }
  0x38   :  { %253 = vst [vmem:[#allocation2 + $0x18c] sm:$0xf] %v252_v23  ;;  %255 = vst [vmem:[#allocation2 + $0x190] sm:$0xf] %v254_v24  ;;  %v256_v25 = vld [vmem:[%s21640_s6 + $0x198] sm:$0xf] }
  0x39   :  { %v258_v26 = vld [vmem:[%s21640_s6 + $0x18c] sm:$0xf]  ;;  %257 = vst [vmem:[#allocation2 + $0x194] sm:$0xf] %v256_v25  ;;  %261 = vst [vmem:[#allocation2 + $0x19c] sm:$0xff] %v260_v27   ;;  %v276_v34 = vld [vmem:[%s21640_s6 + $0x1bc] sm:$0xff]  }
  0x3a   :  { %259 = vst [vmem:[#allocation2 + $0x198] sm:$0xf] %v258_v26  ;;  %v264_v28 = vld [vmem:[%s21640_s6 + $0x1b0] sm:$0xf]  ;;  %v266_v29 = vld [vmem:[%s21640_s6 + $0x1a4] sm:$0xf] }
  0x3b   :  { %v268_v30 = vld [vmem:[%s21640_s6 + $0x1b4] sm:$0xf]  ;;  %265 = vst [vmem:[#allocation2 + $0x1a4] sm:$0xf] %v264_v28  ;;  %267 = vst [vmem:[#allocation2 + $0x1a8] sm:$0xf] %v266_v29 }
  0x3c   :  { %269 = vst [vmem:[#allocation2 + $0x1ac] sm:$0xf] %v268_v30  ;;  %v270_v31 = vld [vmem:[%s21640_s6 + $0x1a8] sm:$0xf]  ;;  %v272_v32 = vld [vmem:[%s21640_s6 + $0x1b8] sm:$0xf] }
  0x3d   :  { %v274_v33 = vld [vmem:[%s21640_s6 + $0x1ac] sm:$0xf]  ;;  %271 = vst [vmem:[#allocation2 + $0x1b0] sm:$0xf] %v270_v31  ;;  %273 = vst [vmem:[#allocation2 + $0x1b4] sm:$0xf] %v272_v32 }
  0x3e   :  { %275 = vst [vmem:[#allocation2 + $0x1b8] sm:$0xf] %v274_v33  ;;  %v280_v35 = vld [vmem:[%s21640_s6 + $0x1d0] sm:$0xf]  ;;  %v282_v36 = vld [vmem:[%s21640_s6 + $0x1c4] sm:$0xf] }
  0x3f   :  { %277 = vst [vmem:[#allocation2 + $0x1bc] sm:$0xff] %v276_v34   ;;  %281 = vst [vmem:[#allocation2 + $0x1c4] sm:$0xf] %v280_v35  ;;  %v284_v37 = vld [vmem:[%s21640_s6 + $0x1d4] sm:$0xf]  ;;  %v292_v41 = vld [vmem:[%s21640_s6 + $0x1dc] sm:$0xff]  }
  0x40   :  { %283 = vst [vmem:[#allocation2 + $0x1c8] sm:$0xf] %v282_v36  ;;  %v286_v38 = vld [vmem:[%s21640_s6 + $0x1c8] sm:$0xf]  ;;  %v288_v39 = vld [vmem:[%s21640_s6 + $0x1d8] sm:$0xf] }
  0x41   :  { %285 = vst [vmem:[#allocation2 + $0x1cc] sm:$0xf] %v284_v37  ;;  %287 = vst [vmem:[#allocation2 + $0x1d0] sm:$0xf] %v286_v38  ;;  %v290_v40 = vld [vmem:[%s21640_s6 + $0x1cc] sm:$0xf] }
  0x42   :  { %289 = vst [vmem:[#allocation2 + $0x1d4] sm:$0xf] %v288_v39  ;;  %v296_v42 = vld [vmem:[%s21640_s6 + $0x1f0] sm:$0xf]  ;;  %291 = vst [vmem:[#allocation2 + $0x1d8] sm:$0xf] %v290_v40 }
  0x43   :  { %293 = vst [vmem:[#allocation2 + $0x1dc] sm:$0xff] %v292_v41   ;;  %297 = vst [vmem:[#allocation2 + $0x1e4] sm:$0xf] %v296_v42  ;;  %v298_v43 = vld [vmem:[%s21640_s6 + $0x1e4] sm:$0xf]  ;;  %v308_v48 = vld [vmem:[%s21640_s6 + $0x1fc] sm:$0xff]  }
  0x44   :  { %v300_v44 = vld [vmem:[%s21640_s6 + $0x1f4] sm:$0xf]  ;;  %v302_v45 = vld [vmem:[%s21640_s6 + $0x1e8] sm:$0xf]  ;;  %299 = vst [vmem:[#allocation2 + $0x1e8] sm:$0xf] %v298_v43 }
  0x45   :  { %301 = vst [vmem:[#allocation2 + $0x1ec] sm:$0xf] %v300_v44  ;;  %303 = vst [vmem:[#allocation2 + $0x1f0] sm:$0xf] %v302_v45  ;;  %v304_v46 = vld [vmem:[%s21640_s6 + $0x1f8] sm:$0xf] }
  0x46   :  { %v306_v47 = vld [vmem:[%s21640_s6 + $0x1ec] sm:$0xf]  ;;  %305 = vst [vmem:[#allocation2 + $0x1f4] sm:$0xf] %v304_v46  ;;  %309 = vst [vmem:[#allocation2 + $0x1fc] sm:$0xff] %v308_v48   ;;  %v324_v55 = vld [vmem:[%s21640_s6 + $0x21c] sm:$0xff]  }
  0x47   :  { %307 = vst [vmem:[#allocation2 + $0x1f8] sm:$0xf] %v306_v47  ;;  %v312_v49 = vld [vmem:[%s21640_s6 + $0x210] sm:$0xf]  ;;  %v314_v50 = vld [vmem:[%s21640_s6 + $0x204] sm:$0xf] }
  0x48   :  { %v316_v51 = vld [vmem:[%s21640_s6 + $0x214] sm:$0xf]  ;;  %313 = vst [vmem:[#allocation2 + $0x204] sm:$0xf] %v312_v49  ;;  %315 = vst [vmem:[#allocation2 + $0x208] sm:$0xf] %v314_v50 }
  0x49   :  { %317 = vst [vmem:[#allocation2 + $0x20c] sm:$0xf] %v316_v51  ;;  %v318_v52 = vld [vmem:[%s21640_s6 + $0x208] sm:$0xf]  ;;  %v320_v53 = vld [vmem:[%s21640_s6 + $0x218] sm:$0xf] }
  0x4a   :  { %v322_v54 = vld [vmem:[%s21640_s6 + $0x20c] sm:$0xf]  ;;  %319 = vst [vmem:[#allocation2 + $0x210] sm:$0xf] %v318_v52  ;;  %321 = vst [vmem:[#allocation2 + $0x214] sm:$0xf] %v320_v53 }
  0x4b   :  { %323 = vst [vmem:[#allocation2 + $0x218] sm:$0xf] %v322_v54  ;;  %v328_v56 = vld [vmem:[%s21640_s6 + $0x230] sm:$0xf]  ;;  %v330_v57 = vld [vmem:[%s21640_s6 + $0x224] sm:$0xf] }
  0x4c   :  { %325 = vst [vmem:[#allocation2 + $0x21c] sm:$0xff] %v324_v55   ;;  %329 = vst [vmem:[#allocation2 + $0x224] sm:$0xf] %v328_v56  ;;  %v332_v58 = vld [vmem:[%s21640_s6 + $0x234] sm:$0xf]  ;;  %v340_v62 = vld [vmem:[%s21640_s6 + $0x23c] sm:$0xff]  }
  0x4d   :  { %331 = vst [vmem:[#allocation2 + $0x228] sm:$0xf] %v330_v57  ;;  %v334_v59 = vld [vmem:[%s21640_s6 + $0x228] sm:$0xf]  ;;  %v336_v60 = vld [vmem:[%s21640_s6 + $0x238] sm:$0xf] }
  0x4e   :  { %333 = vst [vmem:[#allocation2 + $0x22c] sm:$0xf] %v332_v58  ;;  %335 = vst [vmem:[#allocation2 + $0x230] sm:$0xf] %v334_v59  ;;  %v338_v61 = vld [vmem:[%s21640_s6 + $0x22c] sm:$0xf] }
  0x4f   :  { %337 = vst [vmem:[#allocation2 + $0x234] sm:$0xf] %v336_v60  ;;  %v344_v63 = vld [vmem:[%s21640_s6 + $0x250] sm:$0xf]  ;;  %339 = vst [vmem:[#allocation2 + $0x238] sm:$0xf] %v338_v61 }
  0x50   :  { %341 = vst [vmem:[#allocation2 + $0x23c] sm:$0xff] %v340_v62   ;;  %345 = vst [vmem:[#allocation2 + $0x244] sm:$0xf] %v344_v63  ;;  %v346_v0 = vld [vmem:[%s21640_s6 + $0x244] sm:$0xf]  ;;  %v356_v5 = vld [vmem:[%s21640_s6 + $0x25c] sm:$0xff]  }
  0x51   :  { %v348_v1 = vld [vmem:[%s21640_s6 + $0x254] sm:$0xf]  ;;  %v350_v2 = vld [vmem:[%s21640_s6 + $0x248] sm:$0xf]  ;;  %347 = vst [vmem:[#allocation2 + $0x248] sm:$0xf] %v346_v0 }
  0x52   :  { %349 = vst [vmem:[#allocation2 + $0x24c] sm:$0xf] %v348_v1  ;;  %351 = vst [vmem:[#allocation2 + $0x250] sm:$0xf] %v350_v2  ;;  %v352_v3 = vld [vmem:[%s21640_s6 + $0x258] sm:$0xf] }
  0x53   :  { %v354_v4 = vld [vmem:[%s21640_s6 + $0x24c] sm:$0xf]  ;;  %353 = vst [vmem:[#allocation2 + $0x254] sm:$0xf] %v352_v3  ;;  %357 = vst [vmem:[#allocation2 + $0x25c] sm:$0xff] %v356_v5   ;;  %v372_v12 = vld [vmem:[%s21640_s6 + $0x27c] sm:$0xff]  }
  0x54   :  { %355 = vst [vmem:[#allocation2 + $0x258] sm:$0xf] %v354_v4  ;;  %v360_v6 = vld [vmem:[%s21640_s6 + $0x270] sm:$0xf]  ;;  %v362_v7 = vld [vmem:[%s21640_s6 + $0x264] sm:$0xf] }
  0x55   :  { %v364_v8 = vld [vmem:[%s21640_s6 + $0x274] sm:$0xf]  ;;  %361 = vst [vmem:[#allocation2 + $0x264] sm:$0xf] %v360_v6  ;;  %363 = vst [vmem:[#allocation2 + $0x268] sm:$0xf] %v362_v7 }
  0x56   :  { %365 = vst [vmem:[#allocation2 + $0x26c] sm:$0xf] %v364_v8  ;;  %v366_v9 = vld [vmem:[%s21640_s6 + $0x268] sm:$0xf]  ;;  %v368_v10 = vld [vmem:[%s21640_s6 + $0x278] sm:$0xf] }
  0x57   :  { %v370_v11 = vld [vmem:[%s21640_s6 + $0x26c] sm:$0xf]  ;;  %367 = vst [vmem:[#allocation2 + $0x270] sm:$0xf] %v366_v9  ;;  %369 = vst [vmem:[#allocation2 + $0x274] sm:$0xf] %v368_v10 }
  0x58   :  { %371 = vst [vmem:[#allocation2 + $0x278] sm:$0xf] %v370_v11  ;;  %v376_v13 = vld [vmem:[%s21640_s6 + $0x290] sm:$0xf]  ;;  %v378_v14 = vld [vmem:[%s21640_s6 + $0x284] sm:$0xf] }
  0x59   :  { %373 = vst [vmem:[#allocation2 + $0x27c] sm:$0xff] %v372_v12   ;;  %377 = vst [vmem:[#allocation2 + $0x284] sm:$0xf] %v376_v13  ;;  %v380_v15 = vld [vmem:[%s21640_s6 + $0x294] sm:$0xf]  ;;  %v388_v19 = vld [vmem:[%s21640_s6 + $0x29c] sm:$0xff]  }
  0x5a   :  { %379 = vst [vmem:[#allocation2 + $0x288] sm:$0xf] %v378_v14  ;;  %v382_v16 = vld [vmem:[%s21640_s6 + $0x288] sm:$0xf]  ;;  %v384_v17 = vld [vmem:[%s21640_s6 + $0x298] sm:$0xf] }
  0x5b   :  { %381 = vst [vmem:[#allocation2 + $0x28c] sm:$0xf] %v380_v15  ;;  %383 = vst [vmem:[#allocation2 + $0x290] sm:$0xf] %v382_v16  ;;  %v386_v18 = vld [vmem:[%s21640_s6 + $0x28c] sm:$0xf] }
  0x5c   :  { %385 = vst [vmem:[#allocation2 + $0x294] sm:$0xf] %v384_v17  ;;  %v392_v20 = vld [vmem:[%s21640_s6 + $0x2b0] sm:$0xf]  ;;  %387 = vst [vmem:[#allocation2 + $0x298] sm:$0xf] %v386_v18 }
  0x5d   :  { %389 = vst [vmem:[#allocation2 + $0x29c] sm:$0xff] %v388_v19   ;;  %393 = vst [vmem:[#allocation2 + $0x2a4] sm:$0xf] %v392_v20  ;;  %v394_v21 = vld [vmem:[%s21640_s6 + $0x2a4] sm:$0xf]  ;;  %v404_v26 = vld [vmem:[%s21640_s6 + $0x2bc] sm:$0xff]  }
  0x5e   :  { %v396_v22 = vld [vmem:[%s21640_s6 + $0x2b4] sm:$0xf]  ;;  %v398_v23 = vld [vmem:[%s21640_s6 + $0x2a8] sm:$0xf]  ;;  %395 = vst [vmem:[#allocation2 + $0x2a8] sm:$0xf] %v394_v21 }
  0x5f   :  { %397 = vst [vmem:[#allocation2 + $0x2ac] sm:$0xf] %v396_v22  ;;  %399 = vst [vmem:[#allocation2 + $0x2b0] sm:$0xf] %v398_v23  ;;  %v400_v24 = vld [vmem:[%s21640_s6 + $0x2b8] sm:$0xf] }
  0x60   :  { %v402_v25 = vld [vmem:[%s21640_s6 + $0x2ac] sm:$0xf]  ;;  %401 = vst [vmem:[#allocation2 + $0x2b4] sm:$0xf] %v400_v24  ;;  %405 = vst [vmem:[#allocation2 + $0x2bc] sm:$0xff] %v404_v26   ;;  %v420_v33 = vld [vmem:[%s21640_s6 + $0x2dc] sm:$0xff]  }
  0x61   :  { %403 = vst [vmem:[#allocation2 + $0x2b8] sm:$0xf] %v402_v25  ;;  %v408_v27 = vld [vmem:[%s21640_s6 + $0x2d0] sm:$0xf]  ;;  %v410_v28 = vld [vmem:[%s21640_s6 + $0x2c4] sm:$0xf] }
  0x62   :  { %v412_v29 = vld [vmem:[%s21640_s6 + $0x2d4] sm:$0xf]  ;;  %409 = vst [vmem:[#allocation2 + $0x2c4] sm:$0xf] %v408_v27  ;;  %411 = vst [vmem:[#allocation2 + $0x2c8] sm:$0xf] %v410_v28 }
  0x63   :  { %413 = vst [vmem:[#allocation2 + $0x2cc] sm:$0xf] %v412_v29  ;;  %v414_v30 = vld [vmem:[%s21640_s6 + $0x2c8] sm:$0xf]  ;;  %v416_v31 = vld [vmem:[%s21640_s6 + $0x2d8] sm:$0xf] }
  0x64   :  { %v418_v32 = vld [vmem:[%s21640_s6 + $0x2cc] sm:$0xf]  ;;  %415 = vst [vmem:[#allocation2 + $0x2d0] sm:$0xf] %v414_v30  ;;  %417 = vst [vmem:[#allocation2 + $0x2d4] sm:$0xf] %v416_v31 }
  0x65   :  { %419 = vst [vmem:[#allocation2 + $0x2d8] sm:$0xf] %v418_v32  ;;  %v424_v34 = vld [vmem:[%s21640_s6 + $0x2f0] sm:$0xf]  ;;  %v426_v35 = vld [vmem:[%s21640_s6 + $0x2e4] sm:$0xf] }
  0x66   :  { %421 = vst [vmem:[#allocation2 + $0x2dc] sm:$0xff] %v420_v33   ;;  %425 = vst [vmem:[#allocation2 + $0x2e4] sm:$0xf] %v424_v34  ;;  %v428_v36 = vld [vmem:[%s21640_s6 + $0x2f4] sm:$0xf]  ;;  %v436_v40 = vld [vmem:[%s21640_s6 + $0x2fc] sm:$0xff]  }
  0x67   :  { %427 = vst [vmem:[#allocation2 + $0x2e8] sm:$0xf] %v426_v35  ;;  %v430_v37 = vld [vmem:[%s21640_s6 + $0x2e8] sm:$0xf]  ;;  %v432_v38 = vld [vmem:[%s21640_s6 + $0x2f8] sm:$0xf] }
  0x68   :  { %429 = vst [vmem:[#allocation2 + $0x2ec] sm:$0xf] %v428_v36  ;;  %431 = vst [vmem:[#allocation2 + $0x2f0] sm:$0xf] %v430_v37  ;;  %v434_v39 = vld [vmem:[%s21640_s6 + $0x2ec] sm:$0xf] }
  0x69   :  { %433 = vst [vmem:[#allocation2 + $0x2f4] sm:$0xf] %v432_v38  ;;  %v440_v41 = vld [vmem:[%s21640_s6 + $0x310] sm:$0xf]  ;;  %435 = vst [vmem:[#allocation2 + $0x2f8] sm:$0xf] %v434_v39 }
  0x6a   :  { %437 = vst [vmem:[#allocation2 + $0x2fc] sm:$0xff] %v436_v40   ;;  %441 = vst [vmem:[#allocation2 + $0x304] sm:$0xf] %v440_v41  ;;  %v442_v42 = vld [vmem:[%s21640_s6 + $0x304] sm:$0xf]  ;;  %v452_v47 = vld [vmem:[%s21640_s6 + $0x31c] sm:$0xff]  }
  0x6b   :  { %v444_v43 = vld [vmem:[%s21640_s6 + $0x314] sm:$0xf]  ;;  %v446_v44 = vld [vmem:[%s21640_s6 + $0x308] sm:$0xf]  ;;  %443 = vst [vmem:[#allocation2 + $0x308] sm:$0xf] %v442_v42 }
  0x6c   :  { %445 = vst [vmem:[#allocation2 + $0x30c] sm:$0xf] %v444_v43  ;;  %447 = vst [vmem:[#allocation2 + $0x310] sm:$0xf] %v446_v44  ;;  %v448_v45 = vld [vmem:[%s21640_s6 + $0x318] sm:$0xf] }
  0x6d   :  { %v450_v46 = vld [vmem:[%s21640_s6 + $0x30c] sm:$0xf]  ;;  %449 = vst [vmem:[#allocation2 + $0x314] sm:$0xf] %v448_v45  ;;  %453 = vst [vmem:[#allocation2 + $0x31c] sm:$0xff] %v452_v47   ;;  %v468_v54 = vld [vmem:[%s21640_s6 + $0x33c] sm:$0xff]  }
  0x6e   :  { %451 = vst [vmem:[#allocation2 + $0x318] sm:$0xf] %v450_v46  ;;  %v456_v48 = vld [vmem:[%s21640_s6 + $0x330] sm:$0xf]  ;;  %v458_v49 = vld [vmem:[%s21640_s6 + $0x324] sm:$0xf] }
  0x6f   :  { %v460_v50 = vld [vmem:[%s21640_s6 + $0x334] sm:$0xf]  ;;  %457 = vst [vmem:[#allocation2 + $0x324] sm:$0xf] %v456_v48  ;;  %459 = vst [vmem:[#allocation2 + $0x328] sm:$0xf] %v458_v49 }
  0x70   :  { %461 = vst [vmem:[#allocation2 + $0x32c] sm:$0xf] %v460_v50  ;;  %v462_v51 = vld [vmem:[%s21640_s6 + $0x328] sm:$0xf]  ;;  %v464_v52 = vld [vmem:[%s21640_s6 + $0x338] sm:$0xf] }
  0x71   :  { %v466_v53 = vld [vmem:[%s21640_s6 + $0x32c] sm:$0xf]  ;;  %463 = vst [vmem:[#allocation2 + $0x330] sm:$0xf] %v462_v51  ;;  %465 = vst [vmem:[#allocation2 + $0x334] sm:$0xf] %v464_v52 }
  0x72   :  { %467 = vst [vmem:[#allocation2 + $0x338] sm:$0xf] %v466_v53  ;;  %v472_v55 = vld [vmem:[%s21640_s6 + $0x350] sm:$0xf]  ;;  %v474_v56 = vld [vmem:[%s21640_s6 + $0x344] sm:$0xf] }
  0x73   :  { %469 = vst [vmem:[#allocation2 + $0x33c] sm:$0xff] %v468_v54   ;;  %473 = vst [vmem:[#allocation2 + $0x344] sm:$0xf] %v472_v55  ;;  %v476_v57 = vld [vmem:[%s21640_s6 + $0x354] sm:$0xf]  ;;  %v484_v61 = vld [vmem:[%s21640_s6 + $0x35c] sm:$0xff]  }
  0x74   :  { %475 = vst [vmem:[#allocation2 + $0x348] sm:$0xf] %v474_v56  ;;  %v478_v58 = vld [vmem:[%s21640_s6 + $0x348] sm:$0xf]  ;;  %v480_v59 = vld [vmem:[%s21640_s6 + $0x358] sm:$0xf] }
  0x75   :  { %477 = vst [vmem:[#allocation2 + $0x34c] sm:$0xf] %v476_v57  ;;  %479 = vst [vmem:[#allocation2 + $0x350] sm:$0xf] %v478_v58  ;;  %v482_v60 = vld [vmem:[%s21640_s6 + $0x34c] sm:$0xf] }
  0x76   :  { %481 = vst [vmem:[#allocation2 + $0x354] sm:$0xf] %v480_v59  ;;  %v488_v62 = vld [vmem:[%s21640_s6 + $0x370] sm:$0xf]  ;;  %483 = vst [vmem:[#allocation2 + $0x358] sm:$0xf] %v482_v60 }
  0x77   :  { %485 = vst [vmem:[#allocation2 + $0x35c] sm:$0xff] %v484_v61   ;;  %489 = vst [vmem:[#allocation2 + $0x364] sm:$0xf] %v488_v62  ;;  %v490_v63 = vld [vmem:[%s21640_s6 + $0x364] sm:$0xf]  ;;  %v500_v4 = vld [vmem:[%s21640_s6 + $0x37c] sm:$0xff]  }
  0x78   :  { %v492_v0 = vld [vmem:[%s21640_s6 + $0x374] sm:$0xf]  ;;  %v494_v1 = vld [vmem:[%s21640_s6 + $0x368] sm:$0xf]  ;;  %491 = vst [vmem:[#allocation2 + $0x368] sm:$0xf] %v490_v63 }
  0x79   :  { %493 = vst [vmem:[#allocation2 + $0x36c] sm:$0xf] %v492_v0  ;;  %495 = vst [vmem:[#allocation2 + $0x370] sm:$0xf] %v494_v1  ;;  %v496_v2 = vld [vmem:[%s21640_s6 + $0x378] sm:$0xf] }
  0x7a   :  { %v498_v3 = vld [vmem:[%s21640_s6 + $0x36c] sm:$0xf]  ;;  %497 = vst [vmem:[#allocation2 + $0x374] sm:$0xf] %v496_v2  ;;  %501 = vst [vmem:[#allocation2 + $0x37c] sm:$0xff] %v500_v4   ;;  %v516_v11 = vld [vmem:[%s21640_s6 + $0x39c] sm:$0xff]  }
  0x7b   :  { %499 = vst [vmem:[#allocation2 + $0x378] sm:$0xf] %v498_v3  ;;  %v504_v5 = vld [vmem:[%s21640_s6 + $0x390] sm:$0xf]  ;;  %v506_v6 = vld [vmem:[%s21640_s6 + $0x384] sm:$0xf] }
  0x7c   :  { %v508_v7 = vld [vmem:[%s21640_s6 + $0x394] sm:$0xf]  ;;  %505 = vst [vmem:[#allocation2 + $0x384] sm:$0xf] %v504_v5  ;;  %507 = vst [vmem:[#allocation2 + $0x388] sm:$0xf] %v506_v6 }
  0x7d   :  { %509 = vst [vmem:[#allocation2 + $0x38c] sm:$0xf] %v508_v7  ;;  %v510_v8 = vld [vmem:[%s21640_s6 + $0x388] sm:$0xf]  ;;  %v512_v9 = vld [vmem:[%s21640_s6 + $0x398] sm:$0xf] }
  0x7e   :  { %v514_v10 = vld [vmem:[%s21640_s6 + $0x38c] sm:$0xf]  ;;  %511 = vst [vmem:[#allocation2 + $0x390] sm:$0xf] %v510_v8  ;;  %513 = vst [vmem:[#allocation2 + $0x394] sm:$0xf] %v512_v9 }
  0x7f   :  { %515 = vst [vmem:[#allocation2 + $0x398] sm:$0xf] %v514_v10  ;;  %v520_v12 = vld [vmem:[%s21640_s6 + $0x3b0] sm:$0xf]  ;;  %v522_v13 = vld [vmem:[%s21640_s6 + $0x3a4] sm:$0xf] }
  0x80   :  { %517 = vst [vmem:[#allocation2 + $0x39c] sm:$0xff] %v516_v11   ;;  %521 = vst [vmem:[#allocation2 + $0x3a4] sm:$0xf] %v520_v12  ;;  %v524_v14 = vld [vmem:[%s21640_s6 + $0x3b4] sm:$0xf]  ;;  %v532_v18 = vld [vmem:[%s21640_s6 + $0x3bc] sm:$0xff]  }
  0x81   :  { %523 = vst [vmem:[#allocation2 + $0x3a8] sm:$0xf] %v522_v13  ;;  %v526_v15 = vld [vmem:[%s21640_s6 + $0x3a8] sm:$0xf]  ;;  %v528_v16 = vld [vmem:[%s21640_s6 + $0x3b8] sm:$0xf] }
  0x82   :  { %525 = vst [vmem:[#allocation2 + $0x3ac] sm:$0xf] %v524_v14  ;;  %527 = vst [vmem:[#allocation2 + $0x3b0] sm:$0xf] %v526_v15  ;;  %v530_v17 = vld [vmem:[%s21640_s6 + $0x3ac] sm:$0xf] }
  0x83   :  { %529 = vst [vmem:[#allocation2 + $0x3b4] sm:$0xf] %v528_v16  ;;  %v536_v19 = vld [vmem:[%s21640_s6 + $0x3d0] sm:$0xf]  ;;  %531 = vst [vmem:[#allocation2 + $0x3b8] sm:$0xf] %v530_v17 }
  0x84   :  { %533 = vst [vmem:[#allocation2 + $0x3bc] sm:$0xff] %v532_v18   ;;  %537 = vst [vmem:[#allocation2 + $0x3c4] sm:$0xf] %v536_v19  ;;  %v538_v20 = vld [vmem:[%s21640_s6 + $0x3c4] sm:$0xf]  ;;  %v548_v25 = vld [vmem:[%s21640_s6 + $0x3dc] sm:$0xff]  }
  0x85   :  { %v540_v21 = vld [vmem:[%s21640_s6 + $0x3d4] sm:$0xf]  ;;  %v542_v22 = vld [vmem:[%s21640_s6 + $0x3c8] sm:$0xf]  ;;  %539 = vst [vmem:[#allocation2 + $0x3c8] sm:$0xf] %v538_v20 }
  0x86   :  { %541 = vst [vmem:[#allocation2 + $0x3cc] sm:$0xf] %v540_v21  ;;  %543 = vst [vmem:[#allocation2 + $0x3d0] sm:$0xf] %v542_v22  ;;  %v544_v23 = vld [vmem:[%s21640_s6 + $0x3d8] sm:$0xf] }
  0x87   :  { %v546_v24 = vld [vmem:[%s21640_s6 + $0x3cc] sm:$0xf]  ;;  %545 = vst [vmem:[#allocation2 + $0x3d4] sm:$0xf] %v544_v23  ;;  %549 = vst [vmem:[#allocation2 + $0x3dc] sm:$0xff] %v548_v25   ;;  %v564_v32 = vld [vmem:[%s21640_s6 + $0x3fc] sm:$0xff]  }
  0x88   :  { %547 = vst [vmem:[#allocation2 + $0x3d8] sm:$0xf] %v546_v24  ;;  %v552_v26 = vld [vmem:[%s21640_s6 + $0x3f0] sm:$0xf]  ;;  %v554_v27 = vld [vmem:[%s21640_s6 + $0x3e4] sm:$0xf] }
  0x89   :  { %v556_v28 = vld [vmem:[%s21640_s6 + $0x3f4] sm:$0xf]  ;;  %553 = vst [vmem:[#allocation2 + $0x3e4] sm:$0xf] %v552_v26  ;;  %555 = vst [vmem:[#allocation2 + $0x3e8] sm:$0xf] %v554_v27 }
  0x8a   :  { %557 = vst [vmem:[#allocation2 + $0x3ec] sm:$0xf] %v556_v28  ;;  %v558_v29 = vld [vmem:[%s21640_s6 + $0x3e8] sm:$0xf]  ;;  %v560_v30 = vld [vmem:[%s21640_s6 + $0x3f8] sm:$0xf] }
  0x8b   :  { %v562_v31 = vld [vmem:[%s21640_s6 + $0x3ec] sm:$0xf]  ;;  %559 = vst [vmem:[#allocation2 + $0x3f0] sm:$0xf] %v558_v29  ;;  %561 = vst [vmem:[#allocation2 + $0x3f4] sm:$0xf] %v560_v30 }
  0x8c   :  { %563 = vst [vmem:[#allocation2 + $0x3f8] sm:$0xf] %v562_v31  ;;  %v568_v33 = vld [vmem:[%s21640_s6 + $0x410] sm:$0xf]  ;;  %v570_v34 = vld [vmem:[%s21640_s6 + $0x404] sm:$0xf] }
  0x8d   :  { %565 = vst [vmem:[#allocation2 + $0x3fc] sm:$0xff] %v564_v32   ;;  %569 = vst [vmem:[#allocation2 + $0x404] sm:$0xf] %v568_v33  ;;  %v572_v35 = vld [vmem:[%s21640_s6 + $0x414] sm:$0xf]  ;;  %v580_v39 = vld [vmem:[%s21640_s6 + $0x41c] sm:$0xff]  }
  0x8e   :  { %571 = vst [vmem:[#allocation2 + $0x408] sm:$0xf] %v570_v34  ;;  %v574_v36 = vld [vmem:[%s21640_s6 + $0x408] sm:$0xf]  ;;  %v576_v37 = vld [vmem:[%s21640_s6 + $0x418] sm:$0xf] }
  0x8f   :  { %573 = vst [vmem:[#allocation2 + $0x40c] sm:$0xf] %v572_v35  ;;  %575 = vst [vmem:[#allocation2 + $0x410] sm:$0xf] %v574_v36  ;;  %v578_v38 = vld [vmem:[%s21640_s6 + $0x40c] sm:$0xf] }
  0x90   :  { %577 = vst [vmem:[#allocation2 + $0x414] sm:$0xf] %v576_v37  ;;  %v584_v40 = vld [vmem:[%s21640_s6 + $0x430] sm:$0xf]  ;;  %579 = vst [vmem:[#allocation2 + $0x418] sm:$0xf] %v578_v38 }
  0x91   :  { %581 = vst [vmem:[#allocation2 + $0x41c] sm:$0xff] %v580_v39   ;;  %585 = vst [vmem:[#allocation2 + $0x424] sm:$0xf] %v584_v40  ;;  %v586_v41 = vld [vmem:[%s21640_s6 + $0x424] sm:$0xf]  ;;  %v596_v46 = vld [vmem:[%s21640_s6 + $0x43c] sm:$0xff]  }
  0x92   :  { %v588_v42 = vld [vmem:[%s21640_s6 + $0x434] sm:$0xf]  ;;  %v590_v43 = vld [vmem:[%s21640_s6 + $0x428] sm:$0xf]  ;;  %587 = vst [vmem:[#allocation2 + $0x428] sm:$0xf] %v586_v41 }
  0x93   :  { %589 = vst [vmem:[#allocation2 + $0x42c] sm:$0xf] %v588_v42  ;;  %591 = vst [vmem:[#allocation2 + $0x430] sm:$0xf] %v590_v43  ;;  %v592_v44 = vld [vmem:[%s21640_s6 + $0x438] sm:$0xf] }
  0x94   :  { %v594_v45 = vld [vmem:[%s21640_s6 + $0x42c] sm:$0xf]  ;;  %593 = vst [vmem:[#allocation2 + $0x434] sm:$0xf] %v592_v44  ;;  %597 = vst [vmem:[#allocation2 + $0x43c] sm:$0xff] %v596_v46   ;;  %v612_v53 = vld [vmem:[%s21640_s6 + $0x45c] sm:$0xff]  }
  0x95   :  { %595 = vst [vmem:[#allocation2 + $0x438] sm:$0xf] %v594_v45  ;;  %v600_v47 = vld [vmem:[%s21640_s6 + $0x450] sm:$0xf]  ;;  %v602_v48 = vld [vmem:[%s21640_s6 + $0x444] sm:$0xf] }
  0x96   :  { %v604_v49 = vld [vmem:[%s21640_s6 + $0x454] sm:$0xf]  ;;  %601 = vst [vmem:[#allocation2 + $0x444] sm:$0xf] %v600_v47  ;;  %603 = vst [vmem:[#allocation2 + $0x448] sm:$0xf] %v602_v48 }
  0x97   :  { %605 = vst [vmem:[#allocation2 + $0x44c] sm:$0xf] %v604_v49  ;;  %v606_v50 = vld [vmem:[%s21640_s6 + $0x448] sm:$0xf]  ;;  %v608_v51 = vld [vmem:[%s21640_s6 + $0x458] sm:$0xf] }
  0x98   :  { %v610_v52 = vld [vmem:[%s21640_s6 + $0x44c] sm:$0xf]  ;;  %607 = vst [vmem:[#allocation2 + $0x450] sm:$0xf] %v606_v50  ;;  %609 = vst [vmem:[#allocation2 + $0x454] sm:$0xf] %v608_v51 }
  0x99   :  { %611 = vst [vmem:[#allocation2 + $0x458] sm:$0xf] %v610_v52  ;;  %v616_v54 = vld [vmem:[%s21640_s6 + $0x470] sm:$0xf]  ;;  %v618_v55 = vld [vmem:[%s21640_s6 + $0x464] sm:$0xf] }
  0x9a   :  { %613 = vst [vmem:[#allocation2 + $0x45c] sm:$0xff] %v612_v53   ;;  %617 = vst [vmem:[#allocation2 + $0x464] sm:$0xf] %v616_v54  ;;  %v620_v56 = vld [vmem:[%s21640_s6 + $0x474] sm:$0xf]  ;;  %v628_v60 = vld [vmem:[%s21640_s6 + $0x47c] sm:$0xff]  }
  0x9b   :  { %619 = vst [vmem:[#allocation2 + $0x468] sm:$0xf] %v618_v55  ;;  %v622_v57 = vld [vmem:[%s21640_s6 + $0x468] sm:$0xf]  ;;  %v624_v58 = vld [vmem:[%s21640_s6 + $0x478] sm:$0xf] }
  0x9c   :  { %621 = vst [vmem:[#allocation2 + $0x46c] sm:$0xf] %v620_v56  ;;  %623 = vst [vmem:[#allocation2 + $0x470] sm:$0xf] %v622_v57  ;;  %v626_v59 = vld [vmem:[%s21640_s6 + $0x46c] sm:$0xf] }
  0x9d   :  { %625 = vst [vmem:[#allocation2 + $0x474] sm:$0xf] %v624_v58  ;;  %v632_v61 = vld [vmem:[%s21640_s6 + $0x490] sm:$0xf]  ;;  %627 = vst [vmem:[#allocation2 + $0x478] sm:$0xf] %v626_v59 }
  0x9e   :  { %629 = vst [vmem:[#allocation2 + $0x47c] sm:$0xff] %v628_v60   ;;  %633 = vst [vmem:[#allocation2 + $0x484] sm:$0xf] %v632_v61  ;;  %v634_v62 = vld [vmem:[%s21640_s6 + $0x484] sm:$0xf]  ;;  %v644_v3 = vld [vmem:[%s21640_s6 + $0x49c] sm:$0xff]  }
  0x9f   :  { %v636_v63 = vld [vmem:[%s21640_s6 + $0x494] sm:$0xf]  ;;  %v638_v0 = vld [vmem:[%s21640_s6 + $0x488] sm:$0xf]  ;;  %635 = vst [vmem:[#allocation2 + $0x488] sm:$0xf] %v634_v62 }
  0xa0   :  { %637 = vst [vmem:[#allocation2 + $0x48c] sm:$0xf] %v636_v63  ;;  %639 = vst [vmem:[#allocation2 + $0x490] sm:$0xf] %v638_v0  ;;  %v640_v1 = vld [vmem:[%s21640_s6 + $0x498] sm:$0xf] }
  0xa1   :  { %v642_v2 = vld [vmem:[%s21640_s6 + $0x48c] sm:$0xf]  ;;  %641 = vst [vmem:[#allocation2 + $0x494] sm:$0xf] %v640_v1  ;;  %645 = vst [vmem:[#allocation2 + $0x49c] sm:$0xff] %v644_v3   ;;  %v660_v10 = vld [vmem:[%s21640_s6 + $0x4bc] sm:$0xff]  }
  0xa2   :  { %643 = vst [vmem:[#allocation2 + $0x498] sm:$0xf] %v642_v2  ;;  %v648_v4 = vld [vmem:[%s21640_s6 + $0x4b0] sm:$0xf]  ;;  %v650_v5 = vld [vmem:[%s21640_s6 + $0x4a4] sm:$0xf] }
  0xa3   :  { %v652_v6 = vld [vmem:[%s21640_s6 + $0x4b4] sm:$0xf]  ;;  %649 = vst [vmem:[#allocation2 + $0x4a4] sm:$0xf] %v648_v4  ;;  %651 = vst [vmem:[#allocation2 + $0x4a8] sm:$0xf] %v650_v5 }
  0xa4   :  { %653 = vst [vmem:[#allocation2 + $0x4ac] sm:$0xf] %v652_v6  ;;  %v654_v7 = vld [vmem:[%s21640_s6 + $0x4a8] sm:$0xf]  ;;  %v656_v8 = vld [vmem:[%s21640_s6 + $0x4b8] sm:$0xf] }
  0xa5   :  { %v658_v9 = vld [vmem:[%s21640_s6 + $0x4ac] sm:$0xf]  ;;  %655 = vst [vmem:[#allocation2 + $0x4b0] sm:$0xf] %v654_v7  ;;  %657 = vst [vmem:[#allocation2 + $0x4b4] sm:$0xf] %v656_v8 }
  0xa6   :  { %659 = vst [vmem:[#allocation2 + $0x4b8] sm:$0xf] %v658_v9  ;;  %v664_v11 = vld [vmem:[%s21640_s6 + $0x4d0] sm:$0xf]  ;;  %v666_v12 = vld [vmem:[%s21640_s6 + $0x4c4] sm:$0xf] }
  0xa7   :  { %661 = vst [vmem:[#allocation2 + $0x4bc] sm:$0xff] %v660_v10   ;;  %665 = vst [vmem:[#allocation2 + $0x4c4] sm:$0xf] %v664_v11  ;;  %v668_v13 = vld [vmem:[%s21640_s6 + $0x4d4] sm:$0xf]  ;;  %v676_v17 = vld [vmem:[%s21640_s6 + $0x4dc] sm:$0xff]  }
  0xa8   :  { %667 = vst [vmem:[#allocation2 + $0x4c8] sm:$0xf] %v666_v12  ;;  %v670_v14 = vld [vmem:[%s21640_s6 + $0x4c8] sm:$0xf]  ;;  %v672_v15 = vld [vmem:[%s21640_s6 + $0x4d8] sm:$0xf] }
  0xa9   :  { %669 = vst [vmem:[#allocation2 + $0x4cc] sm:$0xf] %v668_v13  ;;  %671 = vst [vmem:[#allocation2 + $0x4d0] sm:$0xf] %v670_v14  ;;  %v674_v16 = vld [vmem:[%s21640_s6 + $0x4cc] sm:$0xf] }
  0xaa   :  { %673 = vst [vmem:[#allocation2 + $0x4d4] sm:$0xf] %v672_v15  ;;  %v680_v18 = vld [vmem:[%s21640_s6 + $0x4f0] sm:$0xf]  ;;  %675 = vst [vmem:[#allocation2 + $0x4d8] sm:$0xf] %v674_v16 }
  0xab   :  { %677 = vst [vmem:[#allocation2 + $0x4dc] sm:$0xff] %v676_v17   ;;  %681 = vst [vmem:[#allocation2 + $0x4e4] sm:$0xf] %v680_v18  ;;  %v682_v19 = vld [vmem:[%s21640_s6 + $0x4e4] sm:$0xf]  ;;  %v692_v24 = vld [vmem:[%s21640_s6 + $0x4fc] sm:$0xff]  }
  0xac   :  { %v684_v20 = vld [vmem:[%s21640_s6 + $0x4f4] sm:$0xf]  ;;  %v686_v21 = vld [vmem:[%s21640_s6 + $0x4e8] sm:$0xf]  ;;  %683 = vst [vmem:[#allocation2 + $0x4e8] sm:$0xf] %v682_v19 }
  0xad   :  { %685 = vst [vmem:[#allocation2 + $0x4ec] sm:$0xf] %v684_v20  ;;  %687 = vst [vmem:[#allocation2 + $0x4f0] sm:$0xf] %v686_v21  ;;  %v688_v22 = vld [vmem:[%s21640_s6 + $0x4f8] sm:$0xf] }
  0xae   :  { %v690_v23 = vld [vmem:[%s21640_s6 + $0x4ec] sm:$0xf]  ;;  %689 = vst [vmem:[#allocation2 + $0x4f4] sm:$0xf] %v688_v22  ;;  %693 = vst [vmem:[#allocation2 + $0x4fc] sm:$0xff] %v692_v24   ;;  %v708_v31 = vld [vmem:[%s21640_s6 + $0x51c] sm:$0xff]  }
  0xaf   :  { %691 = vst [vmem:[#allocation2 + $0x4f8] sm:$0xf] %v690_v23  ;;  %v696_v25 = vld [vmem:[%s21640_s6 + $0x510] sm:$0xf]  ;;  %v698_v26 = vld [vmem:[%s21640_s6 + $0x504] sm:$0xf] }
  0xb0   :  { %v700_v27 = vld [vmem:[%s21640_s6 + $0x514] sm:$0xf]  ;;  %697 = vst [vmem:[#allocation2 + $0x504] sm:$0xf] %v696_v25  ;;  %699 = vst [vmem:[#allocation2 + $0x508] sm:$0xf] %v698_v26 }
  0xb1   :  { %701 = vst [vmem:[#allocation2 + $0x50c] sm:$0xf] %v700_v27  ;;  %v702_v28 = vld [vmem:[%s21640_s6 + $0x508] sm:$0xf]  ;;  %v704_v29 = vld [vmem:[%s21640_s6 + $0x518] sm:$0xf] }
  0xb2   :  { %v706_v30 = vld [vmem:[%s21640_s6 + $0x50c] sm:$0xf]  ;;  %703 = vst [vmem:[#allocation2 + $0x510] sm:$0xf] %v702_v28  ;;  %705 = vst [vmem:[#allocation2 + $0x514] sm:$0xf] %v704_v29 }
  0xb3   :  { %707 = vst [vmem:[#allocation2 + $0x518] sm:$0xf] %v706_v30  ;;  %v712_v32 = vld [vmem:[%s21640_s6 + $0x530] sm:$0xf]  ;;  %v714_v33 = vld [vmem:[%s21640_s6 + $0x524] sm:$0xf] }
  0xb4   :  { %709 = vst [vmem:[#allocation2 + $0x51c] sm:$0xff] %v708_v31   ;;  %713 = vst [vmem:[#allocation2 + $0x524] sm:$0xf] %v712_v32  ;;  %v716_v34 = vld [vmem:[%s21640_s6 + $0x534] sm:$0xf]  ;;  %v724_v38 = vld [vmem:[%s21640_s6 + $0x53c] sm:$0xff]  }
  0xb5   :  { %715 = vst [vmem:[#allocation2 + $0x528] sm:$0xf] %v714_v33  ;;  %v718_v35 = vld [vmem:[%s21640_s6 + $0x528] sm:$0xf]  ;;  %v720_v36 = vld [vmem:[%s21640_s6 + $0x538] sm:$0xf] }
  0xb6   :  { %717 = vst [vmem:[#allocation2 + $0x52c] sm:$0xf] %v716_v34  ;;  %719 = vst [vmem:[#allocation2 + $0x530] sm:$0xf] %v718_v35  ;;  %v722_v37 = vld [vmem:[%s21640_s6 + $0x52c] sm:$0xf] }
  0xb7   :  { %721 = vst [vmem:[#allocation2 + $0x534] sm:$0xf] %v720_v36  ;;  %v728_v39 = vld [vmem:[%s21640_s6 + $0x550] sm:$0xf]  ;;  %723 = vst [vmem:[#allocation2 + $0x538] sm:$0xf] %v722_v37 }
  0xb8   :  { %725 = vst [vmem:[#allocation2 + $0x53c] sm:$0xff] %v724_v38   ;;  %729 = vst [vmem:[#allocation2 + $0x544] sm:$0xf] %v728_v39  ;;  %v730_v40 = vld [vmem:[%s21640_s6 + $0x544] sm:$0xf]  ;;  %v740_v45 = vld [vmem:[%s21640_s6 + $0x55c] sm:$0xff]  }
  0xb9   :  { %v732_v41 = vld [vmem:[%s21640_s6 + $0x554] sm:$0xf]  ;;  %v734_v42 = vld [vmem:[%s21640_s6 + $0x548] sm:$0xf]  ;;  %731 = vst [vmem:[#allocation2 + $0x548] sm:$0xf] %v730_v40 }
  0xba   :  { %733 = vst [vmem:[#allocation2 + $0x54c] sm:$0xf] %v732_v41  ;;  %735 = vst [vmem:[#allocation2 + $0x550] sm:$0xf] %v734_v42  ;;  %v736_v43 = vld [vmem:[%s21640_s6 + $0x558] sm:$0xf] }
  0xbb   :  { %v738_v44 = vld [vmem:[%s21640_s6 + $0x54c] sm:$0xf]  ;;  %737 = vst [vmem:[#allocation2 + $0x554] sm:$0xf] %v736_v43  ;;  %741 = vst [vmem:[#allocation2 + $0x55c] sm:$0xff] %v740_v45   ;;  %v756_v52 = vld [vmem:[%s21640_s6 + $0x57c] sm:$0xff]  }
  0xbc   :  { %739 = vst [vmem:[#allocation2 + $0x558] sm:$0xf] %v738_v44  ;;  %v744_v46 = vld [vmem:[%s21640_s6 + $0x570] sm:$0xf]  ;;  %v746_v47 = vld [vmem:[%s21640_s6 + $0x564] sm:$0xf] }
  0xbd   :  { %v748_v48 = vld [vmem:[%s21640_s6 + $0x574] sm:$0xf]  ;;  %745 = vst [vmem:[#allocation2 + $0x564] sm:$0xf] %v744_v46  ;;  %747 = vst [vmem:[#allocation2 + $0x568] sm:$0xf] %v746_v47 }
  0xbe   :  { %749 = vst [vmem:[#allocation2 + $0x56c] sm:$0xf] %v748_v48  ;;  %v750_v49 = vld [vmem:[%s21640_s6 + $0x568] sm:$0xf]  ;;  %v752_v50 = vld [vmem:[%s21640_s6 + $0x578] sm:$0xf] }
  0xbf   :  { %v754_v51 = vld [vmem:[%s21640_s6 + $0x56c] sm:$0xf]  ;;  %751 = vst [vmem:[#allocation2 + $0x570] sm:$0xf] %v750_v49  ;;  %753 = vst [vmem:[#allocation2 + $0x574] sm:$0xf] %v752_v50 }
  0xc0   :  { %755 = vst [vmem:[#allocation2 + $0x578] sm:$0xf] %v754_v51  ;;  %v760_v53 = vld [vmem:[%s21640_s6 + $0x590] sm:$0xf]  ;;  %v762_v54 = vld [vmem:[%s21640_s6 + $0x584] sm:$0xf] }
  0xc1   :  { %757 = vst [vmem:[#allocation2 + $0x57c] sm:$0xff] %v756_v52   ;;  %761 = vst [vmem:[#allocation2 + $0x584] sm:$0xf] %v760_v53  ;;  %v764_v55 = vld [vmem:[%s21640_s6 + $0x594] sm:$0xf]  ;;  %v772_v59 = vld [vmem:[%s21640_s6 + $0x59c] sm:$0xff]  }
  0xc2   :  { %763 = vst [vmem:[#allocation2 + $0x588] sm:$0xf] %v762_v54  ;;  %v766_v56 = vld [vmem:[%s21640_s6 + $0x588] sm:$0xf]  ;;  %v768_v57 = vld [vmem:[%s21640_s6 + $0x598] sm:$0xf] }
  0xc3   :  { %765 = vst [vmem:[#allocation2 + $0x58c] sm:$0xf] %v764_v55  ;;  %767 = vst [vmem:[#allocation2 + $0x590] sm:$0xf] %v766_v56  ;;  %v770_v58 = vld [vmem:[%s21640_s6 + $0x58c] sm:$0xf] }
  0xc4   :  { %769 = vst [vmem:[#allocation2 + $0x594] sm:$0xf] %v768_v57  ;;  %v776_v60 = vld [vmem:[%s21640_s6 + $0x5b0] sm:$0xf]  ;;  %771 = vst [vmem:[#allocation2 + $0x598] sm:$0xf] %v770_v58 }
  0xc5   :  { %773 = vst [vmem:[#allocation2 + $0x59c] sm:$0xff] %v772_v59   ;;  %777 = vst [vmem:[#allocation2 + $0x5a4] sm:$0xf] %v776_v60  ;;  %v778_v61 = vld [vmem:[%s21640_s6 + $0x5a4] sm:$0xf]  ;;  %v788_v2 = vld [vmem:[%s21640_s6 + $0x5bc] sm:$0xff]  }
  0xc6   :  { %v780_v62 = vld [vmem:[%s21640_s6 + $0x5b4] sm:$0xf]  ;;  %v782_v63 = vld [vmem:[%s21640_s6 + $0x5a8] sm:$0xf]  ;;  %779 = vst [vmem:[#allocation2 + $0x5a8] sm:$0xf] %v778_v61 }
  0xc7   :  { %781 = vst [vmem:[#allocation2 + $0x5ac] sm:$0xf] %v780_v62  ;;  %783 = vst [vmem:[#allocation2 + $0x5b0] sm:$0xf] %v782_v63  ;;  %v784_v0 = vld [vmem:[%s21640_s6 + $0x5b8] sm:$0xf] }
  0xc8   :  { %v786_v1 = vld [vmem:[%s21640_s6 + $0x5ac] sm:$0xf]  ;;  %785 = vst [vmem:[#allocation2 + $0x5b4] sm:$0xf] %v784_v0  ;;  %789 = vst [vmem:[#allocation2 + $0x5bc] sm:$0xff] %v788_v2   ;;  %v804_v9 = vld [vmem:[%s21640_s6 + $0x5dc] sm:$0xff]  }
  0xc9   :  { %787 = vst [vmem:[#allocation2 + $0x5b8] sm:$0xf] %v786_v1  ;;  %v792_v3 = vld [vmem:[%s21640_s6 + $0x5d0] sm:$0xf]  ;;  %v794_v4 = vld [vmem:[%s21640_s6 + $0x5c4] sm:$0xf] }
  0xca   :  { %v796_v5 = vld [vmem:[%s21640_s6 + $0x5d4] sm:$0xf]  ;;  %793 = vst [vmem:[#allocation2 + $0x5c4] sm:$0xf] %v792_v3  ;;  %795 = vst [vmem:[#allocation2 + $0x5c8] sm:$0xf] %v794_v4 }
  0xcb   :  { %797 = vst [vmem:[#allocation2 + $0x5cc] sm:$0xf] %v796_v5  ;;  %v798_v6 = vld [vmem:[%s21640_s6 + $0x5c8] sm:$0xf]  ;;  %v800_v7 = vld [vmem:[%s21640_s6 + $0x5d8] sm:$0xf] }
  0xcc   :  { %v802_v8 = vld [vmem:[%s21640_s6 + $0x5cc] sm:$0xf]  ;;  %799 = vst [vmem:[#allocation2 + $0x5d0] sm:$0xf] %v798_v6  ;;  %801 = vst [vmem:[#allocation2 + $0x5d4] sm:$0xf] %v800_v7 }
  0xcd   :  { %803 = vst [vmem:[#allocation2 + $0x5d8] sm:$0xf] %v802_v8  ;;  %v808_v10 = vld [vmem:[%s21640_s6 + $0x5f0] sm:$0xf]  ;;  %v810_v11 = vld [vmem:[%s21640_s6 + $0x5e4] sm:$0xf] }
  0xce   :  { %805 = vst [vmem:[#allocation2 + $0x5dc] sm:$0xff] %v804_v9   ;;  %809 = vst [vmem:[#allocation2 + $0x5e4] sm:$0xf] %v808_v10  ;;  %v812_v12 = vld [vmem:[%s21640_s6 + $0x5f4] sm:$0xf]  ;;  %v820_v16 = vld [vmem:[%s21640_s6 + $0x5fc] sm:$0xff]  }
  0xcf   :  { %811 = vst [vmem:[#allocation2 + $0x5e8] sm:$0xf] %v810_v11  ;;  %v814_v13 = vld [vmem:[%s21640_s6 + $0x5e8] sm:$0xf]  ;;  %v816_v14 = vld [vmem:[%s21640_s6 + $0x5f8] sm:$0xf] }
  0xd0   :  { %813 = vst [vmem:[#allocation2 + $0x5ec] sm:$0xf] %v812_v12  ;;  %815 = vst [vmem:[#allocation2 + $0x5f0] sm:$0xf] %v814_v13  ;;  %v818_v15 = vld [vmem:[%s21640_s6 + $0x5ec] sm:$0xf] }
  0xd1   :  { %817 = vst [vmem:[#allocation2 + $0x5f4] sm:$0xf] %v816_v14  ;;  %v824_v17 = vld [vmem:[%s21640_s6 + $0x610] sm:$0xf]  ;;  %819 = vst [vmem:[#allocation2 + $0x5f8] sm:$0xf] %v818_v15 }
  0xd2   :  { %821 = vst [vmem:[#allocation2 + $0x5fc] sm:$0xff] %v820_v16   ;;  %825 = vst [vmem:[#allocation2 + $0x604] sm:$0xf] %v824_v17  ;;  %v826_v18 = vld [vmem:[%s21640_s6 + $0x604] sm:$0xf]  ;;  %v836_v23 = vld [vmem:[%s21640_s6 + $0x61c] sm:$0xff]  }
  0xd3   :  { %v828_v19 = vld [vmem:[%s21640_s6 + $0x614] sm:$0xf]  ;;  %v830_v20 = vld [vmem:[%s21640_s6 + $0x608] sm:$0xf]  ;;  %827 = vst [vmem:[#allocation2 + $0x608] sm:$0xf] %v826_v18 }
  0xd4   :  { %829 = vst [vmem:[#allocation2 + $0x60c] sm:$0xf] %v828_v19  ;;  %831 = vst [vmem:[#allocation2 + $0x610] sm:$0xf] %v830_v20  ;;  %v832_v21 = vld [vmem:[%s21640_s6 + $0x618] sm:$0xf] }
  0xd5   :  { %v834_v22 = vld [vmem:[%s21640_s6 + $0x60c] sm:$0xf]  ;;  %833 = vst [vmem:[#allocation2 + $0x614] sm:$0xf] %v832_v21  ;;  %837 = vst [vmem:[#allocation2 + $0x61c] sm:$0xff] %v836_v23   ;;  %v852_v30 = vld [vmem:[%s21640_s6 + $0x63c] sm:$0xff]  }
  0xd6   :  { %835 = vst [vmem:[#allocation2 + $0x618] sm:$0xf] %v834_v22  ;;  %v840_v24 = vld [vmem:[%s21640_s6 + $0x630] sm:$0xf]  ;;  %v842_v25 = vld [vmem:[%s21640_s6 + $0x624] sm:$0xf] }
  0xd7   :  { %v844_v26 = vld [vmem:[%s21640_s6 + $0x634] sm:$0xf]  ;;  %841 = vst [vmem:[#allocation2 + $0x624] sm:$0xf] %v840_v24  ;;  %843 = vst [vmem:[#allocation2 + $0x628] sm:$0xf] %v842_v25 }
  0xd8   :  { %845 = vst [vmem:[#allocation2 + $0x62c] sm:$0xf] %v844_v26  ;;  %v846_v27 = vld [vmem:[%s21640_s6 + $0x628] sm:$0xf]  ;;  %v848_v28 = vld [vmem:[%s21640_s6 + $0x638] sm:$0xf] }
  0xd9   :  { %v850_v29 = vld [vmem:[%s21640_s6 + $0x62c] sm:$0xf]  ;;  %847 = vst [vmem:[#allocation2 + $0x630] sm:$0xf] %v846_v27  ;;  %849 = vst [vmem:[#allocation2 + $0x634] sm:$0xf] %v848_v28 }
  0xda   :  { %851 = vst [vmem:[#allocation2 + $0x638] sm:$0xf] %v850_v29  ;;  %v856_v31 = vld [vmem:[%s21640_s6 + $0x650] sm:$0xf]  ;;  %v858_v32 = vld [vmem:[%s21640_s6 + $0x644] sm:$0xf] }
  0xdb   :  { %853 = vst [vmem:[#allocation2 + $0x63c] sm:$0xff] %v852_v30   ;;  %857 = vst [vmem:[#allocation2 + $0x644] sm:$0xf] %v856_v31  ;;  %v860_v33 = vld [vmem:[%s21640_s6 + $0x654] sm:$0xf]  ;;  %v868_v37 = vld [vmem:[%s21640_s6 + $0x65c] sm:$0xff]  }
  0xdc   :  { %859 = vst [vmem:[#allocation2 + $0x648] sm:$0xf] %v858_v32  ;;  %v862_v34 = vld [vmem:[%s21640_s6 + $0x648] sm:$0xf]  ;;  %v864_v35 = vld [vmem:[%s21640_s6 + $0x658] sm:$0xf] }
  0xdd   :  { %861 = vst [vmem:[#allocation2 + $0x64c] sm:$0xf] %v860_v33  ;;  %863 = vst [vmem:[#allocation2 + $0x650] sm:$0xf] %v862_v34  ;;  %v866_v36 = vld [vmem:[%s21640_s6 + $0x64c] sm:$0xf] }
  0xde   :  { %865 = vst [vmem:[#allocation2 + $0x654] sm:$0xf] %v864_v35  ;;  %v872_v38 = vld [vmem:[%s21640_s6 + $0x670] sm:$0xf]  ;;  %867 = vst [vmem:[#allocation2 + $0x658] sm:$0xf] %v866_v36 }
  0xdf   :  { %869 = vst [vmem:[#allocation2 + $0x65c] sm:$0xff] %v868_v37   ;;  %873 = vst [vmem:[#allocation2 + $0x664] sm:$0xf] %v872_v38  ;;  %v874_v39 = vld [vmem:[%s21640_s6 + $0x664] sm:$0xf]  ;;  %v884_v44 = vld [vmem:[%s21640_s6 + $0x67c] sm:$0xff]  }
  0xe0   :  { %v876_v40 = vld [vmem:[%s21640_s6 + $0x674] sm:$0xf]  ;;  %v878_v41 = vld [vmem:[%s21640_s6 + $0x668] sm:$0xf]  ;;  %875 = vst [vmem:[#allocation2 + $0x668] sm:$0xf] %v874_v39 }
  0xe1   :  { %877 = vst [vmem:[#allocation2 + $0x66c] sm:$0xf] %v876_v40  ;;  %879 = vst [vmem:[#allocation2 + $0x670] sm:$0xf] %v878_v41  ;;  %v880_v42 = vld [vmem:[%s21640_s6 + $0x678] sm:$0xf] }
  0xe2   :  { %v882_v43 = vld [vmem:[%s21640_s6 + $0x66c] sm:$0xf]  ;;  %881 = vst [vmem:[#allocation2 + $0x674] sm:$0xf] %v880_v42  ;;  %885 = vst [vmem:[#allocation2 + $0x67c] sm:$0xff] %v884_v44   ;;  %v900_v51 = vld [vmem:[%s21640_s6 + $0x69c] sm:$0xff]  }
  0xe3   :  { %883 = vst [vmem:[#allocation2 + $0x678] sm:$0xf] %v882_v43  ;;  %v888_v45 = vld [vmem:[%s21640_s6 + $0x690] sm:$0xf]  ;;  %v890_v46 = vld [vmem:[%s21640_s6 + $0x684] sm:$0xf] }
  0xe4   :  { %v892_v47 = vld [vmem:[%s21640_s6 + $0x694] sm:$0xf]  ;;  %889 = vst [vmem:[#allocation2 + $0x684] sm:$0xf] %v888_v45  ;;  %891 = vst [vmem:[#allocation2 + $0x688] sm:$0xf] %v890_v46 }
  0xe5   :  { %893 = vst [vmem:[#allocation2 + $0x68c] sm:$0xf] %v892_v47  ;;  %v894_v48 = vld [vmem:[%s21640_s6 + $0x688] sm:$0xf]  ;;  %v896_v49 = vld [vmem:[%s21640_s6 + $0x698] sm:$0xf] }
  0xe6   :  { %v898_v50 = vld [vmem:[%s21640_s6 + $0x68c] sm:$0xf]  ;;  %895 = vst [vmem:[#allocation2 + $0x690] sm:$0xf] %v894_v48  ;;  %897 = vst [vmem:[#allocation2 + $0x694] sm:$0xf] %v896_v49 }
  0xe7   :  { %899 = vst [vmem:[#allocation2 + $0x698] sm:$0xf] %v898_v50  ;;  %v904_v52 = vld [vmem:[%s21640_s6 + $0x6b0] sm:$0xf]  ;;  %v906_v53 = vld [vmem:[%s21640_s6 + $0x6a4] sm:$0xf] }
  0xe8   :  { %901 = vst [vmem:[#allocation2 + $0x69c] sm:$0xff] %v900_v51   ;;  %905 = vst [vmem:[#allocation2 + $0x6a4] sm:$0xf] %v904_v52  ;;  %v908_v54 = vld [vmem:[%s21640_s6 + $0x6b4] sm:$0xf]  ;;  %v916_v58 = vld [vmem:[%s21640_s6 + $0x6bc] sm:$0xff]  }
  0xe9   :  { %907 = vst [vmem:[#allocation2 + $0x6a8] sm:$0xf] %v906_v53  ;;  %v910_v55 = vld [vmem:[%s21640_s6 + $0x6a8] sm:$0xf]  ;;  %v912_v56 = vld [vmem:[%s21640_s6 + $0x6b8] sm:$0xf] }
  0xea   :  { %909 = vst [vmem:[#allocation2 + $0x6ac] sm:$0xf] %v908_v54  ;;  %911 = vst [vmem:[#allocation2 + $0x6b0] sm:$0xf] %v910_v55  ;;  %v914_v57 = vld [vmem:[%s21640_s6 + $0x6ac] sm:$0xf] }
  0xeb   :  { %913 = vst [vmem:[#allocation2 + $0x6b4] sm:$0xf] %v912_v56  ;;  %v920_v59 = vld [vmem:[%s21640_s6 + $0x6d0] sm:$0xf]  ;;  %915 = vst [vmem:[#allocation2 + $0x6b8] sm:$0xf] %v914_v57 }
  0xec   :  { %917 = vst [vmem:[#allocation2 + $0x6bc] sm:$0xff] %v916_v58   ;;  %921 = vst [vmem:[#allocation2 + $0x6c4] sm:$0xf] %v920_v59  ;;  %v922_v60 = vld [vmem:[%s21640_s6 + $0x6c4] sm:$0xf]  ;;  %v932_v1 = vld [vmem:[%s21640_s6 + $0x6dc] sm:$0xff]  }
  0xed   :  { %v924_v61 = vld [vmem:[%s21640_s6 + $0x6d4] sm:$0xf]  ;;  %v926_v62 = vld [vmem:[%s21640_s6 + $0x6c8] sm:$0xf]  ;;  %923 = vst [vmem:[#allocation2 + $0x6c8] sm:$0xf] %v922_v60 }
  0xee   :  { %925 = vst [vmem:[#allocation2 + $0x6cc] sm:$0xf] %v924_v61  ;;  %927 = vst [vmem:[#allocation2 + $0x6d0] sm:$0xf] %v926_v62  ;;  %v928_v63 = vld [vmem:[%s21640_s6 + $0x6d8] sm:$0xf] }
  0xef   :  { %v930_v0 = vld [vmem:[%s21640_s6 + $0x6cc] sm:$0xf]  ;;  %929 = vst [vmem:[#allocation2 + $0x6d4] sm:$0xf] %v928_v63  ;;  %933 = vst [vmem:[#allocation2 + $0x6dc] sm:$0xff] %v932_v1   ;;  %v948_v8 = vld [vmem:[%s21640_s6 + $0x6fc] sm:$0xff]  }
  0xf0   :  { %931 = vst [vmem:[#allocation2 + $0x6d8] sm:$0xf] %v930_v0  ;;  %v936_v2 = vld [vmem:[%s21640_s6 + $0x6f0] sm:$0xf]  ;;  %v938_v3 = vld [vmem:[%s21640_s6 + $0x6e4] sm:$0xf] }
  0xf1   :  { %v940_v4 = vld [vmem:[%s21640_s6 + $0x6f4] sm:$0xf]  ;;  %937 = vst [vmem:[#allocation2 + $0x6e4] sm:$0xf] %v936_v2  ;;  %939 = vst [vmem:[#allocation2 + $0x6e8] sm:$0xf] %v938_v3 }
  0xf2   :  { %941 = vst [vmem:[#allocation2 + $0x6ec] sm:$0xf] %v940_v4  ;;  %v942_v5 = vld [vmem:[%s21640_s6 + $0x6e8] sm:$0xf]  ;;  %v944_v6 = vld [vmem:[%s21640_s6 + $0x6f8] sm:$0xf] }
  0xf3   :  { %v946_v7 = vld [vmem:[%s21640_s6 + $0x6ec] sm:$0xf]  ;;  %943 = vst [vmem:[#allocation2 + $0x6f0] sm:$0xf] %v942_v5  ;;  %945 = vst [vmem:[#allocation2 + $0x6f4] sm:$0xf] %v944_v6 }
  0xf4   :  { %947 = vst [vmem:[#allocation2 + $0x6f8] sm:$0xf] %v946_v7  ;;  %v952_v9 = vld [vmem:[%s21640_s6 + $0x710] sm:$0xf]  ;;  %v954_v10 = vld [vmem:[%s21640_s6 + $0x704] sm:$0xf] }
  0xf5   :  { %949 = vst [vmem:[#allocation2 + $0x6fc] sm:$0xff] %v948_v8   ;;  %953 = vst [vmem:[#allocation2 + $0x704] sm:$0xf] %v952_v9  ;;  %v956_v11 = vld [vmem:[%s21640_s6 + $0x714] sm:$0xf]  ;;  %v964_v15 = vld [vmem:[%s21640_s6 + $0x71c] sm:$0xff]  }
  0xf6   :  { %955 = vst [vmem:[#allocation2 + $0x708] sm:$0xf] %v954_v10  ;;  %v958_v12 = vld [vmem:[%s21640_s6 + $0x708] sm:$0xf]  ;;  %v960_v13 = vld [vmem:[%s21640_s6 + $0x718] sm:$0xf] }
  0xf7   :  { %957 = vst [vmem:[#allocation2 + $0x70c] sm:$0xf] %v956_v11  ;;  %959 = vst [vmem:[#allocation2 + $0x710] sm:$0xf] %v958_v12  ;;  %v962_v14 = vld [vmem:[%s21640_s6 + $0x70c] sm:$0xf] }
  0xf8   :  { %961 = vst [vmem:[#allocation2 + $0x714] sm:$0xf] %v960_v13  ;;  %v968_v16 = vld [vmem:[%s21640_s6 + $0x730] sm:$0xf]  ;;  %963 = vst [vmem:[#allocation2 + $0x718] sm:$0xf] %v962_v14 }
  0xf9   :  { %965 = vst [vmem:[#allocation2 + $0x71c] sm:$0xff] %v964_v15   ;;  %969 = vst [vmem:[#allocation2 + $0x724] sm:$0xf] %v968_v16  ;;  %v970_v17 = vld [vmem:[%s21640_s6 + $0x724] sm:$0xf]  ;;  %v980_v22 = vld [vmem:[%s21640_s6 + $0x73c] sm:$0xff]  }
  0xfa   :  { %v972_v18 = vld [vmem:[%s21640_s6 + $0x734] sm:$0xf]  ;;  %v974_v19 = vld [vmem:[%s21640_s6 + $0x728] sm:$0xf]  ;;  %971 = vst [vmem:[#allocation2 + $0x728] sm:$0xf] %v970_v17 }
  0xfb   :  { %973 = vst [vmem:[#allocation2 + $0x72c] sm:$0xf] %v972_v18  ;;  %975 = vst [vmem:[#allocation2 + $0x730] sm:$0xf] %v974_v19  ;;  %v976_v20 = vld [vmem:[%s21640_s6 + $0x738] sm:$0xf] }
  0xfc   :  { %v978_v21 = vld [vmem:[%s21640_s6 + $0x72c] sm:$0xf]  ;;  %977 = vst [vmem:[#allocation2 + $0x734] sm:$0xf] %v976_v20  ;;  %981 = vst [vmem:[#allocation2 + $0x73c] sm:$0xff] %v980_v22   ;;  %v996_v29 = vld [vmem:[%s21640_s6 + $0x75c] sm:$0xff]  }
  0xfd   :  { %979 = vst [vmem:[#allocation2 + $0x738] sm:$0xf] %v978_v21  ;;  %v984_v23 = vld [vmem:[%s21640_s6 + $0x750] sm:$0xf]  ;;  %v986_v24 = vld [vmem:[%s21640_s6 + $0x744] sm:$0xf] }
  0xfe   :  { %v988_v25 = vld [vmem:[%s21640_s6 + $0x754] sm:$0xf]  ;;  %985 = vst [vmem:[#allocation2 + $0x744] sm:$0xf] %v984_v23  ;;  %987 = vst [vmem:[#allocation2 + $0x748] sm:$0xf] %v986_v24 }
  0xff   :  { %989 = vst [vmem:[#allocation2 + $0x74c] sm:$0xf] %v988_v25  ;;  %v990_v26 = vld [vmem:[%s21640_s6 + $0x748] sm:$0xf]  ;;  %v992_v27 = vld [vmem:[%s21640_s6 + $0x758] sm:$0xf] }
 0x100   :  { %v994_v28 = vld [vmem:[%s21640_s6 + $0x74c] sm:$0xf]  ;;  %991 = vst [vmem:[#allocation2 + $0x750] sm:$0xf] %v990_v26  ;;  %993 = vst [vmem:[#allocation2 + $0x754] sm:$0xf] %v992_v27 }
 0x101   :  { %995 = vst [vmem:[#allocation2 + $0x758] sm:$0xf] %v994_v28  ;;  %v1000_v30 = vld [vmem:[%s21640_s6 + $0x770] sm:$0xf]  ;;  %v1002_v31 = vld [vmem:[%s21640_s6 + $0x764] sm:$0xf] }
 0x102   :  { %997 = vst [vmem:[#allocation2 + $0x75c] sm:$0xff] %v996_v29   ;;  %1001 = vst [vmem:[#allocation2 + $0x764] sm:$0xf] %v1000_v30  ;;  %v1004_v32 = vld [vmem:[%s21640_s6 + $0x774] sm:$0xf]  ;;  %v1012_v36 = vld [vmem:[%s21640_s6 + $0x77c] sm:$0xff]  }
 0x103   :  { %1003 = vst [vmem:[#allocation2 + $0x768] sm:$0xf] %v1002_v31  ;;  %v1006_v33 = vld [vmem:[%s21640_s6 + $0x768] sm:$0xf]  ;;  %v1008_v34 = vld [vmem:[%s21640_s6 + $0x778] sm:$0xf] }
 0x104   :  { %1005 = vst [vmem:[#allocation2 + $0x76c] sm:$0xf] %v1004_v32  ;;  %1007 = vst [vmem:[#allocation2 + $0x770] sm:$0xf] %v1006_v33  ;;  %v1010_v35 = vld [vmem:[%s21640_s6 + $0x76c] sm:$0xf] }
 0x105   :  { %1009 = vst [vmem:[#allocation2 + $0x774] sm:$0xf] %v1008_v34  ;;  %v1016_v37 = vld [vmem:[%s21640_s6 + $0x790] sm:$0xf]  ;;  %1011 = vst [vmem:[#allocation2 + $0x778] sm:$0xf] %v1010_v35 }
 0x106   :  { %1013 = vst [vmem:[#allocation2 + $0x77c] sm:$0xff] %v1012_v36   ;;  %1017 = vst [vmem:[#allocation2 + $0x784] sm:$0xf] %v1016_v37  ;;  %v1018_v38 = vld [vmem:[%s21640_s6 + $0x784] sm:$0xf]  ;;  %v1028_v43 = vld [vmem:[%s21640_s6 + $0x79c] sm:$0xff]  }
 0x107   :  { %v1020_v39 = vld [vmem:[%s21640_s6 + $0x794] sm:$0xf]  ;;  %v1022_v40 = vld [vmem:[%s21640_s6 + $0x788] sm:$0xf]  ;;  %1019 = vst [vmem:[#allocation2 + $0x788] sm:$0xf] %v1018_v38 }
 0x108   :  { %1021 = vst [vmem:[#allocation2 + $0x78c] sm:$0xf] %v1020_v39  ;;  %1023 = vst [vmem:[#allocation2 + $0x790] sm:$0xf] %v1022_v40  ;;  %v1024_v41 = vld [vmem:[%s21640_s6 + $0x798] sm:$0xf] }
 0x109   :  { %v1026_v42 = vld [vmem:[%s21640_s6 + $0x78c] sm:$0xf]  ;;  %1025 = vst [vmem:[#allocation2 + $0x794] sm:$0xf] %v1024_v41  ;;  %1029 = vst [vmem:[#allocation2 + $0x79c] sm:$0xff] %v1028_v43   ;;  %v1044_v50 = vld [vmem:[%s21640_s6 + $0x7bc] sm:$0xff]  }
 0x10a   :  { %1027 = vst [vmem:[#allocation2 + $0x798] sm:$0xf] %v1026_v42  ;;  %v1032_v44 = vld [vmem:[%s21640_s6 + $0x7b0] sm:$0xf]  ;;  %v1034_v45 = vld [vmem:[%s21640_s6 + $0x7a4] sm:$0xf] }
 0x10b   :  { %v1036_v46 = vld [vmem:[%s21640_s6 + $0x7b4] sm:$0xf]  ;;  %1033 = vst [vmem:[#allocation2 + $0x7a4] sm:$0xf] %v1032_v44  ;;  %1035 = vst [vmem:[#allocation2 + $0x7a8] sm:$0xf] %v1034_v45 }
 0x10c   :  { %1037 = vst [vmem:[#allocation2 + $0x7ac] sm:$0xf] %v1036_v46  ;;  %v1038_v47 = vld [vmem:[%s21640_s6 + $0x7a8] sm:$0xf]  ;;  %v1040_v48 = vld [vmem:[%s21640_s6 + $0x7b8] sm:$0xf] }
 0x10d   :  { %v1042_v49 = vld [vmem:[%s21640_s6 + $0x7ac] sm:$0xf]  ;;  %1039 = vst [vmem:[#allocation2 + $0x7b0] sm:$0xf] %v1038_v47  ;;  %1041 = vst [vmem:[#allocation2 + $0x7b4] sm:$0xf] %v1040_v48 }
 0x10e   :  { %1043 = vst [vmem:[#allocation2 + $0x7b8] sm:$0xf] %v1042_v49  ;;  %v1048_v51 = vld [vmem:[%s21640_s6 + $0x7d0] sm:$0xf]  ;;  %v1050_v52 = vld [vmem:[%s21640_s6 + $0x7c4] sm:$0xf] }
 0x10f   :  { %1045 = vst [vmem:[#allocation2 + $0x7bc] sm:$0xff] %v1044_v50   ;;  %1049 = vst [vmem:[#allocation2 + $0x7c4] sm:$0xf] %v1048_v51  ;;  %v1052_v53 = vld [vmem:[%s21640_s6 + $0x7d4] sm:$0xf]  ;;  %v1060_v57 = vld [vmem:[%s21640_s6 + $0x7dc] sm:$0xff]  }
 0x110   :  { %1051 = vst [vmem:[#allocation2 + $0x7c8] sm:$0xf] %v1050_v52  ;;  %v1054_v54 = vld [vmem:[%s21640_s6 + $0x7c8] sm:$0xf]  ;;  %v1056_v55 = vld [vmem:[%s21640_s6 + $0x7d8] sm:$0xf] }
 0x111   :  { %1053 = vst [vmem:[#allocation2 + $0x7cc] sm:$0xf] %v1052_v53  ;;  %1055 = vst [vmem:[#allocation2 + $0x7d0] sm:$0xf] %v1054_v54  ;;  %v1058_v56 = vld [vmem:[%s21640_s6 + $0x7cc] sm:$0xf] }
 0x112   :  { %1057 = vst [vmem:[#allocation2 + $0x7d4] sm:$0xf] %v1056_v55  ;;  %v1064_v58 = vld [vmem:[%s21640_s6 + $0x7f0] sm:$0xf]  ;;  %1059 = vst [vmem:[#allocation2 + $0x7d8] sm:$0xf] %v1058_v56 }
 0x113   :  { %1061 = vst [vmem:[#allocation2 + $0x7dc] sm:$0xff] %v1060_v57   ;;  %1065 = vst [vmem:[#allocation2 + $0x7e4] sm:$0xf] %v1064_v58  ;;  %v1066_v59 = vld [vmem:[%s21640_s6 + $0x7e4] sm:$0xf] }
 0x114   :  { %v1068_v60 = vld [vmem:[%s21640_s6 + $0x7f4] sm:$0xf]  ;;  %v1070_v61 = vld [vmem:[%s21640_s6 + $0x7e8] sm:$0xf]  ;;  %1067 = vst [vmem:[#allocation2 + $0x7e8] sm:$0xf] %v1066_v59 }
 0x115   :  { %1069 = vst [vmem:[#allocation2 + $0x7ec] sm:$0xf] %v1068_v60  ;;  %1071 = vst [vmem:[#allocation2 + $0x7f0] sm:$0xf] %v1070_v61  ;;  %v1072_v62 = vld [vmem:[%s21640_s6 + $0x7f8] sm:$0xf] }
 0x116   :  { %v1074_v63 = vld [vmem:[%s21640_s6 + $0x7ec] sm:$0xf]  ;;  %v1076_v0 = vld [vmem:[%s21640_s6 + $0x7fc] sm:$0xf]  ;;  %1073 = vst [vmem:[#allocation2 + $0x7f4] sm:$0xf] %v1072_v62 }
 0x117   :  { %1075 = vst [vmem:[#allocation2 + $0x7f8] sm:$0xf] %v1074_v63  ;;  %1077 = vst [vmem:[#allocation2 + $0x7fc] sm:$0xf] %v1076_v0 }
 0x118   :  { %4213 = vsyncadd [#allocation5], 32768  ;;  %v4232_v1 = vld [vmem:[%s21642_s8] sm:$0xf]  ;;  %v4234_v2 = vld [vmem:[%s21642_s8 + $0x8] sm:$0xf] }
 0x119   :  { %4233 = vst [vmem:[#allocation3] sm:$0xf] %v4232_v1  ;;  %4235 = vst [vmem:[#allocation3 + $0x4] sm:$0xf] %v4234_v2  ;;  %v4236_v3 = vld [vmem:[%s21642_s8 + $0x4] sm:$0xf] }
 0x11a   :  { %v4238_v4 = vld [vmem:[%s21642_s8 + $0xc] sm:$0xff]   ;;  %v4242_v5 = vld [vmem:[%s21642_s8 + $0x18] sm:$0xf]  ;;  %4237 = vst [vmem:[#allocation3 + $0x8] sm:$0xf] %v4236_v3  ;;  %v4246_v7 = vld [vmem:[%s21642_s8 + $0x1c] sm:$0xff]  }
 0x11b   :  { %4239 = vst [vmem:[#allocation3 + $0xc] sm:$0xff] %v4238_v4   ;;  %4243 = vst [vmem:[#allocation3 + $0x14] sm:$0xf] %v4242_v5  ;;  %v4244_v6 = vld [vmem:[%s21642_s8 + $0x14] sm:$0xf]  ;;  %v4254_v10 = vld [vmem:[%s21642_s8 + $0x2c] sm:$0xff]  }
 0x11c   :  { %v4250_v8 = vld [vmem:[%s21642_s8 + $0x28] sm:$0xf]  ;;  %4245 = vst [vmem:[#allocation3 + $0x18] sm:$0xf] %v4244_v6  ;;  %4247 = vst [vmem:[#allocation3 + $0x1c] sm:$0xff] %v4246_v7   ;;  %v4262_v13 = vld [vmem:[%s21642_s8 + $0x3c] sm:$0xff]  }
 0x11d   :  { %4251 = vst [vmem:[#allocation3 + $0x24] sm:$0xf] %v4250_v8  ;;  %v4252_v9 = vld [vmem:[%s21642_s8 + $0x24] sm:$0xf]  ;;  %v4258_v11 = vld [vmem:[%s21642_s8 + $0x38] sm:$0xf] }
 0x11e   :  { %4253 = vst [vmem:[#allocation3 + $0x28] sm:$0xf] %v4252_v9  ;;  %4255 = vst [vmem:[#allocation3 + $0x2c] sm:$0xff] %v4254_v10   ;;  %v4260_v12 = vld [vmem:[%s21642_s8 + $0x34] sm:$0xf]  ;;  %v4270_v16 = vld [vmem:[%s21642_s8 + $0x4c] sm:$0xff]  }
 0x11f   :  { %4259 = vst [vmem:[#allocation3 + $0x34] sm:$0xf] %v4258_v11  ;;  %v4266_v14 = vld [vmem:[%s21642_s8 + $0x48] sm:$0xf]  ;;  %4261 = vst [vmem:[#allocation3 + $0x38] sm:$0xf] %v4260_v12 }
 0x120   :  { %4263 = vst [vmem:[#allocation3 + $0x3c] sm:$0xff] %v4262_v13   ;;  %4267 = vst [vmem:[#allocation3 + $0x44] sm:$0xf] %v4266_v14  ;;  %v4268_v15 = vld [vmem:[%s21642_s8 + $0x44] sm:$0xf]  ;;  %v4278_v19 = vld [vmem:[%s21642_s8 + $0x5c] sm:$0xff]  }
 0x121   :  { %v4274_v17 = vld [vmem:[%s21642_s8 + $0x58] sm:$0xf]  ;;  %4269 = vst [vmem:[#allocation3 + $0x48] sm:$0xf] %v4268_v15  ;;  %4271 = vst [vmem:[#allocation3 + $0x4c] sm:$0xff] %v4270_v16   ;;  %v4286_v22 = vld [vmem:[%s21642_s8 + $0x6c] sm:$0xff]  }
 0x122   :  { %4275 = vst [vmem:[#allocation3 + $0x54] sm:$0xf] %v4274_v17  ;;  %v4276_v18 = vld [vmem:[%s21642_s8 + $0x54] sm:$0xf]  ;;  %v4282_v20 = vld [vmem:[%s21642_s8 + $0x68] sm:$0xf] }
 0x123   :  { %4277 = vst [vmem:[#allocation3 + $0x58] sm:$0xf] %v4276_v18  ;;  %4279 = vst [vmem:[#allocation3 + $0x5c] sm:$0xff] %v4278_v19   ;;  %v4284_v21 = vld [vmem:[%s21642_s8 + $0x64] sm:$0xf]  ;;  %v4294_v25 = vld [vmem:[%s21642_s8 + $0x7c] sm:$0xff]  }
 0x124   :  { %4283 = vst [vmem:[#allocation3 + $0x64] sm:$0xf] %v4282_v20  ;;  %v4290_v23 = vld [vmem:[%s21642_s8 + $0x78] sm:$0xf]  ;;  %4285 = vst [vmem:[#allocation3 + $0x68] sm:$0xf] %v4284_v21 }
 0x125   :  { %4287 = vst [vmem:[#allocation3 + $0x6c] sm:$0xff] %v4286_v22   ;;  %4291 = vst [vmem:[#allocation3 + $0x74] sm:$0xf] %v4290_v23  ;;  %v4292_v24 = vld [vmem:[%s21642_s8 + $0x74] sm:$0xf]  ;;  %v4302_v28 = vld [vmem:[%s21642_s8 + $0x8c] sm:$0xff]  }
 0x126   :  { %v4298_v26 = vld [vmem:[%s21642_s8 + $0x88] sm:$0xf]  ;;  %4293 = vst [vmem:[#allocation3 + $0x78] sm:$0xf] %v4292_v24  ;;  %4295 = vst [vmem:[#allocation3 + $0x7c] sm:$0xff] %v4294_v25   ;;  %v4310_v31 = vld [vmem:[%s21642_s8 + $0x9c] sm:$0xff]  }
 0x127   :  { %4299 = vst [vmem:[#allocation3 + $0x84] sm:$0xf] %v4298_v26  ;;  %v4300_v27 = vld [vmem:[%s21642_s8 + $0x84] sm:$0xf]  ;;  %v4306_v29 = vld [vmem:[%s21642_s8 + $0x98] sm:$0xf] }
 0x128   :  { %4301 = vst [vmem:[#allocation3 + $0x88] sm:$0xf] %v4300_v27  ;;  %4303 = vst [vmem:[#allocation3 + $0x8c] sm:$0xff] %v4302_v28   ;;  %v4308_v30 = vld [vmem:[%s21642_s8 + $0x94] sm:$0xf]  ;;  %v4318_v34 = vld [vmem:[%s21642_s8 + $0xac] sm:$0xff]  }
 0x129   :  { %4307 = vst [vmem:[#allocation3 + $0x94] sm:$0xf] %v4306_v29  ;;  %v4314_v32 = vld [vmem:[%s21642_s8 + $0xa8] sm:$0xf]  ;;  %4309 = vst [vmem:[#allocation3 + $0x98] sm:$0xf] %v4308_v30 }
 0x12a   :  { %4311 = vst [vmem:[#allocation3 + $0x9c] sm:$0xff] %v4310_v31   ;;  %4315 = vst [vmem:[#allocation3 + $0xa4] sm:$0xf] %v4314_v32  ;;  %v4316_v33 = vld [vmem:[%s21642_s8 + $0xa4] sm:$0xf]  ;;  %v4326_v37 = vld [vmem:[%s21642_s8 + $0xbc] sm:$0xff]  }
 0x12b   :  { %v4322_v35 = vld [vmem:[%s21642_s8 + $0xb8] sm:$0xf]  ;;  %4317 = vst [vmem:[#allocation3 + $0xa8] sm:$0xf] %v4316_v33  ;;  %4319 = vst [vmem:[#allocation3 + $0xac] sm:$0xff] %v4318_v34   ;;  %v4334_v40 = vld [vmem:[%s21642_s8 + $0xcc] sm:$0xff]  }
 0x12c   :  { %4323 = vst [vmem:[#allocation3 + $0xb4] sm:$0xf] %v4322_v35  ;;  %v4324_v36 = vld [vmem:[%s21642_s8 + $0xb4] sm:$0xf]  ;;  %v4330_v38 = vld [vmem:[%s21642_s8 + $0xc8] sm:$0xf] }
 0x12d   :  { %4325 = vst [vmem:[#allocation3 + $0xb8] sm:$0xf] %v4324_v36  ;;  %4327 = vst [vmem:[#allocation3 + $0xbc] sm:$0xff] %v4326_v37   ;;  %v4332_v39 = vld [vmem:[%s21642_s8 + $0xc4] sm:$0xf]  ;;  %v4342_v43 = vld [vmem:[%s21642_s8 + $0xdc] sm:$0xff]  }
 0x12e   :  { %4331 = vst [vmem:[#allocation3 + $0xc4] sm:$0xf] %v4330_v38  ;;  %v4338_v41 = vld [vmem:[%s21642_s8 + $0xd8] sm:$0xf]  ;;  %4333 = vst [vmem:[#allocation3 + $0xc8] sm:$0xf] %v4332_v39 }
 0x12f   :  { %4335 = vst [vmem:[#allocation3 + $0xcc] sm:$0xff] %v4334_v40   ;;  %4339 = vst [vmem:[#allocation3 + $0xd4] sm:$0xf] %v4338_v41  ;;  %v4340_v42 = vld [vmem:[%s21642_s8 + $0xd4] sm:$0xf]  ;;  %v4350_v46 = vld [vmem:[%s21642_s8 + $0xec] sm:$0xff]  }
 0x130   :  { %v4346_v44 = vld [vmem:[%s21642_s8 + $0xe8] sm:$0xf]  ;;  %4341 = vst [vmem:[#allocation3 + $0xd8] sm:$0xf] %v4340_v42  ;;  %4343 = vst [vmem:[#allocation3 + $0xdc] sm:$0xff] %v4342_v43   ;;  %v4358_v49 = vld [vmem:[%s21642_s8 + $0xfc] sm:$0xff]  }
 0x131   :  { %4347 = vst [vmem:[#allocation3 + $0xe4] sm:$0xf] %v4346_v44  ;;  %v4348_v45 = vld [vmem:[%s21642_s8 + $0xe4] sm:$0xf]  ;;  %v4354_v47 = vld [vmem:[%s21642_s8 + $0xf8] sm:$0xf] }
 0x132   :  { %4349 = vst [vmem:[#allocation3 + $0xe8] sm:$0xf] %v4348_v45  ;;  %4351 = vst [vmem:[#allocation3 + $0xec] sm:$0xff] %v4350_v46   ;;  %v4356_v48 = vld [vmem:[%s21642_s8 + $0xf4] sm:$0xf]  ;;  %v4366_v52 = vld [vmem:[%s21642_s8 + $0x10c] sm:$0xff]  }
 0x133   :  { %4355 = vst [vmem:[#allocation3 + $0xf4] sm:$0xf] %v4354_v47  ;;  %v4362_v50 = vld [vmem:[%s21642_s8 + $0x108] sm:$0xf]  ;;  %4357 = vst [vmem:[#allocation3 + $0xf8] sm:$0xf] %v4356_v48 }
 0x134   :  { %4359 = vst [vmem:[#allocation3 + $0xfc] sm:$0xff] %v4358_v49   ;;  %4363 = vst [vmem:[#allocation3 + $0x104] sm:$0xf] %v4362_v50  ;;  %v4364_v51 = vld [vmem:[%s21642_s8 + $0x104] sm:$0xf]  ;;  %v4374_v55 = vld [vmem:[%s21642_s8 + $0x11c] sm:$0xff]  }
 0x135   :  { %v4370_v53 = vld [vmem:[%s21642_s8 + $0x118] sm:$0xf]  ;;  %4365 = vst [vmem:[#allocation3 + $0x108] sm:$0xf] %v4364_v51  ;;  %4367 = vst [vmem:[#allocation3 + $0x10c] sm:$0xff] %v4366_v52   ;;  %v4382_v58 = vld [vmem:[%s21642_s8 + $0x12c] sm:$0xff]  }
 0x136   :  { %4371 = vst [vmem:[#allocation3 + $0x114] sm:$0xf] %v4370_v53  ;;  %v4372_v54 = vld [vmem:[%s21642_s8 + $0x114] sm:$0xf]  ;;  %v4378_v56 = vld [vmem:[%s21642_s8 + $0x128] sm:$0xf] }
 0x137   :  { %4373 = vst [vmem:[#allocation3 + $0x118] sm:$0xf] %v4372_v54  ;;  %4375 = vst [vmem:[#allocation3 + $0x11c] sm:$0xff] %v4374_v55   ;;  %v4380_v57 = vld [vmem:[%s21642_s8 + $0x124] sm:$0xf]  ;;  %v4390_v61 = vld [vmem:[%s21642_s8 + $0x13c] sm:$0xff]  }
 0x138   :  { %4379 = vst [vmem:[#allocation3 + $0x124] sm:$0xf] %v4378_v56  ;;  %v4386_v59 = vld [vmem:[%s21642_s8 + $0x138] sm:$0xf]  ;;  %4381 = vst [vmem:[#allocation3 + $0x128] sm:$0xf] %v4380_v57 }
 0x139   :  { %4383 = vst [vmem:[#allocation3 + $0x12c] sm:$0xff] %v4382_v58   ;;  %4387 = vst [vmem:[#allocation3 + $0x134] sm:$0xf] %v4386_v59  ;;  %v4388_v60 = vld [vmem:[%s21642_s8 + $0x134] sm:$0xf]  ;;  %v4398_v0 = vld [vmem:[%s21642_s8 + $0x14c] sm:$0xff]  }
 0x13a   :  { %v4394_v62 = vld [vmem:[%s21642_s8 + $0x148] sm:$0xf]  ;;  %4389 = vst [vmem:[#allocation3 + $0x138] sm:$0xf] %v4388_v60  ;;  %4391 = vst [vmem:[#allocation3 + $0x13c] sm:$0xff] %v4390_v61   ;;  %v4406_v3 = vld [vmem:[%s21642_s8 + $0x15c] sm:$0xff]  }
 0x13b   :  { %4395 = vst [vmem:[#allocation3 + $0x144] sm:$0xf] %v4394_v62  ;;  %v4396_v63 = vld [vmem:[%s21642_s8 + $0x144] sm:$0xf]  ;;  %v4402_v1 = vld [vmem:[%s21642_s8 + $0x158] sm:$0xf] }
 0x13c   :  { %4397 = vst [vmem:[#allocation3 + $0x148] sm:$0xf] %v4396_v63  ;;  %4399 = vst [vmem:[#allocation3 + $0x14c] sm:$0xff] %v4398_v0   ;;  %v4404_v2 = vld [vmem:[%s21642_s8 + $0x154] sm:$0xf]  ;;  %v4414_v6 = vld [vmem:[%s21642_s8 + $0x16c] sm:$0xff]  }
 0x13d   :  { %4403 = vst [vmem:[#allocation3 + $0x154] sm:$0xf] %v4402_v1  ;;  %v4410_v4 = vld [vmem:[%s21642_s8 + $0x168] sm:$0xf]  ;;  %4405 = vst [vmem:[#allocation3 + $0x158] sm:$0xf] %v4404_v2 }
 0x13e   :  { %4407 = vst [vmem:[#allocation3 + $0x15c] sm:$0xff] %v4406_v3   ;;  %4411 = vst [vmem:[#allocation3 + $0x164] sm:$0xf] %v4410_v4  ;;  %v4412_v5 = vld [vmem:[%s21642_s8 + $0x164] sm:$0xf]  ;;  %v4422_v9 = vld [vmem:[%s21642_s8 + $0x17c] sm:$0xff]  }
 0x13f   :  { %v4418_v7 = vld [vmem:[%s21642_s8 + $0x178] sm:$0xf]  ;;  %4413 = vst [vmem:[#allocation3 + $0x168] sm:$0xf] %v4412_v5  ;;  %4415 = vst [vmem:[#allocation3 + $0x16c] sm:$0xff] %v4414_v6   ;;  %v4430_v12 = vld [vmem:[%s21642_s8 + $0x18c] sm:$0xff]  }
 0x140   :  { %4419 = vst [vmem:[#allocation3 + $0x174] sm:$0xf] %v4418_v7  ;;  %v4420_v8 = vld [vmem:[%s21642_s8 + $0x174] sm:$0xf]  ;;  %v4426_v10 = vld [vmem:[%s21642_s8 + $0x188] sm:$0xf] }
 0x141   :  { %4421 = vst [vmem:[#allocation3 + $0x178] sm:$0xf] %v4420_v8  ;;  %4423 = vst [vmem:[#allocation3 + $0x17c] sm:$0xff] %v4422_v9   ;;  %v4428_v11 = vld [vmem:[%s21642_s8 + $0x184] sm:$0xf]  ;;  %v4438_v15 = vld [vmem:[%s21642_s8 + $0x19c] sm:$0xff]  }
 0x142   :  { %4427 = vst [vmem:[#allocation3 + $0x184] sm:$0xf] %v4426_v10  ;;  %v4434_v13 = vld [vmem:[%s21642_s8 + $0x198] sm:$0xf]  ;;  %4429 = vst [vmem:[#allocation3 + $0x188] sm:$0xf] %v4428_v11 }
 0x143   :  { %4431 = vst [vmem:[#allocation3 + $0x18c] sm:$0xff] %v4430_v12   ;;  %4435 = vst [vmem:[#allocation3 + $0x194] sm:$0xf] %v4434_v13  ;;  %v4436_v14 = vld [vmem:[%s21642_s8 + $0x194] sm:$0xf]  ;;  %v4446_v18 = vld [vmem:[%s21642_s8 + $0x1ac] sm:$0xff]  }
 0x144   :  { %v4442_v16 = vld [vmem:[%s21642_s8 + $0x1a8] sm:$0xf]  ;;  %4437 = vst [vmem:[#allocation3 + $0x198] sm:$0xf] %v4436_v14  ;;  %4439 = vst [vmem:[#allocation3 + $0x19c] sm:$0xff] %v4438_v15   ;;  %v4454_v21 = vld [vmem:[%s21642_s8 + $0x1bc] sm:$0xff]  }
 0x145   :  { %4443 = vst [vmem:[#allocation3 + $0x1a4] sm:$0xf] %v4442_v16  ;;  %v4444_v17 = vld [vmem:[%s21642_s8 + $0x1a4] sm:$0xf]  ;;  %v4450_v19 = vld [vmem:[%s21642_s8 + $0x1b8] sm:$0xf] }
 0x146   :  { %4445 = vst [vmem:[#allocation3 + $0x1a8] sm:$0xf] %v4444_v17  ;;  %4447 = vst [vmem:[#allocation3 + $0x1ac] sm:$0xff] %v4446_v18   ;;  %v4452_v20 = vld [vmem:[%s21642_s8 + $0x1b4] sm:$0xf]  ;;  %v4462_v24 = vld [vmem:[%s21642_s8 + $0x1cc] sm:$0xff]  }
 0x147   :  { %4451 = vst [vmem:[#allocation3 + $0x1b4] sm:$0xf] %v4450_v19  ;;  %v4458_v22 = vld [vmem:[%s21642_s8 + $0x1c8] sm:$0xf]  ;;  %4453 = vst [vmem:[#allocation3 + $0x1b8] sm:$0xf] %v4452_v20 }
 0x148   :  { %4455 = vst [vmem:[#allocation3 + $0x1bc] sm:$0xff] %v4454_v21   ;;  %4459 = vst [vmem:[#allocation3 + $0x1c4] sm:$0xf] %v4458_v22  ;;  %v4460_v23 = vld [vmem:[%s21642_s8 + $0x1c4] sm:$0xf]  ;;  %v4470_v27 = vld [vmem:[%s21642_s8 + $0x1dc] sm:$0xff]  }
 0x149   :  { %v4466_v25 = vld [vmem:[%s21642_s8 + $0x1d8] sm:$0xf]  ;;  %4461 = vst [vmem:[#allocation3 + $0x1c8] sm:$0xf] %v4460_v23  ;;  %4463 = vst [vmem:[#allocation3 + $0x1cc] sm:$0xff] %v4462_v24   ;;  %v4478_v30 = vld [vmem:[%s21642_s8 + $0x1ec] sm:$0xff]  }
 0x14a   :  { %4467 = vst [vmem:[#allocation3 + $0x1d4] sm:$0xf] %v4466_v25  ;;  %v4468_v26 = vld [vmem:[%s21642_s8 + $0x1d4] sm:$0xf]  ;;  %v4474_v28 = vld [vmem:[%s21642_s8 + $0x1e8] sm:$0xf] }
 0x14b   :  { %4469 = vst [vmem:[#allocation3 + $0x1d8] sm:$0xf] %v4468_v26  ;;  %4471 = vst [vmem:[#allocation3 + $0x1dc] sm:$0xff] %v4470_v27   ;;  %v4476_v29 = vld [vmem:[%s21642_s8 + $0x1e4] sm:$0xf] }
 0x14c   :  { %4475 = vst [vmem:[#allocation3 + $0x1e4] sm:$0xf] %v4474_v28  ;;  %v4482_v31 = vld [vmem:[%s21642_s8 + $0x1f8] sm:$0xf]  ;;  %4477 = vst [vmem:[#allocation3 + $0x1e8] sm:$0xf] %v4476_v29 }
 0x14d   :  { %4479 = vst [vmem:[#allocation3 + $0x1ec] sm:$0xff] %v4478_v30   ;;  %4483 = vst [vmem:[#allocation3 + $0x1f4] sm:$0xf] %v4482_v31  ;;  %v4484_v32 = vld [vmem:[%s21642_s8 + $0x1f4] sm:$0xf] }
 0x14e   :  { %v4486_v33 = vld [vmem:[%s21642_s8 + $0x1fc] sm:$0xf]  ;;  %4485 = vst [vmem:[#allocation3 + $0x1f8] sm:$0xf] %v4484_v32 }
 0x14f   :  { %4487 = vst [vmem:[#allocation3 + $0x1fc] sm:$0xf] %v4486_v33 }
 0x150   :  { %4774 = vsyncadd [#allocation5 + $0x1], 8192  ;;  %v18051_v34 = vld [vmem:[%s21644_s10] sm:$0xff]  ;;  %v18056_v35 = vld [vmem:[%s21644_s10 + $0x8] sm:$0xff] }
 0x151   :  { %21759 = vst [vmem:[#allocation18_spill] sm:$0xff] %v18051_v34  ;;  %21760 = vst [vmem:[#allocation19_spill] sm:$0xff] %v18056_v35  ;;  %v18061_v36 = vld [vmem:[%s21644_s10 + $0x10] sm:$0xff]  ;;  %v18066_v37 = vld [vmem:[%s21644_s10 + $0x18] sm:$0xff] }
 0x152   :  { %21761 = vst [vmem:[#allocation20_spill] sm:$0xff] %v18061_v36  ;;  %21762 = vst [vmem:[#allocation21_spill] sm:$0xff] %v18066_v37  ;;  %v18071_v38 = vld [vmem:[%s21644_s10 + $0x20] sm:$0xff]  ;;  %v18076_v39 = vld [vmem:[%s21644_s10 + $0x28] sm:$0xff] }
 0x153   :  { %21763 = vst [vmem:[#allocation22_spill] sm:$0xff] %v18071_v38  ;;  %21764 = vst [vmem:[#allocation23_spill] sm:$0xff] %v18076_v39  ;;  %v18081_v40 = vld [vmem:[%s21644_s10 + $0x30] sm:$0xff]  ;;  %v18086_v41 = vld [vmem:[%s21644_s10 + $0x38] sm:$0xff] }
 0x154   :  { %21765 = vst [vmem:[#allocation24_spill] sm:$0xff] %v18081_v40  ;;  %21766 = vst [vmem:[#allocation25_spill] sm:$0xff] %v18086_v41  ;;  %v18091_v42 = vld [vmem:[%s21644_s10 + $0x40] sm:$0xff]  ;;  %v18096_v43 = vld [vmem:[%s21644_s10 + $0x48] sm:$0xff] }
 0x155   :  { %21767 = vst [vmem:[#allocation26_spill] sm:$0xff] %v18091_v42  ;;  %21768 = vst [vmem:[#allocation27_spill] sm:$0xff] %v18096_v43  ;;  %v18101_v44 = vld [vmem:[%s21644_s10 + $0x50] sm:$0xff]  ;;  %v18106_v45 = vld [vmem:[%s21644_s10 + $0x58] sm:$0xff] }
 0x156   :  { %21769 = vst [vmem:[#allocation28_spill] sm:$0xff] %v18101_v44  ;;  %21770 = vst [vmem:[#allocation29_spill] sm:$0xff] %v18106_v45  ;;  %v18111_v46 = vld [vmem:[%s21644_s10 + $0x60] sm:$0xff]  ;;  %v18116_v47 = vld [vmem:[%s21644_s10 + $0x68] sm:$0xff] }
 0x157   :  { %21771 = vst [vmem:[#allocation30_spill] sm:$0xff] %v18111_v46  ;;  %21772 = vst [vmem:[#allocation31_spill] sm:$0xff] %v18116_v47  ;;  %v18121_v48 = vld [vmem:[%s21644_s10 + $0x70] sm:$0xff]  ;;  %v18126_v49 = vld [vmem:[%s21644_s10 + $0x78] sm:$0xff] }
 0x158   :  { %21773 = vst [vmem:[#allocation32_spill] sm:$0xff] %v18121_v48  ;;  %21774 = vst [vmem:[#allocation33_spill] sm:$0xff] %v18126_v49  ;;  %v18131_v50 = vld [vmem:[%s21635_s1 + $0x10] sm:$0xff]  ;;  %v18136_v51 = vld [vmem:[%s21635_s1] sm:$0xff] }
 0x159   :  { %4847 = vsyncadd [#allocation5 + $0x2], 2048  ;;  %vm5191_vm0 = vcmask 1043456   ;;  %v21647_v52 = vmov 0   ;;  %v16132_v53 = vld [vmem:[%s21636_s2] sm:$0xff]   ;;  %vm5192_vm1 = vcmask 1044480  }
 0x15a   :  { %16085 = vset.pattern.permute.xlu1 %v21647_v52  ;;  %16084 = vset.pattern.permute.xlu0 %v21647_v52  ;;  %v18148_v54 = vld [vmem:[%s21635_s1 + $0x18] sm:$0xff]  ;;  %v18153_v55 = vld [vmem:[%s21635_s1 + $0x8] sm:$0xff]  ;;  %v16319_v57 = vmov 65535   ;;  %vm5094_vm2 = vcmask 203776   ;;  %v16134_v61 = vld [vmem:[%s21634_s0] sm:$0xff]   ;;  %vm5599_vm3 = vcmask 261120  }
 0x15b   :  { %5682 = vperm.xlu1 %16085, %v18131_v50   ;;  %5672 = vperm.xlu0 %16084, %v18136_v51   ;;  %v16133_v56 = vld [vmem:[%s21636_s2 + $0x8] sm:$0x1f]   ;;  %v5193_v58 = vsel %vm5191_vm0, 4294967295, %v16319_v57  ;;  %v18171_v63 = vld [vmem:[%s21635_s1 + $0x20] sm:$0xff]  ;;  %v16136_v1 = vld [vmem:[%s21634_s0 + $0x10] sm:$0xff]   ;;  %v21649_v2 = vmov 0.0  }
 0x15c   :  { %15099 = vmatprep.subr.bf16.mxu0 %v16132_v53  ;;  %v5194_v59 = vsel %vm5192_vm1, %v5193_v58, 0  ;;  %v18166_v62 = vld [vmem:[%s21635_s1 + $0x28] sm:$0xff]  ;;  %15103 = vmatprep.mubr.msk.bf16.mxu0 %vm5094_vm2, %v16134_v61  ;;  %5600 = vst.msk [vmem:[#allocation6] sm:$0xff] %vm5599_vm3, %v21649_v2  ;;  %5601 = vst.msk [vmem:[#allocation6 + $0x8] sm:$0xff] %vm5599_vm3, %v21649_v2  ;;  %v18229_v3 = vld [vmem:[%s21635_s1 + $0x38] sm:$0xff]  ;;  %v16321_v19 = vmov 1  }
 0x15d   :  { %15100 = vmatpush3.bf16.msra.mxu0 %v16132_v53  ;;  %v5196_v60 = vand.u32 %v16133_v56, %v5194_v59  ;;  %v16135_v0 = vld [vmem:[%s21634_s0 + $0x8] sm:$0xff]   ;;  %5602 = vst.msk [vmem:[#allocation6 + $0x10] sm:$0xff] %vm5599_vm3, %v21649_v2  ;;  %5603 = vst.msk [vmem:[#allocation6 + $0x18] sm:$0xff] %vm5599_vm3, %v21649_v2  ;;  %v18235_v4 = vld [vmem:[%s21635_s1 + $0x30] sm:$0xff]  ;;  %v16322_v28 = vmov 2   ;;  %v16323_v57 = vmov 3  }
 0x15e   :  { %5604 = vst.msk [vmem:[#allocation6 + $0x20] sm:$0xff] %vm5599_vm3, %v21649_v2  ;;  %5605 = vst.msk [vmem:[#allocation6 + $0x28] sm:$0xff] %vm5599_vm3, %v21649_v2  ;;  %v18241_v5 = vld [vmem:[%s21635_s1 + $0x48] sm:$0xff]  ;;  %v18248_v6 = vld [vmem:[%s21635_s1 + $0x40] sm:$0xff]  ;;  %v16326_v41 = vmov 6   ;;  %vm12046_vm4 = vcmask 523264  }
 0x15f   :  { %5687 = vperm.xlu1 %16085, %v18148_v54   ;;  %5677 = vperm.xlu0 %16084, %v18153_v55   ;;  %5606 = vst.msk [vmem:[#allocation6 + $0x30] sm:$0xff] %vm5599_vm3, %v21649_v2  ;;  %5607 = vst.msk [vmem:[#allocation6 + $0x38] sm:$0xff] %vm5599_vm3, %v21649_v2  ;;  %v16137_v7 = vld [vmem:[%s21634_s0 + $0x18] sm:$0xff]   ;;  %v16138_v8 = vld [vmem:[%s21634_s0 + $0x20] sm:$0xff]  }
 0x160   :  { %15101 = vmatprep.subr.bf16.mxu0 %v5196_v60  ;;  %5608 = vst.msk [vmem:[#allocation6 + $0x40] sm:$0xff] %vm5599_vm3, %v21649_v2  ;;  %5609 = vst.msk [vmem:[#allocation6 + $0x48] sm:$0xff] %vm5599_vm3, %v21649_v2  ;;  %v18261_v9 = vld [vmem:[%s21635_s1 + $0x58] sm:$0xff]  ;;  %v18267_v10 = vld [vmem:[%s21635_s1 + $0x50] sm:$0xff] }
 0x161   :  { %15102 = vmatpush3.bf16.msra.mxu0 %v5196_v60  ;;  %5610 = vst.msk [vmem:[#allocation6 + $0x50] sm:$0xff] %vm5599_vm3, %v21649_v2  ;;  %5611 = vst.msk [vmem:[#allocation6 + $0x58] sm:$0xff] %vm5599_vm3, %v21649_v2  ;;  %v18273_v11 = vld [vmem:[%s21635_s1 + $0x68] sm:$0xff]  ;;  %v18280_v12 = vld [vmem:[%s21635_s1 + $0x60] sm:$0xff] }
 0x162   :  { %5612 = vst.msk [vmem:[#allocation6 + $0x60] sm:$0xff] %vm5599_vm3, %v21649_v2  ;;  %5613 = vst.msk [vmem:[#allocation6 + $0x68] sm:$0xff] %vm5599_vm3, %v21649_v2  ;;  %v16139_v13 = vld [vmem:[%s21634_s0 + $0x28] sm:$0xff]   ;;  %v16140_v14 = vld [vmem:[%s21634_s0 + $0x30] sm:$0xff]  }
 0x163   :  { %5614 = vst.msk [vmem:[#allocation6 + $0x70] sm:$0xff] %vm5599_vm3, %v21649_v2  ;;  %5615 = vst.msk [vmem:[#allocation6 + $0x78] sm:$0xff] %vm5599_vm3, %v21649_v2  ;;  %5697 = vperm.xlu1 %16085, %v18166_v62   ;;  %5692 = vperm.xlu0 %16084, %v18171_v63   ;;  %v18293_v15 = vld [vmem:[%s21635_s1 + $0x78] sm:$0xff]  ;;  %v18299_v16 = vld [vmem:[%s21635_s1 + $0x70] sm:$0xff] }
 0x164   :  { %5616 = vst.msk [vmem:[#allocation6 + $0x80] sm:$0xff] %vm5599_vm3, %v21649_v2  ;;  %5617 = vst.msk [vmem:[#allocation6 + $0x88] sm:$0xff] %vm5599_vm3, %v21649_v2  ;;  %15104 = vmatmul.mubr.msk.bf16.vlgmr.msra.gmra.mrb[0].mxu0 %vm5094_vm2, %v16135_v0  ;;  %v16141_v17 = vld [vmem:[%s21634_s0 + $0x38] sm:$0xff]   ;;  %v16142_v18 = vld [vmem:[%s21634_s0 + $0x40] sm:$0xff]  }
 0x165   :  { %5618 = vst.msk [vmem:[#allocation6 + $0x90] sm:$0xff] %vm5599_vm3, %v21649_v2  ;;  %5619 = vst.msk [vmem:[#allocation6 + $0x98] sm:$0xff] %vm5599_vm3, %v21649_v2  ;;  %15107 = vmatprep.mubr.msk.bf16.mxu0 %vm5094_vm2, %v16136_v1  ;;  %v16143_v20 = vld [vmem:[%s21634_s0 + $0x48] sm:$0xff]   ;;  %v16144_v21 = vld [vmem:[%s21634_s0 + $0x50] sm:$0xff]  }
 0x166   :  { %5620 = vst.msk [vmem:[#allocation6 + $0xa0] sm:$0xff] %vm5599_vm3, %v21649_v2  ;;  %5621 = vst.msk [vmem:[#allocation6 + $0xa8] sm:$0xff] %vm5599_vm3, %v21649_v2  ;;  %v16145_v22 = vld [vmem:[%s21634_s0 + $0x58] sm:$0xff]   ;;  %v16146_v23 = vld [vmem:[%s21634_s0 + $0x60] sm:$0xff]  }
 0x167   :  { %5707 = vperm.xlu1 %16085, %v18229_v3   ;;  %5702 = vperm.xlu0 %16084, %v18235_v4   ;;  %v16147_v24 = vld [vmem:[%s21634_s0 + $0x68] sm:$0xff]   ;;  %v16148_v25 = vld [vmem:[%s21634_s0 + $0x70] sm:$0xff]   ;;  %v16149_v26 = vld [vmem:[%s21634_s0 + $0x78] sm:$0xff]  }
 0x168   :  { %v16150_v27 = vld [vmem:[%s21634_s0 + $0x80] sm:$0xff]   ;;  %v16151_v29 = vld [vmem:[%s21634_s0 + $0x88] sm:$0xff]   ;;  %v16152_v30 = vld [vmem:[%s21634_s0 + $0x90] sm:$0xff]  }
 0x169   :  { %v16153_v31 = vld [vmem:[%s21634_s0 + $0x98] sm:$0xff]   ;;  %v16154_v32 = vld [vmem:[%s21634_s0 + $0xa0] sm:$0xff]   ;;  %v16155_v33 = vld [vmem:[%s21634_s0 + $0xa8] sm:$0xff]  }
 0x16a   :  { %v16156_v53 = vld [vmem:[%s21634_s0 + $0xb0] sm:$0xff]   ;;  %v16157_v56 = vld [vmem:[%s21634_s0 + $0xb8] sm:$0xff]   ;;  %v16158_v58 = vld [vmem:[%s21634_s0 + $0xc0] sm:$0xff]  }
 0x16b   :  { %5717 = vperm.xlu1 %16085, %v18241_v5   ;;  %5712 = vperm.xlu0 %16084, %v18248_v6   ;;  %v16159_v59 = vld [vmem:[%s21634_s0 + $0xc8] sm:$0xff]   ;;  %v16160_v60 = vld [vmem:[%s21634_s0 + $0xd0] sm:$0xff]   ;;  %v16161_v61 = vld [vmem:[%s21634_s0 + $0xd8] sm:$0xff]  }
 0x16c   :  { %15108 = vmatmul.mubr.msk.bf16.gmra.mrb[4].mxu0 %vm5094_vm2, %v16137_v7  ;;  %v16162_v0 = vld [vmem:[%s21634_s0 + $0xe0] sm:$0xff]   ;;  %v16163_v1 = vld [vmem:[%s21634_s0 + $0xe8] sm:$0xff]   ;;  %v16164_v7 = vld [vmem:[%s21634_s0 + $0xf0] sm:$0xff]  }
 0x16d   :  { %15111 = vmatprep.mubr.msk.bf16.mxu0 %vm5094_vm2, %v16138_v8  ;;  %v16165_v8 = vld [vmem:[%s21634_s0 + $0xf8] sm:$0xff]   ;;  %v5779_v44 = vld [vmem:[#allocation6 + $0xf] sm:$0xff]  ;;  %v5778_v35 = vld [vmem:[#allocation6 + $0x7] sm:$0xff] }
 0x16f   :  { %5727 = vperm.xlu1 %16085, %v18261_v9   ;;  %5722 = vperm.xlu0 %16084, %v18267_v10  }
 0x173   :  { %5737 = vperm.xlu1 %16085, %v18273_v11   ;;  %5732 = vperm.xlu0 %16084, %v18280_v12  }
 0x174   :  { %15112 = vmatmul.mubr.msk.bf16.gmra.mrb[8].mxu0 %vm5094_vm2, %v16139_v13 }
 0x175   :  { %15115 = vmatprep.mubr.msk.bf16.mxu0 %vm5094_vm2, %v16140_v14 }
 0x177   :  { %5747 = vperm.xlu1 %16085, %v18293_v15   ;;  %5742 = vperm.xlu0 %16084, %v18299_v16  }
 0x17b   :  { %16087 = vset.pattern.permute.xlu1 %v16321_v19  ;;  %16086 = vset.pattern.permute.xlu0 %v16321_v19 }
 0x17c   :  { %5799 = vperm.xlu1 %16087, %v18153_v55   ;;  %5795 = vperm.xlu0 %16086, %v18136_v51  }
 0x17d   :  { %15116 = vmatmul.mubr.msk.bf16.gmra.mrb[12].mxu0 %vm5094_vm2, %v16141_v17  ;;  %v16324_v17 = vmov 4  }
 0x17e   :  { %15119 = vmatprep.mubr.msk.bf16.mxu0 %vm5094_vm2, %v16142_v18 }
 0x180   :  { %5803 = vperm.xlu1 %16087, %v18131_v50   ;;  %5807 = vperm.xlu0 %16086, %v18148_v54  }
 0x184   :  { %5811 = vperm.xlu1 %16087, %v18171_v63   ;;  %5815 = vperm.xlu0 %16086, %v18166_v62  }
 0x185   :  { %15120 = vmatmul.mubr.msk.bf16.gmra.mrb[16].mxu0 %vm5094_vm2, %v16143_v20 }
 0x186   :  { %15123 = vmatprep.mubr.msk.bf16.mxu0 %vm5094_vm2, %v16144_v21 }
 0x188   :  { %5819 = vperm.xlu1 %16087, %v18235_v4   ;;  %5823 = vperm.xlu0 %16086, %v18229_v3  }
 0x18c   :  { %5827 = vperm.xlu1 %16087, %v18248_v6   ;;  %5831 = vperm.xlu0 %16086, %v18241_v5  }
 0x18d   :  { %15124 = vmatmul.mubr.msk.bf16.gmra.mrb[20].mxu0 %vm5094_vm2, %v16145_v22 }
 0x18e   :  { %15127 = vmatprep.mubr.msk.bf16.mxu0 %vm5094_vm2, %v16146_v23 }
 0x190   :  { %5835 = vperm.xlu1 %16087, %v18267_v10   ;;  %5839 = vperm.xlu0 %16086, %v18261_v9  }
 0x194   :  { %5843 = vperm.xlu1 %16087, %v18280_v12   ;;  %5847 = vperm.xlu0 %16086, %v18273_v11  }
 0x195   :  { %15128 = vmatmul.mubr.msk.bf16.gmra.mrb[24].mxu0 %vm5094_vm2, %v16147_v24 }
 0x196   :  { %15131 = vmatprep.mubr.msk.bf16.mxu0 %vm5094_vm2, %v16148_v25 }
 0x198   :  { %5851 = vperm.xlu1 %16087, %v18299_v16   ;;  %5855 = vperm.xlu0 %16086, %v18293_v15  }
 0x19c   :  { %16088 = vset.pattern.permute.xlu1 %v16322_v28  ;;  %16089 = vset.pattern.permute.xlu0 %v16322_v28 }
 0x19d   :  { %15132 = vmatmul.mubr.msk.bf16.gmra.mrb[28].mxu0 %vm5094_vm2, %v16149_v26  ;;  %6170 = vperm.xlu1 %16088, %v18136_v51  }
 0x19e   :  { %6174 = vperm.xlu0 %16089, %v18153_v55   ;;  %15135 = vmatprep.mubr.msk.bf16.mxu0 %vm5094_vm2, %v16150_v27 }
 0x1a1   :  { %6178 = vperm.xlu1 %16088, %v18131_v50  }
 0x1a2   :  { %6186 = vperm.xlu0 %16089, %v18171_v63  }
 0x1a5   :  { %15136 = vmatmul.mubr.msk.bf16.gmra.mrb[32].mxu0 %vm5094_vm2, %v16151_v29  ;;  %6182 = vperm.xlu1 %16088, %v18148_v54  }
 0x1a6   :  { %6194 = vperm.xlu0 %16089, %v18235_v4   ;;  %15139 = vmatprep.mubr.msk.bf16.mxu0 %vm5094_vm2, %v16152_v30 }
 0x1a9   :  { %6190 = vperm.xlu1 %16088, %v18166_v62  }
 0x1aa   :  { %6202 = vperm.xlu0 %16089, %v18248_v6  }
 0x1ad   :  { %15140 = vmatmul.mubr.msk.bf16.gmra.mrb[36].mxu0 %vm5094_vm2, %v16153_v31  ;;  %6198 = vperm.xlu1 %16088, %v18229_v3  }
 0x1ae   :  { %6210 = vperm.xlu0 %16089, %v18267_v10   ;;  %15143 = vmatprep.mubr.msk.bf16.mxu0 %vm5094_vm2, %v16154_v32  ;;  %v16325_v32 = vmov 5  }
 0x1b1   :  { %6206 = vperm.xlu1 %16088, %v18241_v5  }
 0x1b2   :  { %6218 = vperm.xlu0 %16089, %v18280_v12  }
 0x1b5   :  { %15144 = vmatmul.mubr.msk.bf16.gmra.mrb[40].mxu0 %vm5094_vm2, %v16155_v33  ;;  %6214 = vperm.xlu1 %16088, %v18261_v9  }
 0x1b6   :  { %6226 = vperm.xlu0 %16089, %v18299_v16   ;;  %15147 = vmatprep.mubr.msk.bf16.mxu0 %vm5094_vm2, %v16156_v53 }
 0x1b9   :  { %6222 = vperm.xlu1 %16088, %v18273_v11  }
 0x1ba   :  { %16090 = vset.pattern.permute.xlu0 %v16323_v57 }
 0x1bb   :  { %6428 = vperm.xlu0 %16090, %v18136_v51  }
 0x1bd   :  { %15148 = vmatmul.mubr.msk.bf16.gmra.mrb[44].mxu0 %vm5094_vm2, %v16157_v56  ;;  %6230 = vperm.xlu1 %16088, %v18293_v15  }
 0x1be   :  { %15151 = vmatprep.mubr.msk.bf16.mxu0 %vm5094_vm2, %v16158_v58 }
 0x1bf   :  { %6440 = vperm.xlu0 %16090, %v18148_v54  }
 0x1c1   :  { %16091 = vset.pattern.permute.xlu1 %v16323_v57 }
 0x1c2   :  { %6432 = vperm.xlu1 %16091, %v18153_v55  }
 0x1c3   :  { %6448 = vperm.xlu0 %16090, %v18166_v62  }
 0x1c5   :  { %15152 = vmatmul.mubr.msk.bf16.gmra.mrb[48].mxu0 %vm5094_vm2, %v16159_v59 }
 0x1c6   :  { %6436 = vperm.xlu1 %16091, %v18131_v50   ;;  %15155 = vmatprep.mubr.msk.bf16.mxu0 %vm5094_vm2, %v16160_v60 }
 0x1c7   :  { %6456 = vperm.xlu0 %16090, %v18229_v3  }
 0x1ca   :  { %6444 = vperm.xlu1 %16091, %v18171_v63  }
 0x1cb   :  { %6464 = vperm.xlu0 %16090, %v18241_v5  }
 0x1cd   :  { %15156 = vmatmul.mubr.msk.bf16.gmra.mrb[52].mxu0 %vm5094_vm2, %v16161_v61 }
 0x1ce   :  { %6452 = vperm.xlu1 %16091, %v18235_v4   ;;  %15159 = vmatprep.mubr.msk.bf16.mxu0 %vm5094_vm2, %v16162_v0 }
 0x1cf   :  { %6472 = vperm.xlu0 %16090, %v18261_v9  }
 0x1d2   :  { %6460 = vperm.xlu1 %16091, %v18248_v6  }
 0x1d3   :  { %6480 = vperm.xlu0 %16090, %v18273_v11  }
 0x1d5   :  { %15160 = vmatmul.mubr.msk.bf16.gmra.mrb[56].mxu0 %vm5094_vm2, %v16163_v1 }
 0x1d6   :  { %6468 = vperm.xlu1 %16091, %v18267_v10   ;;  %15163 = vmatprep.mubr.msk.bf16.mxu0 %vm5094_vm2, %v16164_v7 }
 0x1d7   :  { %6488 = vperm.xlu0 %16090, %v18293_v15  }
 0x1da   :  { %6476 = vperm.xlu1 %16091, %v18280_v12   ;;  %v18450_v13 = vpop.permute.xlu1 %5682  ;;  %v18452_v14 = vpop.permute.xlu0 %5672 }
 0x1db   :  { %21775 = vst [vmem:[#allocation34_spill] sm:$0xff] %v18450_v13  ;;  %21776 = vst [vmem:[#allocation35_spill] sm:$0xff] %v18452_v14  ;;  %16093 = vset.pattern.permute.xlu0 %v16324_v17  ;;  %v18888_v13 = vld [vmem:[%s21635_s1 + $0x68] sm:$0xff] }
 0x1dc   :  { %6690 = vperm.xlu0 %16093, %v18153_v55   ;;  %21859 = vst [vmem:[#allocation117_spill] sm:$0xff] %v18888_v13 }
 0x1dd   :  { %15164 = vmatmul.mubr.msk.bf16.gmra.mrb[60].mxu0 %vm5094_vm2, %v16165_v8 }
 0x1de   :  { %6484 = vperm.xlu1 %16091, %v18299_v16   ;;  %v18457_v18 = vpop.permute.xlu1 %5687  ;;  %v18459_v19 = vpop.permute.xlu0 %5677 }
 0x1df   :  { %21777 = vst [vmem:[#allocation36_spill] sm:$0xff] %v18457_v18  ;;  %21778 = vst [vmem:[#allocation37_spill] sm:$0xff] %v18459_v19 }
 0x1e0   :  { %6702 = vperm.xlu0 %16093, %v18171_v63  }
 0x1e2   :  { %16092 = vset.pattern.permute.xlu1 %v16324_v17  ;;  %v18462_v20 = vpop.permute.xlu1 %5697  ;;  %v18464_v21 = vpop.permute.xlu0 %5692 }
 0x1e3   :  { %21779 = vst [vmem:[#allocation38_spill] sm:$0xff] %v18462_v20  ;;  %21780 = vst [vmem:[#allocation39_spill] sm:$0xff] %v18464_v21  ;;  %6686 = vperm.xlu1 %16092, %v18136_v51  }
 0x1e4   :  { %6710 = vperm.xlu0 %16093, %v18235_v4  }
 0x1e6   :  { %v18468_v22 = vpop.permute.xlu1 %5707  ;;  %v18470_v23 = vpop.permute.xlu0 %5702 }
 0x1e7   :  { %21781 = vst [vmem:[#allocation40_spill] sm:$0xff] %v18468_v22  ;;  %21782 = vst [vmem:[#allocation41_spill] sm:$0xff] %v18470_v23  ;;  %6694 = vperm.xlu1 %16092, %v18131_v50  }
 0x1e8   :  { %6718 = vperm.xlu0 %16093, %v18248_v6  }
 0x1ea   :  { %v18474_v24 = vpop.permute.xlu1 %5717  ;;  %v18476_v25 = vpop.permute.xlu0 %5712 }
 0x1eb   :  { %21783 = vst [vmem:[#allocation42_spill] sm:$0xff] %v18474_v24  ;;  %21784 = vst [vmem:[#allocation43_spill] sm:$0xff] %v18476_v25  ;;  %6698 = vperm.xlu1 %16092, %v18148_v54  }
 0x1ec   :  { %6726 = vperm.xlu0 %16093, %v18267_v10  }
 0x1ee   :  { %v18480_v26 = vpop.permute.xlu1 %5727  ;;  %v18482_v27 = vpop.permute.xlu0 %5722 }
 0x1ef   :  { %21785 = vst [vmem:[#allocation44_spill] sm:$0xff] %v18480_v26  ;;  %21786 = vst [vmem:[#allocation45_spill] sm:$0xff] %v18482_v27  ;;  %6706 = vperm.xlu1 %16092, %v18166_v62  }
 0x1f0   :  { %6734 = vperm.xlu0 %16093, %v18280_v12  }
 0x1f2   :  { %v18486_v28 = vpop.permute.xlu1 %5737  ;;  %v18488_v29 = vpop.permute.xlu0 %5732 }
 0x1f3   :  { %21787 = vst [vmem:[#allocation46_spill] sm:$0xff] %v18486_v28  ;;  %21788 = vst [vmem:[#allocation47_spill] sm:$0xff] %v18488_v29  ;;  %6714 = vperm.xlu1 %16092, %v18229_v3  }
 0x1f4   :  { %6742 = vperm.xlu0 %16093, %v18299_v16  }
 0x1f6   :  { %v18492_v30 = vpop.permute.xlu1 %5747  ;;  %v18494_v31 = vpop.permute.xlu0 %5742 }
 0x1f7   :  { %21789 = vst [vmem:[#allocation48_spill] sm:$0xff] %v18492_v30  ;;  %21790 = vst [vmem:[#allocation49_spill] sm:$0xff] %v18494_v31  ;;  %6722 = vperm.xlu1 %16092, %v18241_v5  }
 0x1f8   :  { %16094 = vset.pattern.permute.xlu0 %v16325_v32 }
 0x1f9   :  { %6944 = vperm.xlu0 %16094, %v18136_v51  }
 0x1fb   :  { %6730 = vperm.xlu1 %16092, %v18261_v9   ;;  %v5800_v33 = vpop.permute.xlu1 %5799  ;;  %v5796_v53 = vpop.permute.xlu0 %5795 }
 0x1fc   :  { %v5859_v34 = vmul.f32 %v5800_v33, %v5779_v44  ;;  %v5858_v42 = vmul.f32 %v5796_v53, %v5778_v35 }
 0x1fd   :  { %6956 = vperm.xlu0 %16094, %v18148_v54  }
 0x1ff   :  { %6738 = vperm.xlu1 %16092, %v18273_v11   ;;  %v18501_v56 = vpop.permute.xlu1 %5803  ;;  %v18503_v57 = vpop.permute.xlu0 %5807 }
 0x201   :  { %6964 = vperm.xlu0 %16094, %v18166_v62  }
 0x203   :  { %6746 = vperm.xlu1 %16092, %v18293_v15   ;;  %v18507_v58 = vpop.permute.xlu1 %5811  ;;  %v18509_v59 = vpop.permute.xlu0 %5815 }
 0x205   :  { %6972 = vperm.xlu0 %16094, %v18229_v3  }
 0x207   :  { %16095 = vset.pattern.permute.xlu1 %v16325_v32  ;;  %v18512_v60 = vpop.permute.xlu1 %5819  ;;  %v18514_v61 = vpop.permute.xlu0 %5823 }
 0x208   :  { %6948 = vperm.xlu1 %16095, %v18153_v55  }
 0x209   :  { %6980 = vperm.xlu0 %16094, %v18241_v5  }
 0x20b   :  { %v18518_v0 = vpop.permute.xlu1 %5827  ;;  %v18520_v1 = vpop.permute.xlu0 %5831 }
 0x20c   :  { %6952 = vperm.xlu1 %16095, %v18131_v50  }
 0x20d   :  { %6988 = vperm.xlu0 %16094, %v18261_v9  }
 0x20f   :  { %v18524_v7 = vpop.permute.xlu1 %5835  ;;  %v18526_v8 = vpop.permute.xlu0 %5839 }
 0x210   :  { %21791 = vst [vmem:[#allocation50_spill] sm:$0xff] %v18524_v7  ;;  %21792 = vst [vmem:[#allocation51_spill] sm:$0xff] %v18526_v8  ;;  %6960 = vperm.xlu1 %16095, %v18171_v63  }
 0x211   :  { %6996 = vperm.xlu0 %16094, %v18273_v11  }
 0x213   :  { %v18530_v17 = vpop.permute.xlu1 %5843  ;;  %v18532_v32 = vpop.permute.xlu0 %5847 }
 0x214   :  { %21793 = vst [vmem:[#allocation52_spill] sm:$0xff] %v18530_v17  ;;  %21794 = vst [vmem:[#allocation53_spill] sm:$0xff] %v18532_v32  ;;  %6968 = vperm.xlu1 %16095, %v18235_v4  }
 0x215   :  { %7004 = vperm.xlu0 %16094, %v18293_v15  }
 0x217   :  { %v18536_v52 = vpop.permute.xlu1 %5851  ;;  %v18538_v2 = vpop.permute.xlu0 %5855 }
 0x218   :  { %21795 = vst [vmem:[#allocation54_spill] sm:$0xff] %v18536_v52  ;;  %21796 = vst [vmem:[#allocation55_spill] sm:$0xff] %v18538_v2  ;;  %6976 = vperm.xlu1 %16095, %v18248_v6  }
 0x219   :  { %16097 = vset.pattern.permute.xlu0 %v16326_v41 }
 0x21a   :  { %7206 = vperm.xlu0 %16097, %v18153_v55  }
 0x21c   :  { %6984 = vperm.xlu1 %16095, %v18267_v10   ;;  %v18543_v49 = vpop.permute.xlu1 %6170 }
 0x21d   :  { %21797 = vst [vmem:[#allocation56_spill] sm:$0xff] %v18543_v49  ;;  %v18545_v40 = vpop.permute.xlu0 %6174 }
 0x21e   :  { %21798 = vst [vmem:[#allocation57_spill] sm:$0xff] %v18545_v40  ;;  %7218 = vperm.xlu0 %16097, %v18171_v63  }
 0x220   :  { %6992 = vperm.xlu1 %16095, %v18280_v12   ;;  %v18549_v48 = vpop.permute.xlu1 %6178 }
 0x221   :  { %21799 = vst [vmem:[#allocation58_spill] sm:$0xff] %v18549_v48  ;;  %v18551_v39 = vpop.permute.xlu0 %6186 }
 0x222   :  { %21800 = vst [vmem:[#allocation59_spill] sm:$0xff] %v18551_v39  ;;  %7226 = vperm.xlu0 %16097, %v18235_v4  }
 0x224   :  { %7000 = vperm.xlu1 %16095, %v18299_v16   ;;  %v18555_v47 = vpop.permute.xlu1 %6182 }
 0x225   :  { %21801 = vst [vmem:[#allocation60_spill] sm:$0xff] %v18555_v47  ;;  %v18557_v38 = vpop.permute.xlu0 %6194 }
 0x226   :  { %21802 = vst [vmem:[#allocation61_spill] sm:$0xff] %v18557_v38  ;;  %7234 = vperm.xlu0 %16097, %v18248_v6   ;;  %v5874_v38 = vpack.c.bf16 %v5859_v34, %v5858_v42  ;;  %v16167_v34 = vld [vmem:[%s21638_s4 + $0x18] sm:$0xff]  }
 0x228   :  { %16096 = vset.pattern.permute.xlu1 %v16326_v41  ;;  %v18560_v46 = vpop.permute.xlu1 %6190  ;;  %v16166_v41 = vld [vmem:[%s21638_s4 + $0x10] sm:$0xff]   ;;  %15171 = vmatprep.mubr.msk.bf16.mxu1 %vm5599_vm3, %v5874_v38 }
 0x229   :  { %21803 = vst [vmem:[#allocation62_spill] sm:$0xff] %v18560_v46  ;;  %7202 = vperm.xlu1 %16096, %v18136_v51   ;;  %v18563_v37 = vpop.permute.xlu0 %6202  ;;  %15167 = vmatprep.subr.bf16.mxu1 %v16166_v41  ;;  %v21651_v46 = vmov 8  }
 0x22a   :  { %21804 = vst [vmem:[#allocation63_spill] sm:$0xff] %v18563_v37  ;;  %7242 = vperm.xlu0 %16097, %v18267_v10   ;;  %15168 = vmatpush3.bf16.msra.mxu1 %v16166_v41 }
 0x22b   :  { %15169 = vmatprep.subr.bf16.mxu1 %v16167_v34 }
 0x22c   :  { %v18566_v45 = vpop.permute.xlu1 %6198 }
 0x22d   :  { %21805 = vst [vmem:[#allocation64_spill] sm:$0xff] %v18566_v45  ;;  %7210 = vperm.xlu1 %16096, %v18131_v50   ;;  %v18569_v36 = vpop.permute.xlu0 %6210  ;;  %v16327_v45 = vmov 7  }
 0x22e   :  { %21806 = vst [vmem:[#allocation65_spill] sm:$0xff] %v18569_v36  ;;  %7250 = vperm.xlu0 %16097, %v18280_v12   ;;  %15170 = vmatpush3.bf16.msra.mxu1 %v16167_v34 }
 0x230   :  { %v18575_v43 = vpop.permute.xlu1 %6206 }
 0x231   :  { %21807 = vst [vmem:[#allocation66_spill] sm:$0xff] %v18575_v43  ;;  %7214 = vperm.xlu1 %16096, %v18148_v54   ;;  %v18578_v37 = vpop.permute.xlu0 %6218 }
 0x232   :  { %21808 = vst [vmem:[#allocation67_spill] sm:$0xff] %v18578_v37  ;;  %7258 = vperm.xlu0 %16097, %v18299_v16  }
 0x234   :  { %v18581_v50 = vpop.permute.xlu1 %6214 }
 0x235   :  { %21809 = vst [vmem:[#allocation68_spill] sm:$0xff] %v18581_v50  ;;  %7222 = vperm.xlu1 %16096, %v18166_v62   ;;  %v18584_v36 = vpop.permute.xlu0 %6226 }
 0x236   :  { %21810 = vst [vmem:[#allocation69_spill] sm:$0xff] %v18584_v36  ;;  %16098 = vset.pattern.permute.xlu0 %v16327_v45 }
 0x237   :  { %7460 = vperm.xlu0 %16098, %v18136_v51   ;;  %v15105_v44 = vpop.f32.mrb[0].mxu0 }
 0x238   :  { %v5232_v35 = vpop.f32.mrb[1].mxu0  ;;  %v18588_v33 = vpop.permute.xlu1 %6222 }
 0x239   :  { %21811 = vst [vmem:[#allocation70_spill] sm:$0xff] %v18588_v33  ;;  %7230 = vperm.xlu1 %16096, %v18229_v3   ;;  %v15106_v53 = vpop.f32.mrb[2].mxu0 }
 0x23a   :  { %v5235_v41 = vpop.f32.mrb[3].mxu0  ;;  %v18591_v37 = vpop.permute.xlu0 %6428 }
 0x23b   :  { %21812 = vst [vmem:[#allocation71_spill] sm:$0xff] %v18591_v37  ;;  %7472 = vperm.xlu0 %16098, %v18148_v54  }
 0x23c   :  { %v18597_v42 = vpop.permute.xlu1 %6230 }
 0x23d   :  { %21813 = vst [vmem:[#allocation72_spill] sm:$0xff] %v18597_v42  ;;  %7238 = vperm.xlu1 %16096, %v18241_v5  }
 0x23e   :  { %v18600_v38 = vpop.permute.xlu0 %6440 }
 0x23f   :  { %21814 = vst [vmem:[#allocation73_spill] sm:$0xff] %v18600_v38  ;;  %7480 = vperm.xlu0 %16098, %v18166_v62   ;;  %v18603_v51 = vpop.f32.mrb[4].mxu0 }
 0x240   :  { %v18605_v36 = vpop.f32.mrb[5].mxu0 }
 0x241   :  { %7246 = vperm.xlu1 %16096, %v18261_v9   ;;  %v18608_v37 = vpop.f32.mrb[6].mxu0  ;;  %v18610_v33 = vpop.permute.xlu1 %6432 }
 0x242   :  { %21815 = vst [vmem:[#allocation74_spill] sm:$0xff] %v18610_v33  ;;  %v18612_v54 = vpop.f32.mrb[7].mxu0  ;;  %v18614_v42 = vpop.permute.xlu0 %6448 }
 0x243   :  { %21816 = vst [vmem:[#allocation75_spill] sm:$0xff] %v18614_v42  ;;  %7488 = vperm.xlu0 %16098, %v18229_v3  }
 0x245   :  { %7254 = vperm.xlu1 %16096, %v18273_v11   ;;  %v18618_v34 = vpop.permute.xlu1 %6436 }
 0x246   :  { %21817 = vst [vmem:[#allocation76_spill] sm:$0xff] %v18618_v34  ;;  %v18620_v62 = vpop.permute.xlu0 %6456  ;;  %v18646_v34 = vld [vmem:[%s21638_s4] sm:$0xff]  }
 0x247   :  { %21818 = vst [vmem:[#allocation77_spill] sm:$0xff] %v18620_v62  ;;  %7496 = vperm.xlu0 %16098, %v18241_v5   ;;  %v18623_v38 = vpop.f32.mrb[8].mxu0  ;;  %15187 = vmatprep.subr.bf16.mxu1 %v18646_v34 }
 0x248   :  { %v18625_v50 = vpop.f32.mrb[9].mxu0 }
 0x249   :  { %7262 = vperm.xlu1 %16096, %v18293_v15   ;;  %v18628_v33 = vpop.f32.mrb[10].mxu0  ;;  %v18630_v43 = vpop.permute.xlu1 %6444 }
 0x24a   :  { %21819 = vst [vmem:[#allocation78_spill] sm:$0xff] %v18630_v43  ;;  %v18632_v42 = vpop.f32.mrb[11].mxu0  ;;  %v18634_v3 = vpop.permute.xlu0 %6464 }
 0x24b   :  { %21820 = vst [vmem:[#allocation79_spill] sm:$0xff] %v18634_v3  ;;  %7504 = vperm.xlu0 %16098, %v18261_v9  }
 0x24d   :  { %16099 = vset.pattern.permute.xlu1 %v16327_v45  ;;  %v18637_v62 = vpop.permute.xlu1 %6452 }
 0x24e   :  { %21821 = vst [vmem:[#allocation80_spill] sm:$0xff] %v18637_v62  ;;  %7464 = vperm.xlu1 %16099, %v18153_v55   ;;  %v18640_v5 = vpop.permute.xlu0 %6472  ;;  %v18660_v55 = vld [vmem:[%s21635_s1 + $0x10] sm:$0xff] }
 0x24f   :  { %21822 = vst [vmem:[#allocation81_spill] sm:$0xff] %v18640_v5  ;;  %7512 = vperm.xlu0 %16098, %v18273_v11   ;;  %v18671_v5 = vld [vmem:[%s21637_s3] ss:$0 sm:$0xff] }
 0x250   :  { %v18648_v43 = vpop.f32.mrb[12].mxu0  ;;  %v5241_v48 = vadd.f32 %v15105_v44, %v18671_v5  ;;  %v5236_v44 = vadd.f32 %v18671_v5, %v5235_v41  ;;  %v18701_v41 = vld [vmem:[%s21635_s1 + $0x20] sm:$0xff] }
 0x251   :  { %v18650_v39 = vpop.f32.mrb[13].mxu0  ;;  %v18652_v3 = vpop.permute.xlu1 %6460 }
 0x252   :  { %21823 = vst [vmem:[#allocation82_spill] sm:$0xff] %v18652_v3  ;;  %v18655_v45 = vpop.f32.mrb[14].mxu0  ;;  %7468 = vperm.xlu1 %16099, %v18660_v55   ;;  %v18663_v9 = vpop.permute.xlu0 %6480  ;;  %v5489_v40 = vmax.f32 %v5241_v48, 0.0 }
 0x253   :  { %21824 = vst [vmem:[#allocation83_spill] sm:$0xff] %v18663_v9  ;;  %7520 = vperm.xlu0 %16098, %v18293_v15   ;;  %v18666_v11 = vpop.f32.mrb[15].mxu0  ;;  %v5233_v15 = vadd.f32 %v18671_v5, %v5232_v35  ;;  %v18684_v9 = vld [vmem:[%s21635_s1 + $0x8] sm:$0xff] }
 0x254   :  { %21827 = vst [vmem:[#allocation86_spill] sm:$0xff] %v18684_v9 }
 0x255   :  { %v18673_v3 = vpop.permute.xlu1 %6468 }
 0x256   :  { %21825 = vst [vmem:[#allocation84_spill] sm:$0xff] %v18673_v3  ;;  %7476 = vperm.xlu1 %16099, %v18171_v63   ;;  %v18676_v62 = vpop.permute.xlu0 %6488  ;;  %v5244_v3 = vadd.f32 %v15106_v53, %v18671_v5  ;;  %v5487_v53 = vmax.f32 %v5233_v15, 0.0 }
 0x257   :  { %21826 = vst [vmem:[#allocation85_spill] sm:$0xff] %v18676_v62  ;;  %16101 = vset.pattern.permute.xlu0 %v21651_v46 }
 0x258   :  { %7722 = vperm.xlu0 %16101, %v18684_v9   ;;  %v15121_v47 = vpop.f32.mrb[16].mxu0 }
 0x259   :  { %v5305_v63 = vadd.f32 %v15121_v47, %v18671_v5  ;;  %v5296_v62 = vpop.f32.mrb[17].mxu0  ;;  %v18689_v31 = vpop.permute.xlu1 %6476 }
 0x25a   :  { %21828 = vst [vmem:[#allocation87_spill] sm:$0xff] %v18689_v31  ;;  %v5297_v46 = vadd.f32 %v18671_v5, %v5296_v62  ;;  %v15122_v35 = vpop.f32.mrb[18].mxu0  ;;  %7484 = vperm.xlu1 %16099, %v18235_v4   ;;  %v5490_v62 = vmax.f32 %v5244_v3, 0.0 }
 0x25b   :  { %v5505_v49 = vmax.f32 %v5305_v63, 0.0  ;;  %v5308_v30 = vadd.f32 %v15122_v35, %v18671_v5  ;;  %v5299_v27 = vpop.f32.mrb[19].mxu0  ;;  %v18695_v29 = vpop.permute.xlu0 %6690  ;;  %v5488_v35 = vmax.f32 %v5236_v44, 0.0 }
 0x25c   :  { %21829 = vst [vmem:[#allocation88_spill] sm:$0xff] %v18695_v29  ;;  %v5503_v28 = vmax.f32 %v5297_v46, 0.0  ;;  %v5300_v47 = vadd.f32 %v18671_v5, %v5299_v27  ;;  %7734 = vperm.xlu0 %16101, %v18701_v41   ;;  %v5257_v46 = vadd.f32 %v18603_v51, %v18671_v5  ;;  %v5252_v51 = vadd.f32 %v18671_v5, %v18612_v54 }
 0x25d   :  { %v18704_v31 = vmax.f32 %v5489_v40, %v5505_v49  ;;  %v5506_v48 = vmax.f32 %v5308_v30, 0.0  ;;  %v18706_v63 = vpop.permute.xlu1 %6484  ;;  %v5249_v40 = vadd.f32 %v18671_v5, %v18605_v36 }
 0x25e   :  { %21830 = vst [vmem:[#allocation89_spill] sm:$0xff] %v18706_v63  ;;  %v18708_v26 = vmax.f32 %v5487_v53, %v5503_v28  ;;  %v5504_v15 = vmax.f32 %v5300_v47, 0.0  ;;  %7492 = vperm.xlu1 %16099, %v18248_v6   ;;  %v5260_v28 = vadd.f32 %v18608_v37, %v18671_v5  ;;  %v5492_v23 = vmax.f32 %v5252_v51, 0.0 }
 0x25f   :  { %v18713_v27 = vmax.f32 %v5490_v62, %v5506_v48  ;;  %v18715_v29 = vpop.permute.xlu0 %6702  ;;  %v5493_v62 = vmax.f32 %v5257_v46, 0.0  ;;  %v5491_v37 = vmax.f32 %v5249_v40, 0.0  ;;  %v5273_v40 = vadd.f32 %v18623_v38, %v18671_v5 }
 0x260   :  { %21831 = vst [vmem:[#allocation90_spill] sm:$0xff] %v18715_v29  ;;  %v18719_v49 = vmax.f32 %v5488_v35, %v5504_v15  ;;  %7742 = vperm.xlu0 %16101, %v18235_v4   ;;  %v15125_v30 = vpop.f32.mrb[20].mxu0  ;;  %v5494_v54 = vmax.f32 %v5260_v28, 0.0  ;;  %v5268_v38 = vadd.f32 %v18671_v5, %v18632_v42 }
 0x261   :  { %v5321_v3 = vadd.f32 %v15125_v30, %v18671_v5  ;;  %v5312_v44 = vpop.f32.mrb[21].mxu0 }
 0x262   :  { %v5313_v53 = vadd.f32 %v18671_v5, %v5312_v44  ;;  %v15126_v47 = vpop.f32.mrb[22].mxu0  ;;  %7500 = vperm.xlu1 %16099, %v18267_v10   ;;  %v18729_v36 = vpop.permute.xlu1 %6686 }
 0x263   :  { %21832 = vst [vmem:[#allocation91_spill] sm:$0xff] %v18729_v36  ;;  %v5509_v48 = vmax.f32 %v5321_v3, 0.0  ;;  %v5324_v4 = vadd.f32 %v15126_v47, %v18671_v5  ;;  %v5315_v35 = vpop.f32.mrb[23].mxu0  ;;  %v18732_v15 = vpop.permute.xlu0 %6710 }
 0x264   :  { %21833 = vst [vmem:[#allocation92_spill] sm:$0xff] %v18732_v15  ;;  %v5507_v30 = vmax.f32 %v5313_v53, 0.0  ;;  %v5316_v29 = vadd.f32 %v18671_v5, %v5315_v35  ;;  %7750 = vperm.xlu0 %16101, %v18248_v6   ;;  %v5265_v6 = vadd.f32 %v18671_v5, %v18625_v50 }
 0x265   :  { %v18736_v44 = vmax.f32 %v5493_v62, %v5509_v48  ;;  %v5510_v63 = vmax.f32 %v5324_v4, 0.0 }
 0x266   :  { %v18738_v25 = vmax.f32 %v5491_v37, %v5507_v30  ;;  %v5508_v46 = vmax.f32 %v5316_v29, 0.0  ;;  %7508 = vperm.xlu1 %16099, %v18280_v12   ;;  %v18741_v3 = vpop.permute.xlu1 %6694  ;;  %v5276_v29 = vadd.f32 %v18628_v33, %v18671_v5  ;;  %v5495_v33 = vmax.f32 %v5265_v6, 0.0 }
 0x267   :  { %21834 = vst [vmem:[#allocation93_spill] sm:$0xff] %v18741_v3  ;;  %v18745_v53 = vmax.f32 %v5494_v54, %v5510_v63  ;;  %v18747_v47 = vpop.permute.xlu0 %6718  ;;  %v5289_v6 = vadd.f32 %v18648_v43, %v18671_v5  ;;  %v5292_v43 = vadd.f32 %v18655_v45, %v18671_v5 }
 0x268   :  { %21835 = vst [vmem:[#allocation94_spill] sm:$0xff] %v18747_v47  ;;  %v18751_v28 = vmax.f32 %v5492_v23, %v5508_v46  ;;  %7758 = vperm.xlu0 %16101, %v18267_v10   ;;  %v15129_v51 = vpop.f32.mrb[24].mxu0  ;;  %v5497_v23 = vmax.f32 %v5273_v40, 0.0  ;;  %v5498_v42 = vmax.f32 %v5276_v29, 0.0  ;;  %v5496_v47 = vmax.f32 %v5268_v38, 0.0 }
 0x269   :  { %v5337_v62 = vadd.f32 %v15129_v51, %v18671_v5  ;;  %v5328_v48 = vpop.f32.mrb[25].mxu0  ;;  %v5281_v38 = vadd.f32 %v18671_v5, %v18650_v39  ;;  %v5501_v39 = vmax.f32 %v5289_v6, 0.0 }
 0x26a   :  { %v5329_v63 = vadd.f32 %v18671_v5, %v5328_v48  ;;  %v15130_v4 = vpop.f32.mrb[26].mxu0  ;;  %7516 = vperm.xlu1 %16099, %v18299_v16   ;;  %v18761_v50 = vpop.permute.xlu1 %6698 }
 0x26b   :  { %21836 = vst [vmem:[#allocation95_spill] sm:$0xff] %v18761_v50  ;;  %v5513_v35 = vmax.f32 %v5337_v62, 0.0  ;;  %v5340_v10 = vadd.f32 %v15130_v4, %v18671_v5  ;;  %v5331_v37 = vpop.f32.mrb[27].mxu0  ;;  %v18764_v30 = vpop.permute.xlu0 %6726  ;;  %v21838_v62 = vmov 8   ;;  %v5499_v45 = vmax.f32 %v5281_v38, 0.0  ;;  %v18817_v38 = vld [vmem:[%s21635_s1 + $0x18] sm:$0xff] }
 0x26c   :  { %21837 = vst [vmem:[#allocation96_spill] sm:$0xff] %v18764_v30  ;;  %v5511_v54 = vmax.f32 %v5329_v63, 0.0  ;;  %v5332_v46 = vadd.f32 %v18671_v5, %v5331_v37  ;;  %7766 = vperm.xlu0 %16101, %v18280_v12   ;;  %v18782_v12 = vld [vmem:[%s21635_s1] sm:$0xff] }
 0x26d   :  { %v18768_v51 = vmax.f32 %v5497_v23, %v5513_v35  ;;  %v5514_v48 = vmax.f32 %v5340_v10, 0.0  ;;  %21840 = vst [vmem:[#allocation98_spill] sm:$0xff] %v18782_v12 }
 0x26e   :  { %v18770_v15 = vmax.f32 %v5495_v33, %v5511_v54  ;;  %v5512_v40 = vmax.f32 %v5332_v46, 0.0  ;;  %16100 = vset.pattern.permute.xlu1 %v21838_v62  ;;  %v18773_v4 = vpop.permute.xlu1 %6706  ;;  %v5284_v33 = vadd.f32 %v18671_v5, %v18666_v11  ;;  %v5502_v11 = vmax.f32 %v5292_v43, 0.0 }
 0x26f   :  { %21839 = vst [vmem:[#allocation97_spill] sm:$0xff] %v18773_v4  ;;  %v18777_v63 = vmax.f32 %v5498_v42, %v5514_v48  ;;  %7718 = vperm.xlu1 %16100, %v18782_v12   ;;  %v18785_v29 = vpop.permute.xlu0 %6734 }
 0x270   :  { %21841 = vst [vmem:[#allocation99_spill] sm:$0xff] %v18785_v29  ;;  %v18789_v23 = vmax.f32 %v5496_v47, %v5512_v40  ;;  %7774 = vperm.xlu0 %16101, %v18299_v16   ;;  %v15133_v35 = vpop.f32.mrb[28].mxu0  ;;  %v16329_v29 = vmov 9   ;;  %v5500_v6 = vmax.f32 %v5284_v33, 0.0 }
 0x271   :  { %v5353_v10 = vadd.f32 %v15133_v35, %v18671_v5  ;;  %v5344_v37 = vpop.f32.mrb[29].mxu0 }
 0x272   :  { %v5345_v54 = vadd.f32 %v18671_v5, %v5344_v37  ;;  %v15134_v46 = vpop.f32.mrb[30].mxu0  ;;  %v18798_v42 = vpop.permute.xlu1 %6714 }
 0x273   :  { %21842 = vst [vmem:[#allocation100_spill] sm:$0xff] %v18798_v42  ;;  %v5517_v47 = vmax.f32 %v5353_v10, 0.0  ;;  %v5356_v48 = vadd.f32 %v15134_v46, %v18671_v5  ;;  %v5347_v16 = vpop.f32.mrb[31].mxu0  ;;  %7726 = vperm.xlu1 %16100, %v18660_v55   ;;  %v18802_v40 = vpop.permute.xlu0 %6742 }
 0x274   :  { %21843 = vst [vmem:[#allocation101_spill] sm:$0xff] %v18802_v40  ;;  %v5515_v62 = vmax.f32 %v5345_v54, 0.0  ;;  %v5348_v35 = vadd.f32 %v18671_v5, %v5347_v16  ;;  %16102 = vset.pattern.permute.xlu0 %v16329_v29  ;;  %v18830_v16 = vld [vmem:[%s21635_s1 + $0x28] sm:$0xff] }
 0x275   :  { %v18805_v37 = vmax.f32 %v5501_v39, %v5517_v47  ;;  %v5518_v30 = vmax.f32 %v5356_v48, 0.0  ;;  %7976 = vperm.xlu0 %16102, %v18782_v12  }
 0x276   :  { %v18808_v10 = vmax.f32 %v5499_v45, %v5515_v62  ;;  %v5516_v46 = vmax.f32 %v5348_v35, 0.0  ;;  %v18810_v42 = vpop.permute.xlu1 %6722  ;;  %v18841_v35 = vld [vmem:[%s21635_s1 + $0x38] sm:$0xff] }
 0x277   :  { %21844 = vst [vmem:[#allocation102_spill] sm:$0xff] %v18805_v37  ;;  %21846 = vst [vmem:[#allocation104_spill] sm:$0xff] %v18810_v42  ;;  %v18812_v4 = vmax.f32 %v5502_v11, %v5518_v30  ;;  %7730 = vperm.xlu1 %16100, %v18817_v38   ;;  %v18869_v42 = vld [vmem:[%s21635_s1 + $0x58] sm:$0xff] }
 0x278   :  { %21845 = vst [vmem:[#allocation103_spill] sm:$0xff] %v18808_v10  ;;  %v18820_v43 = vmax.f32 %v5500_v6, %v5516_v46  ;;  %v15137_v54 = vpop.f32.mrb[32].mxu0  ;;  %v18822_v39 = vpop.permute.xlu0 %6944  ;;  %21853 = vst [vmem:[#allocation111_spill] sm:$0xff] %v18841_v35 }
 0x279   :  { %21847 = vst [vmem:[#allocation105_spill] sm:$0xff] %v18812_v4  ;;  %21849 = vst [vmem:[#allocation107_spill] sm:$0xff] %v18822_v39  ;;  %7988 = vperm.xlu0 %16102, %v18817_v38   ;;  %v5360_v33 = vpop.f32.mrb[33].mxu0 }
 0x27a   :  { %21848 = vst [vmem:[#allocation106_spill] sm:$0xff] %v18820_v43  ;;  %v15138_v47 = vpop.f32.mrb[34].mxu0  ;;  %v18825_v48 = vpop.permute.xlu1 %6730  ;;  %21856 = vst [vmem:[#allocation114_spill] sm:$0xff] %v18869_v42  ;;  %v5361_v17 = vadd.f32 %v18671_v5, %v5360_v33 }
 0x27b   :  { %21850 = vst [vmem:[#allocation108_spill] sm:$0xff] %v18825_v48  ;;  %v5363_v30 = vpop.f32.mrb[35].mxu0  ;;  %7738 = vperm.xlu1 %16100, %v18830_v16  }
 0x27c   :  { %v18833_v45 = vpop.permute.xlu0 %6956 }
 0x27d   :  { %21851 = vst [vmem:[#allocation109_spill] sm:$0xff] %v18833_v45  ;;  %7996 = vperm.xlu0 %16102, %v18830_v16  }
 0x27e   :  { %v18836_v62 = vpop.permute.xlu1 %6738 }
 0x27f   :  { %21852 = vst [vmem:[#allocation110_spill] sm:$0xff] %v18836_v62  ;;  %7746 = vperm.xlu1 %16100, %v18841_v35   ;;  %v18860_v62 = vld [vmem:[%s21635_s1 + $0x48] sm:$0xff] }
 0x280   :  { %v18844_v11 = vpop.f32.mrb[36].mxu0  ;;  %v18846_v6 = vpop.permute.xlu0 %6964  ;;  %21855 = vst [vmem:[#allocation113_spill] sm:$0xff] %v18860_v62 }
 0x281   :  { %8004 = vperm.xlu0 %16102, %v18841_v35   ;;  %v18849_v46 = vpop.f32.mrb[37].mxu0 }
 0x282   :  { %v18851_v45 = vpop.f32.mrb[38].mxu0  ;;  %v18853_v39 = vpop.permute.xlu1 %6746 }
 0x283   :  { %21854 = vst [vmem:[#allocation112_spill] sm:$0xff] %v18853_v39  ;;  %v18855_v40 = vpop.f32.mrb[39].mxu0  ;;  %7754 = vperm.xlu1 %16100, %v18860_v62  }
 0x284   :  { %v18863_v48 = vpop.permute.xlu0 %6972 }
 0x285   :  { %8012 = vperm.xlu0 %16102, %v18860_v62  }
 0x287   :  { %7762 = vperm.xlu1 %16100, %v18869_v42   ;;  %v18872_v39 = vpop.permute.xlu1 %6948 }
 0x288   :  { %21857 = vst [vmem:[#allocation115_spill] sm:$0xff] %v18872_v39  ;;  %v18874_v3 = vpop.f32.mrb[40].mxu0  ;;  %v18876_v50 = vpop.permute.xlu0 %6980 }
 0x289   :  { %21858 = vst [vmem:[#allocation116_spill] sm:$0xff] %v18876_v50  ;;  %8020 = vperm.xlu0 %16102, %v18869_v42   ;;  %v18879_v36 = vpop.f32.mrb[41].mxu0  ;;  %v18899_v50 = vld [vmem:[%s21635_s1 + $0x78] sm:$0xff] }
 0x28a   :  { %v18881_v24 = vpop.f32.mrb[42].mxu0  ;;  %21862 = vst [vmem:[#allocation120_spill] sm:$0xff] %v18899_v50 }
 0x28b   :  { %v18883_v22 = vpop.f32.mrb[43].mxu0  ;;  %7770 = vperm.xlu1 %16100, %v18888_v13   ;;  %v18891_v39 = vpop.permute.xlu1 %6952 }
 0x28c   :  { %21860 = vst [vmem:[#allocation118_spill] sm:$0xff] %v18891_v39  ;;  %v18893_v21 = vpop.permute.xlu0 %6988 }
 0x28d   :  { %21861 = vst [vmem:[#allocation119_spill] sm:$0xff] %v18893_v21  ;;  %8028 = vperm.xlu0 %16102, %v18888_v13   ;;  %v21658_v13 = vmov 10  }
 0x28f   :  { %7778 = vperm.xlu1 %16100, %v18899_v50   ;;  %v18902_v20 = vpop.permute.xlu1 %6960 }
 0x290   :  { %v18904_v18 = vpop.f32.mrb[44].mxu0  ;;  %v18906_v52 = vpop.permute.xlu0 %6996 }
 0x291   :  { %21863 = vst [vmem:[#allocation121_spill] sm:$0xff] %v18906_v52  ;;  %8036 = vperm.xlu0 %16102, %v18899_v50   ;;  %v18909_v39 = vpop.f32.mrb[45].mxu0  ;;  %v5369_v52 = vadd.f32 %v15137_v54, %v18671_v5 }
 0x292   :  { %v18911_v21 = vpop.f32.mrb[46].mxu0 }
 0x293   :  { %v18913_v2 = vpop.f32.mrb[47].mxu0  ;;  %16103 = vset.pattern.permute.xlu1 %v16329_v29  ;;  %v18915_v19 = vpop.permute.xlu1 %6968  ;;  %v5372_v29 = vadd.f32 %v15138_v47, %v18671_v5  ;;  %v5519_v47 = vmax.f32 %v5361_v17, 0.0  ;;  %v5385_v17 = vadd.f32 %v18844_v11, %v18671_v5 }
 0x294   :  { %7980 = vperm.xlu1 %16103, %v18684_v9   ;;  %v18918_v14 = vpop.permute.xlu0 %7004 }
 0x295   :  { %21864 = vst [vmem:[#allocation122_spill] sm:$0xff] %v18918_v14  ;;  %16105 = vset.pattern.permute.xlu0 %v21658_v13  ;;  %v5364_v13 = vadd.f32 %v18671_v5, %v5363_v30 }
 0x296   :  { %8238 = vperm.xlu0 %16105, %v18684_v9  }
 0x297   :  { %v18923_v50 = vpop.permute.xlu1 %6976  ;;  %v5520_v35 = vmax.f32 %v5364_v13, 0.0  ;;  %v5377_v13 = vadd.f32 %v18671_v5, %v18849_v46  ;;  %v5380_v46 = vadd.f32 %v18671_v5, %v18855_v40 }
 0x298   :  { %21865 = vst [vmem:[#allocation123_spill] sm:$0xff] %v18923_v50  ;;  %v15153_v8 = vpop.f32.mrb[48].mxu0  ;;  %7984 = vperm.xlu1 %16103, %v18660_v55   ;;  %v5521_v50 = vmax.f32 %v5369_v52, 0.0 }
 0x299   :  { %v5433_v7 = vadd.f32 %v15153_v8, %v18671_v5  ;;  %v5424_v42 = vpop.f32.mrb[49].mxu0  ;;  %v18929_v14 = vpop.permute.xlu0 %7206 }
 0x29a   :  { %21866 = vst [vmem:[#allocation124_spill] sm:$0xff] %v18929_v14  ;;  %v5425_v9 = vadd.f32 %v18671_v5, %v5424_v42  ;;  %8250 = vperm.xlu0 %16105, %v18701_v41   ;;  %v15154_v54 = vpop.f32.mrb[50].mxu0  ;;  %v5522_v14 = vmax.f32 %v5372_v29, 0.0 }
 0x29b   :  { %v5537_v32 = vmax.f32 %v5433_v7, 0.0  ;;  %v5436_v33 = vadd.f32 %v15154_v54, %v18671_v5  ;;  %v5427_v62 = vpop.f32.mrb[51].mxu0  ;;  %v18935_v43 = vpop.permute.xlu1 %6984  ;;  %v18944_v7 = vld [vmem:[%s21635_s1 + $0x30] sm:$0xff]  ;;  %v5388_v54 = vadd.f32 %v18851_v45, %v18671_v5  ;;  %v18971_v45 = vld [vmem:[%s21635_s1 + $0x40] sm:$0xff] }
 0x29c   :  { %21867 = vst [vmem:[#allocation125_spill] sm:$0xff] %v18935_v43  ;;  %v5535_v4 = vmax.f32 %v5425_v9, 0.0  ;;  %v5428_v8 = vadd.f32 %v18671_v5, %v5427_v62  ;;  %7992 = vperm.xlu1 %16103, %v18701_v41  }
 0x29d   :  { %v5569_v30 = vmax.f32 %v5521_v50, %v5537_v32  ;;  %v5538_v10 = vmax.f32 %v5436_v33, 0.0  ;;  %v18939_v42 = vpop.permute.xlu0 %7218 }
 0x29e   :  { %v5567_v37 = vmax.f32 %v5519_v47, %v5535_v4  ;;  %v5536_v52 = vmax.f32 %v5428_v8, 0.0  ;;  %8258 = vperm.xlu0 %16105, %v18944_v7  }
 0x29f   :  { %v5585_v9 = vmax.f32 %v18704_v31, %v5569_v30  ;;  %v5570_v62 = vmax.f32 %v5522_v14, %v5538_v10  ;;  %v18950_v32 = vpop.permute.xlu1 %6992 }
 0x2a0   :  { %21868 = vst [vmem:[#allocation126_spill] sm:$0xff] %v18950_v32  ;;  %v5583_v50 = vmax.f32 %v18708_v26, %v5567_v37  ;;  %v5568_v4 = vmax.f32 %v5520_v35, %v5536_v52  ;;  %v15157_v29 = vpop.f32.mrb[52].mxu0  ;;  %8000 = vperm.xlu1 %16103, %v18944_v7   ;;  %v5525_v35 = vmax.f32 %v5385_v17, 0.0 }
 0x2a1   :  { %5624 = vst.msk [vmem:[#allocation6 + $0x28] sm:$0xff] %vm5599_vm3, %v5585_v9  ;;  %v5586_v11 = vmax.f32 %v18713_v27, %v5570_v62  ;;  %v5449_v14 = vadd.f32 %v15157_v29, %v18671_v5  ;;  %v5440_v31 = vpop.f32.mrb[53].mxu0  ;;  %v18961_v10 = vpop.permute.xlu0 %7226  ;;  %v5526_v9 = vmax.f32 %v5388_v54, 0.0 }
 0x2a2   :  { %5622 = vst.msk [vmem:[#allocation6 + $0x18] sm:$0xff] %vm5599_vm3, %v5583_v50  ;;  %v5584_v26 = vmax.f32 %v18719_v49, %v5568_v4  ;;  %v5441_v37 = vadd.f32 %v18671_v5, %v5440_v31  ;;  %8266 = vperm.xlu0 %16105, %v18971_v45   ;;  %v15158_v27 = vpop.f32.mrb[54].mxu0  ;;  %v5523_v49 = vmax.f32 %v5377_v13, 0.0  ;;  %v5524_v4 = vmax.f32 %v5380_v46, 0.0 }
 0x2a3   :  { %5625 = vst.msk [vmem:[#allocation6 + $0x30] sm:$0xff] %vm5599_vm3, %v5586_v11  ;;  %v5541_v33 = vmax.f32 %v5449_v14, 0.0  ;;  %v5452_v40 = vadd.f32 %v15158_v27, %v18671_v5  ;;  %v5443_v47 = vpop.f32.mrb[55].mxu0  ;;  %v18976_v8 = vpop.permute.xlu1 %7000  ;;  %v18986_v14 = vld [vmem:[%s21635_s1 + $0x50] sm:$0xff] }
 0x2a4   :  { %21869 = vst [vmem:[#allocation127_spill] sm:$0xff] %v18976_v8  ;;  %5623 = vst.msk [vmem:[#allocation6 + $0x20] sm:$0xff] %vm5599_vm3, %v5584_v26  ;;  %v5539_v30 = vmax.f32 %v5441_v37, 0.0  ;;  %v5444_v52 = vadd.f32 %v18671_v5, %v5443_v47  ;;  %8008 = vperm.xlu1 %16103, %v18971_v45   ;;  %v19006_v47 = vld [vmem:[%s21635_s1 + $0x60] sm:$0xff] }
 0x2a5   :  { %v5573_v62 = vmax.f32 %v5525_v35, %v5541_v33  ;;  %v5542_v50 = vmax.f32 %v5452_v40, 0.0  ;;  %v18981_v17 = vpop.permute.xlu0 %7234  ;;  %21870 = vst [vmem:[#allocation128_spill] sm:$0xff] %v18986_v14  ;;  %v5401_v40 = vadd.f32 %v18874_v3, %v18671_v5  ;;  %21872 = vst [vmem:[#allocation130_spill] sm:$0xff] %v19006_v47 }
 0x2a6   :  { %v5571_v29 = vmax.f32 %v5523_v49, %v5539_v30  ;;  %v5540_v11 = vmax.f32 %v5444_v52, 0.0  ;;  %8274 = vperm.xlu0 %16105, %v18986_v14   ;;  %v5393_v49 = vadd.f32 %v18671_v5, %v18879_v36 }
 0x2a7   :  { %v5589_v13 = vmax.f32 %v18736_v44, %v5573_v62  ;;  %v5574_v31 = vmax.f32 %v5526_v9, %v5542_v50  ;;  %v5529_v9 = vmax.f32 %v5401_v40, 0.0  ;;  %v19022_v50 = vld [vmem:[%s21635_s1 + $0x70] sm:$0xff] }
 0x2a8   :  { %v5587_v26 = vmax.f32 %v18738_v25, %v5571_v29  ;;  %v5572_v54 = vmax.f32 %v5524_v4, %v5540_v11  ;;  %v15161_v37 = vpop.f32.mrb[56].mxu0  ;;  %8016 = vperm.xlu1 %16103, %v18986_v14   ;;  %v18992_v27 = vpop.permute.xlu1 %7202  ;;  %21873 = vst [vmem:[#allocation131_spill] sm:$0xff] %v19022_v50  ;;  %v5527_v36 = vmax.f32 %v5393_v49, 0.0 }
 0x2a9   :  { %21871 = vst [vmem:[#allocation129_spill] sm:$0xff] %v18992_v27  ;;  %5628 = vst.msk [vmem:[#allocation6 + $0x48] sm:$0xff] %vm5599_vm3, %v5589_v13  ;;  %v5590_v46 = vmax.f32 %v18745_v53, %v5574_v31  ;;  %v5456_v35 = vpop.f32.mrb[57].mxu0  ;;  %v18996_v33 = vpop.permute.xlu0 %7242  ;;  %v5465_v44 = vadd.f32 %v15161_v37, %v18671_v5 }
 0x2aa   :  { %5626 = vst.msk [vmem:[#allocation6 + $0x38] sm:$0xff] %vm5599_vm3, %v5587_v26  ;;  %v5588_v25 = vmax.f32 %v18751_v28, %v5572_v54  ;;  %8282 = vperm.xlu0 %16105, %v19006_v47   ;;  %v15162_v53 = vpop.f32.mrb[58].mxu0  ;;  %v5457_v3 = vadd.f32 %v18671_v5, %v5456_v35  ;;  %v19025_v4 = vld [vmem:[#allocation6 + $0x2e] sm:$0xff]  ;;  %v19034_v26 = vadd.f32 %v18881_v24, %v18671_v5 }
 0x2ab   :  { %5629 = vst.msk [vmem:[#allocation6 + $0x50] sm:$0xff] %vm5599_vm3, %v5590_v46  ;;  %v5459_v30 = vpop.f32.mrb[59].mxu0  ;;  %v5545_v62 = vmax.f32 %v5465_v44, 0.0  ;;  %v19038_v54 = vadd.f32 %v18671_v5, %v18883_v22  ;;  %v19054_v24 = vadd.f32 %v18671_v5, %v18909_v39  ;;  %v5783_v44 = vld [vmem:[#allocation6 + $0x2f] sm:$0xff]  ;;  %v5782_v49 = vld [vmem:[#allocation6 + $0x27] sm:$0xff]  ;;  %v19058_v22 = vmul.f32 %v18902_v20, %v19025_v4 }
 0x2ac   :  { %5627 = vst.msk [vmem:[#allocation6 + $0x40] sm:$0xff] %vm5599_vm3, %v5588_v25  ;;  %8024 = vperm.xlu1 %16103, %v19006_v47   ;;  %v19015_v28 = vpop.permute.xlu1 %7210  ;;  %v5543_v29 = vmax.f32 %v5457_v3, 0.0  ;;  %v19050_v25 = vadd.f32 %v18904_v18, %v18671_v5  ;;  %v19067_v18 = vadd.f32 %v18911_v21, %v18671_v5  ;;  %v19071_v39 = vadd.f32 %v18671_v5, %v18913_v2 }
 0x2ad   :  { %v19017_v52 = vpop.permute.xlu0 %7250  ;;  %v19027_v11 = vmax.f32 %v5529_v9, %v5545_v62  ;;  %21875 = vst [vmem:[#allocation133_spill] sm:$0xff] %v19058_v22  ;;  %v21665_v9 = vmov 11   ;;  %v19082_v21 = vmul.f32 %v18507_v58, %v5782_v49  ;;  %v5530_v8 = vmax.f32 %v19034_v26, 0.0 }
 0x2ae   :  { %8290 = vperm.xlu0 %16105, %v19022_v50   ;;  %v19042_v46 = vmax.f32 %v5527_v36, %v5543_v29  ;;  %v5468_v36 = vadd.f32 %v15162_v53, %v18671_v5  ;;  %v21877_v29 = vmov 10   ;;  %v7187_v53 = vld [vmem:[#allocation6 + $0x1f] sm:$0xff]  ;;  %v5460_v26 = vadd.f32 %v18671_v5, %v5459_v30 }
 0x2af   :  { %v5861_v58 = vmul.f32 %v7187_v53, %v18503_v57  ;;  %v19114_v30 = vmul.f32 %v18939_v42, %v5783_v44  ;;  %v19117_v14 = vmul.f32 %v19015_v28, %v7187_v53 }
 0x2b0   :  { %v15165_v13 = vpop.f32.mrb[60].mxu0  ;;  %8032 = vperm.xlu1 %16103, %v19022_v50   ;;  %v19030_v31 = vpop.permute.xlu1 %7214 }
 0x2b1   :  { %v19040_v37 = vld [vmem:[#allocation6 + $0x36] sm:$0xff]  ;;  %v19044_v35 = vpop.f32.mrb[61].mxu0  ;;  %v19046_v40 = vpop.permute.xlu0 %7258  ;;  %v5481_v22 = vadd.f32 %v15165_v13, %v18671_v5 }
 0x2b2   :  { %21874 = vst [vmem:[#allocation132_spill] sm:$0xff] %v19046_v40  ;;  %v19062_v3 = vmul.f32 %v18846_v6, %v19040_v37  ;;  %16106 = vset.pattern.permute.xlu0 %v21665_v9  ;;  %v15166_v62 = vpop.f32.mrb[62].mxu0  ;;  %v19079_v40 = vmul.f32 %v18509_v59, %v5783_v44  ;;  %v5528_v6 = vmax.f32 %v19038_v54, 0.0  ;;  %v7186_v59 = vld [vmem:[#allocation6 + $0x17] sm:$0xff]  ;;  %v19097_v50 = vld [vmem:[#allocation6 + $0x4f] sm:$0xff] }
 0x2b3   :  { %8492 = vperm.xlu0 %16106, %v18782_v12   ;;  %v5475_v20 = vpop.f32.mrb[63].mxu0  ;;  %v19084_v27 = vld [vmem:[#allocation6 + $0x3e] sm:$0xff]  ;;  %v19086_v2 = vld [vmem:[#allocation6 + $0x46] sm:$0xff]  ;;  %v19126_v57 = vmul.f32 %v18520_v1, %v19097_v50  ;;  %v5544_v1 = vmax.f32 %v5460_v26, 0.0 }
 0x2b4   :  { %21876 = vst [vmem:[#allocation134_spill] sm:$0xff] %v19062_v3  ;;  %16104 = vset.pattern.permute.xlu1 %v21877_v29  ;;  %v7223_v9 = vpop.permute.xlu1 %7222  ;;  %v5533_v29 = vmax.f32 %v19050_v25, 0.0  ;;  %v5784_v3 = vld [vmem:[#allocation6 + $0x37] sm:$0xff]  ;;  %v5785_v47 = vld [vmem:[#allocation6 + $0x3f] sm:$0xff]  ;;  %v5786_v54 = vld [vmem:[#allocation6 + $0x47] sm:$0xff]  ;;  %v19103_v25 = vmul.f32 %v18915_v19, %v19084_v27  ;;  %v19107_v32 = vmul.f32 %v18863_v48, %v19086_v2  ;;  %v5860_v19 = vmul.f32 %v7186_v59, %v18501_v56 }
 0x2b5   :  { %8234 = vperm.xlu1 %16104, %v18782_v12   ;;  %v5546_v12 = vmax.f32 %v5468_v36, 0.0  ;;  %v5876_v36 = vpack.c.bf16 %v19079_v40, %v19082_v21  ;;  %v19122_v48 = vmul.f32 %v18512_v60, %v5784_v3  ;;  %v19129_v13 = vmul.f32 %v18514_v61, %v5785_v47 }
 0x2b6   :  { %v19093_v43 = vpop.permute.xlu0 %7460  ;;  %v19136_v28 = vmul.f32 %v18518_v0, %v5786_v54  ;;  %v5593_v56 = vmax.f32 %v18768_v51, %v19027_v11  ;;  %v5591_v60 = vmax.f32 %v18770_v15, %v19042_v46  ;;  %v5549_v61 = vmax.f32 %v5481_v22, 0.0 }
 0x2b7   :  { %21878 = vst [vmem:[#allocation135_spill] sm:$0xff] %v19093_v43  ;;  %8504 = vperm.xlu0 %16106, %v18817_v38   ;;  %v5875_v44 = vpack.c.bf16 %v5861_v58, %v5860_v19  ;;  %v19144_v21 = vmul.f32 %v19030_v31, %v5782_v49  ;;  %v5473_v51 = vadd.f32 %v18671_v5, %v19044_v35  ;;  %v21881_v59 = vmax.f32 %v19054_v24, 0.0 }
 0x2b8   :  { %v7231_v43 = vpop.permute.xlu1 %7230  ;;  %5632 = vst.msk [vmem:[#allocation6 + $0x68] sm:$0xff] %vm5599_vm3, %v5593_v56  ;;  %5630 = vst.msk [vmem:[#allocation6 + $0x58] sm:$0xff] %vm5599_vm3, %v5591_v60  ;;  %v5484_v15 = vadd.f32 %v15166_v62, %v18671_v5  ;;  %v5576_v11 = vmax.f32 %v5528_v6, %v5544_v1  ;;  %v5581_v31 = vmax.f32 %v5533_v29, %v5549_v61  ;;  %v21879_v6 = vld [vmem:[#allocation102_spill] sm:$0xff]  ;;  %v21885_v60 = vld [vmem:[#allocation105_spill] sm:$0xff] }
 0x2b9   :  { %8242 = vperm.xlu1 %16104, %v18660_v55   ;;  %v5578_v55 = vmax.f32 %v5530_v8, %v5546_v12  ;;  %v5476_v12 = vadd.f32 %v18671_v5, %v5475_v20  ;;  %v16169_v8 = vld [vmem:[%s21638_s4 + $0x8] sm:$0xff]   ;;  %15172 = vmatmul.mubr.msk.bf16.vlgmr.msra.gmra.mrb[0].mxu1 %vm5599_vm3, %v5875_v44  ;;  %v19160_v46 = vmul.f32 %v7223_v9, %v5784_v3  ;;  %v5547_v5 = vmax.f32 %v5473_v51, 0.0 }
 0x2ba   :  { %v19133_v40 = vpop.permute.xlu0 %7472  ;;  %v19165_v49 = vmul.f32 %v18961_v10, %v5785_v47  ;;  %15188 = vmatpush3.bf16.msra.mxu1 %v18646_v34  ;;  %15175 = vmatprep.mubr.msk.bf16.mxu1 %vm5599_vm3, %v5876_v36  ;;  %v5550_v22 = vmax.f32 %v5484_v15, 0.0  ;;  %v5592_v20 = vmax.f32 %v18789_v23, %v5576_v11  ;;  %v5597_v29 = vmax.f32 %v21879_v6, %v5581_v31  ;;  %v21880_v10 = vld [vmem:[#allocation111_spill] sm:$0xff]  ;;  %v19182_v34 = vld [vmem:[%s21638_s4 + $0x20] sm:$0xff]   ;;  %v21894_v6 = vld [vmem:[#allocation52_spill] sm:$0xff] }
 0x2bb   :  { %8512 = vperm.xlu0 %16106, %v18830_v16   ;;  %v5594_v0 = vmax.f32 %v18777_v63, %v5578_v55  ;;  %v5548_v62 = vmax.f32 %v5476_v12, 0.0  ;;  %v19174_v9 = vmul.f32 %v7231_v43, %v5786_v54  ;;  %v5579_v58 = vmax.f32 %v21881_v59, %v5547_v5  ;;  %15189 = vmatprep.subr.bf16.mxu1 %v16169_v8  ;;  %v21886_v1 = vld [vmem:[#allocation106_spill] sm:$0xff]  ;;  %v21890_v12 = vld [vmem:[#allocation53_spill] sm:$0xff] }
 0x2bc   :  { %v7239_v53 = vpop.permute.xlu1 %7238  ;;  %v21882_v23 = vmax.f32 %v19067_v18, 0.0  ;;  %v21883_v36 = vmax.f32 %v19071_v39, 0.0  ;;  %v5877_v43 = vpack.c.bf16 %v19129_v13, %v19122_v48  ;;  %5631 = vst.msk [vmem:[#allocation6 + $0x60] sm:$0xff] %vm5599_vm3, %v5592_v20  ;;  %5636 = vst.msk [vmem:[#allocation6 + $0x88] sm:$0xff] %vm5599_vm3, %v5597_v29  ;;  %v5878_v18 = vpack.c.bf16 %v19126_v57, %v19136_v28  ;;  %v21884_v39 = vld [vmem:[#allocation103_spill] sm:$0xff]  ;;  %v21887_v13 = vld [vmem:[#allocation113_spill] sm:$0xff] }
 0x2bd   :  { %8246 = vperm.xlu1 %16104, %v18817_v38   ;;  %5633 = vst.msk [vmem:[#allocation6 + $0x70] sm:$0xff] %vm5599_vm3, %v5594_v0  ;;  %v5595_v56 = vmax.f32 %v21884_v39, %v5579_v58  ;;  %v19216_v51 = vmul.f32 %v18981_v17, %v19097_v50  ;;  %v21892_v5 = vld [vmem:[#allocation50_spill] sm:$0xff]  ;;  %v21893_v20 = vld [vmem:[#allocation51_spill] sm:$0xff] }
 0x2be   :  { %v19162_v35 = vpop.permute.xlu0 %7480  ;;  %v5582_v26 = vmax.f32 %v21882_v23, %v5550_v22  ;;  %v5580_v19 = vmax.f32 %v21883_v36, %v5548_v62  ;;  %15190 = vmatpush3.bf16.msra.mxu1 %v16169_v8  ;;  %v5638_v58 = vld [vmem:[#allocation6 + $0x6] sm:$0xff]  ;;  %v19232_v23 = vld [vmem:[#allocation6 + $0xe] sm:$0xff]  ;;  %v21895_v36 = vld [vmem:[#allocation117_spill] sm:$0xff] }
 0x2bf   :  { %8520 = vperm.xlu0 %16106, %v21880_v10   ;;  %15207 = vmatprep.subr.bf16.mxu1 %v19182_v34  ;;  %v5788_v44 = vld [vmem:[#allocation6 + $0x57] sm:$0xff]  ;;  %5634 = vst.msk [vmem:[#allocation6 + $0x78] sm:$0xff] %vm5599_vm3, %v5595_v56  ;;  %21888 = vst [vmem:[#allocation102_spill] sm:$0xff] %v19216_v51  ;;  %v21898_v56 = vld [vmem:[#allocation35_spill] sm:$0xff] }
 0x2c0   :  { %v19177_v47 = vpop.permute.xlu1 %7246  ;;  %v5598_v55 = vmax.f32 %v21885_v60, %v5582_v26  ;;  %v5596_v48 = vmax.f32 %v21886_v1, %v5580_v19  ;;  %v19210_v28 = vmul.f32 %v7239_v53, %v5788_v44  ;;  %v21891_v53 = vld [vmem:[#allocation114_spill] sm:$0xff]  ;;  %v5868_v22 = vmul.f32 %v21892_v5, %v5788_v44 }
 0x2c1   :  { %8254 = vperm.xlu1 %16104, %v18830_v16   ;;  %15176 = vmatmul.mubr.msk.bf16.gmra.mrb[4].mxu1 %vm5599_vm3, %v5877_v43  ;;  %v5750_v60 = vmul.f32 %v21898_v56, %v5638_v58  ;;  %v21902_v5 = vld [vmem:[#allocation54_spill] sm:$0xff] }
 0x2c2   :  { %v19197_v24 = vpop.permute.xlu0 %7488  ;;  %5637 = vst.msk [vmem:[#allocation6 + $0x90] sm:$0xff] %vm5599_vm3, %v5598_v55  ;;  %5635 = vst.msk [vmem:[#allocation6 + $0x80] sm:$0xff] %vm5599_vm3, %v5596_v48  ;;  %15179 = vmatprep.mubr.msk.bf16.mxu1 %vm5599_vm3, %v5878_v18  ;;  %v21899_v55 = vld [vmem:[#allocation37_spill] sm:$0xff]  ;;  %v21900_v48 = vld [vmem:[#allocation55_spill] sm:$0xff] }
 0x2c3   :  { %8528 = vperm.xlu0 %16106, %v21887_v13   ;;  %v5789_v11 = vld [vmem:[#allocation6 + $0x5f] sm:$0xff]  ;;  %v5790_v62 = vld [vmem:[#allocation6 + $0x67] sm:$0xff]  ;;  %v5751_v1 = vmul.f32 %v21899_v55, %v19232_v23  ;;  %v21676_v55 = vmov 13  }
 0x2c4   :  { %v7255_v61 = vpop.permute.xlu1 %7254  ;;  %v5791_v57 = vld [vmem:[#allocation6 + $0x6f] sm:$0xff]  ;;  %v5869_v17 = vmul.f32 %v21893_v20, %v5789_v11  ;;  %v5870_v29 = vmul.f32 %v21894_v6, %v5790_v62  ;;  %v19261_v58 = vmul.f32 %v19177_v47, %v5790_v62  ;;  %v19265_v56 = vld [vmem:[#allocation6 + $0x1e] sm:$0xff] }
 0x2c5   :  { %8262 = vperm.xlu1 %16104, %v21880_v10   ;;  %v5871_v8 = vmul.f32 %v21890_v12, %v5791_v57  ;;  %v21901_v12 = vld [vmem:[#allocation120_spill] sm:$0xff]  ;;  %v19310_v54 = vld [vmem:[#allocation6 + $0x48] sm:$0xff] }
 0x2c6   :  { %v19212_v0 = vpop.permute.xlu0 %7496  ;;  %v5879_v59 = vpack.c.bf16 %v5869_v17, %v5868_v22  ;;  %v5792_v39 = vld [vmem:[#allocation6 + $0x77] sm:$0xff]  ;;  %v5766_v17 = vpack.c.bf16 %v5751_v1, %v5750_v60  ;;  %21906 = vst [vmem:[#allocation114_spill] sm:$0xff] %v19261_v58  ;;  %v19268_v1 = vld [vmem:[#allocation6 + $0x28] sm:$0xff]  ;;  %v19318_v63 = vmul.f32 %v19197_v24, %v19310_v54 }
 0x2c7   :  { %8536 = vperm.xlu0 %16106, %v21891_v53   ;;  %v5880_v26 = vpack.c.bf16 %v5871_v8, %v5870_v29  ;;  %v5872_v22 = vmul.f32 %v21902_v5, %v5792_v39  ;;  %v19255_v29 = vmul.f32 %v18996_v33, %v5789_v11  ;;  %v19272_v33 = vld [vmem:[#allocation6 + $0x20] sm:$0xff]  ;;  %v19277_v47 = vld [vmem:[#allocation6 + $0x38] sm:$0xff] }
 0x2c8   :  { %v19220_v15 = vpop.permute.xlu1 %7262  ;;  %v19288_v62 = vld [vmem:[#allocation6 + $0x16] sm:$0xff]  ;;  %v19297_v5 = vmul.f32 %v19162_v35, %v19277_v47  ;;  %v21915_v11 = vld [vmem:[#allocation38_spill] sm:$0xff]  ;;  %21917 = vst [vmem:[#allocation55_spill] sm:$0xff] %v19318_v63 }
 0x2c9   :  { %21889 = vst [vmem:[#allocation111_spill] sm:$0xff] %v19220_v15  ;;  %8270 = vperm.xlu1 %16104, %v21887_v13   ;;  %v19237_v43 = vld [vmem:[#allocation6 + $0x7f] sm:$0xff]  ;;  %15180 = vmatmul.mubr.msk.bf16.gmra.mrb[8].mxu1 %vm5599_vm3, %v5879_v59  ;;  %21904 = vst [vmem:[#allocation113_spill] sm:$0xff] %v19255_v29  ;;  %v19258_v59 = vmul.f32 %v19017_v52, %v5791_v57  ;;  %v19275_v52 = vld [vmem:[#allocation6 + $0x30] sm:$0xff] }
 0x2ca   :  { %v19228_v50 = vpop.permute.xlu0 %7504  ;;  %21897 = vst [vmem:[#allocation105_spill] sm:$0xff] %v19237_v43  ;;  %15183 = vmatprep.mubr.msk.bf16.mxu1 %vm5599_vm3, %v5880_v26  ;;  %v5873_v44 = vmul.f32 %v21900_v48, %v19237_v43  ;;  %v19263_v26 = vmul.f32 %v7255_v61, %v5792_v39  ;;  %v19270_v48 = vld [vmem:[#allocation6 + $0x26] sm:$0xff]  ;;  %v19281_v61 = vmul.f32 %v19133_v40, %v19268_v1  ;;  %21911 = vst [vmem:[#allocation35_spill] sm:$0xff] %v19297_v5  ;;  %v21912_v40 = vld [vmem:[#allocation36_spill] sm:$0xff] }
 0x2cb   :  { %8544 = vperm.xlu0 %16106, %v21895_v36   ;;  %21905 = vst [vmem:[#allocation53_spill] sm:$0xff] %v19258_v59  ;;  %v21916_v57 = vld [vmem:[#allocation39_spill] sm:$0xff]  ;;  %v19312_v35 = vld [vmem:[#allocation6 + $0x40] sm:$0xff] }
 0x2cc   :  { %v5881_v6 = vpack.c.bf16 %v5873_v44, %v5872_v22  ;;  %21907 = vst [vmem:[#allocation50_spill] sm:$0xff] %v19263_v26  ;;  %21908 = vst [vmem:[#allocation51_spill] sm:$0xff] %v19281_v61  ;;  %v5753_v22 = vmul.f32 %v21912_v40, %v19265_v56  ;;  %v5754_v31 = vmul.f32 %v21916_v57, %v19270_v48  ;;  %v21921_v40 = vmov 11   ;;  %v21945_v59 = vld [vmem:[#allocation57_spill] sm:$0xff]  ;;  %v21949_v51 = vld [vmem:[#allocation98_spill] sm:$0xff] }
 0x2cd   :  { %v19235_v19 = vpop.permute.xlu1 %7464  ;;  %8278 = vperm.xlu1 %16104, %v21891_v53  }
 0x2ce   :  { %21896 = vst [vmem:[#allocation103_spill] sm:$0xff] %v19235_v19  ;;  %v19240_v18 = vpop.permute.xlu0 %7512  ;;  %v21939_v19 = vld [vmem:[#allocation130_spill] sm:$0xff] }
 0x2cf   :  { %8552 = vperm.xlu0 %16106, %v21901_v12  }
 0x2d1   :  { %v7469_v8 = vpop.permute.xlu1 %7468  ;;  %8286 = vperm.xlu1 %16104, %v21895_v36   ;;  %15184 = vmatmul.mubr.msk.bf16.gmra.mrb[12].mxu1 %vm5599_vm3, %v5881_v6  ;;  %v21913_v6 = vld [vmem:[#allocation86_spill] sm:$0xff] }
 0x2d2   :  { %v19251_v20 = vpop.permute.xlu0 %7520  ;;  %15191 = vmatprep.mubr.msk.bf16.mxu1 %vm5599_vm3, %v5766_v17  ;;  %v19291_v39 = vmul.f32 %v7469_v8, %v19272_v33  ;;  %v5755_v8 = vmul.f32 %v21915_v11, %v19025_v4  ;;  %v19338_v4 = vld [vmem:[#allocation6 + $0x58] sm:$0xff] }
 0x2d3   :  { %21903 = vst [vmem:[#allocation106_spill] sm:$0xff] %v19251_v20  ;;  %16109 = vset.pattern.permute.xlu0 %v21676_v55  ;;  %v19336_v20 = vld [vmem:[#allocation6 + $0x50] sm:$0xff] }
 0x2d4   :  { %21909 = vst [vmem:[#allocation52_spill] sm:$0xff] %v19291_v39  ;;  %8932 = vperm.xlu0 %16109, %v21913_v6  }
 0x2d5   :  { %v7477_v60 = vpop.permute.xlu1 %7476  ;;  %8294 = vperm.xlu1 %16104, %v21901_v12  }
 0x2d6   :  { %v19304_v17 = vmul.f32 %v7477_v60, %v19275_v52  ;;  %v21918_v60 = vld [vmem:[#allocation34_spill] sm:$0xff] }
 0x2d7   :  { %v19293_v44 = vpop.permute.xlu0 %7722  ;;  %v5752_v42 = vmul.f32 %v21918_v60, %v19288_v62  ;;  %v16171_v60 = vld [vmem:[%s21638_s4 + $0x28] sm:$0xff]  }
 0x2d8   :  { %21910 = vst [vmem:[#allocation117_spill] sm:$0xff] %v19293_v44  ;;  %21914 = vst [vmem:[#allocation37_spill] sm:$0xff] %v19304_v17  ;;  %8944 = vperm.xlu0 %16109, %v18701_v41   ;;  %v5768_v44 = vpack.c.bf16 %v5755_v8, %v5754_v31  ;;  %v21935_v17 = vld [vmem:[#allocation46_spill] sm:$0xff] }
 0x2d9   :  { %v7485_v3 = vpop.permute.xlu1 %7484  ;;  %v5767_v55 = vpack.c.bf16 %v5753_v22, %v5752_v42  ;;  %16107 = vset.pattern.permute.xlu1 %v21921_v40  ;;  %v19341_v42 = vld [vmem:[#allocation6 + $0x4e] sm:$0xff]  ;;  %v19345_v22 = vmul.f32 %v19212_v0, %v19338_v4 }
 0x2da   :  { %v19325_v57 = vmul.f32 %v7485_v3, %v19312_v35  ;;  %8496 = vperm.xlu1 %16107, %v21913_v6   ;;  %v21925_v6 = vld [vmem:[#allocation40_spill] sm:$0xff] }
 0x2db   :  { %v19327_v11 = vpop.permute.xlu0 %7734  ;;  %21922 = vst [vmem:[#allocation36_spill] sm:$0xff] %v19345_v22  ;;  %15192 = vmatmul.mubr.msk.bf16.vlgmr.msra.gmra.mrb[0].mxu1 %vm5599_vm3, %v5767_v55  ;;  %v5757_v8 = vmul.f32 %v21925_v6, %v19084_v27  ;;  %v19363_v55 = vld [vmem:[%s21638_s4 + $0x30] sm:$0xff]   ;;  %v19371_v27 = vld [vmem:[#allocation6 + $0x60] sm:$0xff] }
 0x2dc   :  { %21919 = vst [vmem:[#allocation120_spill] sm:$0xff] %v19325_v57  ;;  %21920 = vst [vmem:[#allocation54_spill] sm:$0xff] %v19327_v11  ;;  %15208 = vmatpush3.bf16.msra.mxu1 %v19182_v34  ;;  %15195 = vmatprep.mubr.msk.bf16.mxu1 %vm5599_vm3, %v5768_v44  ;;  %v21926_v34 = vld [vmem:[#allocation42_spill] sm:$0xff]  ;;  %v21927_v44 = vld [vmem:[#allocation43_spill] sm:$0xff] }
 0x2dd   :  { %v7493_v3 = vpop.permute.xlu1 %7492  ;;  %8952 = vperm.xlu0 %16109, %v18944_v7   ;;  %15209 = vmatprep.subr.bf16.mxu1 %v16171_v60  ;;  %v5758_v24 = vmul.f32 %v21927_v44, %v19086_v2  ;;  %v19376_v6 = vld [vmem:[%s21635_s1 + $0x10] sm:$0xff]  ;;  %v21928_v11 = vld [vmem:[#allocation41_spill] sm:$0xff] }
 0x2de   :  { %v19349_v40 = vmul.f32 %v7493_v3, %v19336_v20  ;;  %v5759_v3 = vmul.f32 %v21926_v34, %v19341_v42  ;;  %8500 = vperm.xlu1 %16107, %v19376_v6  }
 0x2df   :  { %v19353_v31 = vpop.permute.xlu0 %7742 }
 0x2e0   :  { %21923 = vst [vmem:[#allocation86_spill] sm:$0xff] %v19349_v40  ;;  %21924 = vst [vmem:[#allocation38_spill] sm:$0xff] %v19353_v31  ;;  %v19369_v31 = vld [vmem:[#allocation6 + $0x68] sm:$0xff]  ;;  %v5756_v40 = vmul.f32 %v21928_v11, %v19040_v37  ;;  %15210 = vmatpush3.bf16.msra.mxu1 %v16171_v60  ;;  %v5770_v63 = vpack.c.bf16 %v5759_v3, %v5758_v24  ;;  %v19394_v37 = vld [vmem:[#allocation6 + $0x70] sm:$0xff] }
 0x2e1   :  { %v7501_v0 = vpop.permute.xlu1 %7500  ;;  %v19383_v34 = vmul.f32 %v19228_v50, %v19369_v31  ;;  %8960 = vperm.xlu0 %16109, %v18971_v45   ;;  %15227 = vmatprep.subr.bf16.mxu1 %v19363_v55  ;;  %v19396_v11 = vld [vmem:[#allocation6 + $0x5e] sm:$0xff]  ;;  %v19413_v3 = vld [vmem:[#allocation6 + $0x56] sm:$0xff] }
 0x2e2   :  { %v19386_v2 = vmul.f32 %v7501_v0, %v19371_v27  ;;  %v5769_v22 = vpack.c.bf16 %v5757_v8, %v5756_v40  ;;  %v19398_v50 = vld [vmem:[#allocation6 + $0x78] sm:$0xff]  ;;  %8508 = vperm.xlu1 %16107, %v18701_v41   ;;  %v19401_v0 = vld [vmem:[#allocation6 + $0x6e] sm:$0xff]  ;;  %v19403_v40 = vld [vmem:[#allocation6 + $0x66] sm:$0xff] }
 0x2e3   :  { %21929 = vst [vmem:[#allocation39_spill] sm:$0xff] %v19383_v34  ;;  %v19388_v44 = vpop.permute.xlu0 %7750  ;;  %v19407_v8 = vmul.f32 %v19240_v18, %v19398_v50  ;;  %v21933_v41 = vld [vmem:[#allocation44_spill] sm:$0xff]  ;;  %v19435_v18 = vld [vmem:[#allocation6 + $0x7e] sm:$0xff] }
 0x2e4   :  { %21930 = vst [vmem:[#allocation34_spill] sm:$0xff] %v19386_v2  ;;  %15196 = vmatmul.mubr.msk.bf16.gmra.mrb[4].mxu1 %vm5599_vm3, %v5769_v22  ;;  %v5761_v2 = vmul.f32 %v21933_v41, %v19396_v11  ;;  %v21934_v34 = vld [vmem:[#allocation128_spill] sm:$0xff]  ;;  %v5763_v22 = vmul.f32 %v21935_v17, %v19401_v0  ;;  %v6153_v17 = vld [vmem:[#allocation6 + $0x8] sm:$0xff] }
 0x2e5   :  { %v7509_v60 = vpop.permute.xlu1 %7508  ;;  %21931 = vst [vmem:[#allocation40_spill] sm:$0xff] %v19407_v8  ;;  %15199 = vmatprep.mubr.msk.bf16.mxu1 %vm5599_vm3, %v5770_v63  ;;  %8968 = vperm.xlu0 %16109, %v21934_v34   ;;  %v21938_v63 = vld [vmem:[#allocation45_spill] sm:$0xff] }
 0x2e6   :  { %v19411_v24 = vmul.f32 %v7509_v60, %v19394_v37  ;;  %v21936_v60 = vld [vmem:[#allocation47_spill] sm:$0xff]  ;;  %8516 = vperm.xlu1 %16107, %v18944_v7   ;;  %v5760_v61 = vmul.f32 %v21938_v63, %v19413_v3 }
 0x2e7   :  { %v19416_v57 = vpop.permute.xlu0 %7758  ;;  %v5762_v5 = vmul.f32 %v21936_v60, %v19403_v40 }
 0x2e8   :  { %21932 = vst [vmem:[#allocation42_spill] sm:$0xff] %v19411_v24  ;;  %v5771_v41 = vpack.c.bf16 %v5761_v2, %v5760_v61  ;;  %v6154_v24 = vld [vmem:[#allocation6 + $0x10] sm:$0xff] }
 0x2e9   :  { %v19428_v39 = vpop.permute.xlu1 %7516  ;;  %8976 = vperm.xlu0 %16109, %v21939_v19   ;;  %v5772_v15 = vpack.c.bf16 %v5763_v22, %v5762_v5  ;;  %v21942_v61 = vld [vmem:[#allocation48_spill] sm:$0xff]  ;;  %v21943_v5 = vld [vmem:[#allocation131_spill] sm:$0xff]  ;;  %v6234_v26 = vmul.f32 %v21945_v59, %v6154_v24 }
 0x2ea   :  { %21937 = vst [vmem:[#allocation43_spill] sm:$0xff] %v19428_v39  ;;  %8524 = vperm.xlu1 %16107, %v18971_v45   ;;  %v19441_v39 = vld [vmem:[#allocation6 + $0x76] sm:$0xff]  ;;  %v5765_v2 = vmul.f32 %v21942_v61, %v19435_v18 }
 0x2eb   :  { %v19432_v43 = vpop.permute.xlu0 %7766  ;;  %v21944_v22 = vld [vmem:[#allocation56_spill] sm:$0xff] }
 0x2ec   :  { %15200 = vmatmul.mubr.msk.bf16.gmra.mrb[8].mxu1 %vm5599_vm3, %v5771_v41  ;;  %v6233_v8 = vmul.f32 %v21944_v22, %v6153_v17  ;;  %v21946_v41 = vld [vmem:[#allocation49_spill] sm:$0xff]  ;;  %v21950_v17 = vld [vmem:[#allocation60_spill] sm:$0xff]  ;;  %v21952_v22 = vld [vmem:[#allocation62_spill] sm:$0xff] }
 0x2ed   :  { %15203 = vmatprep.mubr.msk.bf16.mxu1 %vm5599_vm3, %v5772_v15  ;;  %8984 = vperm.xlu0 %16109, %v21943_v5   ;;  %v21695_v15 = vmov 14   ;;  %v19464_v24 = vld [vmem:[#allocation6 + $0x18] sm:$0xff] }
 0x2ee   :  { %v19439_v60 = vpop.permute.xlu1 %7718  ;;  %8532 = vperm.xlu1 %16107, %v21934_v34   ;;  %v6249_v61 = vpack.c.bf16 %v6234_v26, %v6233_v8  ;;  %v6238_v26 = vmul.f32 %v21952_v22, %v19275_v52  ;;  %v21953_v8 = vld [vmem:[#allocation58_spill] sm:$0xff] }
 0x2ef   :  { %21940 = vst [vmem:[#allocation41_spill] sm:$0xff] %v19439_v60  ;;  %v19444_v63 = vpop.permute.xlu0 %7774  ;;  %v5764_v60 = vmul.f32 %v21946_v41, %v19441_v39 }
 0x2f0   :  { %21941 = vst [vmem:[#allocation44_spill] sm:$0xff] %v19444_v63 }
 0x2f1   :  { %v5773_v58 = vpack.c.bf16 %v5765_v2, %v5764_v60  ;;  %16110 = vset.pattern.permute.xlu0 %v21695_v15  ;;  %v6236_v60 = vmul.f32 %v21950_v17, %v19272_v33  ;;  %v21954_v15 = vld [vmem:[#allocation59_spill] sm:$0xff]  ;;  %v16173_v33 = vld [vmem:[%s21638_s4 + $0x38] sm:$0xff]   ;;  %v21956_v17 = vmov 13  }
 0x2f2   :  { %v19454_v29 = vpop.permute.xlu1 %7726  ;;  %9186 = vperm.xlu0 %16110, %v21949_v51   ;;  %8540 = vperm.xlu1 %16107, %v21939_v19  }
 0x2f3   :  { %21947 = vst [vmem:[#allocation128_spill] sm:$0xff] %v19454_v29 }
 0x2f4   :  { %v19457_v63 = vpop.permute.xlu0 %7976  ;;  %15204 = vmatmul.mubr.msk.bf16.gmra.mrb[12].mxu1 %vm5599_vm3, %v5773_v58  ;;  %v6235_v58 = vmul.f32 %v19464_v24, %v21953_v8 }
 0x2f5   :  { %21948 = vst [vmem:[#allocation46_spill] sm:$0xff] %v19457_v63  ;;  %15211 = vmatprep.mubr.msk.bf16.mxu1 %vm5599_vm3, %v6249_v61  ;;  %v6237_v61 = vmul.f32 %v21954_v15, %v19268_v1  ;;  %v21957_v1 = vld [vmem:[#allocation64_spill] sm:$0xff] }
 0x2f6   :  { %v19462_v59 = vpop.permute.xlu1 %7730  ;;  %9198 = vperm.xlu0 %16110, %v18817_v38   ;;  %8548 = vperm.xlu1 %16107, %v21943_v5   ;;  %v6250_v63 = vpack.c.bf16 %v6236_v60, %v6235_v58  ;;  %v6240_v15 = vmul.f32 %v21957_v1, %v19312_v35  ;;  %v19508_v58 = vld [vmem:[#allocation6 + $0x51] sm:$0xff] }
 0x2f7   :  { %v6251_v52 = vpack.c.bf16 %v6238_v26, %v6237_v61  ;;  %v19501_v26 = vld [vmem:[%s21638_s4 + $0x40] sm:$0xff]   ;;  %v19517_v1 = vmul.f32 %v19388_v44, %v19508_v58 }
 0x2f8   :  { %v19469_v2 = vpop.permute.xlu0 %7988  ;;  %v19510_v61 = vld [vmem:[#allocation6 + $0x59] sm:$0xff] }
 0x2f9   :  { %21951 = vst [vmem:[#allocation47_spill] sm:$0xff] %v19469_v2  ;;  %v19594_v2 = vld [vmem:[#allocation6 + $0x21] sm:$0xff] }
 0x2fa   :  { %v19477_v41 = vpop.permute.xlu1 %7738  ;;  %9206 = vperm.xlu0 %16110, %v18830_v16   ;;  %16108 = vset.pattern.permute.xlu1 %v21956_v17 }
 0x2fb   :  { %8928 = vperm.xlu1 %16108, %v21949_v51  }
 0x2fc   :  { %v19481_v29 = vpop.permute.xlu0 %7996  ;;  %15212 = vmatmul.mubr.msk.bf16.vlgmr.msra.gmra.mrb[0].mxu1 %vm5599_vm3, %v6250_v63  ;;  %v21959_v63 = vld [vmem:[#allocation66_spill] sm:$0xff] }
 0x2fd   :  { %21955 = vst [vmem:[#allocation45_spill] sm:$0xff] %v19481_v29  ;;  %15228 = vmatpush3.bf16.msra.mxu1 %v19363_v55  ;;  %15215 = vmatprep.mubr.msk.bf16.mxu1 %vm5599_vm3, %v6251_v52  ;;  %v6242_v51 = vmul.f32 %v21959_v63, %v19336_v20  ;;  %v21960_v55 = vld [vmem:[#allocation61_spill] sm:$0xff]  ;;  %v21961_v52 = vld [vmem:[#allocation63_spill] sm:$0xff] }
 0x2fe   :  { %v19490_v22 = vpop.permute.xlu1 %7746  ;;  %15229 = vmatprep.subr.bf16.mxu1 %v16173_v33  ;;  %9214 = vperm.xlu0 %16110, %v21880_v10   ;;  %v6239_v8 = vmul.f32 %v21960_v55, %v19277_v47  ;;  %v6241_v17 = vmul.f32 %v21961_v52, %v19310_v54  ;;  %v19528_v54 = vld [vmem:[#allocation6 + $0x69] sm:$0xff]  ;;  %v19530_v52 = vld [vmem:[#allocation6 + $0x61] sm:$0xff] }
 0x2ff   :  { %8936 = vperm.xlu1 %16108, %v19376_v6   ;;  %v6411_v29 = vld [vmem:[#allocation6 + $0x9] sm:$0xff] }
 0x300   :  { %v19496_v60 = vpop.permute.xlu0 %8004  ;;  %v6252_v63 = vpack.c.bf16 %v6240_v15, %v6239_v8  ;;  %v6253_v55 = vpack.c.bf16 %v6242_v51, %v6241_v17  ;;  %v21963_v51 = vld [vmem:[#allocation68_spill] sm:$0xff]  ;;  %v21965_v17 = vld [vmem:[#allocation70_spill] sm:$0xff] }
 0x301   :  { %21958 = vst [vmem:[#allocation130_spill] sm:$0xff] %v19496_v60  ;;  %15230 = vmatpush3.bf16.msra.mxu1 %v16173_v33  ;;  %v19536_v33 = vmul.f32 %v19416_v57, %v19530_v52  ;;  %v6244_v8 = vmul.f32 %v21963_v51, %v19371_v27  ;;  %v21966_v57 = vld [vmem:[#allocation65_spill] sm:$0xff]  ;;  %v21967_v51 = vld [vmem:[#allocation67_spill] sm:$0xff] }
 0x302   :  { %v7755_v35 = vpop.permute.xlu1 %7754  ;;  %15247 = vmatprep.subr.bf16.mxu1 %v19501_v26  ;;  %9222 = vperm.xlu0 %16110, %v21887_v13   ;;  %v6243_v60 = vmul.f32 %v21966_v57, %v19338_v4  ;;  %v19569_v57 = vld [vmem:[#allocation6 + $0x80] sm:$0xff] }
 0x303   :  { %v19520_v20 = vmul.f32 %v7755_v35, %v19510_v61  ;;  %8940 = vperm.xlu1 %16108, %v18817_v38  }
 0x304   :  { %v19522_v47 = vpop.permute.xlu0 %8012  ;;  %15216 = vmatmul.mubr.msk.bf16.gmra.mrb[4].mxu1 %vm5599_vm3, %v6252_v63  ;;  %v6246_v63 = vmul.f32 %v21965_v17, %v19394_v37  ;;  %v6254_v38 = vpack.c.bf16 %v6244_v8, %v6243_v60  ;;  %v21972_v60 = vld [vmem:[#allocation72_spill] sm:$0xff] }
 0x305   :  { %21962 = vst [vmem:[#allocation48_spill] sm:$0xff] %v19522_v47  ;;  %15219 = vmatprep.mubr.msk.bf16.mxu1 %vm5599_vm3, %v6253_v55  ;;  %v19553_v55 = vld [vmem:[#allocation6 + $0x71] sm:$0xff]  ;;  %v6248_v8 = vmul.f32 %v21972_v60, %v19569_v57  ;;  %v19596_v60 = vld [vmem:[#allocation6 + $0x19] sm:$0xff] }
 0x306   :  { %v7763_v44 = vpop.permute.xlu1 %7762  ;;  %9230 = vperm.xlu0 %16110, %v21891_v53   ;;  %v19562_v37 = vmul.f32 %v19432_v43, %v19553_v55 }
 0x307   :  { %v19540_v15 = vmul.f32 %v7763_v44, %v19528_v54  ;;  %v19555_v44 = vld [vmem:[#allocation6 + $0x79] sm:$0xff]  ;;  %8948 = vperm.xlu1 %16108, %v18830_v16  }
 0x308   :  { %v19544_v35 = vpop.permute.xlu0 %8020  ;;  %21968 = vst [vmem:[#allocation56_spill] sm:$0xff] %v19562_v37 }
 0x309   :  { %21964 = vst [vmem:[#allocation131_spill] sm:$0xff] %v19544_v35  ;;  %v6245_v35 = vmul.f32 %v21967_v51, %v19369_v31  ;;  %v19574_v31 = vld [vmem:[#allocation6 + $0x11] sm:$0xff]  ;;  %v21975_v51 = vld [vmem:[#allocation74_spill] sm:$0xff] }
 0x30a   :  { %v7771_v27 = vpop.permute.xlu1 %7770  ;;  %9238 = vperm.xlu0 %16110, %v21895_v36   ;;  %v6492_v16 = vmul.f32 %v19574_v31, %v21975_v51  ;;  %v21982_v51 = vld [vmem:[#allocation75_spill] sm:$0xff] }
 0x30b   :  { %v19565_v17 = vmul.f32 %v7771_v27, %v19555_v44  ;;  %v6255_v4 = vpack.c.bf16 %v6246_v63, %v6245_v35  ;;  %8956 = vperm.xlu1 %16108, %v21880_v10   ;;  %v21974_v63 = vld [vmem:[#allocation71_spill] sm:$0xff] }
 0x30c   :  { %v19567_v47 = vpop.permute.xlu0 %8028  ;;  %15220 = vmatmul.mubr.msk.bf16.gmra.mrb[8].mxu1 %vm5599_vm3, %v6254_v38  ;;  %v6491_v27 = vmul.f32 %v21974_v63, %v6411_v29  ;;  %v21976_v38 = vld [vmem:[#allocation69_spill] sm:$0xff]  ;;  %v19601_v63 = vld [vmem:[#allocation6 + $0x31] sm:$0xff] }
 0x30d   :  { %21969 = vst [vmem:[#allocation57_spill] sm:$0xff] %v19565_v17  ;;  %21970 = vst [vmem:[#allocation49_spill] sm:$0xff] %v19567_v47  ;;  %15223 = vmatprep.mubr.msk.bf16.mxu1 %vm5599_vm3, %v6255_v4  ;;  %v6247_v47 = vmul.f32 %v21976_v38, %v19398_v50  ;;  %v6415_v50 = vld [vmem:[#allocation6 + $0x29] sm:$0xff]  ;;  %v6496_v38 = vmul.f32 %v21982_v51, %v19601_v63 }
 0x30e   :  { %v19578_v43 = vpop.permute.xlu1 %7778  ;;  %9246 = vperm.xlu0 %16110, %v21901_v12  }
 0x30f   :  { %21971 = vst [vmem:[#allocation98_spill] sm:$0xff] %v19578_v43  ;;  %8964 = vperm.xlu1 %16108, %v21887_v13   ;;  %v6256_v4 = vpack.c.bf16 %v6248_v8, %v6247_v47  ;;  %v21696_v43 = vmov 15   ;;  %v19607_v13 = vld [vmem:[%s21635_s1 + $0x8] sm:$0xff]  ;;  %v21980_v47 = vld [vmem:[#allocation73_spill] sm:$0xff]  ;;  %v21981_v8 = vld [vmem:[#allocation76_spill] sm:$0xff] }
 0x310   :  { %v19583_v35 = vpop.permute.xlu0 %8036 }
 0x311   :  { %21973 = vst [vmem:[#allocation60_spill] sm:$0xff] %v19583_v35  ;;  %v6507_v35 = vpack.c.bf16 %v6492_v16, %v6491_v27  ;;  %v6494_v16 = vmul.f32 %v21980_v47, %v19594_v2  ;;  %v6493_v27 = vmul.f32 %v19596_v60, %v21981_v8  ;;  %v16175_v8 = vld [vmem:[%s21638_s4 + $0x48] sm:$0xff]  }
 0x312   :  { %16113 = vset.pattern.permute.xlu0 %v21696_v43 }
 0x313   :  { %v19592_v10 = vpop.permute.xlu1 %7980  ;;  %9448 = vperm.xlu0 %16113, %v19607_v13   ;;  %8972 = vperm.xlu1 %16108, %v21891_v53   ;;  %v21984_v53 = vld [vmem:[#allocation78_spill] sm:$0xff] }
 0x314   :  { %21977 = vst [vmem:[#allocation62_spill] sm:$0xff] %v19592_v10  ;;  %15224 = vmatmul.mubr.msk.bf16.gmra.mrb[12].mxu1 %vm5599_vm3, %v6256_v4  ;;  %v6495_v43 = vmul.f32 %v21984_v53, %v6415_v50  ;;  %v19647_v50 = vld [vmem:[#allocation6 + $0x49] sm:$0xff] }
 0x315   :  { %v19599_v29 = vpop.permute.xlu0 %8238  ;;  %15231 = vmatprep.mubr.msk.bf16.mxu1 %vm5599_vm3, %v6507_v35  ;;  %v19625_v35 = vld [vmem:[%s21635_s1 + $0x20] sm:$0xff] }
 0x316   :  { %21978 = vst [vmem:[#allocation58_spill] sm:$0xff] %v19599_v29  ;;  %v6508_v29 = vpack.c.bf16 %v6494_v16, %v6493_v27  ;;  %v6509_v51 = vpack.c.bf16 %v6496_v38, %v6495_v43  ;;  %v21988_v43 = vld [vmem:[#allocation80_spill] sm:$0xff]  ;;  %v21989_v27 = vld [vmem:[#allocation77_spill] sm:$0xff] }
 0x317   :  { %v19612_v12 = vpop.permute.xlu1 %7984  ;;  %9460 = vperm.xlu0 %16113, %v19625_v35   ;;  %8980 = vperm.xlu1 %16108, %v21895_v36  }
 0x318   :  { %21979 = vst [vmem:[#allocation59_spill] sm:$0xff] %v19612_v12  ;;  %v19637_v12 = vld [vmem:[#allocation6 + $0x41] sm:$0xff] }
 0x319   :  { %v19620_v4 = vpop.permute.xlu0 %8250  ;;  %v6498_v38 = vmul.f32 %v21989_v27, %v19637_v12 }
 0x31a   :  { %21983 = vst [vmem:[#allocation64_spill] sm:$0xff] %v19620_v4  ;;  %v19635_v4 = vld [vmem:[#allocation6 + $0x39] sm:$0xff] }
 0x31b   :  { %v19630_v47 = vpop.permute.xlu1 %7992  ;;  %9468 = vperm.xlu0 %16113, %v18944_v7   ;;  %v6497_v16 = vmul.f32 %v21988_v43, %v19635_v4  ;;  %v19662_v7 = vld [vmem:[%s21638_s4 + $0x50] sm:$0xff]   ;;  %v21992_v43 = vld [vmem:[#allocation82_spill] sm:$0xff] }
 0x31c   :  { %21985 = vst [vmem:[#allocation66_spill] sm:$0xff] %v19630_v47  ;;  %15232 = vmatmul.mubr.msk.bf16.vlgmr.msra.gmra.mrb[0].mxu1 %vm5599_vm3, %v6508_v29  ;;  %v19656_v29 = vld [vmem:[%s21635_s1 + $0x78] sm:$0xff]  ;;  %v6499_v27 = vmul.f32 %v21992_v43, %v19647_v50  ;;  %v21994_v47 = vmov 14  }
 0x31d   :  { %v19639_v10 = vpop.permute.xlu0 %8258  ;;  %15248 = vmatpush3.bf16.msra.mxu1 %v19501_v26  ;;  %15235 = vmatprep.mubr.msk.bf16.mxu1 %vm5599_vm3, %v6509_v51  ;;  %v21990_v26 = vld [vmem:[#allocation79_spill] sm:$0xff] }
 0x31e   :  { %21986 = vst [vmem:[#allocation61_spill] sm:$0xff] %v19639_v10  ;;  %8988 = vperm.xlu1 %16108, %v19656_v29   ;;  %15249 = vmatprep.subr.bf16.mxu1 %v16175_v8  ;;  %v6500_v53 = vmul.f32 %v21990_v26, %v19508_v58  ;;  %v21999_v26 = vld [vmem:[#allocation83_spill] sm:$0xff] }
 0x31f   :  { %v19645_v36 = vpop.permute.xlu1 %8000  ;;  %9476 = vperm.xlu0 %16113, %v18971_v45  }
 0x320   :  { %21987 = vst [vmem:[#allocation63_spill] sm:$0xff] %v19645_v36  ;;  %v6510_v36 = vpack.c.bf16 %v6498_v38, %v6497_v16  ;;  %v6511_v37 = vpack.c.bf16 %v6500_v53, %v6499_v27  ;;  %v6504_v53 = vmul.f32 %v21999_v26, %v19553_v55  ;;  %v6669_v55 = vld [vmem:[#allocation6 + $0xa] sm:$0xff] }
 0x321   :  { %v19666_v51 = vpop.permute.xlu0 %8266  ;;  %15250 = vmatpush3.bf16.msra.mxu1 %v16175_v8  ;;  %v21997_v8 = vld [vmem:[#allocation84_spill] sm:$0xff] }
 0x322   :  { %21991 = vst [vmem:[#allocation68_spill] sm:$0xff] %v19666_v51  ;;  %16111 = vset.pattern.permute.xlu1 %v21994_v47  ;;  %15267 = vmatprep.subr.bf16.mxu1 %v19662_v7  ;;  %v6501_v16 = vmul.f32 %v21997_v8, %v19510_v61  ;;  %v21998_v47 = vld [vmem:[#allocation81_spill] sm:$0xff]  ;;  %v19702_v8 = vld [vmem:[#allocation6 + $0x12] sm:$0xff] }
 0x323   :  { %v19671_v10 = vpop.permute.xlu1 %8008  ;;  %9190 = vperm.xlu1 %16111, %v19607_v13   ;;  %9484 = vperm.xlu0 %16113, %v21934_v34   ;;  %v6502_v38 = vmul.f32 %v21998_v47, %v19530_v52  ;;  %v19697_v61 = vld [vmem:[#allocation6 + $0x81] sm:$0xff]  ;;  %22005 = vst [vmem:[#allocation73_spill] sm:$0xff] %v19702_v8 }
 0x324   :  { %21993 = vst [vmem:[#allocation70_spill] sm:$0xff] %v19671_v10  ;;  %15236 = vmatmul.mubr.msk.bf16.gmra.mrb[4].mxu1 %vm5599_vm3, %v6510_v36  ;;  %v22001_v36 = vld [vmem:[#allocation87_spill] sm:$0xff]  ;;  %22003 = vst [vmem:[#allocation74_spill] sm:$0xff] %v19697_v61 }
 0x325   :  { %v19676_v17 = vpop.permute.xlu0 %8274  ;;  %15239 = vmatprep.mubr.msk.bf16.mxu1 %vm5599_vm3, %v6511_v37  ;;  %v6503_v37 = vmul.f32 %v22001_v36, %v19528_v54  ;;  %v19759_v10 = vld [vmem:[%s21635_s1 + $0x28] sm:$0xff] }
 0x326   :  { %21995 = vst [vmem:[#allocation65_spill] sm:$0xff] %v19676_v17  ;;  %v6512_v17 = vpack.c.bf16 %v6502_v38, %v6501_v16  ;;  %v22007_v16 = vld [vmem:[#allocation89_spill] sm:$0xff] }
 0x327   :  { %v19681_v58 = vpop.permute.xlu1 %8016  ;;  %9194 = vperm.xlu1 %16111, %v19376_v6   ;;  %9492 = vperm.xlu0 %16113, %v21939_v19   ;;  %v6513_v51 = vpack.c.bf16 %v6504_v53, %v6503_v37  ;;  %v6505_v47 = vmul.f32 %v22007_v16, %v19555_v44  ;;  %v22008_v38 = vld [vmem:[#allocation85_spill] sm:$0xff]  ;;  %v22009_v53 = vld [vmem:[#allocation91_spill] sm:$0xff]  ;;  %v22010_v37 = vld [vmem:[#allocation88_spill] sm:$0xff] }
 0x328   :  { %21996 = vst [vmem:[#allocation67_spill] sm:$0xff] %v19681_v58  ;;  %v6506_v26 = vmul.f32 %v22008_v38, %v19697_v61  ;;  %v6749_v36 = vmul.f32 %v22009_v53, %v6669_v55  ;;  %v19728_v44 = vld [vmem:[%s21635_s1] sm:$0xff]  ;;  %v21709_v61 = vmov 17  }
 0x329   :  { %v19690_v43 = vpop.permute.xlu0 %8282  ;;  %v6672_v38 = vld [vmem:[#allocation6 + $0x22] sm:$0xff]  ;;  %v19733_v53 = vld [vmem:[#allocation6 + $0x1a] sm:$0xff] }
 0x32a   :  { %22000 = vst [vmem:[#allocation72_spill] sm:$0xff] %v19690_v43  ;;  %v6514_v55 = vpack.c.bf16 %v6506_v26, %v6505_v47  ;;  %v6673_v47 = vld [vmem:[#allocation6 + $0x2a] sm:$0xff] }
 0x32b   :  { %v19695_v27 = vpop.permute.xlu1 %8024  ;;  %9202 = vperm.xlu1 %16111, %v19625_v35   ;;  %9500 = vperm.xlu0 %16113, %v21943_v5   ;;  %v22014_v26 = vld [vmem:[#allocation95_spill] sm:$0xff] }
 0x32c   :  { %22002 = vst [vmem:[#allocation71_spill] sm:$0xff] %v19695_v27  ;;  %15240 = vmatmul.mubr.msk.bf16.gmra.mrb[8].mxu1 %vm5599_vm3, %v6512_v17  ;;  %v19719_v17 = vld [vmem:[%s21635_s1 + $0x30] sm:$0xff] }
 0x32d   :  { %v19700_v52 = vpop.permute.xlu0 %8290  ;;  %15243 = vmatprep.mubr.msk.bf16.mxu1 %vm5599_vm3, %v6513_v51  ;;  %v21699_v51 = vmov 16  }
 0x32e   :  { %22004 = vst [vmem:[#allocation69_spill] sm:$0xff] %v19700_v52  ;;  %v6750_v52 = vmul.f32 %v19702_v8, %v22010_v37  ;;  %v19850_v8 = vld [vmem:[#allocation6 + $0x82] sm:$0xff] }
 0x32f   :  { %v19707_v54 = vpop.permute.xlu1 %8032  ;;  %9210 = vperm.xlu1 %16111, %v19719_v17   ;;  %16114 = vset.pattern.permute.xlu0 %v21699_v51 }
 0x330   :  { %22006 = vst [vmem:[#allocation76_spill] sm:$0xff] %v19707_v54  ;;  %9702 = vperm.xlu0 %16114, %v19728_v44   ;;  %v6765_v37 = vpack.c.bf16 %v6750_v52, %v6749_v36  ;;  %v6674_v54 = vld [vmem:[#allocation6 + $0x32] sm:$0xff]  ;;  %v22015_v52 = vld [vmem:[#allocation93_spill] sm:$0xff] }
 0x332   :  { %v19723_v43 = vpop.permute.xlu0 %8492 }
 0x333   :  { %22011 = vst [vmem:[#allocation75_spill] sm:$0xff] %v19723_v43  ;;  %9218 = vperm.xlu1 %16111, %v18971_v45   ;;  %v19743_v43 = vld [vmem:[%s21635_s1 + $0x18] sm:$0xff]  ;;  %v6751_v45 = vmul.f32 %v19733_v53, %v22015_v52 }
 0x334   :  { %v19731_v16 = vpop.permute.xlu1 %8234  ;;  %15244 = vmatmul.mubr.msk.bf16.gmra.mrb[12].mxu1 %vm5599_vm3, %v6514_v55  ;;  %9714 = vperm.xlu0 %16114, %v19743_v43   ;;  %v22017_v55 = vld [vmem:[#allocation97_spill] sm:$0xff] }
 0x335   :  { %22012 = vst [vmem:[#allocation78_spill] sm:$0xff] %v19731_v16  ;;  %15251 = vmatprep.mubr.msk.bf16.mxu1 %vm5599_vm3, %v6765_v37  ;;  %v6752_v16 = vmul.f32 %v22014_v26, %v6672_v38  ;;  %v6754_v27 = vmul.f32 %v22017_v55, %v6674_v54  ;;  %v16177_v54 = vld [vmem:[%s21638_s4 + $0x58] sm:$0xff]   ;;  %v6676_v55 = vld [vmem:[#allocation6 + $0x42] sm:$0xff] }
 0x336   :  { %v19737_v51 = vpop.permute.xlu0 %8504 }
 0x337   :  { %22013 = vst [vmem:[#allocation80_spill] sm:$0xff] %v19737_v51  ;;  %9226 = vperm.xlu1 %16111, %v21934_v34   ;;  %v22019_v51 = vld [vmem:[#allocation90_spill] sm:$0xff]  ;;  %v6766_v38 = vpack.c.bf16 %v6752_v16, %v6751_v45  ;;  %v19767_v34 = vld [vmem:[#allocation6 + $0x3a] sm:$0xff]  ;;  %v22025_v45 = vld [vmem:[#allocation92_spill] sm:$0xff] }
 0x338   :  { %v19749_v36 = vpop.permute.xlu1 %8242  ;;  %v6753_v58 = vmul.f32 %v22019_v51, %v6673_v47  ;;  %9722 = vperm.xlu0 %16114, %v19759_v10   ;;  %22021 = vst [vmem:[#allocation84_spill] sm:$0xff] %v19767_v34  ;;  %v19770_v51 = vld [vmem:[#allocation6 + $0x52] sm:$0xff]  ;;  %v19777_v47 = vld [vmem:[#allocation6 + $0x4a] sm:$0xff] }
 0x339   :  { %22016 = vst [vmem:[#allocation77_spill] sm:$0xff] %v19749_v36  ;;  %22022 = vst [vmem:[#allocation81_spill] sm:$0xff] %v19770_v51 }
 0x33a   :  { %v19753_v37 = vpop.permute.xlu0 %8512  ;;  %v6767_v52 = vpack.c.bf16 %v6754_v27, %v6753_v58  ;;  %22024 = vst [vmem:[#allocation87_spill] sm:$0xff] %v19777_v47  ;;  %v6755_v58 = vmul.f32 %v22025_v45, %v19767_v34  ;;  %v22026_v27 = vld [vmem:[#allocation100_spill] sm:$0xff] }
 0x33b   :  { %22018 = vst [vmem:[#allocation79_spill] sm:$0xff] %v19753_v37  ;;  %9234 = vperm.xlu1 %16111, %v21939_v19   ;;  %v6756_v37 = vmul.f32 %v22026_v27, %v6676_v55  ;;  %v19785_v19 = vld [vmem:[%s21635_s1 + $0x38] sm:$0xff]  ;;  %v22029_v55 = vld [vmem:[#allocation94_spill] sm:$0xff] }
 0x33c   :  { %v19762_v26 = vpop.permute.xlu1 %8246  ;;  %15252 = vmatmul.mubr.msk.bf16.vlgmr.msra.gmra.mrb[0].mxu1 %vm5599_vm3, %v6766_v38  ;;  %9730 = vperm.xlu0 %16114, %v19785_v19   ;;  %v22027_v38 = vld [vmem:[#allocation104_spill] sm:$0xff]  ;;  %v6757_v27 = vmul.f32 %v22029_v55, %v19777_v47  ;;  %v22041_v47 = vld [vmem:[#allocation99_spill] sm:$0xff] }
 0x33d   :  { %22020 = vst [vmem:[#allocation82_spill] sm:$0xff] %v19762_v26  ;;  %15268 = vmatpush3.bf16.msra.mxu1 %v19662_v7  ;;  %15255 = vmatprep.mubr.msk.bf16.mxu1 %vm5599_vm3, %v6767_v52  ;;  %v19791_v7 = vld [vmem:[%s21638_s4 + $0x60] sm:$0xff]   ;;  %v6758_v52 = vmul.f32 %v22027_v38, %v19770_v51  ;;  %v6768_v36 = vpack.c.bf16 %v6756_v37, %v6755_v58  ;;  %v19805_v26 = vld [vmem:[%s21635_s1 + $0x48] sm:$0xff]  ;;  %v22033_v51 = vmov 15  }
 0x33e   :  { %v19775_v16 = vpop.permute.xlu0 %8520  ;;  %15269 = vmatprep.subr.bf16.mxu1 %v16177_v54  ;;  %v19821_v58 = vld [vmem:[#allocation6 + $0x6a] sm:$0xff] }
 0x33f   :  { %22023 = vst [vmem:[#allocation83_spill] sm:$0xff] %v19775_v16  ;;  %9242 = vperm.xlu1 %16111, %v21943_v5   ;;  %v6769_v38 = vpack.c.bf16 %v6758_v52, %v6757_v27  ;;  %v19809_v5 = vld [vmem:[#allocation6 + $0x5a] sm:$0xff]  ;;  %22036 = vst [vmem:[#allocation97_spill] sm:$0xff] %v19821_v58  ;;  %v22037_v52 = vld [vmem:[#allocation96_spill] sm:$0xff] }
 0x340   :  { %v19796_v45 = vpop.permute.xlu1 %8254  ;;  %9738 = vperm.xlu0 %16114, %v19805_v26   ;;  %22031 = vst [vmem:[#allocation91_spill] sm:$0xff] %v19809_v5  ;;  %v6759_v55 = vmul.f32 %v22037_v52, %v19809_v5  ;;  %v22038_v27 = vld [vmem:[#allocation108_spill] sm:$0xff]  ;;  %v6761_v52 = vmul.f32 %v22041_v47, %v19821_v58 }
 0x341   :  { %22028 = vst [vmem:[#allocation89_spill] sm:$0xff] %v19796_v45  ;;  %15270 = vmatpush3.bf16.msra.mxu1 %v16177_v54  ;;  %v19811_v45 = vld [vmem:[#allocation6 + $0x62] sm:$0xff]  ;;  %v19814_v54 = vld [vmem:[#allocation6 + $0x72] sm:$0xff] }
 0x342   :  { %v19800_v16 = vpop.permute.xlu0 %8528  ;;  %15287 = vmatprep.subr.bf16.mxu1 %v19791_v7  ;;  %22032 = vst [vmem:[#allocation88_spill] sm:$0xff] %v19811_v45  ;;  %22034 = vst [vmem:[#allocation95_spill] sm:$0xff] %v19814_v54 }
 0x343   :  { %22030 = vst [vmem:[#allocation85_spill] sm:$0xff] %v19800_v16  ;;  %16112 = vset.pattern.permute.xlu1 %v22033_v51  ;;  %v6760_v16 = vmul.f32 %v22038_v27, %v19811_v45  ;;  %v19830_v51 = vld [vmem:[%s21635_s1 + $0x58] sm:$0xff]  ;;  %v19845_v45 = vld [vmem:[%s21635_s1 + $0x68] sm:$0xff] }
 0x344   :  { %15256 = vmatmul.mubr.msk.bf16.gmra.mrb[4].mxu1 %vm5599_vm3, %v6768_v36  ;;  %9444 = vperm.xlu1 %16112, %v19728_v44   ;;  %v19819_v37 = vpop.permute.xlu1 %8262 }
 0x345   :  { %15259 = vmatprep.mubr.msk.bf16.mxu1 %vm5599_vm3, %v6769_v38  ;;  %22035 = vst [vmem:[#allocation93_spill] sm:$0xff] %v19819_v37  ;;  %9746 = vperm.xlu0 %16114, %v19830_v51   ;;  %v22040_v38 = vld [vmem:[#allocation110_spill] sm:$0xff]  ;;  %v6770_v27 = vpack.c.bf16 %v6760_v16, %v6759_v55  ;;  %v22045_v55 = vld [vmem:[#allocation101_spill] sm:$0xff] }
 0x346   :  { %v19833_v36 = vpop.permute.xlu0 %8536  ;;  %v6762_v37 = vmul.f32 %v22040_v38, %v19814_v54 }
 0x347   :  { %22039 = vst [vmem:[#allocation90_spill] sm:$0xff] %v19833_v36  ;;  %v19848_v36 = vld [vmem:[#allocation6 + $0x7a] sm:$0xff] }
 0x348   :  { %9452 = vperm.xlu1 %16112, %v19376_v6   ;;  %v19840_v5 = vpop.permute.xlu1 %8270  ;;  %v6771_v34 = vpack.c.bf16 %v6762_v37, %v6761_v52  ;;  %v6763_v38 = vmul.f32 %v22045_v55, %v19848_v36  ;;  %v22047_v52 = vld [vmem:[#allocation107_spill] sm:$0xff] }
 0x349   :  { %22042 = vst [vmem:[#allocation92_spill] sm:$0xff] %v19840_v5  ;;  %9754 = vperm.xlu0 %16114, %v19845_v45   ;;  %v22046_v5 = vld [vmem:[#allocation112_spill] sm:$0xff]  ;;  %v7007_v58 = vmul.f32 %v22047_v52, %v19232_v23 }
 0x34a   :  { %v19854_v47 = vpop.permute.xlu0 %8544  ;;  %v6764_v37 = vmul.f32 %v22046_v5, %v19850_v8 }
 0x34b   :  { %22043 = vst [vmem:[#allocation100_spill] sm:$0xff] %v19854_v47 }
 0x34c   :  { %15260 = vmatmul.mubr.msk.bf16.gmra.mrb[8].mxu1 %vm5599_vm3, %v6770_v27  ;;  %9456 = vperm.xlu1 %16112, %v19743_v43   ;;  %v19857_v16 = vpop.permute.xlu1 %8278  ;;  %v22048_v27 = vld [vmem:[#allocation115_spill] sm:$0xff] }
 0x34d   :  { %15263 = vmatprep.mubr.msk.bf16.mxu1 %vm5599_vm3, %v6771_v34  ;;  %22044 = vst [vmem:[#allocation104_spill] sm:$0xff] %v19857_v16  ;;  %9762 = vperm.xlu0 %16114, %v19656_v29   ;;  %v7008_v54 = vmul.f32 %v22048_v27, %v19288_v62  ;;  %v6772_v34 = vpack.c.bf16 %v6764_v37, %v6763_v38  ;;  %v22050_v62 = vld [vmem:[#allocation109_spill] sm:$0xff]  ;;  %v22051_v38 = vld [vmem:[#allocation118_spill] sm:$0xff] }
 0x34e   :  { %v19871_v16 = vpop.permute.xlu0 %8552  ;;  %v7010_v5 = vmul.f32 %v22050_v62, %v19270_v48  ;;  %v7009_v37 = vmul.f32 %v22051_v38, %v19265_v56  ;;  %v16179_v27 = vld [vmem:[%s21638_s4 + $0x68] sm:$0xff]   ;;  %v22054_v48 = vld [vmem:[#allocation133_spill] sm:$0xff]  ;;  %v22057_v38 = vld [vmem:[#allocation116_spill] sm:$0xff] }
 0x34f   :  { %22049 = vst [vmem:[#allocation94_spill] sm:$0xff] %v19871_v16  ;;  %v7023_v55 = vpack.c.bf16 %v7008_v54, %v7007_v58  ;;  %v22053_v56 = vld [vmem:[#allocation134_spill] sm:$0xff]  ;;  %v22072_v16 = vld [vmem:[#allocation129_spill] sm:$0xff] }
 0x350   :  { %9464 = vperm.xlu1 %16112, %v19759_v10   ;;  %v19869_v47 = vpop.permute.xlu1 %8286  ;;  %v7024_v54 = vpack.c.bf16 %v7010_v5, %v7009_v37  ;;  %v16180_v5 = vld [vmem:[%s21638_s4 + $0x70] sm:$0xff]   ;;  %v7016_v37 = vmul.f32 %v22057_v38, %v19413_v3  ;;  %v22059_v38 = vpack.c.bf16 %v19107_v32, %v19103_v25  ;;  %v19946_v32 = vld [vmem:[%s21635_s1 + $0x60] sm:$0xff]  ;;  %v22065_v25 = vmov 16  }
 0x351   :  { %16117 = vset.pattern.permute.xlu0 %v21709_v61  ;;  %v19924_v3 = vld [vmem:[%s21635_s1 + $0x50] sm:$0xff] }
 0x352   :  { %9964 = vperm.xlu0 %16117, %v19607_v13  }
 0x353   :  { %v19885_v52 = vpop.permute.xlu0 %8932 }
 0x354   :  { %15264 = vmatmul.mubr.msk.bf16.gmra.mrb[12].mxu1 %vm5599_vm3, %v6772_v34  ;;  %9472 = vperm.xlu1 %16112, %v19785_v19   ;;  %v19878_v23 = vpop.permute.xlu1 %8294  ;;  %22052 = vst [vmem:[#allocation96_spill] sm:$0xff] %v19885_v52  ;;  %v22055_v34 = vpack.c.bf16 %v22053_v56, %v22054_v48 }
 0x355   :  { %15271 = vmatprep.mubr.msk.bf16.mxu1 %vm5599_vm3, %v7023_v55 }
 0x356   :  { %9976 = vperm.xlu0 %16117, %v19625_v35  }
 0x357   :  { %v19901_v55 = vpop.permute.xlu0 %8944 }
 0x358   :  { %9480 = vperm.xlu1 %16112, %v19805_v26   ;;  %22056 = vst [vmem:[#allocation108_spill] sm:$0xff] %v19901_v55  ;;  %v22064_v55 = vld [vmem:[#allocation121_spill] sm:$0xff] }
 0x359   :  { %v19888_v58 = vpop.permute.xlu1 %8496  ;;  %v7020_v52 = vmul.f32 %v22064_v55, %v19441_v39  ;;  %v19957_v55 = vld [vmem:[#allocation6 + $0x86] sm:$0xff] }
 0x35a   :  { %9984 = vperm.xlu0 %16117, %v19719_v17  }
 0x35c   :  { %15272 = vmatmul.mubr.msk.bf16.vlgmr.msra.gmra.mrb[0].mxu1 %vm5599_vm3, %v7024_v54  ;;  %9488 = vperm.xlu1 %16112, %v19830_v51   ;;  %v22058_v54 = vld [vmem:[#allocation123_spill] sm:$0xff]  ;;  %v19931_v61 = vpop.permute.xlu0 %8952 }
 0x35d   :  { %15288 = vmatpush3.bf16.msra.mxu1 %v19791_v7  ;;  %15275 = vmatprep.mubr.msk.bf16.mxu1 %vm5599_vm3, %v22055_v34  ;;  %v19903_v62 = vpop.permute.xlu1 %8500  ;;  %v19913_v7 = vld [vmem:[%s21635_s1 + $0x40] sm:$0xff]  ;;  %v7015_v56 = vmul.f32 %v22058_v54, %v19341_v42  ;;  %22060 = vst [vmem:[#allocation110_spill] sm:$0xff] %v19931_v61 }
 0x35e   :  { %15289 = vmatprep.subr.bf16.mxu1 %v16179_v27  ;;  %9992 = vperm.xlu0 %16117, %v19913_v7   ;;  %v22061_v42 = vld [vmem:[#allocation125_spill] sm:$0xff] }
 0x35f   :  { %v7027_v34 = vpack.c.bf16 %v7016_v37, %v7015_v56  ;;  %v22062_v37 = vld [vmem:[#allocation119_spill] sm:$0xff] }
 0x360   :  { %9496 = vperm.xlu1 %16112, %v19845_v45   ;;  %v7018_v54 = vmul.f32 %v22062_v37, %v19403_v40  ;;  %v19962_v37 = vld [vmem:[%s21635_s1 + $0x70] sm:$0xff] }
 0x361   :  { %15290 = vmatpush3.bf16.msra.mxu1 %v16179_v27  ;;  %v19919_v48 = vpop.permute.xlu1 %8508  ;;  %v7017_v27 = vmul.f32 %v22061_v42, %v19396_v11 }
 0x362   :  { %15307 = vmatprep.subr.bf16.mxu1 %v16180_v5  ;;  %10000 = vperm.xlu0 %16117, %v19924_v3  }
 0x363   :  { %v7028_v40 = vpack.c.bf16 %v7018_v54, %v7017_v27 }
 0x364   :  { %15276 = vmatmul.mubr.msk.bf16.gmra.mrb[4].mxu1 %vm5599_vm3, %v22059_v38  ;;  %9504 = vperm.xlu1 %16112, %v19656_v29   ;;  %v19953_v38 = vpop.permute.xlu0 %8960 }
 0x365   :  { %15279 = vmatprep.mubr.msk.bf16.mxu1 %vm5599_vm3, %v7027_v34  ;;  %v19939_v56 = vpop.permute.xlu1 %8516  ;;  %v22066_v34 = vld [vmem:[#allocation126_spill] sm:$0xff]  ;;  %22067 = vst [vmem:[#allocation101_spill] sm:$0xff] %v19953_v38  ;;  %v22071_v38 = vld [vmem:[#allocation124_spill] sm:$0xff] }
 0x366   :  { %22063 = vst [vmem:[#allocation99_spill] sm:$0xff] %v19939_v56  ;;  %10008 = vperm.xlu0 %16117, %v19946_v32   ;;  %v7019_v11 = vmul.f32 %v22066_v34, %v19401_v0  ;;  %v22069_v0 = vld [vmem:[#allocation127_spill] sm:$0xff]  ;;  %v21710_v56 = vmov 18  }
 0x367   :  { %v7021_v27 = vmul.f32 %v22069_v0, %v19435_v18 }
 0x368   :  { %16115 = vset.pattern.permute.xlu1 %v22065_v25  ;;  %v7029_v39 = vpack.c.bf16 %v7020_v52, %v7019_v11  ;;  %v7185_v25 = vld [vmem:[#allocation6 + $0xf] sm:$0xff]  ;;  %v22070_v52 = vld [vmem:[#allocation122_spill] sm:$0xff]  ;;  %v16248_v11 = vld [vmem:[#allocation6 + $0x17] sm:$0xff] }
 0x369   :  { %9706 = vperm.xlu1 %16115, %v19607_v13   ;;  %v19955_v42 = vpop.permute.xlu1 %8524  ;;  %v7022_v54 = vmul.f32 %v22070_v52, %v19957_v55  ;;  %v7266_v61 = vmul.f32 %v16248_v11, %v22071_v38  ;;  %v22077_v52 = vpack.c.bf16 %v19160_v46, %v19114_v30  ;;  %v22081_v46 = vld [vmem:[#allocation102_spill] sm:$0xff] }
 0x36a   :  { %22068 = vst [vmem:[#allocation112_spill] sm:$0xff] %v19955_v42  ;;  %10016 = vperm.xlu0 %16117, %v19962_v37   ;;  %v7265_v42 = vmul.f32 %v22072_v16, %v7185_v25 }
 0x36b   :  { %v7030_v18 = vpack.c.bf16 %v7022_v54, %v7021_v27  ;;  %v22076_v27 = vpack.c.bf16 %v19144_v21, %v19117_v14  ;;  %v16182_v54 = vld [vmem:[%s21638_s4 + $0x80] sm:$0xff]   ;;  %v22080_v21 = vpack.c.bf16 %v19174_v9, %v19165_v49  ;;  %v7443_v9 = vld [vmem:[#allocation6 + $0x10] sm:$0xff] }
 0x36c   :  { %15280 = vmatmul.mubr.msk.bf16.gmra.mrb[8].mxu1 %vm5599_vm3, %v7028_v40  ;;  %v19977_v40 = vpop.permute.xlu0 %8968  ;;  %v7281_v0 = vpack.c.bf16 %v7266_v61, %v7265_v42  ;;  %v16181_v61 = vld [vmem:[%s21638_s4 + $0x78] sm:$0xff]  }
 0x36d   :  { %15283 = vmatprep.mubr.msk.bf16.mxu1 %vm5599_vm3, %v7029_v39  ;;  %9710 = vperm.xlu1 %16115, %v19376_v6   ;;  %v19972_v34 = vpop.permute.xlu1 %8532  ;;  %22073 = vst [vmem:[#allocation107_spill] sm:$0xff] %v19977_v40  ;;  %v22096_v40 = vld [vmem:[#allocation103_spill] sm:$0xff] }
 0x36e   :  { %16118 = vset.pattern.permute.xlu0 %v21710_v56 }
 0x36f   :  { %10218 = vperm.xlu0 %16118, %v19728_v44  }
 0x370   :  { %v19987_v16 = vpop.permute.xlu0 %8976 }
 0x371   :  { %9718 = vperm.xlu1 %16115, %v19625_v35   ;;  %v19981_v39 = vpop.permute.xlu1 %8540  ;;  %22074 = vst [vmem:[#allocation115_spill] sm:$0xff] %v19987_v16 }
 0x373   :  { %10230 = vperm.xlu0 %16118, %v19743_v43  }
 0x374   :  { %15284 = vmatmul.mubr.msk.bf16.gmra.mrb[12].mxu1 %vm5599_vm3, %v7030_v18  ;;  %v19998_v25 = vpop.permute.xlu0 %8984 }
 0x375   :  { %15291 = vmatprep.mubr.msk.bf16.mxu1 %vm5599_vm3, %v7281_v0  ;;  %9726 = vperm.xlu1 %16115, %v19719_v17   ;;  %v19989_v38 = vpop.permute.xlu1 %8548  ;;  %22075 = vst [vmem:[#allocation109_spill] sm:$0xff] %v19998_v25  ;;  %v22095_v25 = vld [vmem:[#allocation135_spill] sm:$0xff] }
 0x376   :  { %v7523_v16 = vmul.f32 %v22095_v25, %v7443_v9  ;;  %v22102_v9 = vld [vmem:[#allocation52_spill] sm:$0xff] }
 0x377   :  { %10238 = vperm.xlu0 %16118, %v19759_v10  }
 0x378   :  { %v20016_v14 = vpop.permute.xlu0 %9186 }
 0x379   :  { %9734 = vperm.xlu1 %16115, %v19913_v7   ;;  %22079 = vst [vmem:[#allocation134_spill] sm:$0xff] %v20016_v14 }
 0x37a   :  { %v19996_v42 = vpop.permute.xlu1 %8928 }
 0x37b   :  { %10246 = vperm.xlu0 %16118, %v19785_v19  }
 0x37c   :  { %15292 = vmatmul.mubr.msk.bf16.vlgmr.msra.gmra.mrb[0].mxu1 %vm5599_vm3, %v22076_v27  ;;  %v20033_v0 = vpop.permute.xlu0 %9198  ;;  %v22087_v27 = vld [vmem:[#allocation114_spill] sm:$0xff] }
 0x37d   :  { %15308 = vmatpush3.bf16.msra.mxu1 %v16180_v5  ;;  %15295 = vmatprep.mubr.msk.bf16.mxu1 %vm5599_vm3, %v22077_v52  ;;  %v22082_v5 = vpack.c.bf16 %v19210_v28, %v22081_v46  ;;  %22084 = vst [vmem:[#allocation116_spill] sm:$0xff] %v20033_v0  ;;  %v22088_v52 = vld [vmem:[#allocation113_spill] sm:$0xff]  ;;  %v22090_v46 = vld [vmem:[#allocation50_spill] sm:$0xff]  ;;  %v22093_v0 = vld [vmem:[#allocation111_spill] sm:$0xff] }
 0x37e   :  { %9742 = vperm.xlu1 %16115, %v19924_v3   ;;  %15309 = vmatprep.subr.bf16.mxu1 %v16181_v61  ;;  %v20013_v11 = vpop.permute.xlu1 %8936  ;;  %v22089_v28 = vpack.c.bf16 %v22087_v27, %v22088_v52  ;;  %v22097_v52 = vld [vmem:[#allocation105_spill] sm:$0xff] }
 0x37f   :  { %22078 = vst [vmem:[#allocation118_spill] sm:$0xff] %v20013_v11  ;;  %10254 = vperm.xlu0 %16118, %v19805_v26  }
 0x380   :  { %v20050_v14 = vpop.permute.xlu0 %9206 }
 0x381   :  { %15310 = vmatpush3.bf16.msra.mxu1 %v16181_v61  ;;  %v22085_v61 = vmov 17   ;;  %22094 = vst [vmem:[#allocation125_spill] sm:$0xff] %v20050_v14  ;;  %v7458_v14 = vld [vmem:[#allocation6 + $0x88] sm:$0xff] }
 0x382   :  { %9750 = vperm.xlu1 %16115, %v19946_v32   ;;  %15327 = vmatprep.subr.bf16.mxu1 %v16182_v54  ;;  %v20019_v30 = vpop.permute.xlu1 %8940 }
 0x383   :  { %10262 = vperm.xlu0 %16118, %v19830_v51  }
 0x384   :  { %15296 = vmatmul.mubr.msk.bf16.gmra.mrb[4].mxu1 %vm5599_vm3, %v22080_v21  ;;  %v7200_v21 = vld [vmem:[#allocation6 + $0x87] sm:$0xff]  ;;  %v20063_v25 = vpop.permute.xlu0 %9214 }
 0x385   :  { %15299 = vmatprep.mubr.msk.bf16.mxu1 %vm5599_vm3, %v22082_v5  ;;  %v22091_v5 = vld [vmem:[#allocation53_spill] sm:$0xff]  ;;  %22099 = vst [vmem:[#allocation119_spill] sm:$0xff] %v20063_v25  ;;  %v21712_v25 = vmov 20  }
 0x386   :  { %9758 = vperm.xlu1 %16115, %v19962_v37   ;;  %v20031_v18 = vpop.permute.xlu1 %8948  ;;  %v22092_v56 = vpack.c.bf16 %v22090_v46, %v22091_v5  ;;  %v22104_v46 = vld [vmem:[#allocation35_spill] sm:$0xff]  ;;  %v22105_v5 = vld [vmem:[#allocation37_spill] sm:$0xff] }
 0x387   :  { %22083 = vst [vmem:[#allocation133_spill] sm:$0xff] %v20031_v18  ;;  %10270 = vperm.xlu0 %16118, %v19845_v45   ;;  %v21711_v18 = vmov 19  }
 0x38a   :  { %16116 = vset.pattern.permute.xlu1 %v22085_v61  ;;  %v20038_v49 = vpop.permute.xlu1 %8956  ;;  %v7280_v61 = vmul.f32 %v22093_v0, %v7200_v21 }
 0x38b   :  { %9960 = vperm.xlu1 %16116, %v19728_v44   ;;  %22086 = vst [vmem:[#allocation123_spill] sm:$0xff] %v20038_v49  ;;  %10278 = vperm.xlu0 %16118, %v19656_v29   ;;  %v7524_v49 = vmul.f32 %v22096_v40, %v19464_v24 }
 0x38c   :  { %15300 = vmatmul.mubr.msk.bf16.gmra.mrb[8].mxu1 %vm5599_vm3, %v22089_v28  ;;  %v22098_v28 = vld [vmem:[#allocation132_spill] sm:$0xff] }
 0x38d   :  { %15303 = vmatprep.mubr.msk.bf16.mxu1 %vm5599_vm3, %v22092_v56  ;;  %v7279_v11 = vmul.f32 %v22098_v28, %v22097_v52  ;;  %v7539_v0 = vpack.c.bf16 %v7524_v49, %v7523_v16  ;;  %v16183_v16 = vld [vmem:[%s21638_s4 + $0x88] sm:$0xff]   ;;  %v16184_v28 = vld [vmem:[%s21638_s4 + $0x90] sm:$0xff]  }
 0x38e   :  { %v20056_v27 = vpop.permute.xlu1 %8964  ;;  %v22101_v49 = vld [vmem:[#allocation51_spill] sm:$0xff] }
 0x38f   :  { %9968 = vperm.xlu1 %16116, %v19376_v6   ;;  %16121 = vset.pattern.permute.xlu0 %v21711_v18  ;;  %v7288_v56 = vpack.c.bf16 %v7280_v61, %v7279_v11  ;;  %v20074_v11 = vpop.permute.xlu0 %9222  ;;  %v22103_v21 = vpack.c.bf16 %v22101_v49, %v22102_v9  ;;  %v22106_v61 = vpack.c.bf16 %v22104_v46, %v22105_v5  ;;  %v22109_v49 = vld [vmem:[#allocation120_spill] sm:$0xff]  ;;  %v22112_v46 = vld [vmem:[#allocation86_spill] sm:$0xff] }
 0x390   :  { %10480 = vperm.xlu0 %16121, %v19607_v13   ;;  %22100 = vst [vmem:[#allocation121_spill] sm:$0xff] %v20074_v11 }
 0x392   :  { %v20066_v24 = vpop.permute.xlu1 %8972 }
 0x393   :  { %9972 = vperm.xlu1 %16116, %v19743_v43  }
 0x394   :  { %15304 = vmatmul.mubr.msk.bf16.gmra.mrb[12].mxu1 %vm5599_vm3, %v7288_v56  ;;  %10492 = vperm.xlu0 %16121, %v19625_v35   ;;  %v20095_v56 = vpop.permute.xlu0 %9230 }
 0x395   :  { %15311 = vmatprep.mubr.msk.bf16.mxu1 %vm5599_vm3, %v7539_v0  ;;  %22107 = vst [vmem:[#allocation126_spill] sm:$0xff] %v20095_v56  ;;  %v22108_v0 = vld [vmem:[#allocation55_spill] sm:$0xff] }
 0x396   :  { %v20071_v40 = vpop.permute.xlu1 %8980  ;;  %v22110_v9 = vpack.c.bf16 %v22108_v0, %v22109_v49  ;;  %v22117_v49 = vld [vmem:[#allocation39_spill] sm:$0xff] }
 0x397   :  { %9980 = vperm.xlu1 %16116, %v19759_v10   ;;  %v22123_v56 = vld [vmem:[#allocation43_spill] sm:$0xff] }
 0x398   :  { %10500 = vperm.xlu0 %16121, %v19719_v17   ;;  %v7537_v11 = vmul.f32 %v22123_v56, %v19569_v57 }
 0x39b   :  { %9988 = vperm.xlu1 %16116, %v19785_v19  }
 0x39c   :  { %15312 = vmatmul.mubr.msk.bf16.vlgmr.msra.gmra.mrb[0].mxu1 %vm5599_vm3, %v22103_v21  ;;  %10508 = vperm.xlu0 %16121, %v19913_v7   ;;  %v22111_v21 = vld [vmem:[#allocation36_spill] sm:$0xff] }
 0x39d   :  { %15328 = vmatpush3.bf16.msra.mxu1 %v16182_v54  ;;  %15315 = vmatprep.mubr.msk.bf16.mxu1 %vm5599_vm3, %v22106_v61  ;;  %v20088_v52 = vpop.permute.xlu1 %8988  ;;  %v22113_v5 = vpack.c.bf16 %v22111_v21, %v22112_v46  ;;  %v20109_v61 = vpop.permute.xlu0 %9238  ;;  %v22120_v46 = vld [vmem:[#allocation40_spill] sm:$0xff] }
 0x39e   :  { %15329 = vmatprep.subr.bf16.mxu1 %v16183_v16  ;;  %22114 = vst [vmem:[#allocation127_spill] sm:$0xff] %v20109_v61 }
 0x39f   :  { %9996 = vperm.xlu1 %16116, %v19805_v26  }
 0x3a0   :  { %10516 = vperm.xlu0 %16121, %v19924_v3  }
 0x3a1   :  { %15330 = vmatpush3.bf16.msra.mxu1 %v16183_v16  ;;  %v20117_v0 = vpop.permute.xlu0 %9246 }
 0x3a2   :  { %v20098_v54 = vpop.permute.xlu1 %9190  ;;  %15347 = vmatprep.subr.bf16.mxu1 %v16184_v28  ;;  %22116 = vst [vmem:[#allocation124_spill] sm:$0xff] %v20117_v0  ;;  %v22124_v0 = vld [vmem:[#allocation41_spill] sm:$0xff] }
 0x3a3   :  { %10004 = vperm.xlu1 %16116, %v19830_v51  }
 0x3a4   :  { %15316 = vmatmul.mubr.msk.bf16.gmra.mrb[4].mxu1 %vm5599_vm3, %v22110_v9  ;;  %10524 = vperm.xlu0 %16121, %v19946_v32   ;;  %v22118_v9 = vld [vmem:[#allocation34_spill] sm:$0xff] }
 0x3a5   :  { %15319 = vmatprep.mubr.msk.bf16.mxu1 %vm5599_vm3, %v22113_v5  ;;  %v22119_v18 = vpack.c.bf16 %v22117_v49, %v22118_v9  ;;  %v22121_v5 = vld [vmem:[#allocation42_spill] sm:$0xff]  ;;  %v20140_v57 = vpop.permute.xlu0 %9448 }
 0x3a6   :  { %v20112_v16 = vpop.permute.xlu1 %9194  ;;  %v22122_v61 = vpack.c.bf16 %v22120_v46, %v22121_v5  ;;  %v22126_v49 = vld [vmem:[#allocation106_spill] sm:$0xff] }
 0x3a7   :  { %22115 = vst [vmem:[#allocation122_spill] sm:$0xff] %v20112_v16  ;;  %10012 = vperm.xlu1 %16116, %v19845_v45   ;;  %v7781_v16 = vmul.f32 %v22124_v0, %v19574_v31  ;;  %v7538_v9 = vmul.f32 %v22126_v49, %v7458_v14  ;;  %v20147_v31 = vld [vmem:[#allocation6 + $0x29] sm:$0xff] }
 0x3a8   :  { %10532 = vperm.xlu0 %16121, %v19962_v37   ;;  %v7784_v14 = vmul.f32 %v19462_v59, %v20147_v31  ;;  %v16185_v59 = vld [vmem:[%s21638_s4 + $0x98] sm:$0xff]  }
 0x3a9   :  { %v7546_v5 = vpack.c.bf16 %v7538_v9, %v7537_v11  ;;  %v22128_v11 = vld [vmem:[#allocation128_spill] sm:$0xff]  ;;  %v20157_v0 = vpop.permute.xlu0 %9460  ;;  %v16186_v9 = vld [vmem:[%s21638_s4 + $0xa0] sm:$0xff]  }
 0x3aa   :  { %v20123_v21 = vpop.permute.xlu1 %9202  ;;  %22129 = vst [vmem:[#allocation129_spill] sm:$0xff] %v20157_v0 }
 0x3ab   :  { %10020 = vperm.xlu1 %16116, %v19656_v29  }
 0x3ac   :  { %15320 = vmatmul.mubr.msk.bf16.gmra.mrb[8].mxu1 %vm5599_vm3, %v22119_v18  ;;  %16122 = vset.pattern.permute.xlu0 %v21712_v25  ;;  %v22125_v18 = vmov 18  }
 0x3ad   :  { %15323 = vmatprep.mubr.msk.bf16.mxu1 %vm5599_vm3, %v22122_v61  ;;  %10734 = vperm.xlu0 %16122, %v19728_v44   ;;  %v22127_v61 = vld [vmem:[#allocation117_spill] sm:$0xff] }
 0x3ae   :  { %v7782_v46 = vmul.f32 %v22127_v61, %v19596_v60  ;;  %v20142_v56 = vpop.permute.xlu1 %9210  ;;  %v7786_v60 = vmul.f32 %v19477_v41, %v19635_v4  ;;  %v20173_v4 = vpop.permute.xlu0 %9468  ;;  %v22132_v61 = vld [vmem:[#allocation38_spill] sm:$0xff] }
 0x3af   :  { %16119 = vset.pattern.permute.xlu1 %v22125_v18  ;;  %22131 = vst [vmem:[#allocation102_spill] sm:$0xff] %v20173_v4 }
 0x3b0   :  { %10222 = vperm.xlu1 %16119, %v19607_v13   ;;  %v7797_v25 = vpack.c.bf16 %v7782_v46, %v7781_v16  ;;  %v7783_v16 = vmul.f32 %v22128_v11, %v19594_v2  ;;  %v7788_v2 = vmul.f32 %v19490_v22, %v19647_v50  ;;  %v7787_v46 = vmul.f32 %v22132_v61, %v19637_v12  ;;  %v22138_v11 = vld [vmem:[#allocation56_spill] sm:$0xff] }
 0x3b1   :  { %10746 = vperm.xlu0 %16122, %v19743_v43  }
 0x3b2   :  { %v20159_v18 = vpop.permute.xlu1 %9218  ;;  %v7798_v49 = vpack.c.bf16 %v7784_v14, %v7783_v16  ;;  %v20185_v22 = vpop.permute.xlu0 %9476 }
 0x3b3   :  { %22133 = vst [vmem:[#allocation114_spill] sm:$0xff] %v20185_v22 }
 0x3b4   :  { %15324 = vmatmul.mubr.msk.bf16.gmra.mrb[12].mxu1 %vm5599_vm3, %v7546_v5  ;;  %10226 = vperm.xlu1 %16119, %v19376_v6   ;;  %v22130_v6 = vld [vmem:[#allocation54_spill] sm:$0xff]  ;;  %v22134_v5 = vpack.c.bf16 %v19520_v20, %v19517_v1  ;;  %v22137_v20 = vld [vmem:[#allocation57_spill] sm:$0xff] }
 0x3b5   :  { %15331 = vmatprep.mubr.msk.bf16.mxu1 %vm5599_vm3, %v7797_v25  ;;  %10754 = vperm.xlu0 %16122, %v19759_v10   ;;  %v7785_v25 = vmul.f32 %v22130_v6, %v19601_v63  ;;  %v20207_v1 = vld [vmem:[#allocation6 + $0x89] sm:$0xff]  ;;  %v22139_v16 = vpack.c.bf16 %v22137_v20, %v22138_v11 }
 0x3b6   :  { %v20175_v63 = vpop.permute.xlu1 %9226  ;;  %v20197_v12 = vpop.permute.xlu0 %9484  ;;  %v22140_v6 = vld [vmem:[#allocation98_spill] sm:$0xff] }
 0x3b7   :  { %v7799_v41 = vpack.c.bf16 %v7786_v60, %v7785_v25  ;;  %22135 = vst [vmem:[#allocation113_spill] sm:$0xff] %v20197_v12  ;;  %v22136_v60 = vpack.c.bf16 %v19540_v15, %v19536_v33  ;;  %v7796_v25 = vmul.f32 %v22140_v6, %v20207_v1  ;;  %v22142_v33 = vld [vmem:[#allocation74_spill] sm:$0xff]  ;;  %v22143_v15 = vld [vmem:[#allocation44_spill] sm:$0xff] }
 0x3b8   :  { %10234 = vperm.xlu1 %16119, %v19625_v35   ;;  %v20237_v6 = vld [vmem:[%s21635_s1 + $0x10] sm:$0xff] }
 0x3b9   :  { %10762 = vperm.xlu0 %16122, %v19785_v19  }
 0x3ba   :  { %v20187_v50 = vpop.permute.xlu1 %9234  ;;  %v20220_v61 = vpop.permute.xlu0 %9492 }
 0x3bb   :  { %22144 = vst [vmem:[#allocation50_spill] sm:$0xff] %v20220_v61 }
 0x3bc   :  { %15332 = vmatmul.mubr.msk.bf16.vlgmr.msra.gmra.mrb[0].mxu1 %vm5599_vm3, %v7798_v49  ;;  %10242 = vperm.xlu1 %16119, %v19719_v17   ;;  %v22141_v49 = vld [vmem:[#allocation62_spill] sm:$0xff] }
 0x3bd   :  { %15348 = vmatpush3.bf16.msra.mxu1 %v16184_v28  ;;  %15335 = vmatprep.mubr.msk.bf16.mxu1 %vm5599_vm3, %v7799_v41  ;;  %v7800_v28 = vpack.c.bf16 %v7788_v2, %v7787_v46  ;;  %v21713_v41 = vmov 21   ;;  %v7795_v2 = vmul.f32 %v22143_v15, %v22142_v33 }
 0x3be   :  { %15349 = vmatprep.subr.bf16.mxu1 %v16185_v59  ;;  %10770 = vperm.xlu0 %16122, %v19805_v26   ;;  %v20199_v14 = vpop.permute.xlu1 %9242 }
 0x3c0   :  { %10250 = vperm.xlu1 %16119, %v19913_v7  }
 0x3c1   :  { %15350 = vmatpush3.bf16.msra.mxu1 %v16185_v59  ;;  %v8040_v59 = vmul.f32 %v22141_v49, %v19733_v53  ;;  %v7804_v53 = vpack.c.bf16 %v7796_v25, %v7795_v2  ;;  %v22148_v49 = vld [vmem:[#allocation59_spill] sm:$0xff]  ;;  %v20242_v25 = vld [vmem:[#allocation6 + $0x32] sm:$0xff] }
 0x3c2   :  { %15367 = vmatprep.subr.bf16.mxu1 %v16186_v9  ;;  %10778 = vperm.xlu0 %16122, %v19830_v51   ;;  %v20248_v2 = vld [vmem:[#allocation6 + $0x2a] sm:$0xff] }
 0x3c3   :  { %v20222_v46 = vpop.permute.xlu1 %9444 }
 0x3c4   :  { %15336 = vmatmul.mubr.msk.bf16.gmra.mrb[4].mxu1 %vm5599_vm3, %v7800_v28  ;;  %10258 = vperm.xlu1 %16119, %v19924_v3   ;;  %v22145_v28 = vmov 19  }
 0x3c5   :  { %15339 = vmatprep.mubr.msk.bf16.mxu1 %vm5599_vm3, %v22134_v5  ;;  %v22146_v5 = vld [vmem:[#allocation73_spill] sm:$0xff] }
 0x3c6   :  { %10786 = vperm.xlu0 %16122, %v19845_v45  }
 0x3c7   :  { %v20246_v15 = vpop.permute.xlu1 %9452 }
 0x3c8   :  { %10266 = vperm.xlu1 %16119, %v19946_v32   ;;  %22150 = vst [vmem:[#allocation111_spill] sm:$0xff] %v20246_v15 }
 0x3ca   :  { %10794 = vperm.xlu0 %16122, %v19656_v29  }
 0x3cb   :  { %v20263_v22 = vpop.permute.xlu1 %9456 }
 0x3cc   :  { %15340 = vmatmul.mubr.msk.bf16.gmra.mrb[8].mxu1 %vm5599_vm3, %v22136_v60  ;;  %10274 = vperm.xlu1 %16119, %v19962_v37   ;;  %v22147_v60 = vld [vmem:[#allocation46_spill] sm:$0xff]  ;;  %22156 = vst [vmem:[#allocation103_spill] sm:$0xff] %v20263_v22 }
 0x3cd   :  { %15343 = vmatprep.mubr.msk.bf16.mxu1 %vm5599_vm3, %v22139_v16  ;;  %v8039_v20 = vmul.f32 %v22147_v60, %v22146_v5  ;;  %v20231_v16 = vld [vmem:[#allocation6 + $0x22] sm:$0xff]  ;;  %v22152_v60 = vld [vmem:[#allocation47_spill] sm:$0xff] }
 0x3ce   :  { %16125 = vset.pattern.permute.xlu0 %v21713_v41  ;;  %v8041_v33 = vmul.f32 %v22148_v49, %v20231_v16 }
 0x3cf   :  { %10996 = vperm.xlu0 %16125, %v19607_v13   ;;  %v8055_v11 = vpack.c.bf16 %v8040_v59, %v8039_v20  ;;  %v20244_v59 = vpop.permute.xlu0 %9500  ;;  %v8042_v20 = vmul.f32 %v22152_v60, %v20248_v2  ;;  %v20287_v15 = vpop.permute.xlu1 %9464 }
 0x3d0   :  { %16120 = vset.pattern.permute.xlu1 %v22145_v28  ;;  %22149 = vst [vmem:[#allocation53_spill] sm:$0xff] %v20244_v59  ;;  %v22151_v28 = vld [vmem:[#allocation66_spill] sm:$0xff]  ;;  %22165 = vst [vmem:[#allocation132_spill] sm:$0xff] %v20287_v15 }
 0x3d1   :  { %10476 = vperm.xlu1 %16120, %v19728_v44   ;;  %v8043_v5 = vmul.f32 %v22151_v28, %v20242_v25  ;;  %v8056_v49 = vpack.c.bf16 %v8042_v20, %v8041_v33  ;;  %v16187_v59 = vld [vmem:[%s21638_s4 + $0xa8] sm:$0xff]  }
 0x3d2   :  { %v20267_v28 = vld [vmem:[#allocation6 + $0x42] sm:$0xff]  ;;  %v22157_v33 = vld [vmem:[#allocation63_spill] sm:$0xff] }
 0x3d3   :  { %11008 = vperm.xlu0 %16125, %v19625_v35   ;;  %v20261_v12 = vpop.permute.xlu0 %9702  ;;  %v8045_v60 = vmul.f32 %v22157_v33, %v20267_v28  ;;  %v22159_v20 = vld [vmem:[#allocation70_spill] sm:$0xff] }
 0x3d4   :  { %15344 = vmatmul.mubr.msk.bf16.gmra.mrb[12].mxu1 %vm5599_vm3, %v7804_v53  ;;  %v22153_v53 = vld [vmem:[#allocation84_spill] sm:$0xff]  ;;  %22155 = vst [vmem:[#allocation135_spill] sm:$0xff] %v20261_v12 }
 0x3d5   :  { %15351 = vmatprep.mubr.msk.bf16.mxu1 %vm5599_vm3, %v8055_v11  ;;  %10484 = vperm.xlu1 %16120, %v20237_v6   ;;  %v22154_v11 = vld [vmem:[#allocation45_spill] sm:$0xff] }
 0x3d6   :  { %v8044_v41 = vmul.f32 %v22154_v11, %v22153_v53  ;;  %v22160_v11 = vld [vmem:[#allocation87_spill] sm:$0xff] }
 0x3d7   :  { %11016 = vperm.xlu0 %16125, %v19719_v17   ;;  %v20285_v0 = vpop.permute.xlu0 %9714 }
 0x3d8   :  { %v8057_v61 = vpack.c.bf16 %v8044_v41, %v8043_v5  ;;  %v20276_v41 = vld [vmem:[%s21638_s4 + $0xb0] sm:$0xff]   ;;  %v22158_v5 = vld [vmem:[#allocation81_spill] sm:$0xff]  ;;  %22164 = vst [vmem:[#allocation105_spill] sm:$0xff] %v20285_v0 }
 0x3d9   :  { %10488 = vperm.xlu1 %16120, %v19743_v43   ;;  %v8047_v53 = vmul.f32 %v22159_v20, %v22158_v5  ;;  %v22166_v5 = vld [vmem:[#allocation88_spill] sm:$0xff]  ;;  %v22167_v20 = vld [vmem:[#allocation67_spill] sm:$0xff] }
 0x3db   :  { %11024 = vperm.xlu0 %16125, %v19913_v7   ;;  %v20301_v0 = vpop.permute.xlu0 %9722 }
 0x3dc   :  { %15352 = vmatmul.mubr.msk.bf16.vlgmr.msra.gmra.mrb[0].mxu1 %vm5599_vm3, %v8056_v49  ;;  %v22161_v49 = vld [vmem:[#allocation130_spill] sm:$0xff]  ;;  %22172 = vst [vmem:[#allocation51_spill] sm:$0xff] %v20301_v0 }
 0x3dd   :  { %15368 = vmatpush3.bf16.msra.mxu1 %v16186_v9  ;;  %15355 = vmatprep.mubr.msk.bf16.mxu1 %vm5599_vm3, %v8057_v61  ;;  %v8046_v12 = vmul.f32 %v22161_v49, %v22160_v11  ;;  %v22162_v9 = vld [vmem:[#allocation91_spill] sm:$0xff]  ;;  %v22163_v61 = vld [vmem:[#allocation48_spill] sm:$0xff]  ;;  %v8049_v11 = vmul.f32 %v22167_v20, %v22166_v5  ;;  %v22170_v49 = vld [vmem:[#allocation97_spill] sm:$0xff]  ;;  %v21714_v20 = vmov 22  }
 0x3de   :  { %10496 = vperm.xlu1 %16120, %v19759_v10   ;;  %15369 = vmatprep.subr.bf16.mxu1 %v16187_v59  ;;  %v8048_v4 = vmul.f32 %v22163_v61, %v22162_v9  ;;  %v22171_v9 = vld [vmem:[#allocation131_spill] sm:$0xff] }
 0x3df   :  { %11032 = vperm.xlu0 %16125, %v19924_v3   ;;  %v8058_v33 = vpack.c.bf16 %v8046_v12, %v8045_v60  ;;  %v22168_v12 = vld [vmem:[#allocation95_spill] sm:$0xff]  ;;  %v8050_v61 = vmul.f32 %v22171_v9, %v22170_v49  ;;  %v20315_v49 = vpop.permute.xlu0 %9730 }
 0x3e0   :  { %v8059_v22 = vpack.c.bf16 %v8048_v4, %v8047_v53  ;;  %v20303_v4 = vpop.permute.xlu1 %9472  ;;  %v22174_v53 = vld [vmem:[#allocation49_spill] sm:$0xff]  ;;  %22176 = vst [vmem:[#allocation35_spill] sm:$0xff] %v20315_v49 }
 0x3e1   :  { %15370 = vmatpush3.bf16.msra.mxu1 %v16187_v59  ;;  %v22169_v59 = vld [vmem:[#allocation71_spill] sm:$0xff]  ;;  %22173 = vst [vmem:[#allocation52_spill] sm:$0xff] %v20303_v4  ;;  %v22198_v4 = vld [vmem:[#allocation68_spill] sm:$0xff] }
 0x3e2   :  { %10504 = vperm.xlu1 %16120, %v19785_v19   ;;  %15387 = vmatprep.subr.bf16.mxu1 %v20276_v41  ;;  %v8051_v60 = vmul.f32 %v22169_v59, %v22168_v12  ;;  %v22175_v12 = vld [vmem:[#allocation76_spill] sm:$0xff] }
 0x3e3   :  { %11040 = vperm.xlu0 %16125, %v19946_v32   ;;  %v8053_v59 = vmul.f32 %v22175_v12, %v19850_v8  ;;  %v20328_v49 = vpop.permute.xlu0 %9738 }
 0x3e4   :  { %15356 = vmatmul.mubr.msk.bf16.gmra.mrb[4].mxu1 %vm5599_vm3, %v8058_v33  ;;  %v8060_v33 = vpack.c.bf16 %v8050_v61, %v8049_v11  ;;  %v20317_v9 = vpop.permute.xlu1 %9480  ;;  %v16250_v11 = vld [vmem:[#allocation6 + $0x16] sm:$0xff]  ;;  %22181 = vst [vmem:[#allocation55_spill] sm:$0xff] %v20328_v49 }
 0x3e5   :  { %15359 = vmatprep.mubr.msk.bf16.mxu1 %vm5599_vm3, %v8059_v22  ;;  %v8052_v22 = vmul.f32 %v22174_v53, %v19848_v36  ;;  %22177 = vst [vmem:[#allocation37_spill] sm:$0xff] %v20317_v9  ;;  %v20320_v36 = vld [vmem:[#allocation6 + $0x8a] sm:$0xff]  ;;  %v22179_v53 = vld [vmem:[#allocation60_spill] sm:$0xff] }
 0x3e6   :  { %10512 = vperm.xlu1 %16120, %v19805_v26   ;;  %v20333_v9 = vld [vmem:[#allocation6 + $0x2e] sm:$0xff] }
 0x3e7   :  { %11048 = vperm.xlu0 %16125, %v19962_v37   ;;  %v8061_v5 = vpack.c.bf16 %v8052_v22, %v8051_v60  ;;  %v22178_v60 = vld [vmem:[#allocation78_spill] sm:$0xff]  ;;  %v8054_v22 = vmul.f32 %v22179_v53, %v20320_v36  ;;  %22183 = vst [vmem:[#allocation36_spill] sm:$0xff] %v20333_v9 }
 0x3e8   :  { %v8297_v61 = vmul.f32 %v16250_v11, %v22178_v60  ;;  %v20330_v0 = vpop.permute.xlu1 %9488  ;;  %v22184_v11 = vld [vmem:[#allocation82_spill] sm:$0xff] }
 0x3e9   :  { %v8062_v8 = vpack.c.bf16 %v8054_v22, %v8053_v59  ;;  %22182 = vst [vmem:[#allocation120_spill] sm:$0xff] %v20330_v0  ;;  %v8300_v60 = vmul.f32 %v22184_v11, %v20333_v9  ;;  %v20339_v53 = vld [vmem:[#allocation6 + $0x3e] sm:$0xff]  ;;  %v22186_v59 = vmov 20   ;;  %v20354_v0 = vpop.permute.xlu0 %9746 }
 0x3ea   :  { %10520 = vperm.xlu1 %16120, %v19830_v51   ;;  %22185 = vst [vmem:[#allocation86_spill] sm:$0xff] %v20339_v53  ;;  %22190 = vst [vmem:[#allocation39_spill] sm:$0xff] %v20354_v0 }
 0x3eb   :  { %16126 = vset.pattern.permute.xlu0 %v21714_v20 }
 0x3ec   :  { %15360 = vmatmul.mubr.msk.bf16.gmra.mrb[8].mxu1 %vm5599_vm3, %v8060_v33  ;;  %11250 = vperm.xlu0 %16126, %v19728_v44   ;;  %v16251_v33 = vld [vmem:[#allocation6 + $0x1e] sm:$0xff] }
 0x3ed   :  { %15363 = vmatprep.mubr.msk.bf16.mxu1 %vm5599_vm3, %v8061_v5  ;;  %v22180_v5 = vld [vmem:[#allocation58_spill] sm:$0xff]  ;;  %v20384_v0 = vpop.permute.xlu0 %9754 }
 0x3ee   :  { %10528 = vperm.xlu1 %16120, %v19845_v45   ;;  %v8298_v20 = vmul.f32 %v16251_v33, %v22180_v5  ;;  %v20347_v33 = vld [vmem:[#allocation6 + $0x36] sm:$0xff]  ;;  %22196 = vst [vmem:[#allocation42_spill] sm:$0xff] %v20384_v0 }
 0x3ef   :  { %v22188_v5 = vld [vmem:[#allocation77_spill] sm:$0xff] }
 0x3f0   :  { %11262 = vperm.xlu0 %16126, %v19743_v43   ;;  %v8313_v12 = vpack.c.bf16 %v8298_v20, %v8297_v61  ;;  %v20342_v20 = vld [vmem:[#allocation6 + $0x26] sm:$0xff]  ;;  %v22187_v61 = vld [vmem:[#allocation89_spill] sm:$0xff] }
 0x3f1   :  { %v8302_v22 = vmul.f32 %v22187_v61, %v20339_v53  ;;  %v16189_v61 = vld [vmem:[%s21638_s4 + $0xb8] sm:$0xff]   ;;  %v20398_v0 = vpop.permute.xlu0 %9762 }
 0x3f2   :  { %10536 = vperm.xlu1 %16120, %v19656_v29   ;;  %22200 = vst [vmem:[#allocation41_spill] sm:$0xff] %v20398_v0 }
 0x3f4   :  { %15364 = vmatmul.mubr.msk.bf16.gmra.mrb[12].mxu1 %vm5599_vm3, %v8062_v8  ;;  %11270 = vperm.xlu0 %16126, %v19759_v10   ;;  %v8299_v8 = vmul.f32 %v22188_v5, %v20342_v20  ;;  %v20363_v5 = vld [vmem:[#allocation6 + $0x4e] sm:$0xff] }
 0x3f5   :  { %15371 = vmatprep.mubr.msk.bf16.mxu1 %vm5599_vm3, %v8313_v12  ;;  %v22189_v12 = vld [vmem:[#allocation64_spill] sm:$0xff]  ;;  %22192 = vst [vmem:[#allocation40_spill] sm:$0xff] %v20363_v5  ;;  %v20409_v0 = vpop.permute.xlu0 %9964 }
 0x3f6   :  { %16123 = vset.pattern.permute.xlu1 %v22186_v59  ;;  %v8301_v49 = vmul.f32 %v22189_v12, %v20347_v33  ;;  %v8314_v11 = vpack.c.bf16 %v8300_v60, %v8299_v8  ;;  %v20356_v59 = vpop.permute.xlu1 %9496  ;;  %v22193_v60 = vld [vmem:[#allocation93_spill] sm:$0xff]  ;;  %22204 = vst [vmem:[#allocation117_spill] sm:$0xff] %v20409_v0 }
 0x3f7   :  { %10738 = vperm.xlu1 %16123, %v19607_v13   ;;  %22191 = vst [vmem:[#allocation34_spill] sm:$0xff] %v20356_v59  ;;  %v8304_v8 = vmul.f32 %v22193_v60, %v20363_v5  ;;  %v20369_v12 = vld [vmem:[#allocation6 + $0x5e] sm:$0xff]  ;;  %v16252_v5 = vld [vmem:[#allocation6 + $0x56] sm:$0xff] }
 0x3f8   :  { %11278 = vperm.xlu0 %16126, %v19785_v19   ;;  %v8315_v13 = vpack.c.bf16 %v8302_v22, %v8301_v49  ;;  %v20375_v49 = vld [vmem:[%s21638_s4 + $0xc0] sm:$0xff]   ;;  %v8305_v53 = vmul.f32 %v16252_v5, %v22198_v4 }
 0x3f9   :  { %v20377_v22 = vld [vmem:[#allocation6 + $0x46] sm:$0xff] }
 0x3fa   :  { %v20386_v59 = vpop.permute.xlu1 %9504  ;;  %v16254_v5 = vld [vmem:[#allocation6 + $0x66] sm:$0xff] }
 0x3fb   :  { %10742 = vperm.xlu1 %16123, %v20237_v6   ;;  %22197 = vst [vmem:[#allocation43_spill] sm:$0xff] %v20386_v59 }
 0x3fc   :  { %15372 = vmatmul.mubr.msk.bf16.vlgmr.msra.gmra.mrb[0].mxu1 %vm5599_vm3, %v8314_v11  ;;  %11286 = vperm.xlu0 %16126, %v19805_v26   ;;  %v22194_v11 = vld [vmem:[#allocation92_spill] sm:$0xff] }
 0x3fd   :  { %15388 = vmatpush3.bf16.msra.mxu1 %v20276_v41  ;;  %15375 = vmatprep.mubr.msk.bf16.mxu1 %vm5599_vm3, %v8315_v13  ;;  %v8306_v41 = vmul.f32 %v22194_v11, %v20369_v12  ;;  %v22195_v13 = vld [vmem:[#allocation61_spill] sm:$0xff]  ;;  %v22199_v11 = vld [vmem:[#allocation104_spill] sm:$0xff] }
 0x3fe   :  { %15389 = vmatprep.subr.bf16.mxu1 %v16189_v61  ;;  %v8303_v60 = vmul.f32 %v22195_v13, %v20377_v22  ;;  %v20400_v4 = vpop.permute.xlu1 %9706 }
 0x3ff   :  { %10750 = vperm.xlu1 %16123, %v19625_v35   ;;  %v8317_v15 = vpack.c.bf16 %v8306_v41, %v8305_v53  ;;  %v20393_v35 = vld [vmem:[#allocation6 + $0x6e] sm:$0xff]  ;;  %22201 = vst [vmem:[#allocation106_spill] sm:$0xff] %v20400_v4  ;;  %v16255_v41 = vld [vmem:[#allocation6 + $0x76] sm:$0xff] }
 0x400   :  { %v8316_v9 = vpack.c.bf16 %v8304_v8, %v8303_v60  ;;  %11294 = vperm.xlu0 %16126, %v19830_v51   ;;  %v8308_v13 = vmul.f32 %v22199_v11, %v20393_v35  ;;  %v22203_v60 = vld [vmem:[#allocation72_spill] sm:$0xff] }
 0x401   :  { %15390 = vmatpush3.bf16.msra.mxu1 %v16189_v61  ;;  %v16253_v61 = vld [vmem:[#allocation6 + $0x7e] sm:$0xff] }
 0x402   :  { %15407 = vmatprep.subr.bf16.mxu1 %v20375_v49  ;;  %v8310_v53 = vmul.f32 %v16253_v61, %v19869_v47  ;;  %v20411_v4 = vpop.permute.xlu1 %9710  ;;  %v20414_v47 = vld [vmem:[#allocation6 + $0x8e] sm:$0xff] }
 0x403   :  { %10758 = vperm.xlu1 %16123, %v19719_v17   ;;  %v8312_v61 = vmul.f32 %v19878_v23, %v20414_v47 }
 0x404   :  { %15376 = vmatmul.mubr.msk.bf16.gmra.mrb[4].mxu1 %vm5599_vm3, %v8316_v9  ;;  %11302 = vperm.xlu0 %16126, %v19845_v45   ;;  %v22202_v9 = vld [vmem:[#allocation65_spill] sm:$0xff] }
 0x405   :  { %15379 = vmatprep.mubr.msk.bf16.mxu1 %vm5599_vm3, %v8317_v15  ;;  %v8307_v8 = vmul.f32 %v16254_v5, %v22202_v9  ;;  %v8309_v15 = vmul.f32 %v16255_v41, %v22203_v60  ;;  %v20419_v5 = vld [vmem:[#allocation6 + $0x1f] sm:$0xff]  ;;  %v8475_v9 = vld [vmem:[#allocation6 + $0x17] sm:$0xff] }
 0x407   :  { %10766 = vperm.xlu1 %16123, %v19913_v7   ;;  %v8318_v59 = vpack.c.bf16 %v8308_v13, %v8307_v8  ;;  %v8319_v11 = vpack.c.bf16 %v8310_v53, %v8309_v15  ;;  %v21718_v13 = vmov 23   ;;  %v20427_v53 = vld [vmem:[%s21635_s1 + $0x8] sm:$0xff]  ;;  %v20434_v15 = vpop.permute.xlu0 %9976 }
 0x408   :  { %11310 = vperm.xlu0 %16126, %v19656_v29   ;;  %v8556_v29 = vmul.f32 %v19888_v58, %v20419_v5  ;;  %v22206_v8 = vld [vmem:[#allocation75_spill] sm:$0xff]  ;;  %22207 = vst [vmem:[#allocation128_spill] sm:$0xff] %v20434_v15 }
 0x409   :  { %v8555_v41 = vmul.f32 %v22206_v8, %v8475_v9  ;;  %v22209_v9 = vmov 21   ;;  %v22210_v8 = vld [vmem:[#allocation80_spill] sm:$0xff] }
 0x40b   :  { %10774 = vperm.xlu1 %16123, %v19924_v3   ;;  %v8571_v58 = vpack.c.bf16 %v8556_v29, %v8555_v41  ;;  %v8478_v29 = vld [vmem:[#allocation6 + $0x2f] sm:$0xff]  ;;  %v20460_v15 = vpop.permute.xlu0 %9984 }
 0x40c   :  { %15380 = vmatmul.mubr.msk.bf16.gmra.mrb[8].mxu1 %vm5599_vm3, %v8318_v59  ;;  %16129 = vset.pattern.permute.xlu0 %v21718_v13  ;;  %v22205_v59 = vld [vmem:[#allocation69_spill] sm:$0xff]  ;;  %v8558_v41 = vmul.f32 %v22210_v8, %v8478_v29  ;;  %22211 = vst [vmem:[#allocation38_spill] sm:$0xff] %v20460_v15  ;;  %v20473_v29 = vld [vmem:[#allocation6 + $0x47] sm:$0xff] }
 0x40d   :  { %15383 = vmatprep.mubr.msk.bf16.mxu1 %vm5599_vm3, %v8319_v11  ;;  %11512 = vperm.xlu0 %16129, %v20427_v53   ;;  %v8311_v23 = vmul.f32 %v22205_v59, %v19957_v55  ;;  %v20436_v11 = vpop.permute.xlu1 %9718  ;;  %v20441_v13 = vld [vmem:[%s21635_s1 + $0x20] sm:$0xff]  ;;  %v20451_v59 = vld [vmem:[#allocation6 + $0x37] sm:$0xff]  ;;  %22214 = vst [vmem:[#allocation56_spill] sm:$0xff] %v20473_v29 }
 0x40e   :  { %22208 = vst [vmem:[#allocation54_spill] sm:$0xff] %v20436_v11  ;;  %v20446_v55 = vld [vmem:[#allocation6 + $0x27] sm:$0xff] }
 0x40f   :  { %10782 = vperm.xlu1 %16123, %v19946_v32   ;;  %v8320_v60 = vpack.c.bf16 %v8312_v61, %v8311_v23  ;;  %v8557_v61 = vmul.f32 %v19903_v62, %v20446_v55  ;;  %v8559_v23 = vmul.f32 %v19919_v48, %v20451_v59  ;;  %v22213_v62 = vld [vmem:[#allocation79_spill] sm:$0xff]  ;;  %v20481_v8 = vpop.permute.xlu0 %9992 }
 0x410   :  { %22216 = vst [vmem:[#allocation98_spill] sm:$0xff] %v20481_v8  ;;  %v22220_v8 = vld [vmem:[#allocation85_spill] sm:$0xff] }
 0x411   :  { %11524 = vperm.xlu0 %16129, %v20441_v13   ;;  %v8572_v11 = vpack.c.bf16 %v8558_v41, %v8557_v61 }
 0x413   :  { %10790 = vperm.xlu1 %16123, %v19962_v37  }
 0x414   :  { %15384 = vmatmul.mubr.msk.bf16.gmra.mrb[12].mxu1 %vm5599_vm3, %v8320_v60  ;;  %v20458_v60 = vld [vmem:[#allocation6 + $0x3f] sm:$0xff] }
 0x415   :  { %15391 = vmatprep.mubr.msk.bf16.mxu1 %vm5599_vm3, %v8571_v58  ;;  %11532 = vperm.xlu0 %16129, %v19719_v17   ;;  %v20462_v58 = vpop.permute.xlu1 %9726  ;;  %v8560_v0 = vmul.f32 %v22213_v62, %v20458_v60  ;;  %v16191_v17 = vld [vmem:[%s21638_s4 + $0xc8] sm:$0xff]  }
 0x416   :  { %22212 = vst [vmem:[#allocation57_spill] sm:$0xff] %v20462_v58  ;;  %v22219_v62 = vld [vmem:[#allocation83_spill] sm:$0xff] }
 0x417   :  { %16124 = vset.pattern.permute.xlu1 %v22209_v9  ;;  %v8573_v48 = vpack.c.bf16 %v8560_v0, %v8559_v23  ;;  %v20479_v9 = vld [vmem:[#allocation6 + $0x57] sm:$0xff]  ;;  %v8482_v23 = vld [vmem:[#allocation6 + $0x4f] sm:$0xff] }
 0x418   :  { %10992 = vperm.xlu1 %16124, %v19728_v44   ;;  %v22215_v44 = vld [vmem:[#allocation99_spill] sm:$0xff] }
 0x419   :  { %11540 = vperm.xlu0 %16129, %v19913_v7   ;;  %v8561_v61 = vmul.f32 %v22215_v44, %v20473_v29  ;;  %v20483_v0 = vpop.permute.xlu1 %9734  ;;  %v20494_v44 = vld [vmem:[#allocation6 + $0x5f] sm:$0xff]  ;;  %v20501_v29 = vpop.permute.xlu0 %10000 }
 0x41a   :  { %22217 = vst [vmem:[#allocation62_spill] sm:$0xff] %v20483_v0  ;;  %v8564_v15 = vmul.f32 %v22220_v8, %v20494_v44  ;;  %22221 = vst [vmem:[#allocation74_spill] sm:$0xff] %v20501_v29  ;;  %v22224_v8 = vld [vmem:[#allocation90_spill] sm:$0xff] }
 0x41c   :  { %15392 = vmatmul.mubr.msk.bf16.vlgmr.msra.gmra.mrb[0].mxu1 %vm5599_vm3, %v8572_v11  ;;  %11000 = vperm.xlu1 %16124, %v20237_v6   ;;  %v20488_v11 = vld [vmem:[%s21638_s4 + $0xd0] sm:$0xff]  }
 0x41d   :  { %15408 = vmatpush3.bf16.msra.mxu1 %v20375_v49  ;;  %15395 = vmatprep.mubr.msk.bf16.mxu1 %vm5599_vm3, %v8573_v48  ;;  %v22218_v49 = vld [vmem:[#allocation112_spill] sm:$0xff]  ;;  %v8562_v48 = vmul.f32 %v22219_v62, %v8482_v23  ;;  %v20507_v23 = vld [vmem:[#allocation6 + $0x67] sm:$0xff] }
 0x41e   :  { %15409 = vmatprep.subr.bf16.mxu1 %v16191_v17  ;;  %v8563_v41 = vmul.f32 %v22218_v49, %v20479_v9  ;;  %11548 = vperm.xlu0 %16129, %v19924_v3   ;;  %v20503_v49 = vpop.permute.xlu1 %9742 }
 0x41f   :  { %v8574_v0 = vpack.c.bf16 %v8562_v48, %v8561_v61  ;;  %22222 = vst [vmem:[#allocation44_spill] sm:$0xff] %v20503_v49  ;;  %v21720_v49 = vmov 24  }
 0x420   :  { %11004 = vperm.xlu1 %16124, %v19743_v43   ;;  %v8575_v58 = vpack.c.bf16 %v8564_v15, %v8563_v41  ;;  %v8565_v43 = vmul.f32 %v19972_v34, %v20507_v23  ;;  %v8486_v15 = vld [vmem:[#allocation6 + $0x6f] sm:$0xff] }
 0x421   :  { %15410 = vmatpush3.bf16.msra.mxu1 %v16191_v17  ;;  %v20512_v17 = vld [vmem:[#allocation6 + $0x77] sm:$0xff]  ;;  %v8566_v41 = vmul.f32 %v22224_v8, %v8486_v15  ;;  %v8490_v15 = vld [vmem:[#allocation6 + $0x8f] sm:$0xff] }
 0x422   :  { %15427 = vmatprep.subr.bf16.mxu1 %v20488_v11  ;;  %11556 = vperm.xlu0 %16129, %v19946_v32   ;;  %22223 = vst [vmem:[#allocation73_spill] sm:$0xff] %v20512_v17  ;;  %v8567_v61 = vmul.f32 %v19981_v39, %v20512_v17  ;;  %v20522_v29 = vpop.permute.xlu1 %9750  ;;  %v20529_v39 = vld [vmem:[%s21635_s1] sm:$0xff]  ;;  %v20678_v17 = vld [vmem:[#allocation6 + $0x88] sm:$0xff] }
 0x423   :  { %v8576_v48 = vpack.c.bf16 %v8566_v41, %v8565_v43  ;;  %22257 = vst [vmem:[#allocation93_spill] sm:$0xff] %v20678_v17 }
 0x424   :  { %15396 = vmatmul.mubr.msk.bf16.gmra.mrb[4].mxu1 %vm5599_vm3, %v8574_v0  ;;  %11012 = vperm.xlu1 %16124, %v19759_v10   ;;  %v16258_v10 = vld [vmem:[#allocation6 + $0x7f] sm:$0xff]  ;;  %v22225_v0 = vld [vmem:[#allocation100_spill] sm:$0xff] }
 0x425   :  { %15399 = vmatprep.mubr.msk.bf16.mxu1 %vm5599_vm3, %v8575_v58  ;;  %v8568_v62 = vmul.f32 %v16258_v10, %v22225_v0  ;;  %v20520_v58 = vpop.permute.xlu0 %10008  ;;  %v20543_v0 = vld [vmem:[#allocation6 + $0x20] sm:$0xff] }
 0x426   :  { %11564 = vperm.xlu0 %16129, %v19962_v37   ;;  %22226 = vst [vmem:[#allocation46_spill] sm:$0xff] %v20520_v58  ;;  %v20541_v10 = vpop.permute.xlu1 %9758  ;;  %22231 = vst [vmem:[#allocation84_spill] sm:$0xff] %v20543_v0 }
 0x427   :  { %v8577_v34 = vpack.c.bf16 %v8568_v62, %v8567_v61  ;;  %v22228_v61 = vld [vmem:[#allocation94_spill] sm:$0xff]  ;;  %22230 = vst [vmem:[#allocation47_spill] sm:$0xff] %v20541_v10  ;;  %v20548_v62 = vld [vmem:[%s21635_s1 + $0x18] sm:$0xff]  ;;  %v20663_v10 = vld [vmem:[%s21635_s1 + $0x30] sm:$0xff] }
 0x428   :  { %11020 = vperm.xlu1 %16124, %v19785_v19   ;;  %v20532_v19 = vld [vmem:[#allocation6 + $0x87] sm:$0xff]  ;;  %v8570_v8 = vmul.f32 %v22228_v61, %v8490_v15 }
 0x429   :  { %22227 = vst [vmem:[#allocation59_spill] sm:$0xff] %v20532_v19  ;;  %v8569_v43 = vmul.f32 %v19989_v38, %v20532_v19  ;;  %v20539_v41 = vpop.permute.xlu0 %10016  ;;  %v8733_v38 = vld [vmem:[#allocation6 + $0x18] sm:$0xff]  ;;  %v20568_v61 = vld [vmem:[#allocation6 + $0x40] sm:$0xff] }
 0x42a   :  { %16130 = vset.pattern.permute.xlu0 %v21720_v49  ;;  %22229 = vst [vmem:[#allocation66_spill] sm:$0xff] %v20539_v41  ;;  %22235 = vst [vmem:[#allocation70_spill] sm:$0xff] %v20568_v61  ;;  %v16193_v49 = vld [vmem:[%s21638_s4 + $0xd8] sm:$0xff]  }
 0x42b   :  { %11766 = vperm.xlu0 %16130, %v20529_v39  }
 0x42c   :  { %15400 = vmatmul.mubr.msk.bf16.gmra.mrb[8].mxu1 %vm5599_vm3, %v8576_v48  ;;  %11028 = vperm.xlu1 %16124, %v19805_v26   ;;  %v8578_v26 = vpack.c.bf16 %v8570_v8, %v8569_v43  ;;  %v8749_v48 = vpack.c.bf16 %v20543_v0, %v8733_v38  ;;  %v20566_v43 = vld [vmem:[#allocation6 + $0x30] sm:$0xff]  ;;  %v20573_v8 = vld [vmem:[%s21635_s1 + $0x38] sm:$0xff] }
 0x42d   :  { %15403 = vmatprep.mubr.msk.bf16.mxu1 %vm5599_vm3, %v8577_v34  ;;  %v20557_v34 = vld [vmem:[%s21635_s1 + $0x28] sm:$0xff]  ;;  %v20562_v15 = vpop.permute.xlu0 %10218  ;;  %22234 = vst [vmem:[#allocation81_spill] sm:$0xff] %v20566_v43  ;;  %v20584_v38 = vld [vmem:[#allocation6 + $0x38] sm:$0xff] }
 0x42e   :  { %22232 = vst [vmem:[#allocation45_spill] sm:$0xff] %v20562_v15  ;;  %22237 = vst [vmem:[#allocation130_spill] sm:$0xff] %v20584_v38  ;;  %v8751_v15 = vpack.c.bf16 %v20568_v61, %v20584_v38  ;;  %v20610_v61 = vld [vmem:[#allocation6 + $0x50] sm:$0xff]  ;;  %v20627_v38 = vld [vmem:[#allocation6 + $0x58] sm:$0xff] }
 0x42f   :  { %11778 = vperm.xlu0 %16130, %v20548_v62   ;;  %22241 = vst [vmem:[#allocation88_spill] sm:$0xff] %v20610_v61  ;;  %22246 = vst [vmem:[#allocation131_spill] sm:$0xff] %v20627_v38 }
 0x430   :  { %11036 = vperm.xlu1 %16124, %v19830_v51   ;;  %v20564_v51 = vpop.permute.xlu1 %9960 }
 0x431   :  { %22233 = vst [vmem:[#allocation63_spill] sm:$0xff] %v20564_v51  ;;  %v20593_v41 = vpop.permute.xlu0 %10230  ;;  %v20601_v51 = vld [vmem:[%s21635_s1 + $0x48] sm:$0xff] }
 0x432   :  { %22238 = vst [vmem:[#allocation91_spill] sm:$0xff] %v20593_v41  ;;  %v16194_v41 = vld [vmem:[%s21638_s4 + $0xe0] sm:$0xff]  }
 0x433   :  { %11786 = vperm.xlu0 %16130, %v20557_v34  }
 0x434   :  { %15404 = vmatmul.mubr.msk.bf16.gmra.mrb[12].mxu1 %vm5599_vm3, %v8578_v26  ;;  %11044 = vperm.xlu1 %16124, %v19845_v45   ;;  %v20576_v26 = vld [vmem:[#allocation6 + $0x28] sm:$0xff]  ;;  %v20581_v45 = vld [vmem:[%s21635_s1 + $0x78] sm:$0xff]  ;;  %v20595_v58 = vpop.permute.xlu1 %9968 }
 0x435   :  { %15411 = vmatprep.mubr.msk.bf16.mxu1 %vm5599_vm3, %v8749_v48  ;;  %22236 = vst [vmem:[#allocation87_spill] sm:$0xff] %v20576_v26  ;;  %v8750_v48 = vpack.c.bf16 %v20566_v43, %v20576_v26  ;;  %22239 = vst [vmem:[#allocation48_spill] sm:$0xff] %v20595_v58  ;;  %v22240_v43 = vmov 22   ;;  %v20618_v58 = vld [vmem:[%s21635_s1 + $0x58] sm:$0xff] }
 0x437   :  { %11794 = vperm.xlu0 %16130, %v20573_v8  }
 0x438   :  { %11052 = vperm.xlu1 %16124, %v20581_v45  }
 0x43b   :  { %11802 = vperm.xlu0 %16130, %v20601_v51  }
 0x43c   :  { %15412 = vmatmul.mubr.msk.bf16.vlgmr.msra.gmra.mrb[0].mxu1 %vm5599_vm3, %v8750_v48  ;;  %16127 = vset.pattern.permute.xlu1 %v22240_v43  ;;  %v20613_v48 = vld [vmem:[#allocation6 + $0x60] sm:$0xff]  ;;  %v20625_v43 = vpop.permute.xlu1 %9972 }
 0x43d   :  { %15428 = vmatpush3.bf16.msra.mxu1 %v20488_v11  ;;  %15415 = vmatprep.mubr.msk.bf16.mxu1 %vm5599_vm3, %v8751_v15  ;;  %22242 = vst [vmem:[#allocation67_spill] sm:$0xff] %v20613_v48  ;;  %v20621_v11 = vld [vmem:[#allocation6 + $0x48] sm:$0xff]  ;;  %v20623_v15 = vpop.permute.xlu0 %10238  ;;  %22245 = vst [vmem:[#allocation97_spill] sm:$0xff] %v20625_v43  ;;  %v8753_v0 = vpack.c.bf16 %v20613_v48, %v20627_v38 }
 0x43e   :  { %15429 = vmatprep.subr.bf16.mxu1 %v16193_v49  ;;  %11254 = vperm.xlu1 %16127, %v20427_v53   ;;  %22243 = vst [vmem:[#allocation95_spill] sm:$0xff] %v20621_v11  ;;  %22244 = vst [vmem:[#allocation71_spill] sm:$0xff] %v20623_v15  ;;  %v8752_v26 = vpack.c.bf16 %v20610_v61, %v20621_v11  ;;  %v20642_v15 = vld [vmem:[#allocation6 + $0x70] sm:$0xff]  ;;  %v20645_v61 = vld [vmem:[#allocation6 + $0x80] sm:$0xff] }
 0x43f   :  { %11810 = vperm.xlu0 %16130, %v20618_v58   ;;  %22247 = vst [vmem:[#allocation49_spill] sm:$0xff] %v20642_v15  ;;  %22248 = vst [vmem:[#allocation76_spill] sm:$0xff] %v20645_v61  ;;  %v20654_v11 = vld [vmem:[#allocation6 + $0x78] sm:$0xff] }
 0x440   :  { %v20649_v38 = vpop.permute.xlu1 %9980  ;;  %22252 = vst [vmem:[#allocation82_spill] sm:$0xff] %v20654_v11 }
 0x441   :  { %15430 = vmatpush3.bf16.msra.mxu1 %v16193_v49  ;;  %v20638_v49 = vld [vmem:[%s21635_s1 + $0x68] sm:$0xff]  ;;  %v20647_v48 = vpop.permute.xlu0 %10246  ;;  %22250 = vst [vmem:[#allocation60_spill] sm:$0xff] %v20649_v38  ;;  %v16268_v38 = vld [vmem:[#allocation6 + $0x19] sm:$0xff] }
 0x442   :  { %15447 = vmatprep.subr.bf16.mxu1 %v16194_v41  ;;  %11258 = vperm.xlu1 %16127, %v20237_v6   ;;  %22249 = vst [vmem:[#allocation78_spill] sm:$0xff] %v20647_v48  ;;  %v8991_v19 = vmul.f32 %v16268_v38, %v19996_v42  ;;  %v20686_v42 = vld [vmem:[#allocation6 + $0x31] sm:$0xff]  ;;  %v20691_v38 = vld [vmem:[#allocation6 + $0x41] sm:$0xff] }
 0x443   :  { %11818 = vperm.xlu0 %16130, %v20638_v49   ;;  %22258 = vst [vmem:[#allocation92_spill] sm:$0xff] %v20686_v42 }
 0x444   :  { %15416 = vmatmul.mubr.msk.bf16.gmra.mrb[4].mxu1 %vm5599_vm3, %v8752_v26  ;;  %v20652_v26 = vld [vmem:[#allocation6 + $0x68] sm:$0xff]  ;;  %v20668_v48 = vpop.permute.xlu1 %9988 }
 0x445   :  { %15419 = vmatprep.mubr.msk.bf16.mxu1 %vm5599_vm3, %v8753_v0  ;;  %22251 = vst [vmem:[#allocation58_spill] sm:$0xff] %v20652_v26  ;;  %v8754_v43 = vpack.c.bf16 %v20642_v15, %v20652_v26  ;;  %v8755_v0 = vpack.c.bf16 %v20645_v61, %v20654_v11  ;;  %22253 = vst [vmem:[#allocation89_spill] sm:$0xff] %v20668_v48  ;;  %v20671_v15 = vld [vmem:[#allocation6 + $0x90] sm:$0xff]  ;;  %v20674_v61 = vld [vmem:[#allocation6 + $0x21] sm:$0xff] }
 0x446   :  { %11266 = vperm.xlu1 %16127, %v20441_v13   ;;  %22254 = vst [vmem:[#allocation77_spill] sm:$0xff] %v20671_v15  ;;  %22255 = vst [vmem:[#allocation64_spill] sm:$0xff] %v20674_v61  ;;  %v22256_v11 = vld [vmem:[#allocation96_spill] sm:$0xff] }
 0x447   :  { %11826 = vperm.xlu0 %16130, %v20581_v45   ;;  %v8992_v26 = vmul.f32 %v22256_v11, %v20674_v61  ;;  %v22259_v11 = vld [vmem:[#allocation133_spill] sm:$0xff] }
 0x448   :  { %v20683_v48 = vpop.permute.xlu1 %9996  ;;  %v8996_v61 = vmul.f32 %v22259_v11, %v20691_v38 }
 0x44a   :  { %11274 = vperm.xlu1 %16127, %v20663_v10  }
 0x44c   :  { %15420 = vmatmul.mubr.msk.bf16.gmra.mrb[8].mxu1 %vm5599_vm3, %v8754_v43  ;;  %v8756_v43 = vpack.c.bf16 %v20671_v15, %v20678_v17 }
 0x44d   :  { %15423 = vmatprep.mubr.msk.bf16.mxu1 %vm5599_vm3, %v8755_v0  ;;  %v9007_v0 = vpack.c.bf16 %v8992_v26, %v8991_v19  ;;  %v20696_v19 = vld [vmem:[#allocation6 + $0x39] sm:$0xff] }
 0x44e   :  { %11282 = vperm.xlu1 %16127, %v19913_v7   ;;  %v8994_v7 = vmul.f32 %v20019_v30, %v20686_v42  ;;  %22260 = vst [vmem:[#allocation61_spill] sm:$0xff] %v20696_v19  ;;  %v16195_v30 = vld [vmem:[%s21638_s4 + $0xe8] sm:$0xff]  }
 0x452   :  { %11290 = vperm.xlu1 %16127, %v19924_v3   ;;  %v22261_v3 = vld [vmem:[#allocation118_spill] sm:$0xff] }
 0x453   :  { %v8993_v26 = vmul.f32 %v22261_v3, %v20147_v31  ;;  %v22264_v31 = vld [vmem:[#allocation123_spill] sm:$0xff] }
 0x454   :  { %15424 = vmatmul.mubr.msk.bf16.gmra.mrb[12].mxu1 %vm5599_vm3, %v8756_v43  ;;  %v22262_v43 = vld [vmem:[#allocation108_spill] sm:$0xff] }
 0x455   :  { %15431 = vmatprep.mubr.msk.bf16.mxu1 %vm5599_vm3, %v9007_v0  ;;  %v8995_v15 = vmul.f32 %v22262_v43, %v20696_v19  ;;  %v9008_v17 = vpack.c.bf16 %v8994_v7, %v8993_v26  ;;  %v20702_v0 = vpop.permute.xlu1 %10004  ;;  %v20714_v7 = vld [vmem:[#allocation6 + $0x61] sm:$0xff]  ;;  %v16196_v3 = vld [vmem:[%s21638_s4 + $0xf0] sm:$0xff]  }
 0x456   :  { %11298 = vperm.xlu1 %16127, %v19946_v32   ;;  %v20709_v32 = vld [vmem:[#allocation6 + $0x51] sm:$0xff]  ;;  %v22268_v43 = vld [vmem:[#allocation101_spill] sm:$0xff] }
 0x457   :  { %v9009_v42 = vpack.c.bf16 %v8996_v61, %v8995_v15  ;;  %22263 = vst [vmem:[#allocation68_spill] sm:$0xff] %v20709_v32  ;;  %v8998_v11 = vmul.f32 %v22264_v31, %v20709_v32  ;;  %v20719_v61 = vld [vmem:[#allocation6 + $0x49] sm:$0xff] }
 0x459   :  { %v20728_v26 = vpop.permute.xlu1 %10012 }
 0x45a   :  { %11306 = vperm.xlu1 %16127, %v19962_v37   ;;  %v9000_v37 = vmul.f32 %v20056_v27, %v20714_v7  ;;  %v20735_v27 = vld [vmem:[#allocation6 + $0x71] sm:$0xff] }
 0x45b   :  { %22269 = vst [vmem:[#allocation65_spill] sm:$0xff] %v20735_v27 }
 0x45c   :  { %15432 = vmatmul.mubr.msk.bf16.vlgmr.msra.gmra.mrb[0].mxu1 %vm5599_vm3, %v9008_v17  ;;  %v22265_v17 = vmov 23  }
 0x45d   :  { %15448 = vmatpush3.bf16.msra.mxu1 %v16194_v41  ;;  %15435 = vmatprep.mubr.msk.bf16.mxu1 %vm5599_vm3, %v9009_v42  ;;  %v22266_v41 = vld [vmem:[#allocation110_spill] sm:$0xff]  ;;  %v20726_v42 = vld [vmem:[#allocation6 + $0x59] sm:$0xff] }
 0x45e   :  { %15449 = vmatprep.subr.bf16.mxu1 %v16195_v30  ;;  %16128 = vset.pattern.permute.xlu1 %v22265_v17  ;;  %v8997_v15 = vmul.f32 %v22266_v41, %v20719_v61  ;;  %22267 = vst [vmem:[#allocation104_spill] sm:$0xff] %v20726_v42  ;;  %v8999_v31 = vmul.f32 %v22268_v43, %v20726_v42  ;;  %v20740_v41 = vld [vmem:[#allocation6 + $0x81] sm:$0xff]  ;;  %v20744_v43 = vld [vmem:[#allocation6 + $0x69] sm:$0xff]  ;;  %v20759_v42 = vld [vmem:[#allocation6 + $0x91] sm:$0xff] }
 0x45f   :  { %11508 = vperm.xlu1 %16128, %v20529_v39   ;;  %v9002_v17 = vmul.f32 %v20066_v24, %v20735_v27  ;;  %v20742_v39 = vpop.permute.xlu1 %10020 }
 0x460   :  { %v9010_v32 = vpack.c.bf16 %v8998_v11, %v8997_v15  ;;  %v9011_v19 = vpack.c.bf16 %v9000_v37, %v8999_v31  ;;  %v20750_v37 = vld [vmem:[#allocation6 + $0x79] sm:$0xff] }
 0x461   :  { %15450 = vmatpush3.bf16.msra.mxu1 %v16195_v30  ;;  %v9004_v30 = vmul.f32 %v20071_v40, %v20740_v41  ;;  %v9006_v40 = vmul.f32 %v20088_v52, %v20759_v42  ;;  %v22274_v52 = vld [vmem:[#allocation122_spill] sm:$0xff] }
 0x462   :  { %15467 = vmatprep.subr.bf16.mxu1 %v16196_v3 }
 0x463   :  { %11516 = vperm.xlu1 %16128, %v20237_v6   ;;  %v20755_v27 = vpop.permute.xlu1 %10222 }
 0x464   :  { %15436 = vmatmul.mubr.msk.bf16.gmra.mrb[4].mxu1 %vm5599_vm3, %v9010_v32  ;;  %v22270_v32 = vld [vmem:[#allocation107_spill] sm:$0xff] }
 0x465   :  { %15439 = vmatprep.mubr.msk.bf16.mxu1 %vm5599_vm3, %v9011_v19  ;;  %v9001_v11 = vmul.f32 %v22270_v32, %v20744_v43  ;;  %v22271_v19 = vld [vmem:[#allocation115_spill] sm:$0xff]  ;;  %v22272_v32 = vld [vmem:[#allocation109_spill] sm:$0xff] }
 0x466   :  { %v9003_v15 = vmul.f32 %v22271_v19, %v20750_v37 }
 0x467   :  { %11520 = vperm.xlu1 %16128, %v20548_v62   ;;  %v9012_v24 = vpack.c.bf16 %v9002_v17, %v9001_v11  ;;  %v9250_v62 = vmul.f32 %v20098_v54, %v20231_v16  ;;  %v9005_v17 = vmul.f32 %v22272_v32, %v20207_v1  ;;  %v22273_v11 = vld [vmem:[#allocation134_spill] sm:$0xff]  ;;  %v9251_v54 = vmul.f32 %v22274_v52, %v20248_v2  ;;  %v20777_v16 = vld [vmem:[#allocation6 + $0x3a] sm:$0xff] }
 0x468   :  { %v9013_v31 = vpack.c.bf16 %v9004_v30, %v9003_v15  ;;  %v16269_v30 = vld [vmem:[#allocation6 + $0x1a] sm:$0xff]  ;;  %v9253_v1 = vmul.f32 %v20123_v21, %v20777_v16  ;;  %v20793_v21 = vld [vmem:[#allocation6 + $0x4a] sm:$0xff] }
 0x469   :  { %v9249_v19 = vmul.f32 %v16269_v30, %v22273_v11  ;;  %v9014_v15 = vpack.c.bf16 %v9006_v40, %v9005_v17  ;;  %v16197_v2 = vld [vmem:[%s21638_s4 + $0xf8] sm:$0xff]   ;;  %v16198_v30 = vld [vmem:[%s21638_s4 + $0x100] sm:$0xff]  }
 0x46a   :  { %v20805_v11 = vld [vmem:[#allocation6 + $0x52] sm:$0xff] }
 0x46b   :  { %11528 = vperm.xlu1 %16128, %v20557_v34   ;;  %v20770_v34 = vpop.permute.xlu1 %10226 }
 0x46c   :  { %15440 = vmatmul.mubr.msk.bf16.gmra.mrb[8].mxu1 %vm5599_vm3, %v9012_v24  ;;  %v9265_v24 = vpack.c.bf16 %v9250_v62, %v9249_v19  ;;  %v22276_v62 = vld [vmem:[#allocation125_spill] sm:$0xff] }
 0x46d   :  { %15443 = vmatprep.mubr.msk.bf16.mxu1 %vm5599_vm3, %v9013_v31 }
 0x46f   :  { %11536 = vperm.xlu1 %16128, %v20573_v8   ;;  %v22275_v8 = vld [vmem:[#allocation116_spill] sm:$0xff]  ;;  %v20783_v40 = vpop.permute.xlu1 %10234 }
 0x470   :  { %v9252_v31 = vmul.f32 %v22275_v8, %v20242_v25  ;;  %v9255_v25 = vmul.f32 %v20142_v56, %v20793_v21  ;;  %v22278_v56 = vld [vmem:[#allocation121_spill] sm:$0xff]  ;;  %v22279_v8 = vmov 24  }
 0x472   :  { %v9266_v32 = vpack.c.bf16 %v9252_v31, %v9251_v54  ;;  %v20826_v31 = vld [vmem:[#allocation6 + $0x7a] sm:$0xff] }
 0x473   :  { %11544 = vperm.xlu1 %16128, %v20601_v51   ;;  %v9254_v51 = vmul.f32 %v22276_v62, %v20267_v28  ;;  %v20800_v28 = vpop.permute.xlu1 %10242  ;;  %v20828_v62 = vld [vmem:[#allocation6 + $0x72] sm:$0xff] }
 0x474   :  { %15444 = vmatmul.mubr.msk.bf16.gmra.mrb[12].mxu1 %vm5599_vm3, %v9014_v15  ;;  %v20811_v15 = vld [vmem:[#allocation6 + $0x62] sm:$0xff] }
 0x475   :  { %15451 = vmatprep.mubr.msk.bf16.mxu1 %vm5599_vm3, %v9265_v24  ;;  %v9267_v17 = vpack.c.bf16 %v9254_v51, %v9253_v1  ;;  %v9258_v24 = vmul.f32 %v22278_v56, %v20811_v15  ;;  %v9261_v51 = vmul.f32 %v20187_v50, %v20826_v31  ;;  %v9263_v50 = vmul.f32 %v20199_v14, %v20320_v36  ;;  %v20846_v56 = vld [vmem:[#allocation6 + $0x92] sm:$0xff]  ;;  %v16270_v14 = vld [vmem:[%s21635_s1 + $0x40] sm:$0xff] }
 0x476   :  { %22282 = vst [vmem:[#allocation72_spill] sm:$0xff] %v20846_v56 }
 0x477   :  { %11552 = vperm.xlu1 %16128, %v20618_v58   ;;  %v20798_v58 = vld [vmem:[#allocation6 + $0x5a] sm:$0xff]  ;;  %v20816_v1 = vpop.permute.xlu1 %10250 }
 0x47b   :  { %11560 = vperm.xlu1 %16128, %v20638_v49   ;;  %v9257_v49 = vmul.f32 %v20159_v18, %v20798_v58  ;;  %v20820_v18 = vld [vmem:[#allocation6 + $0x6a] sm:$0xff] }
 0x47c   :  { %15452 = vmatmul.mubr.msk.bf16.vlgmr.msra.gmra.mrb[0].mxu1 %vm5599_vm3, %v9266_v32  ;;  %v22280_v32 = vld [vmem:[#allocation126_spill] sm:$0xff] }
 0x47d   :  { %15468 = vmatpush3.bf16.msra.mxu1 %v16196_v3  ;;  %15455 = vmatprep.mubr.msk.bf16.mxu1 %vm5599_vm3, %v9267_v17  ;;  %v22277_v3 = vld [vmem:[#allocation119_spill] sm:$0xff]  ;;  %v9269_v54 = vpack.c.bf16 %v9258_v24, %v9257_v49  ;;  %v20834_v17 = vld [vmem:[#allocation6 + $0x82] sm:$0xff] }
 0x47e   :  { %15469 = vmatprep.subr.bf16.mxu1 %v16197_v2  ;;  %v9256_v19 = vmul.f32 %v22277_v3, %v20805_v11  ;;  %v20839_v3 = vpop.permute.xlu1 %10258 }
 0x47f   :  { %11568 = vperm.xlu1 %16128, %v20581_v45   ;;  %v9259_v45 = vmul.f32 %v20175_v63, %v20820_v18 }
 0x480   :  { %v9268_v52 = vpack.c.bf16 %v9256_v19, %v9255_v25  ;;  %v22281_v25 = vld [vmem:[#allocation127_spill] sm:$0xff]  ;;  %v9427_v19 = vld [vmem:[#allocation6 + $0x1e] sm:$0xff] }
 0x481   :  { %15470 = vmatpush3.bf16.msra.mxu1 %v16197_v2  ;;  %v9260_v2 = vmul.f32 %v22280_v32, %v20828_v62  ;;  %v9262_v49 = vmul.f32 %v22281_v25, %v20834_v17  ;;  %v9507_v24 = vmul.f32 %v20222_v46, %v9427_v19  ;;  %v22284_v46 = vld [vmem:[#allocation103_spill] sm:$0xff]  ;;  %v22288_v25 = vld [vmem:[#allocation86_spill] sm:$0xff] }
 0x482   :  { %15487 = vmatprep.subr.bf16.mxu1 %v16198_v30  ;;  %v9510_v36 = vmul.f32 %v22284_v46, %v20347_v33  ;;  %v22287_v32 = vld [vmem:[#allocation111_spill] sm:$0xff]  ;;  %v22294_v46 = vld [vmem:[#allocation40_spill] sm:$0xff] }
 0x483   :  { %16131 = vset.pattern.permute.xlu1 %v22279_v8  ;;  %v9271_v63 = vpack.c.bf16 %v9262_v49, %v9261_v51  ;;  %v9508_v8 = vmul.f32 %v20140_v57, %v20342_v20  ;;  %v22285_v57 = vld [vmem:[#allocation132_spill] sm:$0xff]  ;;  %v22289_v49 = vld [vmem:[#allocation129_spill] sm:$0xff]  ;;  %v16199_v33 = vld [vmem:[%s21638_s4 + $0x108] sm:$0xff]  }
 0x484   :  { %15456 = vmatmul.mubr.msk.bf16.gmra.mrb[4].mxu1 %vm5599_vm3, %v9268_v52  ;;  %11770 = vperm.xlu1 %16131, %v20427_v53   ;;  %v9270_v53 = vpack.c.bf16 %v9260_v2, %v9259_v45  ;;  %v9512_v20 = vmul.f32 %v22285_v57, %v20377_v22  ;;  %v20880_v22 = vld [vmem:[#allocation6 + $0x56] sm:$0xff] }
 0x485   :  { %15459 = vmatprep.mubr.msk.bf16.mxu1 %vm5599_vm3, %v9269_v54  ;;  %v20851_v54 = vpop.permute.xlu1 %10266  ;;  %22290 = vst [vmem:[#allocation69_spill] sm:$0xff] %v20880_v22 }
 0x488   :  { %11774 = vperm.xlu1 %16131, %v20237_v6   ;;  %v22283_v6 = vld [vmem:[#allocation124_spill] sm:$0xff] }
 0x489   :  { %v9264_v52 = vmul.f32 %v22283_v6, %v20846_v56  ;;  %v20863_v51 = vpop.permute.xlu1 %10274  ;;  %v22291_v6 = vld [vmem:[#allocation52_spill] sm:$0xff] }
 0x48b   :  { %v9272_v45 = vpack.c.bf16 %v9264_v52, %v9263_v50  ;;  %v9514_v52 = vmul.f32 %v22291_v6, %v20880_v22  ;;  %v22301_v6 = vld [vmem:[#allocation113_spill] sm:$0xff]  ;;  %v22339_v22 = vld [vmem:[#allocation48_spill] sm:$0xff] }
 0x48c   :  { %15460 = vmatmul.mubr.msk.bf16.gmra.mrb[8].mxu1 %vm5599_vm3, %v9270_v53  ;;  %11782 = vperm.xlu1 %16131, %v20441_v13   ;;  %v9523_v13 = vpack.c.bf16 %v9508_v8, %v9507_v24  ;;  %v9511_v53 = vmul.f32 %v22289_v49, %v22288_v25  ;;  %v20885_v8 = vld [vmem:[#allocation6 + $0x66] sm:$0xff]  ;;  %v16273_v25 = vld [vmem:[%s21635_s1 + $0x70] sm:$0xff] }
 0x48d   :  { %15463 = vmatprep.mubr.msk.bf16.mxu1 %vm5599_vm3, %v9271_v63  ;;  %v16271_v63 = vld [vmem:[%s21635_s1 + $0x50] sm:$0xff]  ;;  %v20877_v24 = vpop.permute.xlu1 %10476  ;;  %22292 = vst [vmem:[#allocation75_spill] sm:$0xff] %v20885_v8 }
 0x48e   :  { %v9525_v19 = vpack.c.bf16 %v9512_v20, %v9511_v53  ;;  %v22296_v20 = vld [vmem:[#allocation114_spill] sm:$0xff]  ;;  %v20905_v53 = vld [vmem:[#allocation6 + $0x76] sm:$0xff] }
 0x48f   :  { %22297 = vst [vmem:[#allocation80_spill] sm:$0xff] %v20905_v53 }
 0x490   :  { %11790 = vperm.xlu1 %16131, %v20663_v10   ;;  %v22286_v10 = vld [vmem:[#allocation36_spill] sm:$0xff] }
 0x491   :  { %v9509_v2 = vmul.f32 %v22287_v32, %v22286_v10  ;;  %v9515_v10 = vmul.f32 %v22296_v20, %v20369_v12  ;;  %v20922_v20 = vpop.permute.xlu0 %10254 }
 0x493   :  { %v9524_v50 = vpack.c.bf16 %v9510_v36, %v9509_v2  ;;  %v22295_v36 = vld [vmem:[#allocation102_spill] sm:$0xff]  ;;  %v20899_v2 = vpop.permute.xlu1 %10484 }
 0x494   :  { %15464 = vmatmul.mubr.msk.bf16.gmra.mrb[12].mxu1 %vm5599_vm3, %v9272_v45  ;;  %11798 = vperm.xlu1 %16131, %v16270_v14   ;;  %v16272_v45 = vld [vmem:[%s21635_s1 + $0x60] sm:$0xff]  ;;  %v9513_v57 = vmul.f32 %v22295_v36, %v22294_v46 }
 0x495   :  { %15471 = vmatprep.mubr.msk.bf16.mxu1 %vm5599_vm3, %v9523_v13  ;;  %v16200_v13 = vld [vmem:[%s21638_s4 + $0x110] sm:$0xff]   ;;  %v22293_v14 = vld [vmem:[#allocation37_spill] sm:$0xff] }
 0x496   :  { %v9526_v32 = vpack.c.bf16 %v9514_v52, %v9513_v57  ;;  %v9517_v52 = vmul.f32 %v22301_v6, %v20393_v35 }
 0x497   :  { %v20920_v36 = vpop.permute.xlu1 %10488 }
 0x498   :  { %11806 = vperm.xlu1 %16131, %v16271_v63   ;;  %v22298_v63 = vld [vmem:[#allocation120_spill] sm:$0xff] }
 0x499   :  { %v9518_v12 = vmul.f32 %v22298_v63, %v20905_v53  ;;  %v22307_v63 = vld [vmem:[#allocation53_spill] sm:$0xff] }
 0x49b   :  { %v9528_v46 = vpack.c.bf16 %v9518_v12, %v9517_v52  ;;  %v9521_v12 = vmul.f32 %v22307_v63, %v20414_v47  ;;  %v22310_v47 = vld [vmem:[#allocation54_spill] sm:$0xff]  ;;  %v22313_v63 = vld [vmem:[#allocation51_spill] sm:$0xff] }
 0x49c   :  { %15472 = vmatmul.mubr.msk.bf16.vlgmr.msra.gmra.mrb[0].mxu1 %vm5599_vm3, %v9524_v50  ;;  %11814 = vperm.xlu1 %16131, %v16272_v45   ;;  %v20910_v50 = vld [vmem:[#allocation6 + $0x86] sm:$0xff]  ;;  %v20916_v45 = vld [vmem:[#allocation6 + $0x7e] sm:$0xff] }
 0x49d   :  { %15488 = vmatpush3.bf16.msra.mxu1 %v16198_v30  ;;  %15475 = vmatprep.mubr.msk.bf16.mxu1 %vm5599_vm3, %v9525_v19  ;;  %v9516_v30 = vmul.f32 %v22293_v14, %v20885_v8  ;;  %22299 = vst [vmem:[#allocation79_spill] sm:$0xff] %v20910_v50  ;;  %22302 = vst [vmem:[#allocation99_spill] sm:$0xff] %v20916_v45  ;;  %v22303_v14 = vld [vmem:[#allocation50_spill] sm:$0xff]  ;;  %v22338_v8 = vld [vmem:[#allocation81_spill] sm:$0xff] }
 0x49e   :  { %15489 = vmatprep.subr.bf16.mxu1 %v16199_v33  ;;  %v10025_v56 = vmul.f32 %v22339_v22, %v22338_v8  ;;  %v22344_v22 = vld [vmem:[#allocation89_spill] sm:$0xff] }
 0x49f   :  { %v9527_v49 = vpack.c.bf16 %v9516_v30, %v9515_v10  ;;  %v9519_v30 = vmul.f32 %v22303_v14, %v20916_v45  ;;  %v20925_v10 = vld [vmem:[#allocation6 + $0x96] sm:$0xff]  ;;  %v20938_v14 = vpop.permute.xlu0 %10262 }
 0x4a0   :  { %11822 = vperm.xlu1 %16131, %v16273_v25   ;;  %22304 = vst [vmem:[#allocation112_spill] sm:$0xff] %v20925_v10  ;;  %v22306_v25 = vld [vmem:[#allocation106_spill] sm:$0xff] }
 0x4a1   :  { %15490 = vmatpush3.bf16.msra.mxu1 %v16199_v33  ;;  %v22300_v33 = vld [vmem:[#allocation34_spill] sm:$0xff] }
 0x4a2   :  { %15507 = vmatprep.subr.bf16.mxu1 %v16200_v13  ;;  %v9520_v19 = vmul.f32 %v22300_v33, %v20910_v50  ;;  %v20934_v33 = vpop.permute.xlu1 %10496 }
 0x4a4   :  { %15476 = vmatmul.mubr.msk.bf16.gmra.mrb[4].mxu1 %vm5599_vm3, %v9526_v32  ;;  %v9529_v57 = vpack.c.bf16 %v9520_v19, %v9519_v30  ;;  %v22305_v32 = vld [vmem:[#allocation43_spill] sm:$0xff] }
 0x4a5   :  { %15479 = vmatprep.mubr.msk.bf16.mxu1 %vm5599_vm3, %v9527_v49  ;;  %v9522_v35 = vmul.f32 %v22305_v32, %v20925_v10  ;;  %v9766_v49 = vmul.f32 %v22306_v25, %v20446_v55  ;;  %v22308_v19 = vld [vmem:[#allocation135_spill] sm:$0xff]  ;;  %v9769_v32 = vmul.f32 %v22310_v47, %v20458_v60  ;;  %v20952_v25 = vpop.permute.xlu0 %10270 }
 0x4a6   :  { %v9765_v6 = vmul.f32 %v22308_v19, %v20419_v5  ;;  %v22311_v5 = vld [vmem:[#allocation105_spill] sm:$0xff]  ;;  %v22330_v10 = vld [vmem:[#allocation63_spill] sm:$0xff] }
 0x4a7   :  { %v9530_v52 = vpack.c.bf16 %v9522_v35, %v9521_v12  ;;  %v9768_v35 = vmul.f32 %v22311_v5, %v20451_v59  ;;  %v22315_v59 = vld [vmem:[#allocation57_spill] sm:$0xff] }
 0x4a8   :  { %v9781_v30 = vpack.c.bf16 %v9766_v49, %v9765_v6  ;;  %v22312_v49 = vld [vmem:[#allocation56_spill] sm:$0xff] }
 0x4a9   :  { %v9770_v12 = vmul.f32 %v22313_v63, %v22312_v49  ;;  %v16201_v6 = vld [vmem:[%s21638_s4 + $0x118] sm:$0xff]   ;;  %v20967_v47 = vpop.permute.xlu0 %10278 }
 0x4ac   :  { %15480 = vmatmul.mubr.msk.bf16.gmra.mrb[8].mxu1 %vm5599_vm3, %v9528_v46  ;;  %v20941_v46 = vld [vmem:[#allocation6 + $0x2f] sm:$0xff] }
 0x4ad   :  { %15483 = vmatprep.mubr.msk.bf16.mxu1 %vm5599_vm3, %v9529_v57  ;;  %22309 = vst [vmem:[#allocation83_spill] sm:$0xff] %v20941_v46  ;;  %v9767_v55 = vmul.f32 %v20411_v4, %v20941_v46  ;;  %v20946_v57 = vpop.permute.xlu1 %10504 }
 0x4af   :  { %v9782_v19 = vpack.c.bf16 %v9768_v35, %v9767_v55  ;;  %v16202_v55 = vld [vmem:[%s21638_s4 + $0x120] sm:$0xff]   ;;  %v22317_v35 = vld [vmem:[#allocation35_spill] sm:$0xff] }
 0x4b0   :  { %v9772_v49 = vmul.f32 %v22317_v35, %v20479_v9 }
 0x4b1   :  { %v20959_v4 = vpop.permute.xlu1 %10512 }
 0x4b4   :  { %15484 = vmatmul.mubr.msk.bf16.gmra.mrb[12].mxu1 %vm5599_vm3, %v9530_v52  ;;  %v9783_v52 = vpack.c.bf16 %v9770_v12, %v9769_v32  ;;  %v22316_v32 = vld [vmem:[#allocation62_spill] sm:$0xff] }
 0x4b5   :  { %15491 = vmatprep.mubr.msk.bf16.mxu1 %vm5599_vm3, %v9781_v30  ;;  %v20962_v30 = vld [vmem:[#allocation6 + $0x4f] sm:$0xff]  ;;  %v9773_v5 = vmul.f32 %v22316_v32, %v20494_v44  ;;  %v20988_v32 = vld [vmem:[#allocation6 + $0x7f] sm:$0xff] }
 0x4b6   :  { %22314 = vst [vmem:[#allocation85_spill] sm:$0xff] %v20962_v30  ;;  %v9771_v60 = vmul.f32 %v22315_v59, %v20962_v30  ;;  %v20980_v59 = vpop.permute.xlu0 %10480  ;;  %v20983_v30 = vld [vmem:[#allocation6 + $0x6f] sm:$0xff]  ;;  %22321 = vst [vmem:[#allocation100_spill] sm:$0xff] %v20988_v32 }
 0x4b7   :  { %22319 = vst [vmem:[#allocation90_spill] sm:$0xff] %v20983_v30  ;;  %v22320_v44 = vld [vmem:[#allocation44_spill] sm:$0xff] }
 0x4b8   :  { %v9784_v12 = vpack.c.bf16 %v9772_v49, %v9771_v60  ;;  %v9775_v9 = vmul.f32 %v22320_v44, %v20983_v30  ;;  %v22323_v60 = vld [vmem:[#allocation39_spill] sm:$0xff] }
 0x4b9   :  { %v22324_v49 = vld [vmem:[#allocation59_spill] sm:$0xff] }
 0x4ba   :  { %v20998_v46 = vpop.permute.xlu0 %10492  ;;  %v21001_v44 = vld [vmem:[#allocation6 + $0x8f] sm:$0xff] }
 0x4bb   :  { %22326 = vst [vmem:[#allocation94_spill] sm:$0xff] %v21001_v44 }
 0x4bc   :  { %15492 = vmatmul.mubr.msk.bf16.vlgmr.msra.gmra.mrb[0].mxu1 %vm5599_vm3, %v9782_v19  ;;  %v20978_v19 = vpop.permute.xlu1 %10520 }
 0x4bd   :  { %15508 = vmatpush3.bf16.msra.mxu1 %v16200_v13  ;;  %15495 = vmatprep.mubr.msk.bf16.mxu1 %vm5599_vm3, %v9783_v52  ;;  %v22318_v13 = vld [vmem:[#allocation55_spill] sm:$0xff] }
 0x4be   :  { %15509 = vmatprep.subr.bf16.mxu1 %v16201_v6  ;;  %v9774_v63 = vmul.f32 %v22318_v13, %v20507_v23  ;;  %v9777_v23 = vmul.f32 %v20522_v29, %v20988_v32  ;;  %v22325_v13 = vld [vmem:[#allocation42_spill] sm:$0xff]  ;;  %v22327_v29 = vld [vmem:[#allocation47_spill] sm:$0xff] }
 0x4bf   :  { %v9779_v32 = vmul.f32 %v22327_v29, %v21001_v44  ;;  %v22334_v29 = vld [vmem:[#allocation130_spill] sm:$0xff]  ;;  %v22335_v44 = vld [vmem:[#allocation97_spill] sm:$0xff] }
 0x4c0   :  { %v9785_v52 = vpack.c.bf16 %v9774_v63, %v9773_v5  ;;  %v20994_v5 = vpop.permute.xlu1 %10528  ;;  %v9778_v63 = vmul.f32 %v22325_v13, %v22324_v49  ;;  %v22332_v13 = vld [vmem:[#allocation87_spill] sm:$0xff]  ;;  %v10026_v53 = vmul.f32 %v22335_v44, %v22334_v29 }
 0x4c1   :  { %15510 = vmatpush3.bf16.msra.mxu1 %v16201_v6  ;;  %v22322_v6 = vld [vmem:[#allocation73_spill] sm:$0xff] }
 0x4c2   :  { %15527 = vmatprep.subr.bf16.mxu1 %v16202_v55  ;;  %v9776_v35 = vmul.f32 %v22323_v60, %v22322_v6  ;;  %v21008_v6 = vld [vmem:[#allocation6 + $0x97] sm:$0xff] }
 0x4c3   :  { %22328 = vst [vmem:[#allocation96_spill] sm:$0xff] %v21008_v6  ;;  %v22329_v60 = vld [vmem:[#allocation84_spill] sm:$0xff] }
 0x4c4   :  { %15496 = vmatmul.mubr.msk.bf16.gmra.mrb[4].mxu1 %vm5599_vm3, %v9784_v12  ;;  %v9786_v12 = vpack.c.bf16 %v9776_v35, %v9775_v9  ;;  %v21006_v30 = vpop.permute.xlu1 %10536  ;;  %v10023_v49 = vmul.f32 %v22330_v10, %v22329_v60  ;;  %v22331_v9 = vld [vmem:[#allocation41_spill] sm:$0xff]  ;;  %v22336_v60 = vld [vmem:[#allocation95_spill] sm:$0xff] }
 0x4c5   :  { %15499 = vmatprep.mubr.msk.bf16.mxu1 %vm5599_vm3, %v9785_v52  ;;  %v9787_v52 = vpack.c.bf16 %v9778_v63, %v9777_v23  ;;  %v9780_v35 = vmul.f32 %v22331_v9, %v21008_v6  ;;  %v21014_v23 = vpop.permute.xlu0 %10500  ;;  %v22333_v63 = vld [vmem:[#allocation117_spill] sm:$0xff]  ;;  %v22337_v9 = vld [vmem:[#allocation60_spill] sm:$0xff] }
 0x4c6   :  { %v10028_v6 = vmul.f32 %v22337_v9, %v22336_v60  ;;  %v22346_v60 = vld [vmem:[#allocation88_spill] sm:$0xff] }
 0x4c7   :  { %v9788_v45 = vpack.c.bf16 %v9780_v35, %v9779_v32  ;;  %v22341_v32 = vld [vmem:[#allocation128_spill] sm:$0xff]  ;;  %v10040_v35 = vpack.c.bf16 %v10026_v53, %v10025_v56  ;;  %v22345_v53 = vld [vmem:[#allocation58_spill] sm:$0xff] }
 0x4c8   :  { %v21018_v50 = vpop.permute.xlu1 %10738  ;;  %v16204_v56 = vld [vmem:[%s21638_s4 + $0x130] sm:$0xff]   ;;  %v10032_v29 = vmul.f32 %v20683_v48, %v22345_v53 }
 0x4c9   :  { %v21024_v10 = vpop.permute.xlu0 %10508 }
 0x4cc   :  { %15500 = vmatmul.mubr.msk.bf16.gmra.mrb[8].mxu1 %vm5599_vm3, %v9786_v12  ;;  %v10024_v12 = vmul.f32 %v22333_v63, %v22332_v13  ;;  %v22340_v13 = vld [vmem:[#allocation70_spill] sm:$0xff]  ;;  %v21032_v63 = vpop.permute.xlu1 %10742 }
 0x4cd   :  { %15503 = vmatprep.mubr.msk.bf16.mxu1 %vm5599_vm3, %v9787_v52  ;;  %22342 = vst [vmem:[#allocation133_spill] sm:$0xff] %v21032_v63  ;;  %v21037_v44 = vpop.permute.xlu0 %10516  ;;  %v21070_v63 = vld [vmem:[#allocation6 + $0x98] sm:$0xff] }
 0x4ce   :  { %v10039_v52 = vpack.c.bf16 %v10024_v12, %v10023_v49  ;;  %v10027_v49 = vmul.f32 %v22341_v32, %v22340_v13  ;;  %v22349_v32 = vld [vmem:[#allocation67_spill] sm:$0xff]  ;;  %22357 = vst [vmem:[#allocation108_spill] sm:$0xff] %v21070_v63 }
 0x4d0   :  { %v10041_v12 = vpack.c.bf16 %v10028_v6, %v10027_v49  ;;  %v22347_v6 = vld [vmem:[#allocation38_spill] sm:$0xff]  ;;  %v21050_v13 = vpop.permute.xlu1 %10750 }
 0x4d1   :  { %v10029_v9 = vmul.f32 %v22347_v6, %v22346_v60  ;;  %22348 = vst [vmem:[#allocation118_spill] sm:$0xff] %v21050_v13  ;;  %v22352_v60 = vld [vmem:[#allocation93_spill] sm:$0xff] }
 0x4d2   :  { %v10036_v6 = vmul.f32 %v20728_v26, %v22352_v60  ;;  %v22353_v13 = vld [vmem:[#allocation49_spill] sm:$0xff]  ;;  %v22360_v60 = vld [vmem:[#allocation66_spill] sm:$0xff] }
 0x4d4   :  { %15504 = vmatmul.mubr.msk.bf16.gmra.mrb[12].mxu1 %vm5599_vm3, %v9788_v45  ;;  %v16203_v45 = vld [vmem:[%s21638_s4 + $0x128] sm:$0xff]   ;;  %v21060_v53 = vpop.permute.xlu1 %10758 }
 0x4d5   :  { %15511 = vmatprep.mubr.msk.bf16.mxu1 %vm5599_vm3, %v10039_v52  ;;  %v22343_v52 = vld [vmem:[#allocation131_spill] sm:$0xff] }
 0x4d6   :  { %v10030_v8 = vmul.f32 %v22344_v22, %v22343_v52  ;;  %v22351_v22 = vld [vmem:[#allocation82_spill] sm:$0xff] }
 0x4d7   :  { %v10034_v48 = vmul.f32 %v20702_v0, %v22351_v22  ;;  %v10038_v0 = vmul.f32 %v20742_v39, %v21070_v63  ;;  %v22363_v39 = vld [vmem:[#allocation92_spill] sm:$0xff] }
 0x4d8   :  { %v10283_v63 = vmul.f32 %v20770_v34, %v22363_v39 }
 0x4dc   :  { %15512 = vmatmul.mubr.msk.bf16.vlgmr.msra.gmra.mrb[0].mxu1 %vm5599_vm3, %v10040_v35  ;;  %v10042_v35 = vpack.c.bf16 %v10030_v8, %v10029_v9  ;;  %v22355_v9 = vld [vmem:[#allocation76_spill] sm:$0xff] }
 0x4dd   :  { %15528 = vmatpush3.bf16.msra.mxu1 %v16202_v55  ;;  %15515 = vmatprep.mubr.msk.bf16.mxu1 %vm5599_vm3, %v10041_v12  ;;  %v22350_v55 = vld [vmem:[#allocation98_spill] sm:$0xff]  ;;  %v21054_v12 = vpop.permute.xlu0 %10524 }
 0x4de   :  { %15529 = vmatprep.subr.bf16.mxu1 %v16203_v45  ;;  %v10031_v49 = vmul.f32 %v22350_v55, %v22349_v32  ;;  %v22354_v32 = vld [vmem:[#allocation74_spill] sm:$0xff] }
 0x4df   :  { %v22356_v55 = vld [vmem:[#allocation46_spill] sm:$0xff] }
 0x4e0   :  { %v10043_v52 = vpack.c.bf16 %v10032_v29, %v10031_v49  ;;  %v10035_v29 = vmul.f32 %v22356_v55, %v22355_v9 }
 0x4e1   :  { %15530 = vmatpush3.bf16.msra.mxu1 %v16203_v45  ;;  %v10033_v45 = vmul.f32 %v22354_v32, %v22353_v13  ;;  %v21066_v8 = vpop.permute.xlu0 %10532  ;;  %v21080_v13 = vld [vmem:[#allocation6 + $0x29] sm:$0xff]  ;;  %v22361_v32 = vld [vmem:[#allocation64_spill] sm:$0xff] }
 0x4e2   :  { %15547 = vmatprep.subr.bf16.mxu1 %v16204_v56  ;;  %22358 = vst [vmem:[#allocation123_spill] sm:$0xff] %v21080_v13  ;;  %v10282_v22 = vmul.f32 %v20755_v27, %v21080_v13  ;;  %v10285_v27 = vmul.f32 %v20783_v40, %v20691_v38  ;;  %v22367_v38 = vld [vmem:[#allocation68_spill] sm:$0xff] }
 0x4e3   :  { %v10044_v49 = vpack.c.bf16 %v10034_v48, %v10033_v45  ;;  %v22359_v48 = vld [vmem:[#allocation77_spill] sm:$0xff]  ;;  %v10287_v34 = vmul.f32 %v20800_v28, %v22367_v38 }
 0x4e4   :  { %15516 = vmatmul.mubr.msk.bf16.gmra.mrb[4].mxu1 %vm5599_vm3, %v10042_v35  ;;  %v10045_v35 = vpack.c.bf16 %v10036_v6, %v10035_v29  ;;  %v10037_v6 = vmul.f32 %v22360_v60, %v22359_v48  ;;  %v22362_v45 = vld [vmem:[#allocation45_spill] sm:$0xff]  ;;  %v22365_v60 = vld [vmem:[#allocation91_spill] sm:$0xff] }
 0x4e5   :  { %15519 = vmatprep.mubr.msk.bf16.mxu1 %vm5599_vm3, %v10043_v52  ;;  %v21072_v52 = vpop.permute.xlu1 %10766  ;;  %v21078_v26 = vpop.permute.xlu0 %10734  ;;  %v10281_v9 = vmul.f32 %v22362_v45, %v22361_v32  ;;  %v22364_v48 = vld [vmem:[#allocation61_spill] sm:$0xff] }
 0x4e6   :  { %v10046_v55 = vpack.c.bf16 %v10038_v0, %v10037_v6  ;;  %v10284_v13 = vmul.f32 %v22365_v60, %v22364_v48  ;;  %v22366_v0 = vld [vmem:[#allocation71_spill] sm:$0xff]  ;;  %v21144_v38 = vld [vmem:[#allocation6 + $0x99] sm:$0xff] }
 0x4e8   :  { %v10298_v6 = vpack.c.bf16 %v10284_v13, %v10283_v63  ;;  %v10289_v63 = vmul.f32 %v20816_v1, %v20714_v7  ;;  %v22368_v13 = vld [vmem:[#allocation104_spill] sm:$0xff]  ;;  %v22370_v7 = vld [vmem:[#allocation65_spill] sm:$0xff] }
 0x4e9   :  { %v21088_v29 = vpop.permute.xlu1 %10774  ;;  %v10291_v1 = vmul.f32 %v20839_v3, %v22370_v7  ;;  %v10459_v3 = vld [vmem:[#allocation6 + $0x22] sm:$0xff] }
 0x4ec   :  { %15520 = vmatmul.mubr.msk.bf16.gmra.mrb[8].mxu1 %vm5599_vm3, %v10044_v49  ;;  %v10297_v49 = vpack.c.bf16 %v10282_v22, %v10281_v9  ;;  %v10286_v22 = vmul.f32 %v22366_v0, %v20719_v61  ;;  %v16205_v9 = vld [vmem:[%s21638_s4 + $0x138] sm:$0xff]   ;;  %v16206_v61 = vld [vmem:[%s21638_s4 + $0x140] sm:$0xff]  }
 0x4ed   :  { %15523 = vmatprep.mubr.msk.bf16.mxu1 %vm5599_vm3, %v10045_v35  ;;  %v21090_v35 = vpop.permute.xlu0 %10746  ;;  %v21100_v32 = vpop.permute.xlu1 %10782 }
 0x4f1   :  { %v21104_v45 = vpop.permute.xlu0 %10754  ;;  %v21113_v40 = vpop.permute.xlu1 %10790 }
 0x4f4   :  { %15524 = vmatmul.mubr.msk.bf16.gmra.mrb[12].mxu1 %vm5599_vm3, %v10046_v55  ;;  %v10299_v55 = vpack.c.bf16 %v10286_v22, %v10285_v27  ;;  %v10293_v22 = vmul.f32 %v20851_v54, %v20740_v41  ;;  %v10296_v41 = vmul.f32 %v20967_v47, %v21144_v38  ;;  %v10539_v54 = vmul.f32 %v20877_v24, %v10459_v3  ;;  %v21169_v24 = vld [vmem:[#allocation6 + $0x32] sm:$0xff]  ;;  %v21221_v3 = vld [vmem:[#allocation6 + $0x9a] sm:$0xff] }
 0x4f5   :  { %15531 = vmatprep.mubr.msk.bf16.mxu1 %vm5599_vm3, %v10297_v49  ;;  %v22369_v49 = vld [vmem:[#allocation78_spill] sm:$0xff]  ;;  %v21122_v27 = vpop.permute.xlu0 %10762  ;;  %v21126_v60 = vpop.permute.xlu1 %10992  ;;  %v10544_v47 = vmul.f32 %v20934_v33, %v20793_v21  ;;  %v16208_v33 = vld [vmem:[%s21638_s4 + $0x150] sm:$0xff]  }
 0x4f6   :  { %v10288_v39 = vmul.f32 %v22369_v49, %v22368_v13 }
 0x4f8   :  { %v10300_v28 = vpack.c.bf16 %v10288_v39, %v10287_v34 }
 0x4f9   :  { %v21130_v0 = vpop.permute.xlu0 %10770 }
 0x4fc   :  { %15532 = vmatmul.mubr.msk.bf16.vlgmr.msra.gmra.mrb[0].mxu1 %vm5599_vm3, %v10298_v6 }
 0x4fd   :  { %15548 = vmatpush3.bf16.msra.mxu1 %v16204_v56  ;;  %15535 = vmatprep.mubr.msk.bf16.mxu1 %vm5599_vm3, %v10299_v55  ;;  %v10290_v56 = vmul.f32 %v20922_v20, %v20744_v43  ;;  %v10292_v43 = vmul.f32 %v20938_v14, %v20750_v37  ;;  %v21138_v20 = vld [vmem:[#allocation6 + $0x89] sm:$0xff]  ;;  %v21142_v55 = vpop.permute.xlu1 %11000  ;;  %v10295_v37 = vmul.f32 %v20863_v51, %v20759_v42 }
 0x4fe   :  { %15549 = vmatprep.subr.bf16.mxu1 %v16205_v9  ;;  %v10294_v6 = vmul.f32 %v20952_v25, %v21138_v20  ;;  %v21155_v14 = vld [vmem:[#allocation6 + $0x2a] sm:$0xff]  ;;  %v10542_v42 = vmul.f32 %v20920_v36, %v20777_v16 }
 0x4ff   :  { %v10301_v48 = vpack.c.bf16 %v10290_v56, %v10289_v63  ;;  %v21146_v63 = vpop.permute.xlu0 %10778  ;;  %v10540_v13 = vmul.f32 %v20980_v59, %v21155_v14  ;;  %v10304_v39 = vpack.c.bf16 %v10296_v41, %v10295_v37  ;;  %v16207_v16 = vld [vmem:[%s21638_s4 + $0x148] sm:$0xff]  }
 0x500   :  { %v10303_v34 = vpack.c.bf16 %v10294_v6, %v10293_v22 }
 0x501   :  { %15550 = vmatpush3.bf16.msra.mxu1 %v16205_v9  ;;  %v10302_v9 = vpack.c.bf16 %v10292_v43, %v10291_v1  ;;  %v21157_v25 = vpop.permute.xlu1 %11004  ;;  %v10555_v56 = vpack.c.bf16 %v10540_v13, %v10539_v54  ;;  %v10545_v43 = vmul.f32 %v21014_v23, %v20805_v11 }
 0x502   :  { %15567 = vmatprep.subr.bf16.mxu1 %v16206_v61 }
 0x503   :  { %v21161_v49 = vpop.permute.xlu0 %10786 }
 0x504   :  { %15536 = vmatmul.mubr.msk.bf16.gmra.mrb[4].mxu1 %vm5599_vm3, %v10300_v28  ;;  %v21173_v28 = vld [vmem:[#allocation6 + $0x42] sm:$0xff] }
 0x505   :  { %15539 = vmatprep.mubr.msk.bf16.mxu1 %vm5599_vm3, %v10301_v48  ;;  %v21167_v51 = vpop.permute.xlu1 %11012  ;;  %v10541_v48 = vmul.f32 %v20899_v2, %v21169_v24  ;;  %v10543_v7 = vmul.f32 %v20998_v46, %v21173_v28  ;;  %v10546_v2 = vmul.f32 %v20946_v57, %v20798_v58  ;;  %v10548_v46 = vmul.f32 %v20959_v4, %v20820_v18  ;;  %v21209_v4 = vld [vmem:[#allocation6 + $0x8a] sm:$0xff] }
 0x506   :  { %v10550_v18 = vmul.f32 %v20978_v19, %v20826_v31  ;;  %v10552_v11 = vmul.f32 %v20994_v5, %v21209_v4  ;;  %v10554_v31 = vmul.f32 %v21006_v30, %v21221_v3  ;;  %v10718_v19 = vld [vmem:[#allocation6 + $0x2e] sm:$0xff]  ;;  %v10719_v30 = vld [vmem:[#allocation6 + $0x36] sm:$0xff] }
 0x507   :  { %v21175_v59 = vpop.permute.xlu0 %10794  ;;  %v10556_v1 = vpack.c.bf16 %v10542_v42, %v10541_v48  ;;  %v10557_v36 = vpack.c.bf16 %v10544_v47, %v10543_v7  ;;  %v10558_v6 = vpack.c.bf16 %v10546_v2, %v10545_v43  ;;  %v10798_v5 = vmul.f32 %v21018_v50, %v10718_v19  ;;  %v22372_v50 = vld [vmem:[#allocation133_spill] sm:$0xff]  ;;  %v10721_v7 = vld [vmem:[#allocation6 + $0x46] sm:$0xff] }
 0x508   :  { %v10799_v48 = vmul.f32 %v22372_v50, %v10719_v30 }
 0x509   :  { %v21184_v22 = vpop.permute.xlu1 %11020 }
 0x50b   :  { %v21188_v21 = vpop.permute.xlu0 %10996 }
 0x50c   :  { %15540 = vmatmul.mubr.msk.bf16.gmra.mrb[8].mxu1 %vm5599_vm3, %v10302_v9 }
 0x50d   :  { %15543 = vmatprep.mubr.msk.bf16.mxu1 %vm5599_vm3, %v10303_v34  ;;  %v21201_v9 = vpop.permute.xlu1 %11028 }
 0x50f   :  { %v21203_v57 = vpop.permute.xlu0 %11008 }
 0x511   :  { %v21215_v23 = vpop.permute.xlu1 %11036 }
 0x513   :  { %v21219_v34 = vpop.permute.xlu0 %11016 }
 0x514   :  { %15544 = vmatmul.mubr.msk.bf16.gmra.mrb[12].mxu1 %vm5599_vm3, %v10304_v39 }
 0x515   :  { %15551 = vmatprep.mubr.msk.bf16.mxu1 %vm5599_vm3, %v10555_v56 }
 0x517   :  { %v21232_v54 = vpop.permute.xlu0 %11024 }
 0x51b   :  { %v21239_v47 = vpop.permute.xlu0 %11032 }
 0x51c   :  { %15552 = vmatmul.mubr.msk.bf16.vlgmr.msra.gmra.mrb[0].mxu1 %vm5599_vm3, %v10556_v1  ;;  %v22373_v1 = vld [vmem:[#allocation118_spill] sm:$0xff] }
 0x51d   :  { %15568 = vmatpush3.bf16.msra.mxu1 %v16206_v61  ;;  %15555 = vmatprep.mubr.msk.bf16.mxu1 %vm5599_vm3, %v10557_v36  ;;  %v10547_v61 = vmul.f32 %v21024_v10, %v20811_v15  ;;  %v10549_v15 = vmul.f32 %v21037_v44, %v20828_v62  ;;  %v10551_v10 = vmul.f32 %v21054_v12, %v20834_v17  ;;  %v21227_v62 = vpop.permute.xlu1 %11044  ;;  %v22371_v44 = vld [vmem:[#allocation72_spill] sm:$0xff]  ;;  %v10717_v12 = vld [vmem:[#allocation6 + $0x26] sm:$0xff] }
 0x51e   :  { %15569 = vmatprep.subr.bf16.mxu1 %v16207_v16  ;;  %v10553_v17 = vmul.f32 %v21066_v8, %v22371_v44  ;;  %v10797_v13 = vmul.f32 %v21078_v26, %v10717_v12  ;;  %v10720_v8 = vld [vmem:[#allocation6 + $0x3e] sm:$0xff]  ;;  %v10722_v26 = vld [vmem:[#allocation6 + $0x4e] sm:$0xff] }
 0x51f   :  { %v10559_v58 = vpack.c.bf16 %v10548_v46, %v10547_v61  ;;  %v10560_v41 = vpack.c.bf16 %v10550_v18, %v10549_v15  ;;  %v10561_v37 = vpack.c.bf16 %v10552_v11, %v10551_v10  ;;  %v10800_v36 = vmul.f32 %v21090_v35, %v10720_v8  ;;  %v16209_v61 = vld [vmem:[%s21638_s4 + $0x158] sm:$0xff]   ;;  %v22375_v15 = vld [vmem:[#allocation75_spill] sm:$0xff] }
 0x520   :  { %v10562_v39 = vpack.c.bf16 %v10554_v31, %v10553_v17  ;;  %v10813_v56 = vpack.c.bf16 %v10798_v5, %v10797_v13  ;;  %v10802_v2 = vmul.f32 %v21104_v45, %v10722_v26  ;;  %v22374_v18 = vld [vmem:[#allocation69_spill] sm:$0xff]  ;;  %v10805_v10 = vmul.f32 %v21072_v52, %v22375_v15  ;;  %v22376_v44 = vld [vmem:[#allocation80_spill] sm:$0xff]  ;;  %v22378_v13 = vld [vmem:[#allocation99_spill] sm:$0xff] }
 0x521   :  { %15570 = vmatpush3.bf16.msra.mxu1 %v16207_v16  ;;  %v21235_v42 = vpop.permute.xlu1 %11052  ;;  %v10801_v16 = vmul.f32 %v22373_v1, %v10721_v7  ;;  %v10814_v46 = vpack.c.bf16 %v10800_v36, %v10799_v48  ;;  %v10803_v35 = vmul.f32 %v21060_v53, %v22374_v18  ;;  %v16210_v45 = vld [vmem:[%s21638_s4 + $0x160] sm:$0xff]   ;;  %v10807_v52 = vmul.f32 %v21088_v29, %v22376_v44  ;;  %v22379_v1 = vld [vmem:[#allocation112_spill] sm:$0xff] }
 0x522   :  { %15587 = vmatprep.subr.bf16.mxu1 %v16208_v33  ;;  %v10724_v11 = vld [vmem:[#allocation6 + $0x5e] sm:$0xff] }
 0x523   :  { %v10732_v48 = vld [vmem:[#allocation6 + $0x9e] sm:$0xff] }
 0x524   :  { %15556 = vmatmul.mubr.msk.bf16.gmra.mrb[4].mxu1 %vm5599_vm3, %v10558_v6  ;;  %v10815_v6 = vpack.c.bf16 %v10802_v2, %v10801_v16  ;;  %v10812_v29 = vmul.f32 %v21175_v59, %v10732_v48  ;;  %v10975_v16 = vld [vmem:[#allocation6 + $0x27] sm:$0xff]  ;;  %v10978_v59 = vld [vmem:[#allocation6 + $0x3f] sm:$0xff] }
 0x525   :  { %15559 = vmatprep.mubr.msk.bf16.mxu1 %vm5599_vm3, %v10559_v58  ;;  %v21245_v43 = vpop.permute.xlu1 %11254  ;;  %v21250_v58 = vpop.permute.xlu0 %11040  ;;  %v11055_v36 = vmul.f32 %v21126_v60, %v10975_v16  ;;  %v11058_v18 = vmul.f32 %v21157_v25, %v10978_v59  ;;  %v10982_v25 = vld [vmem:[#allocation6 + $0x5f] sm:$0xff] }
 0x526   :  { %v22382_v44 = vld [vmem:[#allocation90_spill] sm:$0xff] }
 0x527   :  { %v22384_v48 = vld [vmem:[#allocation94_spill] sm:$0xff] }
 0x529   :  { %v21262_v31 = vpop.permute.xlu1 %11258  ;;  %v21265_v19 = vpop.permute.xlu0 %11048 }
 0x52c   :  { %15560 = vmatmul.mubr.msk.bf16.gmra.mrb[8].mxu1 %vm5599_vm3, %v10560_v41  ;;  %v10804_v41 = vmul.f32 %v21122_v27, %v10724_v11  ;;  %v22377_v27 = vld [vmem:[#allocation79_spill] sm:$0xff] }
 0x52d   :  { %15563 = vmatprep.mubr.msk.bf16.mxu1 %vm5599_vm3, %v10561_v37  ;;  %v10726_v37 = vld [vmem:[#allocation6 + $0x6e] sm:$0xff]  ;;  %v21271_v17 = vpop.permute.xlu1 %11266  ;;  %v10809_v12 = vmul.f32 %v21100_v32, %v22377_v27 }
 0x52e   :  { %v10816_v53 = vpack.c.bf16 %v10804_v41, %v10803_v35  ;;  %v22381_v35 = vld [vmem:[#allocation85_spill] sm:$0xff]  ;;  %v10979_v11 = vld [vmem:[#allocation6 + $0x47] sm:$0xff] }
 0x52f   :  { %v11060_v60 = vmul.f32 %v21167_v51, %v22381_v35 }
 0x531   :  { %v21280_v8 = vpop.permute.xlu1 %11274 }
 0x534   :  { %15564 = vmatmul.mubr.msk.bf16.gmra.mrb[12].mxu1 %vm5599_vm3, %v10562_v39  ;;  %v10730_v39 = vld [vmem:[#allocation6 + $0x8e] sm:$0xff] }
 0x535   :  { %15571 = vmatprep.mubr.msk.bf16.mxu1 %vm5599_vm3, %v10813_v56  ;;  %v21277_v56 = vpop.permute.xlu0 %11250  ;;  %v10810_v30 = vmul.f32 %v21161_v49, %v10730_v39  ;;  %v22380_v49 = vld [vmem:[#allocation83_spill] sm:$0xff] }
 0x536   :  { %v11056_v26 = vmul.f32 %v21188_v21, %v22380_v49  ;;  %v10990_v49 = vld [vmem:[#allocation6 + $0x9f] sm:$0xff] }
 0x537   :  { %v10819_v7 = vpack.c.bf16 %v10810_v30, %v10809_v12  ;;  %v10983_v12 = vld [vmem:[#allocation6 + $0x67] sm:$0xff] }
 0x539   :  { %v21285_v32 = vpop.permute.xlu0 %11262 }
 0x53c   :  { %15572 = vmatmul.mubr.msk.bf16.vlgmr.msra.gmra.mrb[0].mxu1 %vm5599_vm3, %v10814_v46  ;;  %v21292_v46 = vpop.permute.xlu1 %11282 }
 0x53d   :  { %15588 = vmatpush3.bf16.msra.mxu1 %v16208_v33  ;;  %15575 = vmatprep.mubr.msk.bf16.mxu1 %vm5599_vm3, %v10815_v6  ;;  %v10806_v33 = vmul.f32 %v21130_v0, %v10726_v37  ;;  %v10808_v0 = vmul.f32 %v21146_v63, %v22378_v13  ;;  %v10811_v63 = vmul.f32 %v21113_v40, %v22379_v1  ;;  %v21294_v6 = vpop.permute.xlu0 %11270  ;;  %v10977_v40 = vld [vmem:[#allocation6 + $0x37] sm:$0xff] }
 0x53e   :  { %15589 = vmatprep.subr.bf16.mxu1 %v16209_v61  ;;  %v11057_v21 = vmul.f32 %v21142_v55, %v10977_v40  ;;  %v11062_v55 = vmul.f32 %v21184_v22, %v10982_v25 }
 0x53f   :  { %v10817_v5 = vpack.c.bf16 %v10806_v33, %v10805_v10  ;;  %v10818_v50 = vpack.c.bf16 %v10808_v0, %v10807_v52  ;;  %v10820_v2 = vpack.c.bf16 %v10812_v29, %v10811_v63  ;;  %v11059_v10 = vmul.f32 %v21203_v57, %v10979_v11  ;;  %v16211_v33 = vld [vmem:[%s21638_s4 + $0x168] sm:$0xff]   ;;  %v16212_v57 = vld [vmem:[%s21638_s4 + $0x170] sm:$0xff]   ;;  %v16276_v11 = vld [vmem:[#allocation6 + $0x38] sm:$0xff] }
 0x540   :  { %v21302_v15 = vpop.permute.xlu1 %11290  ;;  %v11072_v37 = vpack.c.bf16 %v11058_v18, %v11057_v21  ;;  %v11064_v52 = vmul.f32 %v21201_v9, %v22382_v44  ;;  %v10987_v29 = vld [vmem:[#allocation6 + $0x87] sm:$0xff] }
 0x541   :  { %15590 = vmatpush3.bf16.msra.mxu1 %v16209_v61  ;;  %v11071_v61 = vpack.c.bf16 %v11056_v26, %v11055_v36  ;;  %v21305_v41 = vpop.permute.xlu0 %11278  ;;  %v11067_v1 = vmul.f32 %v21250_v58, %v10987_v29  ;;  %v16275_v58 = vld [vmem:[#allocation6 + $0x28] sm:$0xff]  ;;  %v16287_v29 = vld [vmem:[#allocation6 + $0x90] sm:$0xff] }
 0x542   :  { %15607 = vmatprep.subr.bf16.mxu1 %v16210_v45  ;;  %v11313_v18 = vmul.f32 %v16275_v58, %v21277_v56  ;;  %v16279_v56 = vld [vmem:[#allocation6 + $0x50] sm:$0xff] }
 0x544   :  { %15576 = vmatmul.mubr.msk.bf16.gmra.mrb[4].mxu1 %vm5599_vm3, %v10816_v53  ;;  %v11073_v53 = vpack.c.bf16 %v11060_v60, %v11059_v10  ;;  %v21313_v51 = vpop.permute.xlu1 %11298  ;;  %v16278_v10 = vld [vmem:[#allocation6 + $0x40] sm:$0xff] }
 0x545   :  { %15579 = vmatprep.mubr.msk.bf16.mxu1 %vm5599_vm3, %v10817_v5  ;;  %v10981_v5 = vld [vmem:[#allocation6 + $0x57] sm:$0xff]  ;;  %v11287_v13 = vpop.permute.xlu0 %11286 }
 0x546   :  { %v11061_v27 = vmul.f32 %v21219_v34, %v10981_v5  ;;  %v10985_v34 = vld [vmem:[#allocation6 + $0x77] sm:$0xff] }
 0x548   :  { %v11074_v0 = vpack.c.bf16 %v11062_v55, %v11061_v27  ;;  %v21322_v39 = vpop.permute.xlu1 %11306  ;;  %v16213_v55 = vld [vmem:[%s21638_s4 + $0x178] sm:$0xff]  }
 0x549   :  { %v21326_v30 = vpop.permute.xlu0 %11294 }
 0x54c   :  { %15580 = vmatmul.mubr.msk.bf16.gmra.mrb[8].mxu1 %vm5599_vm3, %v10818_v50  ;;  %v22383_v50 = vld [vmem:[#allocation100_spill] sm:$0xff]  ;;  %v21334_v16 = vpop.permute.xlu1 %11508 }
 0x54d   :  { %15583 = vmatprep.mubr.msk.bf16.mxu1 %vm5599_vm3, %v10819_v7  ;;  %v11066_v9 = vmul.f32 %v21215_v23, %v22383_v50  ;;  %v11068_v7 = vmul.f32 %v21227_v62, %v22384_v48  ;;  %v11303_v26 = vpop.permute.xlu0 %11302  ;;  %v11070_v23 = vmul.f32 %v21235_v42, %v10990_v49  ;;  %v11315_v42 = vmul.f32 %v16276_v11, %v21262_v31  ;;  %v11248_v49 = vld [vmem:[#allocation6 + $0xa0] sm:$0xff] }
 0x54e   :  { %v11494_v11 = vld [vmem:[#allocation6 + $0x41] sm:$0xff] }
 0x54f   :  { %v11077_v36 = vpack.c.bf16 %v11068_v7, %v11067_v1  ;;  %v16285_v7 = vld [vmem:[#allocation6 + $0x88] sm:$0xff]  ;;  %v11326_v1 = vmul.f32 %v16287_v29, %v11303_v26 }
 0x550   :  { %v21342_v59 = vpop.permute.xlu1 %11516 }
 0x551   :  { %v11311_v40 = vpop.permute.xlu0 %11310 }
 0x554   :  { %15584 = vmatmul.mubr.msk.bf16.gmra.mrb[12].mxu1 %vm5599_vm3, %v10820_v2  ;;  %v16274_v2 = vld [vmem:[#allocation6 + $0x30] sm:$0xff]  ;;  %v21348_v21 = vpop.permute.xlu1 %11520 }
 0x555   :  { %15591 = vmatprep.mubr.msk.bf16.mxu1 %vm5599_vm3, %v11071_v61  ;;  %v11314_v62 = vmul.f32 %v16274_v2, %v21245_v43  ;;  %v22385_v61 = vld [vmem:[#allocation96_spill] sm:$0xff]  ;;  %v16277_v43 = vld [vmem:[#allocation6 + $0x48] sm:$0xff]  ;;  %v11328_v2 = vmul.f32 %v11311_v40, %v11248_v49  ;;  %v11574_v40 = vmul.f32 %v21348_v21, %v11494_v11 }
 0x556   :  { %v11757_v11 = vld [vmem:[#allocation6 + $0x6a] sm:$0xff] }
 0x557   :  { %v11329_v60 = vpack.c.bf16 %v11314_v62, %v11313_v18  ;;  %v22386_v62 = vld [vmem:[#allocation108_spill] sm:$0xff] }
 0x558   :  { %v11529_v44 = vpop.permute.xlu1 %11528 }
 0x55c   :  { %15592 = vmatmul.mubr.msk.bf16.vlgmr.msra.gmra.mrb[0].mxu1 %vm5599_vm3, %v11072_v37  ;;  %v11316_v37 = vmul.f32 %v16278_v10, %v21285_v32  ;;  %v11537_v50 = vpop.permute.xlu1 %11536  ;;  %v11495_v10 = vld [vmem:[#allocation6 + $0x49] sm:$0xff] }
 0x55d   :  { %15608 = vmatpush3.bf16.msra.mxu1 %v16210_v45  ;;  %15595 = vmatprep.mubr.msk.bf16.mxu1 %vm5599_vm3, %v11073_v53  ;;  %v11063_v45 = vmul.f32 %v21232_v54, %v10983_v12  ;;  %v11065_v54 = vmul.f32 %v21239_v47, %v10985_v34  ;;  %v11069_v47 = vmul.f32 %v21265_v19, %v22385_v61  ;;  %v16282_v12 = vld [vmem:[#allocation6 + $0x60] sm:$0xff] }
 0x55e   :  { %15609 = vmatprep.subr.bf16.mxu1 %v16211_v33  ;;  %v11317_v19 = vmul.f32 %v16277_v43, %v21271_v17  ;;  %v11318_v53 = vmul.f32 %v16279_v56, %v21294_v6  ;;  %v11330_v25 = vpack.c.bf16 %v11316_v37, %v11315_v42  ;;  %v16280_v17 = vld [vmem:[#allocation6 + $0x58] sm:$0xff]  ;;  %v16214_v6 = vld [vmem:[%s21638_s4 + $0x180] sm:$0xff]  }
 0x55f   :  { %v11075_v22 = vpack.c.bf16 %v11064_v52, %v11063_v45  ;;  %v11076_v63 = vpack.c.bf16 %v11066_v9, %v11065_v54  ;;  %v11078_v35 = vpack.c.bf16 %v11070_v23, %v11069_v47  ;;  %v11319_v32 = vmul.f32 %v16280_v17, %v21280_v8  ;;  %v16281_v52 = vld [vmem:[#allocation6 + $0x68] sm:$0xff]  ;;  %v16284_v8 = vld [vmem:[#allocation6 + $0x78] sm:$0xff]  ;;  %v16286_v54 = vld [vmem:[#allocation6 + $0x80] sm:$0xff] }
 0x560   :  { %v11331_v5 = vpack.c.bf16 %v11318_v53, %v11317_v19  ;;  %v11321_v27 = vmul.f32 %v16281_v52, %v21292_v46  ;;  %v11320_v45 = vmul.f32 %v16282_v12, %v21305_v41  ;;  %v11323_v48 = vmul.f32 %v16284_v8, %v21302_v15  ;;  %v11496_v43 = vld [vmem:[#allocation6 + $0x51] sm:$0xff]  ;;  %v16215_v53 = vld [vmem:[%s21638_s4 + $0x188] sm:$0xff]   ;;  %v11497_v17 = vld [vmem:[#allocation6 + $0x59] sm:$0xff] }
 0x561   :  { %15610 = vmatpush3.bf16.msra.mxu1 %v16211_v33  ;;  %v11513_v33 = vpop.permute.xlu0 %11512  ;;  %v11325_v46 = vmul.f32 %v16285_v7, %v21313_v51  ;;  %v11324_v41 = vmul.f32 %v16286_v54, %v21326_v30  ;;  %v11327_v15 = vmul.f32 %v21322_v39, %v22386_v62  ;;  %v22387_v51 = vld [vmem:[#allocation123_spill] sm:$0xff]  ;;  %v11493_v39 = vld [vmem:[#allocation6 + $0x39] sm:$0xff]  ;;  %v11576_v19 = vmul.f32 %v11529_v44, %v11496_v43 }
 0x562   :  { %15627 = vmatprep.subr.bf16.mxu1 %v16212_v57  ;;  %v11571_v47 = vmul.f32 %v21334_v16, %v22387_v51  ;;  %v11492_v30 = vld [vmem:[#allocation6 + $0x31] sm:$0xff]  ;;  %v11573_v16 = vmul.f32 %v21342_v59, %v11493_v39 }
 0x563   :  { %v11335_v23 = vpack.c.bf16 %v11326_v1, %v11325_v46  ;;  %v11572_v18 = vmul.f32 %v11513_v33, %v11492_v30  ;;  %v11336_v26 = vpack.c.bf16 %v11328_v2, %v11327_v15  ;;  %v11500_v44 = vld [vmem:[#allocation6 + $0x71] sm:$0xff]  ;;  %v11751_v15 = vld [vmem:[#allocation6 + $0x3a] sm:$0xff] }
 0x564   :  { %15596 = vmatmul.mubr.msk.bf16.gmra.mrb[4].mxu1 %vm5599_vm3, %v11074_v0  ;;  %v16283_v0 = vld [vmem:[#allocation6 + $0x70] sm:$0xff]  ;;  %v11588_v56 = vpack.c.bf16 %v11574_v40, %v11573_v16  ;;  %v11756_v40 = vld [vmem:[#allocation6 + $0x62] sm:$0xff] }
 0x565   :  { %15599 = vmatprep.mubr.msk.bf16.mxu1 %vm5599_vm3, %v11075_v22  ;;  %v11525_v31 = vpop.permute.xlu0 %11524  ;;  %v11322_v22 = vmul.f32 %v16283_v0, %v11287_v13  ;;  %v11545_v13 = vpop.permute.xlu1 %11544  ;;  %v11753_v51 = vld [vmem:[#allocation6 + $0x4a] sm:$0xff]  ;;  %v11754_v30 = vld [vmem:[#allocation6 + $0x52] sm:$0xff] }
 0x566   :  { %v11575_v37 = vmul.f32 %v11525_v31, %v11495_v10  ;;  %v11580_v59 = vmul.f32 %v11545_v13, %v11500_v44  ;;  %v11762_v44 = vld [vmem:[#allocation6 + $0x92] sm:$0xff] }
 0x567   :  { %v11333_v9 = vpack.c.bf16 %v11322_v22, %v11321_v27  ;;  %v11502_v22 = vld [vmem:[#allocation6 + $0x81] sm:$0xff] }
 0x569   :  { %v11533_v34 = vpop.permute.xlu0 %11532  ;;  %v11553_v61 = vpop.permute.xlu1 %11552 }
 0x56a   :  { %v11577_v31 = vmul.f32 %v11533_v34, %v11497_v17 }
 0x56c   :  { %15600 = vmatmul.mubr.msk.bf16.gmra.mrb[8].mxu1 %vm5599_vm3, %v11076_v63 }
 0x56d   :  { %15603 = vmatprep.mubr.msk.bf16.mxu1 %vm5599_vm3, %v11077_v36  ;;  %v11541_v63 = vpop.permute.xlu0 %11540  ;;  %v11334_v36 = vpack.c.bf16 %v11324_v41, %v11323_v48  ;;  %v11506_v41 = vld [vmem:[#allocation6 + $0xa1] sm:$0xff] }
 0x571   :  { %v11549_v58 = vpop.permute.xlu0 %11548 }
 0x574   :  { %15604 = vmatmul.mubr.msk.bf16.gmra.mrb[12].mxu1 %vm5599_vm3, %v11078_v35  ;;  %v11587_v35 = vpack.c.bf16 %v11572_v18, %v11571_v47 }
 0x575   :  { %15611 = vmatprep.mubr.msk.bf16.mxu1 %vm5599_vm3, %v11329_v60  ;;  %v11561_v60 = vpop.permute.xlu1 %11560  ;;  %v11557_v42 = vpop.permute.xlu0 %11556 }
 0x576   :  { %v11583_v34 = vmul.f32 %v11557_v42, %v21138_v20 }
 0x579   :  { %v11569_v33 = vpop.permute.xlu1 %11568 }
 0x57c   :  { %15612 = vmatmul.mubr.msk.bf16.vlgmr.msra.gmra.mrb[0].mxu1 %vm5599_vm3, %v11330_v25  ;;  %v11589_v25 = vpack.c.bf16 %v11576_v19, %v11575_v37  ;;  %v11758_v19 = vld [vmem:[#allocation6 + $0x72] sm:$0xff] }
 0x57d   :  { %15628 = vmatpush3.bf16.msra.mxu1 %v16212_v57  ;;  %15615 = vmatprep.mubr.msk.bf16.mxu1 %vm5599_vm3, %v11331_v5  ;;  %v11332_v57 = vpack.c.bf16 %v11320_v45, %v11319_v32  ;;  %v11498_v5 = vld [vmem:[#allocation6 + $0x61] sm:$0xff]  ;;  %v11499_v32 = vld [vmem:[#allocation6 + $0x69] sm:$0xff]  ;;  %v11771_v52 = vpop.permute.xlu1 %11770 }
 0x57e   :  { %15629 = vmatprep.subr.bf16.mxu1 %v16213_v55  ;;  %v11578_v21 = vmul.f32 %v11537_v50, %v11498_v5  ;;  %v11579_v27 = vmul.f32 %v11541_v63, %v11499_v32  ;;  %v11586_v63 = vmul.f32 %v11569_v33, %v11506_v41  ;;  %v11759_v33 = vld [vmem:[#allocation6 + $0x7a] sm:$0xff] }
 0x580   :  { %v11590_v45 = vpack.c.bf16 %v11578_v21, %v11577_v31  ;;  %v11591_v0 = vpack.c.bf16 %v11580_v59, %v11579_v27  ;;  %v11764_v27 = vld [vmem:[#allocation6 + $0xa2] sm:$0xff] }
 0x581   :  { %15630 = vmatpush3.bf16.msra.mxu1 %v16213_v55  ;;  %v11565_v55 = vpop.permute.xlu0 %11564  ;;  %v11775_v50 = vpop.permute.xlu1 %11774 }
 0x582   :  { %15647 = vmatprep.subr.bf16.mxu1 %v16214_v6  ;;  %v11585_v29 = vmul.f32 %v11565_v55, %v21144_v38  ;;  %v11760_v55 = vld [vmem:[#allocation6 + $0x82] sm:$0xff] }
 0x584   :  { %15616 = vmatmul.mubr.msk.bf16.gmra.mrb[4].mxu1 %vm5599_vm3, %v11332_v57  ;;  %v11504_v57 = vld [vmem:[#allocation6 + $0x91] sm:$0xff] }
 0x585   :  { %15619 = vmatprep.mubr.msk.bf16.mxu1 %vm5599_vm3, %v11333_v9  ;;  %v11767_v12 = vpop.permute.xlu0 %11766  ;;  %v11501_v9 = vld [vmem:[#allocation6 + $0x79] sm:$0xff]  ;;  %v11584_v8 = vmul.f32 %v11561_v60, %v11504_v57  ;;  %v11783_v13 = vpop.permute.xlu1 %11782 }
 0x586   :  { %v11581_v48 = vmul.f32 %v11549_v58, %v11501_v9  ;;  %v11829_v49 = vmul.f32 %v11767_v12, %v21155_v14  ;;  %v11833_v47 = vmul.f32 %v11783_v13, %v11753_v51 }
 0x587   :  { %v11593_v54 = vpack.c.bf16 %v11584_v8, %v11583_v34 }
 0x589   :  { %v11779_v7 = vpop.permute.xlu0 %11778  ;;  %v11791_v2 = vpop.permute.xlu1 %11790 }
 0x58a   :  { %v11832_v38 = vmul.f32 %v11779_v7, %v21173_v28 }
 0x58c   :  { %15620 = vmatmul.mubr.msk.bf16.gmra.mrb[8].mxu1 %vm5599_vm3, %v11334_v36  ;;  %v11830_v36 = vmul.f32 %v11771_v52, %v21169_v24 }
 0x58d   :  { %15623 = vmatprep.mubr.msk.bf16.mxu1 %vm5599_vm3, %v11335_v23  ;;  %v11787_v1 = vpop.permute.xlu0 %11786  ;;  %v11594_v23 = vpack.c.bf16 %v11586_v63, %v11585_v29  ;;  %v11799_v58 = vpop.permute.xlu1 %11798 }
 0x58e   :  { %v11845_v62 = vpack.c.bf16 %v11830_v36, %v11829_v49  ;;  %v11834_v18 = vmul.f32 %v11787_v1, %v11754_v30  ;;  %v11837_v43 = vmul.f32 %v11799_v58, %v11757_v11 }
 0x590   :  { %v11847_v14 = vpack.c.bf16 %v11834_v18, %v11833_v47 }
 0x591   :  { %v11795_v20 = vpop.permute.xlu0 %11794  ;;  %v11807_v42 = vpop.permute.xlu1 %11806 }
 0x592   :  { %v11836_v39 = vmul.f32 %v11795_v20, %v11756_v40 }
 0x594   :  { %15624 = vmatmul.mubr.msk.bf16.gmra.mrb[12].mxu1 %vm5599_vm3, %v11336_v26 }
 0x595   :  { %15631 = vmatprep.mubr.msk.bf16.mxu1 %vm5599_vm3, %v11587_v35  ;;  %v11803_v24 = vpop.permute.xlu0 %11802  ;;  %v11755_v35 = vld [vmem:[#allocation6 + $0x5a] sm:$0xff] }
 0x596   :  { %v11835_v60 = vmul.f32 %v11791_v2, %v11755_v35  ;;  %v11838_v28 = vmul.f32 %v11803_v24, %v11758_v19 }
 0x598   :  { %v11848_v16 = vpack.c.bf16 %v11836_v39, %v11835_v60  ;;  %v11849_v37 = vpack.c.bf16 %v11838_v28, %v11837_v43 }
 0x599   :  { %v11811_v10 = vpop.permute.xlu0 %11810 }
 0x59a   :  { %v11840_v21 = vmul.f32 %v11811_v10, %v11760_v55 }
 0x59c   :  { %15632 = vmatmul.mubr.msk.bf16.vlgmr.msra.gmra.mrb[0].mxu1 %vm5599_vm3, %v11588_v56  ;;  %v11815_v56 = vpop.permute.xlu1 %11814 }
 0x59d   :  { %15648 = vmatpush3.bf16.msra.mxu1 %v16214_v6  ;;  %15635 = vmatprep.mubr.msk.bf16.mxu1 %vm5599_vm3, %v11589_v25  ;;  %v11582_v6 = vmul.f32 %v11553_v61, %v11502_v22  ;;  %v11831_v61 = vmul.f32 %v11775_v50, %v11751_v15  ;;  %v11839_v25 = vmul.f32 %v11807_v42, %v11759_v33 }
 0x59e   :  { %15649 = vmatprep.subr.bf16.mxu1 %v16215_v53  ;;  %v11841_v5 = vmul.f32 %v11815_v56, %v21209_v4  ;;  %v22388_v4 = vmov 0.0  }
 0x59f   :  { %v11592_v46 = vpack.c.bf16 %v11582_v6, %v11581_v48  ;;  %v11846_v26 = vpack.c.bf16 %v11832_v38, %v11831_v61  ;;  %v11850_v59 = vpack.c.bf16 %v11840_v21, %v11839_v25  ;;  %12049 = vst.msk [vmem:[#allocation7 + $0x10] sm:$0xff] %vm12046_vm4, %v22388_v4  ;;  %12047 = vst.msk [vmem:[#allocation7] sm:$0xff] %vm12046_vm4, %v22388_v4 }
 0x5a0   :  { %v11823_v32 = vpop.permute.xlu1 %11822  ;;  %12048 = vst.msk [vmem:[#allocation7 + $0x8] sm:$0xff] %vm12046_vm4, %v22388_v4  ;;  %12050 = vst.msk [vmem:[#allocation7 + $0x18] sm:$0xff] %vm12046_vm4, %v22388_v4 }
 0x5a1   :  { %15650 = vmatpush3.bf16.msra.mxu1 %v16215_v53  ;;  %v11819_v53 = vpop.permute.xlu0 %11818  ;;  %v11843_v12 = vmul.f32 %v11823_v32, %v21221_v3  ;;  %12051 = vst.msk [vmem:[#allocation7 + $0x20] sm:$0xff] %vm12046_vm4, %v22388_v4  ;;  %12052 = vst.msk [vmem:[#allocation7 + $0x28] sm:$0xff] %vm12046_vm4, %v22388_v4  ;;  %v21443_v3 = vld [vmem:[%s21639_s5] ss:$0 sm:$0xff] }
 0x5a2   :  { %v11842_v17 = vmul.f32 %v11819_v53, %v11762_v44  ;;  %12053 = vst.msk [vmem:[#allocation7 + $0x30] sm:$0xff] %vm12046_vm4, %v22388_v4  ;;  %12054 = vst.msk [vmem:[#allocation7 + $0x38] sm:$0xff] %vm12046_vm4, %v22388_v4 }
 0x5a3   :  { %12055 = vst.msk [vmem:[#allocation7 + $0x40] sm:$0xff] %vm12046_vm4, %v22388_v4  ;;  %12056 = vst.msk [vmem:[#allocation7 + $0x48] sm:$0xff] %vm12046_vm4, %v22388_v4 }
 0x5a4   :  { %15636 = vmatmul.mubr.msk.bf16.gmra.mrb[4].mxu1 %vm5599_vm3, %v11590_v45  ;;  %v11851_v31 = vpack.c.bf16 %v11842_v17, %v11841_v5  ;;  %12057 = vst.msk [vmem:[#allocation7 + $0x50] sm:$0xff] %vm12046_vm4, %v22388_v4  ;;  %12058 = vst.msk [vmem:[#allocation7 + $0x58] sm:$0xff] %vm12046_vm4, %v22388_v4 }
 0x5a5   :  { %15639 = vmatprep.mubr.msk.bf16.mxu1 %vm5599_vm3, %v11591_v0  ;;  %v11827_v52 = vpop.permute.xlu0 %11826  ;;  %12059 = vst.msk [vmem:[#allocation7 + $0x60] sm:$0xff] %vm12046_vm4, %v22388_v4  ;;  %12060 = vst.msk [vmem:[#allocation7 + $0x68] sm:$0xff] %vm12046_vm4, %v22388_v4 }
 0x5a6   :  { %v11844_v45 = vmul.f32 %v11827_v52, %v11764_v27  ;;  %12061 = vst.msk [vmem:[#allocation7 + $0x70] sm:$0xff] %vm12046_vm4, %v22388_v4  ;;  %12062 = vst.msk [vmem:[#allocation7 + $0x78] sm:$0xff] %vm12046_vm4, %v22388_v4 }
 0x5a7   :  { %12063 = vst.msk [vmem:[#allocation7 + $0x80] sm:$0xff] %vm12046_vm4, %v22388_v4  ;;  %12064 = vst.msk [vmem:[#allocation7 + $0x88] sm:$0xff] %vm12046_vm4, %v22388_v4 }
 0x5a8   :  { %v11852_v0 = vpack.c.bf16 %v11844_v45, %v11843_v12 }
 0x5ac   :  { %15640 = vmatmul.mubr.msk.bf16.gmra.mrb[8].mxu1 %vm5599_vm3, %v11592_v46 }
 0x5ad   :  { %15643 = vmatprep.mubr.msk.bf16.mxu1 %vm5599_vm3, %v11593_v54 }
 0x5b4   :  { %15644 = vmatmul.mubr.msk.bf16.gmra.mrb[12].mxu1 %vm5599_vm3, %v11594_v23 }
 0x5b5   :  { %15651 = vmatprep.mubr.msk.bf16.mxu1 %vm5599_vm3, %v11845_v62 }
 0x5bc   :  { %15652 = vmatmul.mubr.msk.bf16.vlgmr.msra.gmra.mrb[0].mxu1 %vm5599_vm3, %v11846_v26 }
 0x5bd   :  { %15655 = vmatprep.mubr.msk.bf16.mxu1 %vm5599_vm3, %v11847_v14 }
 0x5c4   :  { %15656 = vmatmul.mubr.msk.bf16.gmra.mrb[4].mxu1 %vm5599_vm3, %v11848_v16 }
 0x5c5   :  { %15659 = vmatprep.mubr.msk.bf16.mxu1 %vm5599_vm3, %v11849_v37 }
 0x5cc   :  { %15660 = vmatmul.mubr.msk.bf16.gmra.mrb[8].mxu1 %vm5599_vm3, %v11850_v59 }
 0x5cd   :  { %15663 = vmatprep.mubr.msk.bf16.mxu1 %vm5599_vm3, %v11851_v31 }
 0x5d4   :  { %15664 = vmatmul.mubr.msk.bf16.gmra.mrb[12].mxu1 %vm5599_vm3, %v11852_v0 }
 0x68f   :  { %v15653_v22 = vpop.f32.mrb[0].mxu1 }
 0x690   :  { %v12016_v6 = vadd.f32 %v15653_v22, %v21443_v3  ;;  %v11928_v57 = vpop.f32.mrb[1].mxu1 }
 0x691   :  { %v12014_v50 = vadd.f32 %v21443_v3, %v11928_v57  ;;  %v15654_v9 = vpop.f32.mrb[2].mxu1 }
 0x692   :  { %v12032_v8 = vmax.f32 %v12016_v6, 0.0  ;;  %v12017_v48 = vadd.f32 %v15654_v9, %v21443_v3  ;;  %v11931_v7 = vpop.f32.mrb[3].mxu1 }
 0x693   :  { %v12030_v34 = vmax.f32 %v12014_v50, 0.0  ;;  %v12015_v46 = vadd.f32 %v21443_v3, %v11931_v7 }
 0x694   :  { %12067 = vst.msk [vmem:[#allocation7 + $0x10] sm:$0xff] %vm12046_vm4, %v12032_v8  ;;  %v12033_v54 = vmax.f32 %v12017_v48, 0.0 }
 0x695   :  { %12065 = vst.msk [vmem:[#allocation7] sm:$0xff] %vm12046_vm4, %v12030_v34  ;;  %v12031_v41 = vmax.f32 %v12015_v46, 0.0 }
 0x696   :  { %12068 = vst.msk [vmem:[#allocation7 + $0x18] sm:$0xff] %vm12046_vm4, %v12033_v54 }
 0x697   :  { %12066 = vst.msk [vmem:[#allocation7 + $0x8] sm:$0xff] %vm12046_vm4, %v12031_v41  ;;  %v15657_v13 = vpop.f32.mrb[4].mxu1 }
 0x698   :  { %v12020_v29 = vadd.f32 %v15657_v13, %v21443_v3  ;;  %v11944_v1 = vpop.f32.mrb[5].mxu1 }
 0x699   :  { %v12018_v63 = vadd.f32 %v21443_v3, %v11944_v1  ;;  %v15658_v36 = vpop.f32.mrb[6].mxu1 }
 0x69a   :  { %v12036_v49 = vmax.f32 %v12020_v29, 0.0  ;;  %v12021_v23 = vadd.f32 %v15658_v36, %v21443_v3  ;;  %v11947_v2 = vpop.f32.mrb[7].mxu1 }
 0x69b   :  { %v12034_v62 = vmax.f32 %v12018_v63, 0.0  ;;  %v12019_v20 = vadd.f32 %v21443_v3, %v11947_v2  ;;  %v12083_v61 = vld [vmem:[#allocation7 + $0x10] sm:$0xff] }
 0x69c   :  { %12071 = vst.msk [vmem:[#allocation7 + $0x30] sm:$0xff] %vm12046_vm4, %v12036_v49  ;;  %v12037_v15 = vmax.f32 %v12021_v23, 0.0  ;;  %v12081_v51 = vld [vmem:[#allocation7] sm:$0xff] }
 0x69d   :  { %v12099_v47 = vld [vmem:[#allocation7 + $0x11] sm:$0xff]  ;;  %12069 = vst.msk [vmem:[#allocation7 + $0x20] sm:$0xff] %vm12046_vm4, %v12034_v62  ;;  %v12035_v38 = vmax.f32 %v12019_v20, 0.0 }
 0x69e   :  { %v12115_v30 = vmax.f32 %v12083_v61, %v12099_v47  ;;  %v12082_v58 = vld [vmem:[#allocation7 + $0x8] sm:$0xff]  ;;  %12072 = vst.msk [vmem:[#allocation7 + $0x38] sm:$0xff] %vm12046_vm4, %v12037_v15  ;;  %v12084_v37 = vld [vmem:[#allocation7 + $0x18] sm:$0xff] }
 0x69f   :  { %v12097_v18 = vld [vmem:[#allocation7 + $0x1] sm:$0xff]  ;;  %v12098_v24 = vld [vmem:[#allocation7 + $0x9] sm:$0xff]  ;;  %12070 = vst.msk [vmem:[#allocation7 + $0x28] sm:$0xff] %vm12046_vm4, %v12035_v38  ;;  %v15661_v35 = vpop.f32.mrb[8].mxu1 }
 0x6a0   :  { %v12113_v26 = vmax.f32 %v12081_v51, %v12097_v18  ;;  %v12114_v14 = vmax.f32 %v12082_v58, %v12098_v24  ;;  %v12024_v60 = vadd.f32 %v15661_v35, %v21443_v3  ;;  %v11960_v11 = vpop.f32.mrb[9].mxu1 }
 0x6a1   :  { %v12022_v40 = vadd.f32 %v21443_v3, %v11960_v11  ;;  %v15662_v43 = vpop.f32.mrb[10].mxu1 }
 0x6a2   :  { %v12132_v42 = vmax.f32 %v12113_v26, %v12114_v14  ;;  %v12040_v39 = vmax.f32 %v12024_v60, 0.0  ;;  %v12025_v19 = vadd.f32 %v15662_v43, %v21443_v3  ;;  %v11963_v10 = vpop.f32.mrb[11].mxu1 }
 0x6a3   :  { %v12038_v28 = vmax.f32 %v12022_v40, 0.0  ;;  %v12023_v16 = vadd.f32 %v21443_v3, %v11963_v10  ;;  %v12087_v53 = vld [vmem:[#allocation7 + $0x30] sm:$0xff] }
 0x6a4   :  { %12148 = vst.msk [vmem:[#allocation8] sm:$0xff] %vm12046_vm4, %v12132_v42  ;;  %v12100_v56 = vld [vmem:[#allocation7 + $0x19] sm:$0xff]  ;;  %12075 = vst.msk [vmem:[#allocation7 + $0x50] sm:$0xff] %vm12046_vm4, %v12040_v39  ;;  %v12041_v33 = vmax.f32 %v12025_v19, 0.0 }
 0x6a5   :  { %v12085_v25 = vld [vmem:[#allocation7 + $0x20] sm:$0xff]  ;;  %v12116_v55 = vmax.f32 %v12084_v37, %v12100_v56  ;;  %v12103_v5 = vld [vmem:[#allocation7 + $0x31] sm:$0xff]  ;;  %12073 = vst.msk [vmem:[#allocation7 + $0x40] sm:$0xff] %vm12046_vm4, %v12038_v28  ;;  %v12039_v21 = vmax.f32 %v12023_v16, 0.0 }
 0x6a6   :  { %v12119_v44 = vmax.f32 %v12087_v53, %v12103_v5  ;;  %v12086_v17 = vld [vmem:[#allocation7 + $0x28] sm:$0xff]  ;;  %12076 = vst.msk [vmem:[#allocation7 + $0x58] sm:$0xff] %vm12046_vm4, %v12041_v33  ;;  %v12088_v7 = vld [vmem:[#allocation7 + $0x38] sm:$0xff] }
 0x6a7   :  { %v12101_v59 = vld [vmem:[#allocation7 + $0x21] sm:$0xff]  ;;  %v12102_v31 = vld [vmem:[#allocation7 + $0x29] sm:$0xff]  ;;  %v12134_v32 = vmax.f32 %v12115_v30, %v12116_v55  ;;  %12074 = vst.msk [vmem:[#allocation7 + $0x48] sm:$0xff] %vm12046_vm4, %v12039_v21  ;;  %v15665_v12 = vpop.f32.mrb[12].mxu1 }
 0x6a8   :  { %v12117_v52 = vmax.f32 %v12085_v25, %v12101_v59  ;;  %v12118_v27 = vmax.f32 %v12086_v17, %v12102_v31  ;;  %v12028_v45 = vadd.f32 %v15665_v12, %v21443_v3  ;;  %v11976_v0 = vpop.f32.mrb[13].mxu1 }
 0x6a9   :  { %12150 = vst.msk [vmem:[#allocation8 + $0x10] sm:$0xff] %vm12046_vm4, %v12134_v32  ;;  %v12026_v22 = vadd.f32 %v21443_v3, %v11976_v0  ;;  %v15666_v6 = vpop.f32.mrb[14].mxu1 }
 0x6aa   :  { %v12136_v4 = vmax.f32 %v12117_v52, %v12118_v27  ;;  %v12044_v57 = vmax.f32 %v12028_v45, 0.0  ;;  %v12029_v50 = vadd.f32 %v15666_v6, %v21443_v3  ;;  %v11979_v9 = vpop.f32.mrb[15].mxu1 }
 0x6ab   :  { %v12042_v8 = vmax.f32 %v12026_v22, 0.0  ;;  %v12027_v48 = vadd.f32 %v21443_v3, %v11979_v9  ;;  %v12091_v54 = vld [vmem:[#allocation7 + $0x50] sm:$0xff] }
 0x6ac   :  { %12152 = vst.msk [vmem:[#allocation8 + $0x20] sm:$0xff] %vm12046_vm4, %v12136_v4  ;;  %v12104_v34 = vld [vmem:[#allocation7 + $0x39] sm:$0xff]  ;;  %12079 = vst.msk [vmem:[#allocation7 + $0x70] sm:$0xff] %vm12046_vm4, %v12044_v57  ;;  %v12045_v46 = vmax.f32 %v12029_v50, 0.0 }
 0x6ad   :  { %v12089_v41 = vld [vmem:[#allocation7 + $0x40] sm:$0xff]  ;;  %v12120_v13 = vmax.f32 %v12088_v7, %v12104_v34  ;;  %v12107_v29 = vld [vmem:[#allocation7 + $0x51] sm:$0xff]  ;;  %12077 = vst.msk [vmem:[#allocation7 + $0x60] sm:$0xff] %vm12046_vm4, %v12042_v8  ;;  %v12043_v1 = vmax.f32 %v12027_v48, 0.0 }
 0x6ae   :  { %v12123_v63 = vmax.f32 %v12091_v54, %v12107_v29  ;;  %v12090_v36 = vld [vmem:[#allocation7 + $0x48] sm:$0xff]  ;;  %12080 = vst.msk [vmem:[#allocation7 + $0x78] sm:$0xff] %vm12046_vm4, %v12045_v46  ;;  %v12092_v15 = vld [vmem:[#allocation7 + $0x58] sm:$0xff] }
 0x6af   :  { %v12105_v49 = vld [vmem:[#allocation7 + $0x41] sm:$0xff]  ;;  %v12106_v23 = vld [vmem:[#allocation7 + $0x49] sm:$0xff]  ;;  %v12138_v2 = vmax.f32 %v12119_v44, %v12120_v13  ;;  %12078 = vst.msk [vmem:[#allocation7 + $0x68] sm:$0xff] %vm12046_vm4, %v12043_v1 }
 0x6b0   :  { %v12121_v3 = vmax.f32 %v12089_v41, %v12105_v49  ;;  %v12122_v62 = vmax.f32 %v12090_v36, %v12106_v23 }
 0x6b1   :  { %12154 = vst.msk [vmem:[#allocation8 + $0x30] sm:$0xff] %vm12046_vm4, %v12138_v2 }
 0x6b2   :  { %v12140_v20 = vmax.f32 %v12121_v3, %v12122_v62 }
 0x6b3   :  { %v12095_v61 = vld [vmem:[#allocation7 + $0x70] sm:$0xff] }
 0x6b4   :  { %12156 = vst.msk [vmem:[#allocation8 + $0x40] sm:$0xff] %vm12046_vm4, %v12140_v20  ;;  %v12093_v51 = vld [vmem:[#allocation7 + $0x60] sm:$0xff] }
 0x6b5   :  { %v12108_v47 = vld [vmem:[#allocation7 + $0x59] sm:$0xff]  ;;  %v12111_v58 = vld [vmem:[#allocation7 + $0x71] sm:$0xff] }
 0x6b6   :  { %v12124_v38 = vmax.f32 %v12092_v15, %v12108_v47  ;;  %v12096_v30 = vld [vmem:[#allocation7 + $0x78] sm:$0xff]  ;;  %v12127_v24 = vmax.f32 %v12095_v61, %v12111_v58  ;;  %v12094_v14 = vld [vmem:[#allocation7 + $0x68] sm:$0xff] }
 0x6b7   :  { %v12112_v18 = vld [vmem:[#allocation7 + $0x79] sm:$0xff]  ;;  %v12109_v35 = vld [vmem:[#allocation7 + $0x61] sm:$0xff]  ;;  %v12110_v60 = vld [vmem:[#allocation7 + $0x69] sm:$0xff] }
 0x6b8   :  { %v12128_v26 = vmax.f32 %v12096_v30, %v12112_v18  ;;  %v12142_v11 = vmax.f32 %v12123_v63, %v12124_v38  ;;  %v12125_v42 = vmax.f32 %v12093_v51, %v12109_v35  ;;  %v12126_v40 = vmax.f32 %v12094_v14, %v12110_v60 }
 0x6ba   :  { %v12146_v43 = vmax.f32 %v12127_v24, %v12128_v26  ;;  %12158 = vst.msk [vmem:[#allocation8 + $0x50] sm:$0xff] %vm12046_vm4, %v12142_v11  ;;  %v12144_v39 = vmax.f32 %v12125_v42, %v12126_v40 }
 0x6bc   :  { %12162 = vst.msk [vmem:[#allocation8 + $0x70] sm:$0xff] %vm12046_vm4, %v12146_v43  ;;  %12160 = vst.msk [vmem:[#allocation8 + $0x60] sm:$0xff] %vm12046_vm4, %v12144_v39 }
 0x6bd   :  { %16310 = dma.done.wait [#allocation5], 32768 }
 0x6be   :  { %16311 = vsyncadd [#allocation5], 4294934528  ;;  %v22389_v19 = vmov 0   ;;  %v12202_v10 = vld [vmem:[#allocation2 + $0x88] sm:$0xff]  ;;  %v12201_v28 = vld [vmem:[#allocation2 + $0x80] sm:$0xff]  ;;  %vm12174_vm5 = vcmask 1040384  }
 0x6bf   :  { %12252 = vmatprep.mubr.bf16.mxu0 %v22389_v19  ;;  %v12206_v16 = vld [vmem:[#allocation2 + $0xa8] sm:$0xff]  ;;  %12220 = vmatprep.subr.bf16.mxu0 %v12202_v10  ;;  %v12205_v37 = vld [vmem:[#allocation2 + $0xa0] sm:$0xff]  ;;  %v12204_v17 = vld [vmem:[#allocation2 + $0x98] sm:$0xff] }
 0x6c0   :  { %12221 = vmatpush1.bf16.msra.mxu0 %v12201_v28  ;;  %v12194_v56 = vld [vmem:[#allocation8 + $0x42] sm:$0x1]  ;;  %v12210_v33 = vld [vmem:[#allocation2 + $0xc8] sm:$0xff]  ;;  %v12203_v31 = vld [vmem:[#allocation2 + $0x90] sm:$0xff] }
 0x6c1   :  { %12222 = vmatprep.subr.bf16.mxu0 %v12206_v16  ;;  %v12196_v53 = vrot.slane %v12194_v56, 7  ;;  %v12209_v25 = vld [vmem:[#allocation2 + $0xc0] sm:$0xff]  ;;  %v12214_v5 = vld [vmem:[#allocation2 + $0xe8] sm:$0xff]  ;;  %v12208_v32 = vld [vmem:[#allocation2 + $0xb8] sm:$0xff] }
 0x6c2   :  { %v12193_v55 = vld [vmem:[#allocation8 + $0x2] sm:$0x1]  ;;  %v12207_v52 = vld [vmem:[#allocation2 + $0xb0] sm:$0xff]  ;;  %v12212_v27 = vld [vmem:[#allocation2 + $0xd8] sm:$0xff] }
 0x6c3   :  { %v12198_v21 = vsel %vm12174_vm5, %v12193_v55, %v12196_v53  ;;  %v12213_v44 = vld [vmem:[#allocation2 + $0xe0] sm:$0xff]  ;;  %v12211_v12 = vld [vmem:[#allocation2 + $0xd0] sm:$0xff]  ;;  %v12216_v45 = vld [vmem:[#allocation2 + $0xf8] sm:$0xff] }
 0x6c4   :  { %12223 = vmatpush1.bf16.msra.mxu0 %v12205_v37  ;;  %v12199_v59 = vpack.c.bf16 %v12198_v21, %v12198_v21  ;;  %v12215_v0 = vld [vmem:[#allocation2 + $0xf0] sm:$0xff]  ;;  %v12178_v4 = vld [vmem:[#allocation2 + $0x8] sm:$0xff]  ;;  %v12177_v22 = vld [vmem:[#allocation2] sm:$0xff] }
 0x6c5   :  { %12224 = vmatprep.subr.bf16.mxu0 %v12210_v33  ;;  %v12182_v6 = vld [vmem:[#allocation2 + $0x28] sm:$0xff]  ;;  %v12181_v57 = vld [vmem:[#allocation2 + $0x20] sm:$0xff]  ;;  %v12180_v41 = vld [vmem:[#allocation2 + $0x18] sm:$0xff] }
 0x6c6   :  { %v12170_v50 = vld [vmem:[#allocation8 + $0x40] sm:$0x1]  ;;  %v12186_v9 = vld [vmem:[#allocation2 + $0x48] sm:$0xff]  ;;  %v12179_v29 = vld [vmem:[#allocation2 + $0x10] sm:$0xff] }
 0x6c7   :  { %v12172_v8 = vrot.slane %v12170_v50, 7  ;;  %v12185_v48 = vld [vmem:[#allocation2 + $0x40] sm:$0xff]  ;;  %v12190_v34 = vld [vmem:[#allocation2 + $0x68] sm:$0xff]  ;;  %v12184_v1 = vld [vmem:[#allocation2 + $0x38] sm:$0xff] }
 0x6c8   :  { %12225 = vmatpush1.bf16.msra.mxu0 %v12209_v25  ;;  %v12169_v7 = vld [vmem:[#allocation8] sm:$0x1]  ;;  %v12183_v63 = vld [vmem:[#allocation2 + $0x30] sm:$0xff]  ;;  %v12188_v36 = vld [vmem:[#allocation2 + $0x58] sm:$0xff] }
 0x6c9   :  { %12226 = vmatprep.subr.bf16.mxu0 %v12214_v5  ;;  %v12175_v46 = vsel %vm12174_vm5, %v12169_v7, %v12172_v8  ;;  %v12189_v54 = vld [vmem:[#allocation2 + $0x60] sm:$0xff]  ;;  %v12187_v49 = vld [vmem:[#allocation2 + $0x50] sm:$0xff]  ;;  %v12192_v23 = vld [vmem:[#allocation2 + $0x78] sm:$0xff] }
 0x6ca   :  { %v12176_v13 = vpack.c.bf16 %v12175_v46, %v12175_v46  ;;  %v12191_v2 = vld [vmem:[#allocation2 + $0x70] sm:$0xff]  ;;  %v12396_v3 = vld [vmem:[#allocation2 + $0x108] sm:$0xff]  ;;  %v12395_v62 = vld [vmem:[#allocation2 + $0x100] sm:$0xff] }
 0x6cb   :  { %v12400_v20 = vld [vmem:[#allocation2 + $0x128] sm:$0xff]  ;;  %v12399_v15 = vld [vmem:[#allocation2 + $0x120] sm:$0xff]  ;;  %v12398_v26 = vld [vmem:[#allocation2 + $0x118] sm:$0xff] }
 0x6cc   :  { %12227 = vmatpush1.bf16.msra.mxu0 %v12213_v44  ;;  %v12388_v61 = vld [vmem:[#allocation8 + $0x44] sm:$0x1]  ;;  %v12404_v51 = vld [vmem:[#allocation2 + $0x148] sm:$0xff]  ;;  %v12397_v35 = vld [vmem:[#allocation2 + $0x110] sm:$0xff] }
 0x6cd   :  { %12261 = vmatprep.subr.bf16.mxu0 %v12204_v17  ;;  %v12390_v47 = vrot.slane %v12388_v61, 7  ;;  %v12403_v38 = vld [vmem:[#allocation2 + $0x140] sm:$0xff]  ;;  %v12408_v58 = vld [vmem:[#allocation2 + $0x168] sm:$0xff]  ;;  %v12402_v60 = vld [vmem:[#allocation2 + $0x138] sm:$0xff] }
 0x6ce   :  { %v12387_v30 = vld [vmem:[#allocation8 + $0x4] sm:$0x1]  ;;  %v12401_v11 = vld [vmem:[#allocation2 + $0x130] sm:$0xff]  ;;  %v12406_v42 = vld [vmem:[#allocation2 + $0x158] sm:$0xff] }
 0x6cf   :  { %14757 = vmatmul.mubr.msk.bf16.vlgmr.msra.gmra.mrb[64].mxu0 %vm12046_vm4, %v12199_v59  ;;  %v12392_v18 = vsel %vm12174_vm5, %v12387_v30, %v12390_v47  ;;  %v12407_v24 = vld [vmem:[#allocation2 + $0x160] sm:$0xff]  ;;  %v12405_v40 = vld [vmem:[#allocation2 + $0x150] sm:$0xff]  ;;  %v12410_v43 = vld [vmem:[#allocation2 + $0x178] sm:$0xff] }
 0x6d0   :  { %12262 = vmatpush1.bf16.msra.mxu0 %v12203_v31  ;;  %12293 = vmatprep.mubr.bf16.mxu0 %v22389_v19  ;;  %v12393_v14 = vpack.c.bf16 %v12392_v18, %v12392_v18  ;;  %v12409_v39 = vld [vmem:[#allocation2 + $0x170] sm:$0xff]  ;;  %v12509_v10 = vld [vmem:[#allocation2 + $0x188] sm:$0xff]  ;;  %v12508_v28 = vld [vmem:[#allocation2 + $0x180] sm:$0xff] }
 0x6d1   :  { %12263 = vmatprep.subr.bf16.mxu0 %v12208_v32  ;;  %v12513_v16 = vld [vmem:[#allocation2 + $0x1a8] sm:$0xff]  ;;  %v12512_v37 = vld [vmem:[#allocation2 + $0x1a0] sm:$0xff]  ;;  %v12511_v17 = vld [vmem:[#allocation2 + $0x198] sm:$0xff] }
 0x6d2   :  { %v12501_v56 = vld [vmem:[#allocation8 + $0x46] sm:$0x1]  ;;  %v12517_v33 = vld [vmem:[#allocation2 + $0x1c8] sm:$0xff]  ;;  %v12510_v31 = vld [vmem:[#allocation2 + $0x190] sm:$0xff] }
 0x6d3   :  { %v12503_v53 = vrot.slane %v12501_v56, 7  ;;  %v12516_v25 = vld [vmem:[#allocation2 + $0x1c0] sm:$0xff]  ;;  %v12521_v5 = vld [vmem:[#allocation2 + $0x1e8] sm:$0xff]  ;;  %v12515_v32 = vld [vmem:[#allocation2 + $0x1b8] sm:$0xff] }
 0x6d4   :  { %12264 = vmatpush1.bf16.msra.mxu0 %v12207_v52  ;;  %v12500_v55 = vld [vmem:[#allocation8 + $0x6] sm:$0x1]  ;;  %v12514_v52 = vld [vmem:[#allocation2 + $0x1b0] sm:$0xff] }
 0x6d5   :  { %12265 = vmatprep.subr.bf16.mxu0 %v12212_v27  ;;  %v12505_v21 = vsel %vm12174_vm5, %v12500_v55, %v12503_v53  ;;  %v12520_v44 = vld [vmem:[#allocation2 + $0x1e0] sm:$0xff]  ;;  %v12519_v27 = vld [vmem:[#allocation2 + $0x1d8] sm:$0xff]  ;;  %v12614_v50 = vld [vmem:[#allocation8 + $0x50] sm:$0x1] }
 0x6d6   :  { %v12616_v8 = vrot.slane %v12614_v50, 7  ;;  %v12613_v7 = vld [vmem:[#allocation8 + $0x10] sm:$0x1]  ;;  %v12727_v61 = vld [vmem:[#allocation8 + $0x52] sm:$0x1] }
 0x6d7   :  { %v12729_v47 = vrot.slane %v12727_v61, 7  ;;  %v12726_v30 = vld [vmem:[#allocation8 + $0x12] sm:$0x1]  ;;  %v12840_v56 = vld [vmem:[#allocation8 + $0x54] sm:$0x1] }
 0x6d8   :  { %12266 = vmatpush1.bf16.msra.mxu0 %v12211_v12  ;;  %v12518_v12 = vld [vmem:[#allocation2 + $0x1d0] sm:$0xff]  ;;  %v12618_v46 = vsel %vm12174_vm5, %v12613_v7, %v12616_v8  ;;  %v12842_v53 = vrot.slane %v12840_v56, 7  ;;  %v12969_v8 = vld [vmem:[#allocation2 + $0x3c8] sm:$0xff]  ;;  %v13085_v56 = vld [vmem:[#allocation2 + $0x460] sm:$0xff] }
 0x6d9   :  { %12267 = vmatprep.subr.bf16.mxu0 %v12216_v45  ;;  %v12523_v45 = vld [vmem:[#allocation2 + $0x1f8] sm:$0xff]  ;;  %v12731_v18 = vsel %vm12174_vm5, %v12726_v30, %v12729_v47  ;;  %v12839_v55 = vld [vmem:[#allocation8 + $0x14] sm:$0x1]  ;;  %v12953_v50 = vld [vmem:[#allocation8 + $0x56] sm:$0x1] }
 0x6da   :  { %v12975_v47 = vld [vmem:[#allocation2 + $0x3f8] sm:$0xff]  ;;  %v13074_v30 = vld [vmem:[#allocation2 + $0x408] sm:$0xff] }
 0x6dc   :  { %12268 = vmatpush1.bf16.msra.mxu0 %v12215_v0  ;;  %v12522_v0 = vld [vmem:[#allocation2 + $0x1f0] sm:$0xff] }
 0x6dd   :  { %12305 = vmatprep.subr.bf16.mxu0 %v12178_v4  ;;  %v12622_v4 = vld [vmem:[#allocation2 + $0x208] sm:$0xff] }
 0x6df   :  { %14758 = vmatmul.mubr.msk.bf16.vlgmr.msra.gmra.mrb[68].mxu0 %vm12046_vm4, %v12199_v59  ;;  %v12506_v59 = vpack.c.bf16 %v12505_v21, %v12505_v21  ;;  %v12844_v21 = vsel %vm12174_vm5, %v12839_v55, %v12842_v53  ;;  %v13080_v55 = vld [vmem:[#allocation2 + $0x438] sm:$0xff] }
 0x6e0   :  { %12306 = vmatpush1.bf16.msra.mxu0 %v12177_v22  ;;  %12337 = vmatprep.mubr.bf16.mxu0 %v22389_v19  ;;  %v12621_v22 = vld [vmem:[#allocation2 + $0x200] sm:$0xff] }
 0x6e1   :  { %12307 = vmatprep.subr.bf16.mxu0 %v12182_v6  ;;  %v12626_v6 = vld [vmem:[#allocation2 + $0x228] sm:$0xff] }
 0x6e4   :  { %12308 = vmatpush1.bf16.msra.mxu0 %v12181_v57  ;;  %v12625_v57 = vld [vmem:[#allocation2 + $0x220] sm:$0xff] }
 0x6e5   :  { %12309 = vmatprep.subr.bf16.mxu0 %v12186_v9  ;;  %v12630_v9 = vld [vmem:[#allocation2 + $0x248] sm:$0xff] }
 0x6e8   :  { %12310 = vmatpush1.bf16.msra.mxu0 %v12185_v48  ;;  %v12629_v48 = vld [vmem:[#allocation2 + $0x240] sm:$0xff] }
 0x6e9   :  { %12311 = vmatprep.subr.bf16.mxu0 %v12190_v34  ;;  %v12634_v34 = vld [vmem:[#allocation2 + $0x268] sm:$0xff] }
 0x6ec   :  { %12312 = vmatpush1.bf16.msra.mxu0 %v12189_v54  ;;  %v12633_v54 = vld [vmem:[#allocation2 + $0x260] sm:$0xff] }
 0x6ed   :  { %12346 = vmatprep.subr.bf16.mxu0 %v12180_v41  ;;  %v12624_v41 = vld [vmem:[#allocation2 + $0x218] sm:$0xff] }
 0x6ef   :  { %14759 = vmatmul.mubr.msk.bf16.vlgmr.msra.gmra.mrb[72].mxu0 %vm12046_vm4, %v12176_v13 }
 0x6f0   :  { %12347 = vmatpush1.bf16.msra.mxu0 %v12179_v29  ;;  %12378 = vmatprep.mubr.bf16.mxu0 %v22389_v19  ;;  %v12623_v29 = vld [vmem:[#allocation2 + $0x210] sm:$0xff] }
 0x6f1   :  { %12348 = vmatprep.subr.bf16.mxu0 %v12184_v1  ;;  %v12628_v1 = vld [vmem:[#allocation2 + $0x238] sm:$0xff] }
 0x6f4   :  { %12349 = vmatpush1.bf16.msra.mxu0 %v12183_v63  ;;  %v12627_v63 = vld [vmem:[#allocation2 + $0x230] sm:$0xff] }
 0x6f5   :  { %12350 = vmatprep.subr.bf16.mxu0 %v12188_v36  ;;  %v12632_v36 = vld [vmem:[#allocation2 + $0x258] sm:$0xff] }
 0x6f8   :  { %12351 = vmatpush1.bf16.msra.mxu0 %v12187_v49  ;;  %v12631_v49 = vld [vmem:[#allocation2 + $0x250] sm:$0xff] }
 0x6f9   :  { %12352 = vmatprep.subr.bf16.mxu0 %v12192_v23  ;;  %v12636_v23 = vld [vmem:[#allocation2 + $0x278] sm:$0xff] }
 0x6fc   :  { %12353 = vmatpush1.bf16.msra.mxu0 %v12191_v2  ;;  %v12635_v2 = vld [vmem:[#allocation2 + $0x270] sm:$0xff] }
 0x6fd   :  { %12414 = vmatprep.subr.bf16.mxu0 %v12396_v3  ;;  %v12735_v3 = vld [vmem:[#allocation2 + $0x288] sm:$0xff] }
 0x6ff   :  { %14760 = vmatmul.mubr.msk.bf16.vlgmr.msra.gmra.mrb[76].mxu0 %vm12046_vm4, %v12176_v13  ;;  %v12619_v13 = vpack.c.bf16 %v12618_v46, %v12618_v46 }
 0x700   :  { %12415 = vmatpush1.bf16.msra.mxu0 %v12395_v62  ;;  %12446 = vmatprep.mubr.bf16.mxu0 %v22389_v19  ;;  %v12734_v62 = vld [vmem:[#allocation2 + $0x280] sm:$0xff] }
 0x701   :  { %12416 = vmatprep.subr.bf16.mxu0 %v12400_v20  ;;  %v12739_v20 = vld [vmem:[#allocation2 + $0x2a8] sm:$0xff] }
 0x704   :  { %12417 = vmatpush1.bf16.msra.mxu0 %v12399_v15  ;;  %v12738_v15 = vld [vmem:[#allocation2 + $0x2a0] sm:$0xff] }
 0x705   :  { %12418 = vmatprep.subr.bf16.mxu0 %v12404_v51  ;;  %v12743_v51 = vld [vmem:[#allocation2 + $0x2c8] sm:$0xff] }
 0x708   :  { %12419 = vmatpush1.bf16.msra.mxu0 %v12403_v38  ;;  %v12742_v38 = vld [vmem:[#allocation2 + $0x2c0] sm:$0xff] }
 0x709   :  { %12420 = vmatprep.subr.bf16.mxu0 %v12408_v58  ;;  %v12747_v58 = vld [vmem:[#allocation2 + $0x2e8] sm:$0xff] }
 0x70c   :  { %12421 = vmatpush1.bf16.msra.mxu0 %v12407_v24  ;;  %v12746_v24 = vld [vmem:[#allocation2 + $0x2e0] sm:$0xff] }
 0x70d   :  { %12455 = vmatprep.subr.bf16.mxu0 %v12398_v26  ;;  %v12737_v26 = vld [vmem:[#allocation2 + $0x298] sm:$0xff] }
 0x70f   :  { %14761 = vmatmul.mubr.msk.bf16.vlgmr.msra.gmra.mrb[80].mxu0 %vm12046_vm4, %v12393_v14 }
 0x710   :  { %12456 = vmatpush1.bf16.msra.mxu0 %v12397_v35  ;;  %12487 = vmatprep.mubr.bf16.mxu0 %v22389_v19  ;;  %v12736_v35 = vld [vmem:[#allocation2 + $0x290] sm:$0xff] }
 0x711   :  { %12457 = vmatprep.subr.bf16.mxu0 %v12402_v60  ;;  %v12741_v60 = vld [vmem:[#allocation2 + $0x2b8] sm:$0xff] }
 0x714   :  { %12458 = vmatpush1.bf16.msra.mxu0 %v12401_v11  ;;  %v12740_v11 = vld [vmem:[#allocation2 + $0x2b0] sm:$0xff] }
 0x715   :  { %12459 = vmatprep.subr.bf16.mxu0 %v12406_v42  ;;  %v12745_v42 = vld [vmem:[#allocation2 + $0x2d8] sm:$0xff] }
 0x718   :  { %12460 = vmatpush1.bf16.msra.mxu0 %v12405_v40  ;;  %v12744_v40 = vld [vmem:[#allocation2 + $0x2d0] sm:$0xff] }
 0x719   :  { %12461 = vmatprep.subr.bf16.mxu0 %v12410_v43  ;;  %v12749_v43 = vld [vmem:[#allocation2 + $0x2f8] sm:$0xff] }
 0x71c   :  { %12462 = vmatpush1.bf16.msra.mxu0 %v12409_v39  ;;  %v12748_v39 = vld [vmem:[#allocation2 + $0x2f0] sm:$0xff] }
 0x71d   :  { %12527 = vmatprep.subr.bf16.mxu0 %v12509_v10  ;;  %v12848_v10 = vld [vmem:[#allocation2 + $0x308] sm:$0xff] }
 0x71f   :  { %14762 = vmatmul.mubr.msk.bf16.vlgmr.msra.gmra.mrb[84].mxu0 %vm12046_vm4, %v12393_v14  ;;  %v12732_v14 = vpack.c.bf16 %v12731_v18, %v12731_v18  ;;  %v13078_v18 = vld [vmem:[#allocation2 + $0x428] sm:$0xff] }
 0x720   :  { %12528 = vmatpush1.bf16.msra.mxu0 %v12508_v28  ;;  %12559 = vmatprep.mubr.bf16.mxu0 %v22389_v19  ;;  %v12847_v28 = vld [vmem:[#allocation2 + $0x300] sm:$0xff] }
 0x721   :  { %12529 = vmatprep.subr.bf16.mxu0 %v12513_v16  ;;  %v12852_v16 = vld [vmem:[#allocation2 + $0x328] sm:$0xff] }
 0x724   :  { %12530 = vmatpush1.bf16.msra.mxu0 %v12512_v37  ;;  %v12851_v37 = vld [vmem:[#allocation2 + $0x320] sm:$0xff] }
 0x725   :  { %12531 = vmatprep.subr.bf16.mxu0 %v12517_v33  ;;  %v12856_v33 = vld [vmem:[#allocation2 + $0x348] sm:$0xff] }
 0x728   :  { %12532 = vmatpush1.bf16.msra.mxu0 %v12516_v25  ;;  %v12855_v25 = vld [vmem:[#allocation2 + $0x340] sm:$0xff] }
 0x729   :  { %12533 = vmatprep.subr.bf16.mxu0 %v12521_v5  ;;  %v12860_v5 = vld [vmem:[#allocation2 + $0x368] sm:$0xff] }
 0x72c   :  { %12534 = vmatpush1.bf16.msra.mxu0 %v12520_v44  ;;  %v12859_v44 = vld [vmem:[#allocation2 + $0x360] sm:$0xff] }
 0x72d   :  { %12568 = vmatprep.subr.bf16.mxu0 %v12511_v17  ;;  %v12850_v17 = vld [vmem:[#allocation2 + $0x318] sm:$0xff] }
 0x72f   :  { %14763 = vmatmul.mubr.msk.bf16.vlgmr.msra.gmra.mrb[88].mxu0 %vm12046_vm4, %v12506_v59 }
 0x730   :  { %12569 = vmatpush1.bf16.msra.mxu0 %v12510_v31  ;;  %12600 = vmatprep.mubr.bf16.mxu0 %v22389_v19  ;;  %v12849_v31 = vld [vmem:[#allocation2 + $0x310] sm:$0xff] }
 0x731   :  { %12570 = vmatprep.subr.bf16.mxu0 %v12515_v32  ;;  %v12854_v32 = vld [vmem:[#allocation2 + $0x338] sm:$0xff] }
 0x734   :  { %12571 = vmatpush1.bf16.msra.mxu0 %v12514_v52  ;;  %v12853_v52 = vld [vmem:[#allocation2 + $0x330] sm:$0xff] }
 0x735   :  { %12572 = vmatprep.subr.bf16.mxu0 %v12519_v27  ;;  %v12858_v27 = vld [vmem:[#allocation2 + $0x358] sm:$0xff] }
 0x738   :  { %12573 = vmatpush1.bf16.msra.mxu0 %v12518_v12  ;;  %v12857_v12 = vld [vmem:[#allocation2 + $0x350] sm:$0xff] }
 0x739   :  { %12574 = vmatprep.subr.bf16.mxu0 %v12523_v45  ;;  %v12862_v45 = vld [vmem:[#allocation2 + $0x378] sm:$0xff] }
 0x73c   :  { %12575 = vmatpush1.bf16.msra.mxu0 %v12522_v0  ;;  %v12861_v0 = vld [vmem:[#allocation2 + $0x370] sm:$0xff] }
 0x73d   :  { %12640 = vmatprep.subr.bf16.mxu0 %v12622_v4  ;;  %v12961_v4 = vld [vmem:[#allocation2 + $0x388] sm:$0xff] }
 0x73f   :  { %14764 = vmatmul.mubr.msk.bf16.vlgmr.msra.gmra.mrb[92].mxu0 %vm12046_vm4, %v12506_v59  ;;  %v12845_v59 = vpack.c.bf16 %v12844_v21, %v12844_v21 }
 0x740   :  { %12641 = vmatpush1.bf16.msra.mxu0 %v12621_v22  ;;  %12672 = vmatprep.mubr.bf16.mxu0 %v22389_v19  ;;  %v12960_v22 = vld [vmem:[#allocation2 + $0x380] sm:$0xff] }
 0x741   :  { %12642 = vmatprep.subr.bf16.mxu0 %v12626_v6  ;;  %v12965_v6 = vld [vmem:[#allocation2 + $0x3a8] sm:$0xff] }
 0x744   :  { %12643 = vmatpush1.bf16.msra.mxu0 %v12625_v57  ;;  %v12964_v57 = vld [vmem:[#allocation2 + $0x3a0] sm:$0xff] }
 0x745   :  { %12644 = vmatprep.subr.bf16.mxu0 %v12630_v9 }
 0x748   :  { %12645 = vmatpush1.bf16.msra.mxu0 %v12629_v48 }
 0x749   :  { %12646 = vmatprep.subr.bf16.mxu0 %v12634_v34  ;;  %v12955_v34 = vrot.slane %v12953_v50, 7 }
 0x74c   :  { %12647 = vmatpush1.bf16.msra.mxu0 %v12633_v54  ;;  %v12968_v54 = vld [vmem:[#allocation2 + $0x3c0] sm:$0xff] }
 0x74d   :  { %12681 = vmatprep.subr.bf16.mxu0 %v12624_v41  ;;  %v12952_v41 = vld [vmem:[#allocation8 + $0x16] sm:$0x1] }
 0x74f   :  { %14765 = vmatmul.mubr.msk.bf16.vlgmr.msra.gmra.mrb[96].mxu0 %vm12046_vm4, %v12619_v13 }
 0x750   :  { %12682 = vmatpush1.bf16.msra.mxu0 %v12623_v29  ;;  %12713 = vmatprep.mubr.bf16.mxu0 %v22389_v19  ;;  %v12957_v29 = vsel %vm12174_vm5, %v12952_v41, %v12955_v34  ;;  %v13194_v41 = vld [vmem:[#allocation2 + $0x4c0] sm:$0xff] }
 0x751   :  { %12683 = vmatprep.subr.bf16.mxu0 %v12628_v1  ;;  %v12972_v1 = vld [vmem:[#allocation2 + $0x3e0] sm:$0xff] }
 0x754   :  { %12684 = vmatpush1.bf16.msra.mxu0 %v12627_v63  ;;  %v12963_v63 = vld [vmem:[#allocation2 + $0x398] sm:$0xff] }
 0x755   :  { %12685 = vmatprep.subr.bf16.mxu0 %v12632_v36  ;;  %v12958_v36 = vpack.c.bf16 %v12957_v29, %v12957_v29  ;;  %v13199_v29 = vld [vmem:[#allocation2 + $0x4e8] sm:$0xff] }
 0x758   :  { %12686 = vmatpush1.bf16.msra.mxu0 %v12631_v49  ;;  %v12962_v49 = vld [vmem:[#allocation2 + $0x390] sm:$0xff] }
 0x759   :  { %12687 = vmatprep.subr.bf16.mxu0 %v12636_v23  ;;  %v12967_v23 = vld [vmem:[#allocation2 + $0x3b8] sm:$0xff] }
 0x75c   :  { %12688 = vmatpush1.bf16.msra.mxu0 %v12635_v2  ;;  %v12966_v2 = vld [vmem:[#allocation2 + $0x3b0] sm:$0xff] }
 0x75d   :  { %12753 = vmatprep.subr.bf16.mxu0 %v12735_v3 }
 0x75f   :  { %14766 = vmatmul.mubr.msk.bf16.vlgmr.msra.gmra.mrb[100].mxu0 %vm12046_vm4, %v12619_v13  ;;  %v12973_v13 = vld [vmem:[#allocation2 + $0x3e8] sm:$0xff] }
 0x760   :  { %12754 = vmatpush1.bf16.msra.mxu0 %v12734_v62  ;;  %12785 = vmatprep.mubr.bf16.mxu0 %v22389_v19  ;;  %v12971_v62 = vld [vmem:[#allocation2 + $0x3d8] sm:$0xff] }
 0x761   :  { %12755 = vmatprep.subr.bf16.mxu0 %v12739_v20 }
 0x764   :  { %12756 = vmatpush1.bf16.msra.mxu0 %v12738_v15 }
 0x765   :  { %12757 = vmatprep.subr.bf16.mxu0 %v12743_v51  ;;  %v12970_v51 = vld [vmem:[#allocation2 + $0x3d0] sm:$0xff] }
 0x768   :  { %12758 = vmatpush1.bf16.msra.mxu0 %v12742_v38  ;;  %v12974_v38 = vld [vmem:[#allocation2 + $0x3f0] sm:$0xff] }
 0x769   :  { %12759 = vmatprep.subr.bf16.mxu0 %v12747_v58  ;;  %v13073_v58 = vld [vmem:[#allocation2 + $0x400] sm:$0xff] }
 0x76c   :  { %12760 = vmatpush1.bf16.msra.mxu0 %v12746_v24  ;;  %v13077_v24 = vld [vmem:[#allocation2 + $0x420] sm:$0xff] }
 0x76d   :  { %12794 = vmatprep.subr.bf16.mxu0 %v12737_v26  ;;  %v13066_v26 = vld [vmem:[#allocation8 + $0x60] sm:$0x1] }
 0x76f   :  { %14767 = vmatmul.mubr.msk.bf16.vlgmr.msra.gmra.mrb[104].mxu0 %vm12046_vm4, %v12732_v14 }
 0x770   :  { %12795 = vmatpush1.bf16.msra.mxu0 %v12736_v35  ;;  %12826 = vmatprep.mubr.bf16.mxu0 %v22389_v19  ;;  %v13082_v35 = vld [vmem:[#allocation2 + $0x448] sm:$0xff] }
 0x771   :  { %12796 = vmatprep.subr.bf16.mxu0 %v12741_v60 }
 0x774   :  { %12797 = vmatpush1.bf16.msra.mxu0 %v12740_v11 }
 0x775   :  { %12798 = vmatprep.subr.bf16.mxu0 %v12745_v42 }
 0x778   :  { %12799 = vmatpush1.bf16.msra.mxu0 %v12744_v40 }
 0x779   :  { %12800 = vmatprep.subr.bf16.mxu0 %v12749_v43  ;;  %v13068_v43 = vrot.slane %v13066_v26, 7  ;;  %v13299_v26 = vld [vmem:[#allocation2 + $0x500] sm:$0xff] }
 0x77c   :  { %12801 = vmatpush1.bf16.msra.mxu0 %v12748_v39 }
 0x77d   :  { %12866 = vmatprep.subr.bf16.mxu0 %v12848_v10  ;;  %v13081_v10 = vld [vmem:[#allocation2 + $0x440] sm:$0xff] }
 0x77f   :  { %14768 = vmatmul.mubr.msk.bf16.vlgmr.msra.gmra.mrb[108].mxu0 %vm12046_vm4, %v12732_v14 }
 0x780   :  { %12867 = vmatpush1.bf16.msra.mxu0 %v12847_v28  ;;  %12898 = vmatprep.mubr.bf16.mxu0 %v22389_v19  ;;  %v13065_v28 = vld [vmem:[#allocation8 + $0x20] sm:$0x1] }
 0x781   :  { %12868 = vmatprep.subr.bf16.mxu0 %v12852_v16  ;;  %v13086_v16 = vld [vmem:[#allocation2 + $0x468] sm:$0xff] }
 0x784   :  { %12869 = vmatpush1.bf16.msra.mxu0 %v12851_v37  ;;  %v13070_v37 = vsel %vm12174_vm5, %v13065_v28, %v13068_v43 }
 0x785   :  { %12870 = vmatprep.subr.bf16.mxu0 %v12856_v33  ;;  %v13076_v33 = vld [vmem:[#allocation2 + $0x418] sm:$0xff]  ;;  %v13071_v53 = vpack.c.bf16 %v13070_v37, %v13070_v37  ;;  %v13307_v37 = vld [vmem:[#allocation2 + $0x540] sm:$0xff] }
 0x788   :  { %12871 = vmatpush1.bf16.msra.mxu0 %v12855_v25  ;;  %v13075_v25 = vld [vmem:[#allocation2 + $0x410] sm:$0xff] }
 0x789   :  { %12872 = vmatprep.subr.bf16.mxu0 %v12860_v5  ;;  %v13079_v5 = vld [vmem:[#allocation2 + $0x430] sm:$0xff] }
 0x78c   :  { %12873 = vmatpush1.bf16.msra.mxu0 %v12859_v44  ;;  %v13084_v44 = vld [vmem:[#allocation2 + $0x458] sm:$0xff] }
 0x78d   :  { %12907 = vmatprep.subr.bf16.mxu0 %v12850_v17 }
 0x78f   :  { %14769 = vmatmul.mubr.msk.bf16.vlgmr.msra.gmra.mrb[112].mxu0 %vm12046_vm4, %v12845_v59 }
 0x790   :  { %12908 = vmatpush1.bf16.msra.mxu0 %v12849_v31  ;;  %12939 = vmatprep.mubr.bf16.mxu0 %v22389_v19 }
 0x791   :  { %12909 = vmatprep.subr.bf16.mxu0 %v12854_v32 }
 0x794   :  { %12910 = vmatpush1.bf16.msra.mxu0 %v12853_v52 }
 0x795   :  { %12911 = vmatprep.subr.bf16.mxu0 %v12858_v27  ;;  %v13083_v27 = vld [vmem:[#allocation2 + $0x450] sm:$0xff] }
 0x798   :  { %12912 = vmatpush1.bf16.msra.mxu0 %v12857_v12  ;;  %v13088_v12 = vld [vmem:[#allocation2 + $0x478] sm:$0xff] }
 0x799   :  { %12913 = vmatprep.subr.bf16.mxu0 %v12862_v45  ;;  %v13087_v45 = vld [vmem:[#allocation2 + $0x470] sm:$0xff] }
 0x79c   :  { %12914 = vmatpush1.bf16.msra.mxu0 %v12861_v0  ;;  %v13187_v0 = vld [vmem:[#allocation2 + $0x488] sm:$0xff] }
 0x79d   :  { %12979 = vmatprep.subr.bf16.mxu0 %v12961_v4  ;;  %v13186_v4 = vld [vmem:[#allocation2 + $0x480] sm:$0xff] }
 0x79f   :  { %14770 = vmatmul.mubr.msk.bf16.vlgmr.msra.gmra.mrb[116].mxu0 %vm12046_vm4, %v12845_v59 }
 0x7a0   :  { %12980 = vmatpush1.bf16.msra.mxu0 %v12960_v22  ;;  %13011 = vmatprep.mubr.bf16.mxu0 %v22389_v19  ;;  %v13191_v22 = vld [vmem:[#allocation2 + $0x4a8] sm:$0xff] }
 0x7a1   :  { %12981 = vmatprep.subr.bf16.mxu0 %v12965_v6  ;;  %v13190_v6 = vld [vmem:[#allocation2 + $0x4a0] sm:$0xff] }
 0x7a2   :  { %v12254_v9 = vpop.f32.mrb[64].mxu0 }
 0x7a3   :  { %v12256_v48 = vpop.f32.mrb[65].mxu0 }
 0x7a4   :  { %v12258_v7 = vpop.f32.mrb[66].mxu0  ;;  %12982 = vmatpush1.bf16.msra.mxu0 %v12964_v57  ;;  %v13179_v57 = vld [vmem:[#allocation8 + $0x62] sm:$0x1] }
 0x7a5   :  { %v12259_v46 = vpop.f32.mrb[67].mxu0  ;;  %12983 = vmatprep.subr.bf16.mxu0 %v12969_v8 }
 0x7a6   :  { %v13181_v46 = vrot.slane %v13179_v57, 7  ;;  %v13412_v57 = vld [vmem:[#allocation2 + $0x580] sm:$0xff] }
 0x7a8   :  { %12984 = vmatpush1.bf16.msra.mxu0 %v12968_v54 }
 0x7a9   :  { %12985 = vmatprep.subr.bf16.mxu0 %v12973_v13  ;;  %v13178_v13 = vld [vmem:[#allocation8 + $0x22] sm:$0x1] }
 0x7ac   :  { %12986 = vmatpush1.bf16.msra.mxu0 %v12972_v1  ;;  %v13183_v1 = vsel %vm12174_vm5, %v13178_v13, %v13181_v46 }
 0x7ad   :  { %13020 = vmatprep.subr.bf16.mxu0 %v12963_v63  ;;  %v13198_v63 = vld [vmem:[#allocation2 + $0x4e0] sm:$0xff] }
 0x7af   :  { %14771 = vmatmul.mubr.msk.bf16.vlgmr.msra.gmra.mrb[120].mxu0 %vm12046_vm4, %v12958_v36 }
 0x7b0   :  { %13021 = vmatpush1.bf16.msra.mxu0 %v12962_v49  ;;  %13052 = vmatprep.mubr.bf16.mxu0 %v22389_v19  ;;  %v13184_v49 = vpack.c.bf16 %v13183_v1, %v13183_v1  ;;  %v13420_v1 = vld [vmem:[#allocation2 + $0x5c0] sm:$0xff] }
 0x7b1   :  { %13022 = vmatprep.subr.bf16.mxu0 %v12967_v23  ;;  %v13188_v23 = vld [vmem:[#allocation2 + $0x490] sm:$0xff] }
 0x7b2   :  { %v12295_v3 = vpop.f32.mrb[68].mxu0 }
 0x7b3   :  { %v12297_v20 = vpop.f32.mrb[69].mxu0 }
 0x7b4   :  { %v12299_v15 = vpop.f32.mrb[70].mxu0  ;;  %13023 = vmatpush1.bf16.msra.mxu0 %v12966_v2  ;;  %v13193_v2 = vld [vmem:[#allocation2 + $0x4b8] sm:$0xff] }
 0x7b5   :  { %v12300_v61 = vpop.f32.mrb[71].mxu0  ;;  %13024 = vmatprep.subr.bf16.mxu0 %v12971_v62 }
 0x7b8   :  { %13025 = vmatpush1.bf16.msra.mxu0 %v12970_v51 }
 0x7b9   :  { %13026 = vmatprep.subr.bf16.mxu0 %v12975_v47 }
 0x7bc   :  { %13027 = vmatpush1.bf16.msra.mxu0 %v12974_v38 }
 0x7bd   :  { %13092 = vmatprep.subr.bf16.mxu0 %v13074_v30  ;;  %v13196_v30 = vld [vmem:[#allocation2 + $0x4d0] sm:$0xff] }
 0x7bf   :  { %14772 = vmatmul.mubr.msk.bf16.vlgmr.msra.gmra.mrb[124].mxu0 %vm12046_vm4, %v12958_v36  ;;  %v13189_v36 = vld [vmem:[#allocation2 + $0x498] sm:$0xff] }
 0x7c0   :  { %13093 = vmatpush1.bf16.msra.mxu0 %v13073_v58  ;;  %13124 = vmatprep.mubr.bf16.mxu0 %v22389_v19  ;;  %v13201_v58 = vld [vmem:[#allocation2 + $0x4f8] sm:$0xff] }
 0x7c1   :  { %13094 = vmatprep.subr.bf16.mxu0 %v13078_v18  ;;  %v13200_v18 = vld [vmem:[#allocation2 + $0x4f0] sm:$0xff] }
 0x7c2   :  { %v12339_v14 = vpop.f32.mrb[72].mxu0 }
 0x7c3   :  { %v12340_v60 = vadd.f32 %v12339_v14, %v12254_v9  ;;  %v12341_v11 = vpop.f32.mrb[73].mxu0  ;;  %v13195_v9 = vld [vmem:[#allocation2 + $0x4c8] sm:$0xff] }
 0x7c4   :  { %v12342_v42 = vadd.f32 %v12341_v11, %v12256_v48  ;;  %v12343_v40 = vpop.f32.mrb[74].mxu0  ;;  %13095 = vmatpush1.bf16.msra.mxu0 %v13077_v24  ;;  %v13300_v24 = vld [vmem:[#allocation2 + $0x508] sm:$0xff] }
 0x7c5   :  { %v12344_v39 = vpop.f32.mrb[75].mxu0  ;;  %13096 = vmatprep.subr.bf16.mxu0 %v13082_v35  ;;  %v13304_v14 = vld [vmem:[#allocation2 + $0x528] sm:$0xff]  ;;  %v13303_v35 = vld [vmem:[#allocation2 + $0x520] sm:$0xff] }
 0x7c8   :  { %13097 = vmatpush1.bf16.msra.mxu0 %v13081_v10 }
 0x7c9   :  { %13098 = vmatprep.subr.bf16.mxu0 %v13086_v16 }
 0x7cc   :  { %13099 = vmatpush1.bf16.msra.mxu0 %v13085_v56  ;;  %v13291_v56 = vld [vmem:[#allocation8 + $0x24] sm:$0x1] }
 0x7cd   :  { %13133 = vmatprep.subr.bf16.mxu0 %v13076_v33  ;;  %v13312_v33 = vld [vmem:[#allocation2 + $0x568] sm:$0xff] }
 0x7cf   :  { %14773 = vmatmul.mubr.msk.bf16.vlgmr.msra.gmra.mrb[128].mxu0 %vm12046_vm4, %v13071_v53 }
 0x7d0   :  { %13134 = vmatpush1.bf16.msra.mxu0 %v13075_v25  ;;  %13165 = vmatprep.mubr.bf16.mxu0 %v22389_v19  ;;  %v13311_v25 = vld [vmem:[#allocation2 + $0x560] sm:$0xff] }
 0x7d1   :  { %13135 = vmatprep.subr.bf16.mxu0 %v13080_v55  ;;  %v13302_v55 = vld [vmem:[#allocation2 + $0x518] sm:$0xff] }
 0x7d2   :  { %v12380_v21 = vpop.f32.mrb[76].mxu0 }
 0x7d3   :  { %v12381_v17 = vadd.f32 %v12380_v21, %v12295_v3  ;;  %v12382_v59 = vpop.f32.mrb[77].mxu0  ;;  %v13192_v3 = vld [vmem:[#allocation2 + $0x4b0] sm:$0xff] }
 0x7d4   :  { %v12383_v31 = vadd.f32 %v12382_v59, %v12297_v20  ;;  %v12384_v32 = vpop.f32.mrb[78].mxu0  ;;  %13136 = vmatpush1.bf16.msra.mxu0 %v13079_v5  ;;  %v13197_v20 = vld [vmem:[#allocation2 + $0x4d8] sm:$0xff]  ;;  %v13301_v21 = vld [vmem:[#allocation2 + $0x510] sm:$0xff] }
 0x7d5   :  { %v12385_v52 = vpop.f32.mrb[79].mxu0  ;;  %13137 = vmatprep.subr.bf16.mxu0 %v13084_v44  ;;  %v13306_v44 = vld [vmem:[#allocation2 + $0x538] sm:$0xff] }
 0x7d8   :  { %13138 = vmatpush1.bf16.msra.mxu0 %v13083_v27 }
 0x7d9   :  { %13139 = vmatprep.subr.bf16.mxu0 %v13088_v12 }
 0x7dc   :  { %13140 = vmatpush1.bf16.msra.mxu0 %v13087_v45 }
 0x7dd   :  { %13205 = vmatprep.subr.bf16.mxu0 %v13187_v0  ;;  %v13309_v0 = vld [vmem:[#allocation2 + $0x550] sm:$0xff] }
 0x7df   :  { %14774 = vmatmul.mubr.msk.bf16.vlgmr.msra.gmra.mrb[132].mxu0 %vm12046_vm4, %v13071_v53 }
 0x7e0   :  { %13206 = vmatpush1.bf16.msra.mxu0 %v13186_v4  ;;  %13237 = vmatprep.mubr.bf16.mxu0 %v22389_v19  ;;  %v13314_v4 = vld [vmem:[#allocation2 + $0x578] sm:$0xff] }
 0x7e1   :  { %13207 = vmatprep.subr.bf16.mxu0 %v13191_v22  ;;  %v13313_v22 = vld [vmem:[#allocation2 + $0x570] sm:$0xff] }
 0x7e2   :  { %v12448_v50 = vpop.f32.mrb[80].mxu0 }
 0x7e3   :  { %v12496_v8 = vadd.f32 %v12448_v50, %v12340_v60  ;;  %v12450_v48 = vpop.f32.mrb[81].mxu0  ;;  %v13292_v60 = vld [vmem:[#allocation8 + $0x64] sm:$0x1]  ;;  %v13417_v50 = vld [vmem:[#allocation2 + $0x5a8] sm:$0xff] }
 0x7e4   :  { %v12497_v7 = vadd.f32 %v12450_v48, %v12342_v42  ;;  %v12452_v34 = vpop.f32.mrb[82].mxu0  ;;  %13208 = vmatpush1.bf16.msra.mxu0 %v13190_v6  ;;  %v13308_v42 = vld [vmem:[#allocation2 + $0x548] sm:$0xff]  ;;  %v13294_v28 = vrot.slane %v13292_v60, 7  ;;  %v13525_v60 = vld [vmem:[#allocation2 + $0x600] sm:$0xff] }
 0x7e5   :  { %v12453_v54 = vpop.f32.mrb[83].mxu0  ;;  %13209 = vmatprep.subr.bf16.mxu0 %v13195_v9  ;;  %v13413_v6 = vld [vmem:[#allocation2 + $0x588] sm:$0xff]  ;;  %v13416_v9 = vld [vmem:[#allocation2 + $0x5a0] sm:$0xff] }
 0x7e6   :  { %v13296_v53 = vsel %vm12174_vm5, %v13291_v56, %v13294_v28 }
 0x7e7   :  { %v13297_v5 = vpack.c.bf16 %v13296_v53, %v13296_v53  ;;  %v13533_v53 = vld [vmem:[#allocation2 + $0x640] sm:$0xff] }
 0x7e8   :  { %13210 = vmatpush1.bf16.msra.mxu0 %v13194_v41 }
 0x7e9   :  { %13211 = vmatprep.subr.bf16.mxu0 %v13199_v29 }
 0x7ec   :  { %13212 = vmatpush1.bf16.msra.mxu0 %v13198_v63  ;;  %v13404_v63 = vld [vmem:[#allocation8 + $0x26] sm:$0x1] }
 0x7ed   :  { %13246 = vmatprep.subr.bf16.mxu0 %v13189_v36  ;;  %v13425_v36 = vld [vmem:[#allocation2 + $0x5e8] sm:$0xff] }
 0x7ef   :  { %14775 = vmatmul.mubr.msk.bf16.vlgmr.msra.gmra.mrb[136].mxu0 %vm12046_vm4, %v13184_v49 }
 0x7f0   :  { %13247 = vmatpush1.bf16.msra.mxu0 %v13188_v23  ;;  %13278 = vmatprep.mubr.bf16.mxu0 %v22389_v19  ;;  %v13424_v23 = vld [vmem:[#allocation2 + $0x5e0] sm:$0xff] }
 0x7f1   :  { %13248 = vmatprep.subr.bf16.mxu0 %v13193_v2  ;;  %v13415_v2 = vld [vmem:[#allocation2 + $0x598] sm:$0xff] }
 0x7f2   :  { %v12489_v62 = vpop.f32.mrb[84].mxu0 }
 0x7f3   :  { %v12498_v15 = vadd.f32 %v12489_v62, %v12381_v17  ;;  %v12491_v61 = vpop.f32.mrb[85].mxu0  ;;  %v13305_v17 = vld [vmem:[#allocation2 + $0x530] sm:$0xff] }
 0x7f4   :  { %v12499_v51 = vadd.f32 %v12491_v61, %v12383_v31  ;;  %v12493_v47 = vpop.f32.mrb[86].mxu0  ;;  %13249 = vmatpush1.bf16.msra.mxu0 %v13192_v3  ;;  %v13310_v31 = vld [vmem:[#allocation2 + $0x558] sm:$0xff]  ;;  %v13414_v62 = vld [vmem:[#allocation2 + $0x590] sm:$0xff] }
 0x7f5   :  { %v12494_v38 = vpop.f32.mrb[87].mxu0  ;;  %13250 = vmatprep.subr.bf16.mxu0 %v13197_v20  ;;  %v13419_v20 = vld [vmem:[#allocation2 + $0x5b8] sm:$0xff] }
 0x7f8   :  { %13251 = vmatpush1.bf16.msra.mxu0 %v13196_v30 }
 0x7f9   :  { %13252 = vmatprep.subr.bf16.mxu0 %v13201_v58 }
 0x7fc   :  { %13253 = vmatpush1.bf16.msra.mxu0 %v13200_v18 }
 0x7fd   :  { %13318 = vmatprep.subr.bf16.mxu0 %v13300_v24  ;;  %v13422_v24 = vld [vmem:[#allocation2 + $0x5d0] sm:$0xff] }
 0x7ff   :  { %14776 = vmatmul.mubr.msk.bf16.vlgmr.msra.gmra.mrb[140].mxu0 %vm12046_vm4, %v13184_v49 }
 0x800   :  { %13319 = vmatpush1.bf16.msra.mxu0 %v13299_v26  ;;  %13350 = vmatprep.mubr.bf16.mxu0 %v22389_v19  ;;  %v13427_v26 = vld [vmem:[#allocation2 + $0x5f8] sm:$0xff] }
 0x801   :  { %13320 = vmatprep.subr.bf16.mxu0 %v13304_v14  ;;  %v13426_v14 = vld [vmem:[#allocation2 + $0x5f0] sm:$0xff] }
 0x802   :  { %v12561_v11 = vpop.f32.mrb[88].mxu0 }
 0x803   :  { %v12609_v40 = vadd.f32 %v12561_v11, %v12496_v8  ;;  %v12563_v43 = vpop.f32.mrb[89].mxu0  ;;  %v13405_v8 = vld [vmem:[#allocation8 + $0x66] sm:$0x1]  ;;  %v13530_v11 = vld [vmem:[#allocation2 + $0x628] sm:$0xff] }
 0x804   :  { %v12610_v39 = vadd.f32 %v12563_v43, %v12497_v7  ;;  %v12565_v10 = vpop.f32.mrb[90].mxu0  ;;  %13321 = vmatpush1.bf16.msra.mxu0 %v13303_v35  ;;  %v13421_v7 = vld [vmem:[#allocation2 + $0x5c8] sm:$0xff]  ;;  %v13407_v13 = vrot.slane %v13405_v8, 7  ;;  %v13638_v8 = vld [vmem:[#allocation2 + $0x680] sm:$0xff] }
 0x805   :  { %v12566_v16 = vpop.f32.mrb[91].mxu0  ;;  %13322 = vmatprep.subr.bf16.mxu0 %v13308_v42  ;;  %v13526_v35 = vld [vmem:[#allocation2 + $0x608] sm:$0xff]  ;;  %v13529_v42 = vld [vmem:[#allocation2 + $0x620] sm:$0xff] }
 0x806   :  { %v13409_v49 = vsel %vm12174_vm5, %v13404_v63, %v13407_v13 }
 0x807   :  { %v13410_v3 = vpack.c.bf16 %v13409_v49, %v13409_v49  ;;  %v13646_v49 = vld [vmem:[#allocation2 + $0x6c0] sm:$0xff] }
 0x808   :  { %13323 = vmatpush1.bf16.msra.mxu0 %v13307_v37 }
 0x809   :  { %13324 = vmatprep.subr.bf16.mxu0 %v13312_v33 }
 0x80c   :  { %13325 = vmatpush1.bf16.msra.mxu0 %v13311_v25  ;;  %v13517_v25 = vld [vmem:[#allocation8 + $0x30] sm:$0x1] }
 0x80d   :  { %13359 = vmatprep.subr.bf16.mxu0 %v13302_v55  ;;  %v13538_v55 = vld [vmem:[#allocation2 + $0x668] sm:$0xff] }
 0x80f   :  { %14777 = vmatmul.mubr.msk.bf16.vlgmr.msra.gmra.mrb[144].mxu0 %vm12046_vm4, %v13297_v5 }
 0x810   :  { %13360 = vmatpush1.bf16.msra.mxu0 %v13301_v21  ;;  %13391 = vmatprep.mubr.bf16.mxu0 %v22389_v19  ;;  %v13537_v21 = vld [vmem:[#allocation2 + $0x660] sm:$0xff] }
 0x811   :  { %13361 = vmatprep.subr.bf16.mxu0 %v13306_v44  ;;  %v13528_v44 = vld [vmem:[#allocation2 + $0x618] sm:$0xff] }
 0x812   :  { %v12602_v59 = vpop.f32.mrb[92].mxu0 }
 0x813   :  { %v12611_v32 = vadd.f32 %v12602_v59, %v12498_v15  ;;  %v12604_v52 = vpop.f32.mrb[93].mxu0  ;;  %v13418_v15 = vld [vmem:[#allocation2 + $0x5b0] sm:$0xff] }
 0x814   :  { %v12612_v27 = vadd.f32 %v12604_v52, %v12499_v51  ;;  %v12606_v12 = vpop.f32.mrb[94].mxu0  ;;  %13362 = vmatpush1.bf16.msra.mxu0 %v13305_v17  ;;  %v13423_v51 = vld [vmem:[#allocation2 + $0x5d8] sm:$0xff]  ;;  %v13527_v59 = vld [vmem:[#allocation2 + $0x610] sm:$0xff] }
 0x815   :  { %v12607_v45 = vpop.f32.mrb[95].mxu0  ;;  %13363 = vmatprep.subr.bf16.mxu0 %v13310_v31  ;;  %v13532_v31 = vld [vmem:[#allocation2 + $0x638] sm:$0xff] }
 0x818   :  { %13364 = vmatpush1.bf16.msra.mxu0 %v13309_v0 }
 0x819   :  { %13365 = vmatprep.subr.bf16.mxu0 %v13314_v4 }
 0x81c   :  { %13366 = vmatpush1.bf16.msra.mxu0 %v13313_v22 }
 0x81d   :  { %13431 = vmatprep.subr.bf16.mxu0 %v13413_v6  ;;  %v13535_v6 = vld [vmem:[#allocation2 + $0x650] sm:$0xff] }
 0x81f   :  { %14778 = vmatmul.mubr.msk.bf16.vlgmr.msra.gmra.mrb[148].mxu0 %vm12046_vm4, %v13297_v5 }
 0x820   :  { %13432 = vmatpush1.bf16.msra.mxu0 %v13412_v57  ;;  %13463 = vmatprep.mubr.bf16.mxu0 %v22389_v19  ;;  %v13540_v57 = vld [vmem:[#allocation2 + $0x678] sm:$0xff] }
 0x821   :  { %13433 = vmatprep.subr.bf16.mxu0 %v13417_v50  ;;  %v13539_v50 = vld [vmem:[#allocation2 + $0x670] sm:$0xff] }
 0x822   :  { %v12674_v48 = vpop.f32.mrb[96].mxu0 }
 0x823   :  { %v12722_v34 = vadd.f32 %v12674_v48, %v12609_v40  ;;  %v12676_v46 = vpop.f32.mrb[97].mxu0  ;;  %v13518_v40 = vld [vmem:[#allocation8 + $0x70] sm:$0x1]  ;;  %v13643_v48 = vld [vmem:[#allocation2 + $0x6a8] sm:$0xff] }
 0x824   :  { %v12723_v54 = vadd.f32 %v12676_v46, %v12610_v39  ;;  %v12678_v41 = vpop.f32.mrb[98].mxu0  ;;  %13434 = vmatpush1.bf16.msra.mxu0 %v13416_v9  ;;  %v13534_v39 = vld [vmem:[#allocation2 + $0x648] sm:$0xff]  ;;  %v13520_v56 = vrot.slane %v13518_v40, 7  ;;  %v13751_v40 = vld [vmem:[#allocation2 + $0x700] sm:$0xff] }
 0x825   :  { %v12679_v29 = vpop.f32.mrb[99].mxu0  ;;  %13435 = vmatprep.subr.bf16.mxu0 %v13421_v7  ;;  %v13639_v9 = vld [vmem:[#allocation2 + $0x688] sm:$0xff]  ;;  %v13642_v7 = vld [vmem:[#allocation2 + $0x6a0] sm:$0xff] }
 0x826   :  { %v13522_v5 = vsel %vm12174_vm5, %v13517_v25, %v13520_v56 }
 0x827   :  { %v13523_v17 = vpack.c.bf16 %v13522_v5, %v13522_v5  ;;  %v13759_v5 = vld [vmem:[#allocation2 + $0x740] sm:$0xff] }
 0x828   :  { %13436 = vmatpush1.bf16.msra.mxu0 %v13420_v1 }
 0x829   :  { %13437 = vmatprep.subr.bf16.mxu0 %v13425_v36 }
 0x82c   :  { %13438 = vmatpush1.bf16.msra.mxu0 %v13424_v23  ;;  %v13630_v23 = vld [vmem:[#allocation8 + $0x32] sm:$0x1] }
 0x82d   :  { %13472 = vmatprep.subr.bf16.mxu0 %v13415_v2  ;;  %v13651_v2 = vld [vmem:[#allocation2 + $0x6e8] sm:$0xff] }
 0x82f   :  { %14779 = vmatmul.mubr.msk.bf16.vlgmr.msra.gmra.mrb[152].mxu0 %vm12046_vm4, %v13410_v3 }
 0x830   :  { %13473 = vmatpush1.bf16.msra.mxu0 %v13414_v62  ;;  %13504 = vmatprep.mubr.bf16.mxu0 %v22389_v19  ;;  %v13650_v62 = vld [vmem:[#allocation2 + $0x6e0] sm:$0xff] }
 0x831   :  { %13474 = vmatprep.subr.bf16.mxu0 %v13419_v20  ;;  %v13641_v20 = vld [vmem:[#allocation2 + $0x698] sm:$0xff] }
 0x832   :  { %v12715_v61 = vpop.f32.mrb[100].mxu0 }
 0x833   :  { %v12724_v47 = vadd.f32 %v12715_v61, %v12611_v32  ;;  %v12717_v38 = vpop.f32.mrb[101].mxu0  ;;  %v13531_v32 = vld [vmem:[#allocation2 + $0x630] sm:$0xff] }
 0x834   :  { %v12725_v30 = vadd.f32 %v12717_v38, %v12612_v27  ;;  %v12719_v58 = vpop.f32.mrb[102].mxu0  ;;  %13475 = vmatpush1.bf16.msra.mxu0 %v13418_v15  ;;  %v13536_v27 = vld [vmem:[#allocation2 + $0x658] sm:$0xff]  ;;  %v13640_v61 = vld [vmem:[#allocation2 + $0x690] sm:$0xff] }
 0x835   :  { %v12720_v18 = vpop.f32.mrb[103].mxu0  ;;  %13476 = vmatprep.subr.bf16.mxu0 %v13423_v51  ;;  %v13645_v51 = vld [vmem:[#allocation2 + $0x6b8] sm:$0xff] }
 0x838   :  { %13477 = vmatpush1.bf16.msra.mxu0 %v13422_v24 }
 0x839   :  { %13478 = vmatprep.subr.bf16.mxu0 %v13427_v26 }
 0x83c   :  { %13479 = vmatpush1.bf16.msra.mxu0 %v13426_v14 }
 0x83d   :  { %13544 = vmatprep.subr.bf16.mxu0 %v13526_v35  ;;  %v13648_v35 = vld [vmem:[#allocation2 + $0x6d0] sm:$0xff] }
 0x83f   :  { %14780 = vmatmul.mubr.msk.bf16.vlgmr.msra.gmra.mrb[156].mxu0 %vm12046_vm4, %v13410_v3 }
 0x840   :  { %13545 = vmatpush1.bf16.msra.mxu0 %v13525_v60  ;;  %13576 = vmatprep.mubr.bf16.mxu0 %v22389_v19  ;;  %v13653_v60 = vld [vmem:[#allocation2 + $0x6f8] sm:$0xff] }
 0x841   :  { %13546 = vmatprep.subr.bf16.mxu0 %v13530_v11  ;;  %v13652_v11 = vld [vmem:[#allocation2 + $0x6f0] sm:$0xff] }
 0x842   :  { %v12787_v43 = vpop.f32.mrb[104].mxu0 }
 0x843   :  { %v12835_v10 = vadd.f32 %v12787_v43, %v12722_v34  ;;  %v12789_v28 = vpop.f32.mrb[105].mxu0  ;;  %v13631_v34 = vld [vmem:[#allocation8 + $0x72] sm:$0x1]  ;;  %v13756_v43 = vld [vmem:[#allocation2 + $0x728] sm:$0xff] }
 0x844   :  { %v12836_v16 = vadd.f32 %v12789_v28, %v12723_v54  ;;  %v12791_v37 = vpop.f32.mrb[106].mxu0  ;;  %13547 = vmatpush1.bf16.msra.mxu0 %v13529_v42  ;;  %v13647_v54 = vld [vmem:[#allocation2 + $0x6c8] sm:$0xff]  ;;  %v13633_v63 = vrot.slane %v13631_v34, 7  ;;  %v13864_v34 = vld [vmem:[#allocation2 + $0x780] sm:$0xff] }
 0x845   :  { %v12792_v33 = vpop.f32.mrb[107].mxu0  ;;  %13548 = vmatprep.subr.bf16.mxu0 %v13534_v39  ;;  %v13752_v42 = vld [vmem:[#allocation2 + $0x708] sm:$0xff]  ;;  %v13755_v39 = vld [vmem:[#allocation2 + $0x720] sm:$0xff] }
 0x846   :  { %v13635_v3 = vsel %vm12174_vm5, %v13630_v23, %v13633_v63 }
 0x847   :  { %v13636_v15 = vpack.c.bf16 %v13635_v3, %v13635_v3  ;;  %v13872_v3 = vld [vmem:[#allocation2 + $0x7c0] sm:$0xff] }
 0x848   :  { %13549 = vmatpush1.bf16.msra.mxu0 %v13533_v53 }
 0x849   :  { %13550 = vmatprep.subr.bf16.mxu0 %v13538_v55 }
 0x84c   :  { %13551 = vmatpush1.bf16.msra.mxu0 %v13537_v21  ;;  %v13743_v21 = vld [vmem:[#allocation8 + $0x34] sm:$0x1] }
 0x84d   :  { %13585 = vmatprep.subr.bf16.mxu0 %v13528_v44  ;;  %v13764_v44 = vld [vmem:[#allocation2 + $0x768] sm:$0xff] }
 0x84f   :  { %14781 = vmatmul.mubr.msk.bf16.vlgmr.msra.gmra.mrb[160].mxu0 %vm12046_vm4, %v13523_v17 }
 0x850   :  { %13586 = vmatpush1.bf16.msra.mxu0 %v13527_v59  ;;  %13617 = vmatprep.mubr.bf16.mxu0 %v22389_v19  ;;  %v13763_v59 = vld [vmem:[#allocation2 + $0x760] sm:$0xff] }
 0x851   :  { %13587 = vmatprep.subr.bf16.mxu0 %v13532_v31  ;;  %v13754_v31 = vld [vmem:[#allocation2 + $0x718] sm:$0xff] }
 0x852   :  { %v12828_v52 = vpop.f32.mrb[108].mxu0 }
 0x853   :  { %v12837_v12 = vadd.f32 %v12828_v52, %v12724_v47  ;;  %v12830_v45 = vpop.f32.mrb[109].mxu0  ;;  %v13644_v47 = vld [vmem:[#allocation2 + $0x6b0] sm:$0xff] }
 0x854   :  { %v12838_v0 = vadd.f32 %v12830_v45, %v12725_v30  ;;  %v12832_v4 = vpop.f32.mrb[110].mxu0  ;;  %13588 = vmatpush1.bf16.msra.mxu0 %v13531_v32  ;;  %v13649_v30 = vld [vmem:[#allocation2 + $0x6d8] sm:$0xff]  ;;  %v13753_v52 = vld [vmem:[#allocation2 + $0x710] sm:$0xff] }
 0x855   :  { %v12833_v22 = vpop.f32.mrb[111].mxu0  ;;  %13589 = vmatprep.subr.bf16.mxu0 %v13536_v27  ;;  %v13758_v27 = vld [vmem:[#allocation2 + $0x738] sm:$0xff] }
 0x858   :  { %13590 = vmatpush1.bf16.msra.mxu0 %v13535_v6 }
 0x859   :  { %13591 = vmatprep.subr.bf16.mxu0 %v13540_v57 }
 0x85c   :  { %13592 = vmatpush1.bf16.msra.mxu0 %v13539_v50 }
 0x85d   :  { %13657 = vmatprep.subr.bf16.mxu0 %v13639_v9  ;;  %v13761_v9 = vld [vmem:[#allocation2 + $0x750] sm:$0xff] }
 0x85f   :  { %14782 = vmatmul.mubr.msk.bf16.vlgmr.msra.gmra.mrb[164].mxu0 %vm12046_vm4, %v13523_v17 }
 0x860   :  { %13658 = vmatpush1.bf16.msra.mxu0 %v13638_v8  ;;  %13689 = vmatprep.mubr.bf16.mxu0 %v22389_v19  ;;  %v13766_v8 = vld [vmem:[#allocation2 + $0x778] sm:$0xff] }
 0x861   :  { %13659 = vmatprep.subr.bf16.mxu0 %v13643_v48  ;;  %v13765_v48 = vld [vmem:[#allocation2 + $0x770] sm:$0xff] }
 0x862   :  { %v12900_v46 = vpop.f32.mrb[112].mxu0 }
 0x863   :  { %v12948_v41 = vadd.f32 %v12900_v46, %v12835_v10  ;;  %v12902_v13 = vpop.f32.mrb[113].mxu0  ;;  %v13744_v10 = vld [vmem:[#allocation8 + $0x74] sm:$0x1]  ;;  %v13869_v46 = vld [vmem:[#allocation2 + $0x7a8] sm:$0xff] }
 0x864   :  { %v12949_v29 = vadd.f32 %v12902_v13, %v12836_v16  ;;  %v12904_v1 = vpop.f32.mrb[114].mxu0  ;;  %13660 = vmatpush1.bf16.msra.mxu0 %v13642_v7  ;;  %v13760_v16 = vld [vmem:[#allocation2 + $0x748] sm:$0xff]  ;;  %v13746_v25 = vrot.slane %v13744_v10, 7 }
 0x865   :  { %v12905_v36 = vpop.f32.mrb[115].mxu0  ;;  %13661 = vmatprep.subr.bf16.mxu0 %v13647_v54  ;;  %v13865_v7 = vld [vmem:[#allocation2 + $0x788] sm:$0xff]  ;;  %v13868_v54 = vld [vmem:[#allocation2 + $0x7a0] sm:$0xff] }
 0x866   :  { %v13748_v17 = vsel %vm12174_vm5, %v13743_v21, %v13746_v25 }
 0x867   :  { %v13749_v32 = vpack.c.bf16 %v13748_v17, %v13748_v17 }
 0x868   :  { %13662 = vmatpush1.bf16.msra.mxu0 %v13646_v49 }
 0x869   :  { %13663 = vmatprep.subr.bf16.mxu0 %v13651_v2 }
 0x86c   :  { %13664 = vmatpush1.bf16.msra.mxu0 %v13650_v62  ;;  %v13856_v62 = vld [vmem:[#allocation8 + $0x36] sm:$0x1] }
 0x86d   :  { %13698 = vmatprep.subr.bf16.mxu0 %v13641_v20  ;;  %v13877_v20 = vld [vmem:[#allocation2 + $0x7e8] sm:$0xff] }
 0x86f   :  { %14783 = vmatmul.mubr.msk.bf16.vlgmr.msra.gmra.mrb[168].mxu0 %vm12046_vm4, %v13636_v15 }
 0x870   :  { %13699 = vmatpush1.bf16.msra.mxu0 %v13640_v61  ;;  %13730 = vmatprep.mubr.bf16.mxu0 %v22389_v19  ;;  %v13876_v61 = vld [vmem:[#allocation2 + $0x7e0] sm:$0xff] }
 0x871   :  { %13700 = vmatprep.subr.bf16.mxu0 %v13645_v51  ;;  %v13867_v51 = vld [vmem:[#allocation2 + $0x798] sm:$0xff] }
 0x872   :  { %v12941_v38 = vpop.f32.mrb[116].mxu0 }
 0x873   :  { %v12950_v58 = vadd.f32 %v12941_v38, %v12837_v12  ;;  %v12943_v18 = vpop.f32.mrb[117].mxu0  ;;  %v13757_v12 = vld [vmem:[#allocation2 + $0x730] sm:$0xff] }
 0x874   :  { %v12951_v24 = vadd.f32 %v12943_v18, %v12838_v0  ;;  %v12945_v26 = vpop.f32.mrb[118].mxu0  ;;  %13701 = vmatpush1.bf16.msra.mxu0 %v13644_v47  ;;  %v13762_v0 = vld [vmem:[#allocation2 + $0x758] sm:$0xff]  ;;  %v13866_v38 = vld [vmem:[#allocation2 + $0x790] sm:$0xff] }
 0x875   :  { %v12946_v14 = vpop.f32.mrb[119].mxu0  ;;  %13702 = vmatprep.subr.bf16.mxu0 %v13649_v30  ;;  %v13871_v30 = vld [vmem:[#allocation2 + $0x7b8] sm:$0xff] }
 0x878   :  { %13703 = vmatpush1.bf16.msra.mxu0 %v13648_v35 }
 0x879   :  { %13704 = vmatprep.subr.bf16.mxu0 %v13653_v60 }
 0x87c   :  { %13705 = vmatpush1.bf16.msra.mxu0 %v13652_v11 }
 0x87d   :  { %13770 = vmatprep.subr.bf16.mxu0 %v13752_v42  ;;  %v13874_v42 = vld [vmem:[#allocation2 + $0x7d0] sm:$0xff] }
 0x87f   :  { %14784 = vmatmul.mubr.msk.bf16.vlgmr.msra.gmra.mrb[172].mxu0 %vm12046_vm4, %v13636_v15 }
 0x880   :  { %13771 = vmatpush1.bf16.msra.mxu0 %v13751_v40  ;;  %13802 = vmatprep.mubr.bf16.mxu0 %v22389_v19  ;;  %v13879_v40 = vld [vmem:[#allocation2 + $0x7f8] sm:$0xff] }
 0x881   :  { %13772 = vmatprep.subr.bf16.mxu0 %v13756_v43  ;;  %v13878_v43 = vld [vmem:[#allocation2 + $0x7f0] sm:$0xff] }
 0x882   :  { %v13013_v28 = vpop.f32.mrb[120].mxu0 }
 0x883   :  { %v13061_v37 = vadd.f32 %v13013_v28, %v12948_v41  ;;  %v13015_v56 = vpop.f32.mrb[121].mxu0  ;;  %v13857_v41 = vld [vmem:[#allocation8 + $0x76] sm:$0x1] }
 0x884   :  { %v13062_v33 = vadd.f32 %v13015_v56, %v12949_v29  ;;  %v13017_v53 = vpop.f32.mrb[122].mxu0  ;;  %13773 = vmatpush1.bf16.msra.mxu0 %v13755_v39  ;;  %v13873_v29 = vld [vmem:[#allocation2 + $0x7c8] sm:$0xff]  ;;  %v13859_v23 = vrot.slane %v13857_v41, 7 }
 0x885   :  { %v13018_v55 = vpop.f32.mrb[123].mxu0  ;;  %13774 = vmatprep.subr.bf16.mxu0 %v13760_v16 }
 0x886   :  { %v13861_v15 = vsel %vm12174_vm5, %v13856_v62, %v13859_v23 }
 0x887   :  { %v13862_v47 = vpack.c.bf16 %v13861_v15, %v13861_v15 }
 0x888   :  { %13775 = vmatpush1.bf16.msra.mxu0 %v13759_v5 }
 0x889   :  { %13776 = vmatprep.subr.bf16.mxu0 %v13764_v44 }
 0x88c   :  { %13777 = vmatpush1.bf16.msra.mxu0 %v13763_v59 }
 0x88d   :  { %13811 = vmatprep.subr.bf16.mxu0 %v13754_v31 }
 0x88f   :  { %14785 = vmatmul.mubr.msk.bf16.vlgmr.msra.gmra.mrb[176].mxu0 %vm12046_vm4, %v13749_v32 }
 0x890   :  { %13812 = vmatpush1.bf16.msra.mxu0 %v13753_v52  ;;  %13843 = vmatprep.mubr.bf16.mxu0 %v22389_v19 }
 0x891   :  { %13813 = vmatprep.subr.bf16.mxu0 %v13758_v27 }
 0x892   :  { %v13054_v45 = vpop.f32.mrb[124].mxu0 }
 0x893   :  { %v13063_v4 = vadd.f32 %v13054_v45, %v12950_v58  ;;  %v13056_v22 = vpop.f32.mrb[125].mxu0  ;;  %v13870_v58 = vld [vmem:[#allocation2 + $0x7b0] sm:$0xff] }
 0x894   :  { %v13064_v6 = vadd.f32 %v13056_v22, %v12951_v24  ;;  %v13058_v57 = vpop.f32.mrb[126].mxu0  ;;  %13814 = vmatpush1.bf16.msra.mxu0 %v13757_v12  ;;  %v13875_v24 = vld [vmem:[#allocation2 + $0x7d8] sm:$0xff] }
 0x895   :  { %v13059_v50 = vpop.f32.mrb[127].mxu0  ;;  %13815 = vmatprep.subr.bf16.mxu0 %v13762_v0 }
 0x898   :  { %13816 = vmatpush1.bf16.msra.mxu0 %v13761_v9 }
 0x899   :  { %13817 = vmatprep.subr.bf16.mxu0 %v13766_v8 }
 0x89c   :  { %13818 = vmatpush1.bf16.msra.mxu0 %v13765_v48 }
 0x89d   :  { %13883 = vmatprep.subr.bf16.mxu0 %v13865_v7 }
 0x89f   :  { %14786 = vmatmul.mubr.msk.bf16.vlgmr.msra.gmra.mrb[180].mxu0 %vm12046_vm4, %v13749_v32 }
 0x8a0   :  { %13884 = vmatpush1.bf16.msra.mxu0 %v13864_v34  ;;  %13915 = vmatprep.mubr.bf16.mxu0 %v22389_v19 }
 0x8a1   :  { %13885 = vmatprep.subr.bf16.mxu0 %v13869_v46 }
 0x8a2   :  { %v13126_v13 = vpop.f32.mrb[128].mxu0 }
 0x8a3   :  { %v13174_v1 = vadd.f32 %v13126_v13, %v13061_v37  ;;  %v13128_v63 = vpop.f32.mrb[129].mxu0 }
 0x8a4   :  { %v13175_v36 = vadd.f32 %v13128_v63, %v13062_v33  ;;  %v13130_v49 = vpop.f32.mrb[130].mxu0  ;;  %13886 = vmatpush1.bf16.msra.mxu0 %v13868_v54 }
 0x8a5   :  { %v13131_v2 = vpop.f32.mrb[131].mxu0  ;;  %13887 = vmatprep.subr.bf16.mxu0 %v13873_v29 }
 0x8a8   :  { %13888 = vmatpush1.bf16.msra.mxu0 %v13872_v3 }
 0x8a9   :  { %13889 = vmatprep.subr.bf16.mxu0 %v13877_v20 }
 0x8ac   :  { %13890 = vmatpush1.bf16.msra.mxu0 %v13876_v61 }
 0x8ad   :  { %13924 = vmatprep.subr.bf16.mxu0 %v13867_v51 }
 0x8af   :  { %14787 = vmatmul.mubr.msk.bf16.vlgmr.msra.gmra.mrb[184].mxu0 %vm12046_vm4, %v13862_v47 }
 0x8b0   :  { %13925 = vmatpush1.bf16.msra.mxu0 %v13866_v38  ;;  %13956 = vmatprep.mubr.bf16.mxu0 %v22389_v19 }
 0x8b1   :  { %13926 = vmatprep.subr.bf16.mxu0 %v13871_v30 }
 0x8b2   :  { %v13167_v18 = vpop.f32.mrb[132].mxu0 }
 0x8b3   :  { %v13176_v26 = vadd.f32 %v13167_v18, %v13063_v4  ;;  %v13169_v14 = vpop.f32.mrb[133].mxu0 }
 0x8b4   :  { %v13177_v35 = vadd.f32 %v13169_v14, %v13064_v6  ;;  %v13171_v60 = vpop.f32.mrb[134].mxu0  ;;  %13927 = vmatpush1.bf16.msra.mxu0 %v13870_v58 }
 0x8b5   :  { %v13172_v11 = vpop.f32.mrb[135].mxu0  ;;  %13928 = vmatprep.subr.bf16.mxu0 %v13875_v24 }
 0x8b8   :  { %13929 = vmatpush1.bf16.msra.mxu0 %v13874_v42 }
 0x8b9   :  { %13930 = vmatprep.subr.bf16.mxu0 %v13879_v40 }
 0x8bc   :  { %13931 = vmatpush1.bf16.msra.mxu0 %v13878_v43 }
 0x8bf   :  { %14788 = vmatmul.mubr.msk.bf16.vlgmr.msra.gmra.mrb[188].mxu0 %vm12046_vm4, %v13862_v47 }
 0x8c2   :  { %v13239_v19 = vpop.f32.mrb[136].mxu0 }
 0x8c3   :  { %v13287_v39 = vadd.f32 %v13239_v19, %v13174_v1  ;;  %v13241_v10 = vpop.f32.mrb[137].mxu0 }
 0x8c4   :  { %v13288_v28 = vadd.f32 %v13241_v10, %v13175_v36  ;;  %v13243_v16 = vpop.f32.mrb[138].mxu0 }
 0x8c5   :  { %v13244_v37 = vpop.f32.mrb[139].mxu0 }
 0x8d2   :  { %v13280_v56 = vpop.f32.mrb[140].mxu0 }
 0x8d3   :  { %v13289_v33 = vadd.f32 %v13280_v56, %v13176_v26  ;;  %v13282_v53 = vpop.f32.mrb[141].mxu0 }
 0x8d4   :  { %v13290_v25 = vadd.f32 %v13282_v53, %v13177_v35  ;;  %v13284_v55 = vpop.f32.mrb[142].mxu0  ;;  %v13971_v53 = vlaneseq }
 0x8d5   :  { %v13285_v5 = vpop.f32.mrb[143].mxu0 }
 0x8d6   :  { %v13969_v5 = vld [vmem:[%s21641_s7] sm:$0xf] }
 0x8e2   :  { %v13352_v21 = vpop.f32.mrb[144].mxu0 }
 0x8e3   :  { %v13400_v44 = vadd.f32 %v13352_v21, %v13287_v39  ;;  %v13354_v17 = vpop.f32.mrb[145].mxu0 }
 0x8e4   :  { %v13401_v59 = vadd.f32 %v13354_v17, %v13288_v28  ;;  %v13356_v31 = vpop.f32.mrb[146].mxu0 }
 0x8e5   :  { %v13357_v32 = vpop.f32.mrb[147].mxu0 }
 0x8f2   :  { %v13393_v52 = vpop.f32.mrb[148].mxu0 }
 0x8f3   :  { %v13402_v27 = vadd.f32 %v13393_v52, %v13289_v33  ;;  %v13395_v12 = vpop.f32.mrb[149].mxu0 }
 0x8f4   :  { %v13403_v45 = vadd.f32 %v13395_v12, %v13290_v25  ;;  %v13397_v0 = vpop.f32.mrb[150].mxu0  ;;  %v21565_v25 = vshrl.u32 %v13971_v53, 7 }
 0x8f5   :  { %v13398_v4 = vpop.f32.mrb[151].mxu0 }
 0x8f6   :  { %v13973_v55 = vsub.s32 0, %v21565_v25  ;;  %v13977_v21 = vsub.s32 1, %v21565_v25 }
 0x902   :  { %v13465_v22 = vpop.f32.mrb[152].mxu0 }
 0x903   :  { %v13513_v6 = vadd.f32 %v13465_v22, %v13400_v44  ;;  %v13467_v57 = vpop.f32.mrb[153].mxu0  ;;  %v13974_v44 = vrot.slane %v13969_v5, %v13973_v55 }
 0x904   :  { %v13514_v50 = vadd.f32 %v13467_v57, %v13401_v59  ;;  %v13469_v9 = vpop.f32.mrb[154].mxu0  ;;  %v13978_v59 = vrot.slane %v13969_v5, %v13977_v21  ;;  %v13985_v57 = vsub.s32 3, %v21565_v25 }
 0x905   :  { %v13470_v8 = vpop.f32.mrb[155].mxu0 }
 0x906   :  { %v13986_v8 = vrot.slane %v13969_v5, %v13985_v57 }
 0x912   :  { %v13506_v48 = vpop.f32.mrb[156].mxu0 }
 0x913   :  { %v13515_v7 = vadd.f32 %v13506_v48, %v13402_v27  ;;  %v13508_v34 = vpop.f32.mrb[157].mxu0 }
 0x914   :  { %v13516_v46 = vadd.f32 %v13508_v34, %v13403_v45  ;;  %v13510_v54 = vpop.f32.mrb[158].mxu0 }
 0x915   :  { %v13511_v41 = vpop.f32.mrb[159].mxu0 }
 0x922   :  { %v13578_v13 = vpop.f32.mrb[160].mxu0 }
 0x923   :  { %v13626_v29 = vadd.f32 %v13578_v13, %v13513_v6  ;;  %v13580_v1 = vpop.f32.mrb[161].mxu0  ;;  %v13981_v6 = vsub.s32 2, %v21565_v25 }
 0x924   :  { %v13627_v63 = vadd.f32 %v13580_v1, %v13514_v50  ;;  %v13582_v36 = vpop.f32.mrb[162].mxu0 }
 0x925   :  { %v13583_v49 = vpop.f32.mrb[163].mxu0  ;;  %v13982_v50 = vrot.slane %v13969_v5, %v13981_v6 }
 0x932   :  { %v13619_v23 = vpop.f32.mrb[164].mxu0 }
 0x933   :  { %v13628_v2 = vadd.f32 %v13619_v23, %v13515_v7  ;;  %v13621_v3 = vpop.f32.mrb[165].mxu0 }
 0x934   :  { %v13629_v62 = vadd.f32 %v13621_v3, %v13516_v46  ;;  %v13623_v20 = vpop.f32.mrb[166].mxu0 }
 0x935   :  { %v13624_v15 = vpop.f32.mrb[167].mxu0 }
 0x942   :  { %v13691_v61 = vpop.f32.mrb[168].mxu0 }
 0x943   :  { %v13739_v51 = vadd.f32 %v13691_v61, %v13626_v29  ;;  %v13693_v47 = vpop.f32.mrb[169].mxu0 }
 0x944   :  { %v13740_v38 = vadd.f32 %v13693_v47, %v13627_v63  ;;  %v13695_v30 = vpop.f32.mrb[170].mxu0 }
 0x945   :  { %v13696_v58 = vpop.f32.mrb[171].mxu0 }
 0x952   :  { %v13732_v18 = vpop.f32.mrb[172].mxu0 }
 0x953   :  { %v13741_v24 = vadd.f32 %v13732_v18, %v13628_v2  ;;  %v13734_v26 = vpop.f32.mrb[173].mxu0 }
 0x954   :  { %v13742_v14 = vadd.f32 %v13734_v26, %v13629_v62  ;;  %v13736_v35 = vpop.f32.mrb[174].mxu0 }
 0x955   :  { %v13737_v60 = vpop.f32.mrb[175].mxu0 }
 0x962   :  { %v13804_v11 = vpop.f32.mrb[176].mxu0 }
 0x963   :  { %v13852_v42 = vadd.f32 %v13804_v11, %v13739_v51  ;;  %v13806_v40 = vpop.f32.mrb[177].mxu0 }
 0x964   :  { %v13853_v43 = vadd.f32 %v13806_v40, %v13740_v38  ;;  %v13808_v19 = vpop.f32.mrb[178].mxu0 }
 0x965   :  { %v13809_v39 = vpop.f32.mrb[179].mxu0 }
 0x972   :  { %v13845_v10 = vpop.f32.mrb[180].mxu0 }
 0x973   :  { %v13854_v28 = vadd.f32 %v13845_v10, %v13741_v24  ;;  %v13847_v16 = vpop.f32.mrb[181].mxu0 }
 0x974   :  { %v13855_v37 = vadd.f32 %v13847_v16, %v13742_v14  ;;  %v13849_v56 = vpop.f32.mrb[182].mxu0 }
 0x975   :  { %v13850_v33 = vpop.f32.mrb[183].mxu0 }
 0x982   :  { %v13917_v17 = vpop.f32.mrb[184].mxu0 }
 0x983   :  { %v13965_v31 = vadd.f32 %v13917_v17, %v13852_v42  ;;  %v13919_v32 = vpop.f32.mrb[185].mxu0 }
 0x984   :  { %v13966_v52 = vadd.f32 %v13919_v32, %v13853_v43  ;;  %v13921_v27 = vpop.f32.mrb[186].mxu0 }
 0x985   :  { %v21576_v12 = vadd.f32 %v13974_v44, %v13965_v31  ;;  %v13922_v45 = vpop.f32.mrb[187].mxu0 }
 0x986   :  { %v13992_v0 = vadd.f32 %v13978_v59, %v13966_v52 }
 0x987   :  { %v13995_v4 = vmax.f32 %v21576_v12, 0.0 }
 0x988   :  { %v13996_v22 = vmax.f32 %v13992_v0, 0.0 }
 0x992   :  { %v13958_v9 = vpop.f32.mrb[188].mxu0 }
 0x993   :  { %v13967_v48 = vadd.f32 %v13958_v9, %v13854_v28  ;;  %v13960_v7 = vpop.f32.mrb[189].mxu0 }
 0x994   :  { %v13968_v34 = vadd.f32 %v13960_v7, %v13855_v37  ;;  %v13962_v46 = vpop.f32.mrb[190].mxu0 }
 0x995   :  { %v21581_v54 = vadd.f32 %v13982_v50, %v13967_v48  ;;  %v13963_v41 = vpop.f32.mrb[191].mxu0 }
 0x996   :  { %v21583_v13 = vadd.f32 %v13986_v8, %v13968_v34 }
 0x997   :  { %v13997_v29 = vmax.f32 %v21581_v54, 0.0 }
 0x998   :  { %v13998_v1 = vmax.f32 %v21583_v13, 0.0 }
 0x999   :  { %16312 = dma.done.wait [#allocation5 + $0x1], 8192 }
 0x99a   :  { %16313 = vsyncadd [#allocation5 + $0x1], 4294959104  ;;  %v14004_v63 = vpack.c.bf16 %v13996_v22, %v13996_v22  ;;  %v14008_v36 = vld [vmem:[#allocation3 + $0x8] sm:$0xff]  ;;  %v14007_v49 = vld [vmem:[#allocation3] sm:$0xff]  ;;  %v14003_v5 = vpack.c.bf16 %v13995_v4, %v13995_v4  ;;  %v14006_v44 = vpack.c.bf16 %v13998_v1, %v13998_v1 }
 0x99b   :  { %v14010_v23 = vld [vmem:[#allocation3 + $0x18] sm:$0xff]  ;;  %14083 = vmatprep.subr.bf16.mxu0 %v14008_v36  ;;  %v14009_v2 = vld [vmem:[#allocation3 + $0x10] sm:$0xff]  ;;  %v14012_v3 = vld [vmem:[#allocation3 + $0x28] sm:$0xff] }
 0x99c   :  { %14115 = vmatprep.mubr.bf16.mxu0 %v14004_v63  ;;  %14084 = vmatpush1.bf16.msra.mxu0 %v14007_v49  ;;  %v14011_v62 = vld [vmem:[#allocation3 + $0x20] sm:$0xff]  ;;  %v14014_v20 = vld [vmem:[#allocation3 + $0x38] sm:$0xff]  ;;  %v14013_v15 = vld [vmem:[#allocation3 + $0x30] sm:$0xff] }
 0x99d   :  { %14085 = vmatprep.subr.bf16.mxu0 %v14010_v23  ;;  %v14016_v61 = vld [vmem:[#allocation3 + $0x48] sm:$0xff]  ;;  %v14015_v51 = vld [vmem:[#allocation3 + $0x40] sm:$0xff]  ;;  %v14018_v47 = vld [vmem:[#allocation3 + $0x58] sm:$0xff] }
 0x99e   :  { %v14017_v38 = vld [vmem:[#allocation3 + $0x50] sm:$0xff]  ;;  %v14020_v30 = vld [vmem:[#allocation3 + $0x68] sm:$0xff]  ;;  %v14019_v58 = vld [vmem:[#allocation3 + $0x60] sm:$0xff] }
 0x99f   :  { %v14022_v18 = vld [vmem:[#allocation3 + $0x78] sm:$0xff]  ;;  %v14021_v24 = vld [vmem:[#allocation3 + $0x70] sm:$0xff]  ;;  %v14024_v26 = vld [vmem:[#allocation3 + $0x88] sm:$0xff] }
 0x9a0   :  { %14086 = vmatpush1.bf16.msra.mxu0 %v14009_v2  ;;  %v14023_v14 = vld [vmem:[#allocation3 + $0x80] sm:$0xff]  ;;  %v14026_v35 = vld [vmem:[#allocation3 + $0x98] sm:$0xff]  ;;  %v14025_v60 = vld [vmem:[#allocation3 + $0x90] sm:$0xff] }
 0x9a1   :  { %14087 = vmatprep.subr.bf16.mxu0 %v14012_v3  ;;  %v14028_v11 = vld [vmem:[#allocation3 + $0xa8] sm:$0xff]  ;;  %v14027_v42 = vld [vmem:[#allocation3 + $0xa0] sm:$0xff]  ;;  %v14030_v40 = vld [vmem:[#allocation3 + $0xb8] sm:$0xff] }
 0x9a2   :  { %v14029_v43 = vld [vmem:[#allocation3 + $0xb0] sm:$0xff]  ;;  %v14032_v19 = vld [vmem:[#allocation3 + $0xc8] sm:$0xff]  ;;  %v14031_v39 = vld [vmem:[#allocation3 + $0xc0] sm:$0xff] }
 0x9a3   :  { %v14034_v10 = vld [vmem:[#allocation3 + $0xd8] sm:$0xff]  ;;  %v14033_v28 = vld [vmem:[#allocation3 + $0xd0] sm:$0xff]  ;;  %v14036_v16 = vld [vmem:[#allocation3 + $0xe8] sm:$0xff] }
 0x9a4   :  { %14088 = vmatpush1.bf16.msra.mxu0 %v14011_v62  ;;  %v14035_v37 = vld [vmem:[#allocation3 + $0xe0] sm:$0xff]  ;;  %v14038_v56 = vld [vmem:[#allocation3 + $0xf8] sm:$0xff]  ;;  %v14037_v33 = vld [vmem:[#allocation3 + $0xf0] sm:$0xff] }
 0x9a5   :  { %14089 = vmatprep.subr.bf16.mxu0 %v14014_v20  ;;  %v14040_v53 = vld [vmem:[#allocation3 + $0x108] sm:$0xff]  ;;  %v14039_v17 = vld [vmem:[#allocation3 + $0x100] sm:$0xff]  ;;  %v14042_v59 = vld [vmem:[#allocation3 + $0x118] sm:$0xff] }
 0x9a6   :  { %v14041_v31 = vld [vmem:[#allocation3 + $0x110] sm:$0xff]  ;;  %v14044_v32 = vld [vmem:[#allocation3 + $0x128] sm:$0xff]  ;;  %v14043_v52 = vld [vmem:[#allocation3 + $0x120] sm:$0xff] }
 0x9a7   :  { %v14046_v27 = vld [vmem:[#allocation3 + $0x138] sm:$0xff]  ;;  %v14045_v12 = vld [vmem:[#allocation3 + $0x130] sm:$0xff]  ;;  %v14048_v45 = vld [vmem:[#allocation3 + $0x148] sm:$0xff] }
 0x9a8   :  { %14090 = vmatpush1.bf16.msra.mxu0 %v14013_v15  ;;  %v14047_v0 = vld [vmem:[#allocation3 + $0x140] sm:$0xff]  ;;  %v14050_v4 = vld [vmem:[#allocation3 + $0x158] sm:$0xff]  ;;  %v14049_v22 = vld [vmem:[#allocation3 + $0x150] sm:$0xff]  ;;  %v14005_v15 = vpack.c.bf16 %v13997_v29, %v13997_v29 }
 0x9a9   :  { %14091 = vmatprep.subr.bf16.mxu0 %v14016_v61  ;;  %v14052_v6 = vld [vmem:[#allocation3 + $0x168] sm:$0xff]  ;;  %v14051_v57 = vld [vmem:[#allocation3 + $0x160] sm:$0xff]  ;;  %v14054_v50 = vld [vmem:[#allocation3 + $0x178] sm:$0xff] }
 0x9aa   :  { %v14053_v9 = vld [vmem:[#allocation3 + $0x170] sm:$0xff]  ;;  %v14056_v8 = vld [vmem:[#allocation3 + $0x188] sm:$0xff]  ;;  %v14055_v48 = vld [vmem:[#allocation3 + $0x180] sm:$0xff] }
 0x9ab   :  { %v14058_v7 = vld [vmem:[#allocation3 + $0x198] sm:$0xff]  ;;  %v14057_v34 = vld [vmem:[#allocation3 + $0x190] sm:$0xff]  ;;  %v14060_v46 = vld [vmem:[#allocation3 + $0x1a8] sm:$0xff] }
 0x9ac   :  { %14092 = vmatpush1.bf16.msra.mxu0 %v14015_v51  ;;  %v14059_v41 = vld [vmem:[#allocation3 + $0x1a0] sm:$0xff]  ;;  %v14062_v13 = vld [vmem:[#allocation3 + $0x1b8] sm:$0xff]  ;;  %v14061_v1 = vld [vmem:[#allocation3 + $0x1b0] sm:$0xff] }
 0x9ad   :  { %14093 = vmatprep.subr.bf16.mxu0 %v14018_v47  ;;  %v14064_v63 = vld [vmem:[#allocation3 + $0x1c8] sm:$0xff]  ;;  %v14063_v36 = vld [vmem:[#allocation3 + $0x1c0] sm:$0xff]  ;;  %v14066_v49 = vld [vmem:[#allocation3 + $0x1d8] sm:$0xff] }
 0x9ae   :  { %v14065_v23 = vld [vmem:[#allocation3 + $0x1d0] sm:$0xff]  ;;  %v14068_v2 = vld [vmem:[#allocation3 + $0x1e8] sm:$0xff]  ;;  %v14067_v3 = vld [vmem:[#allocation3 + $0x1e0] sm:$0xff] }
 0x9af   :  { %v14070_v62 = vld [vmem:[#allocation3 + $0x1f8] sm:$0xff]  ;;  %v14069_v20 = vld [vmem:[#allocation3 + $0x1f0] sm:$0xff]  ;;  %v14071_v61 = vld [vmem:[%s21643_s9] sm:$0x3] }
 0x9b0   :  { %14094 = vmatpush1.bf16.msra.mxu0 %v14017_v38  ;;  %v14076_v51 = vrot.slane %v14071_v61, %v13973_v55  ;;  %v14080_v47 = vrot.slane %v14071_v61, %v13977_v21 }
 0x9b1   :  { %14095 = vmatprep.subr.bf16.mxu0 %v14020_v30 }
 0x9b4   :  { %14096 = vmatpush1.bf16.msra.mxu0 %v14019_v58 }
 0x9b5   :  { %14097 = vmatprep.subr.bf16.mxu0 %v14022_v18 }
 0x9b8   :  { %14098 = vmatpush1.bf16.msra.mxu0 %v14021_v24 }
 0x9b9   :  { %14099 = vmatprep.subr.bf16.mxu0 %v14024_v26 }
 0x9bc   :  { %14100 = vmatpush1.bf16.msra.mxu0 %v14023_v14  ;;  %v22390_v14 = vld [vmem:[#allocation26_spill] sm:$0xff] }
 0x9bd   :  { %14101 = vmatprep.subr.bf16.mxu0 %v14026_v35 }
 0x9c0   :  { %14102 = vmatpush1.bf16.msra.mxu0 %v14025_v60 }
 0x9c1   :  { %14103 = vmatprep.subr.bf16.mxu0 %v14028_v11 }
 0x9c4   :  { %14104 = vmatpush1.bf16.msra.mxu0 %v14027_v42 }
 0x9c5   :  { %14105 = vmatprep.subr.bf16.mxu0 %v14030_v40 }
 0x9c8   :  { %14106 = vmatpush1.bf16.msra.mxu0 %v14029_v43 }
 0x9c9   :  { %14107 = vmatprep.subr.bf16.mxu0 %v14032_v19 }
 0x9cc   :  { %14108 = vmatpush1.bf16.msra.mxu0 %v14031_v39 }
 0x9cd   :  { %14109 = vmatprep.subr.bf16.mxu0 %v14034_v10 }
 0x9d0   :  { %14110 = vmatpush1.bf16.msra.mxu0 %v14033_v28 }
 0x9d1   :  { %14111 = vmatprep.subr.bf16.mxu0 %v14036_v16 }
 0x9d4   :  { %14112 = vmatpush1.bf16.msra.mxu0 %v14035_v37 }
 0x9d5   :  { %14113 = vmatprep.subr.bf16.mxu0 %v14038_v56 }
 0x9d8   :  { %14114 = vmatpush1.bf16.msra.mxu0 %v14037_v33 }
 0x9d9   :  { %14124 = vmatprep.subr.bf16.mxu0 %v14040_v53 }
 0x9db   :  { %14116 = vmatmul.mubr.bf16.vlgmr.msra.gmra.mrb[192].mxu0 %v14003_v5 }
 0x9dc   :  { %14125 = vmatpush1.bf16.msra.mxu0 %v14039_v17  ;;  %14156 = vmatprep.mubr.bf16.mxu0 %v14006_v44 }
 0x9dd   :  { %14126 = vmatprep.subr.bf16.mxu0 %v14042_v59 }
 0x9e0   :  { %14127 = vmatpush1.bf16.msra.mxu0 %v14041_v31 }
 0x9e1   :  { %14128 = vmatprep.subr.bf16.mxu0 %v14044_v32 }
 0x9e4   :  { %14129 = vmatpush1.bf16.msra.mxu0 %v14043_v52 }
 0x9e5   :  { %14130 = vmatprep.subr.bf16.mxu0 %v14046_v27 }
 0x9e8   :  { %14131 = vmatpush1.bf16.msra.mxu0 %v14045_v12 }
 0x9e9   :  { %14132 = vmatprep.subr.bf16.mxu0 %v14048_v45 }
 0x9ec   :  { %14133 = vmatpush1.bf16.msra.mxu0 %v14047_v0 }
 0x9ed   :  { %14134 = vmatprep.subr.bf16.mxu0 %v14050_v4 }
 0x9f0   :  { %14135 = vmatpush1.bf16.msra.mxu0 %v14049_v22 }
 0x9f1   :  { %14136 = vmatprep.subr.bf16.mxu0 %v14052_v6 }
 0x9f4   :  { %14137 = vmatpush1.bf16.msra.mxu0 %v14051_v57 }
 0x9f5   :  { %14138 = vmatprep.subr.bf16.mxu0 %v14054_v50 }
 0x9f8   :  { %14139 = vmatpush1.bf16.msra.mxu0 %v14053_v9 }
 0x9f9   :  { %14140 = vmatprep.subr.bf16.mxu0 %v14056_v8 }
 0x9fc   :  { %14141 = vmatpush1.bf16.msra.mxu0 %v14055_v48 }
 0x9fd   :  { %14142 = vmatprep.subr.bf16.mxu0 %v14058_v7 }
 0xa00   :  { %14143 = vmatpush1.bf16.msra.mxu0 %v14057_v34 }
 0xa01   :  { %14144 = vmatprep.subr.bf16.mxu0 %v14060_v46 }
 0xa04   :  { %14145 = vmatpush1.bf16.msra.mxu0 %v14059_v41 }
 0xa05   :  { %14146 = vmatprep.subr.bf16.mxu0 %v14062_v13 }
 0xa08   :  { %14147 = vmatpush1.bf16.msra.mxu0 %v14061_v1 }
 0xa09   :  { %14148 = vmatprep.subr.bf16.mxu0 %v14064_v63 }
 0xa0c   :  { %14149 = vmatpush1.bf16.msra.mxu0 %v14063_v36 }
 0xa0d   :  { %14150 = vmatprep.subr.bf16.mxu0 %v14066_v49 }
 0xa10   :  { %14151 = vmatpush1.bf16.msra.mxu0 %v14065_v23 }
 0xa11   :  { %14152 = vmatprep.subr.bf16.mxu0 %v14068_v2 }
 0xa14   :  { %14153 = vmatpush1.bf16.msra.mxu0 %v14067_v3 }
 0xa15   :  { %14154 = vmatprep.subr.bf16.mxu0 %v14070_v62 }
 0xa18   :  { %14155 = vmatpush1.bf16.msra.mxu0 %v14069_v20 }
 0xa19   :  { %15077 = vmatprep.subr.bf16.mxu0 %v22390_v14 }
 0xa1b   :  { %14157 = vmatmul.mubr.bf16.vlgmr.msra.gmra.mrb[192].mxu0 %v14005_v15 }
 0xaee   :  { %v14158_v38 = vpop.f32.mrb[192].mxu0 }
 0xaef   :  { %v15667_v30 = vadd.f32 %v14158_v38, %v14076_v51  ;;  %v14160_v58 = vpop.f32.mrb[193].mxu0 }
 0xaf0   :  { %v15668_v18 = vadd.f32 %v14160_v58, %v14080_v47  ;;  %v14162_v24 = vpop.f32.mrb[194].mxu0 }
 0xaf1   :  { %v14165_v54 = vmax.f32 %v15667_v30, 0.0  ;;  %v14163_v26 = vpop.f32.mrb[195].mxu0 }
 0xaf2   :  { %v14166_v29 = vmax.f32 %v15668_v18, 0.0 }
 0xaf4   :  { %v14172_v35 = vpack.c.bf16 %v14166_v29, %v14166_v29 }
 0xaf5   :  { %16314 = dma.done.wait [#allocation5 + $0x2], 2048 }
 0xaf6   :  { %16315 = vsyncadd [#allocation5 + $0x2], 4294965248  ;;  %v22391_v60 = vld [vmem:[#allocation18_spill] sm:$0xff]  ;;  %v22392_v11 = vld [vmem:[#allocation27_spill] sm:$0xff]  ;;  %14228 = vmatprep.mubr.bf16.mxu0 %v14172_v35  ;;  %v14171_v56 = vpack.c.bf16 %v14165_v54, %v14165_v54  ;;  %s16344_s30 = smov [#allocation9]  }
 0xaf7   :  { %15078 = vmatpush3.bf16.msra.mxu0 %v22391_v60  ;;  %v22393_v25 = vld [vmem:[#allocation19_spill] sm:$0xff]  ;;  %v22394_v55 = vld [vmem:[#allocation28_spill] sm:$0xff]  ;;  %v22396_v42 = vld [vmem:[#allocation29_spill] sm:$0xff]  ;;  %s14243_s13 = sshll.u32 %s16344_s30, 4  ;;  %s14244_s13 = int_to_ptr.vmem [resolvable:$true] %s14243_s13 }
 0xaf8   :  { %15079 = vmatprep.subr.bf16.mxu0 %v22392_v11  ;;  %v22395_v21 = vld [vmem:[#allocation20_spill] sm:$0xff]  ;;  %v22397_v40 = vld [vmem:[#allocation21_spill] sm:$0xff]  ;;  %v22398_v43 = vld [vmem:[#allocation30_spill] sm:$0xff]  ;;  %s16288_s14 = scalar_lea.vmem %s14244_s13, 32  ;;  %p16293_p1 = scmp.lt.s32.totalorder %s14244_s13, %s14244_s13 }
 0xaf9   :  { %v22399_v19 = vld [vmem:[#allocation22_spill] sm:$0xff]  ;;  %v22400_v39 = vld [vmem:[#allocation31_spill] sm:$0xff]  ;;  %v22402_v28 = vld [vmem:[#allocation32_spill] sm:$0xff]  ;;  %p16289_p0 = scmp.ne.s32.totalorder %s14244_s13, %s16288_s14  ;;  %p16294_p2 = scmp.lt.s32.totalorder %s16288_s14, %s16288_s14 }
 0xafa   :  { %v22401_v10 = vld [vmem:[#allocation23_spill] sm:$0xff]  ;;  %v22403_v16 = vld [vmem:[#allocation24_spill] sm:$0xff]  ;;  %v22404_v37 = vld [vmem:[#allocation33_spill] sm:$0xff] }
 0xafb   :  { %15080 = vmatpush3.bf16.msra.mxu0 %v22393_v25  ;;  %v22405_v33 = vld [vmem:[#allocation25_spill] sm:$0xff]  ;;  %p16295_p3 = por %p16294_p2, %p16293_p1 }
 0xafc   :  { %15081 = vmatprep.subr.bf16.mxu0 %v22394_v55  ;;  %v14789_v5 = vld [vmem:[%s21645_s11] ss:$0 sm:$0xff] }
 0xafd   :  { %p16296_p4 = pnand %p16295_p3, %p16289_p0 }
 0xaff   :  { %15082 = vmatpush3.bf16.msra.mxu0 %v22395_v21 }
 0xb00   :  { %15083 = vmatprep.subr.bf16.mxu0 %v22396_v42 }
 0xb03   :  { %15084 = vmatpush3.bf16.msra.mxu0 %v22397_v40 }
 0xb04   :  { %15085 = vmatprep.subr.bf16.mxu0 %v22398_v43 }
 0xb07   :  { %15086 = vmatpush3.bf16.msra.mxu0 %v22399_v19 }
 0xb08   :  { %15087 = vmatprep.subr.bf16.mxu0 %v22400_v39 }
 0xb0b   :  { %15088 = vmatpush3.bf16.msra.mxu0 %v22401_v10 }
 0xb0c   :  { %15089 = vmatprep.subr.bf16.mxu0 %v22402_v28 }
 0xb0f   :  { %15090 = vmatpush3.bf16.msra.mxu0 %v22403_v16 }
 0xb10   :  { %15091 = vmatprep.subr.bf16.mxu0 %v22404_v37 }
 0xb13   :  { %15092 = vmatpush3.bf16.msra.mxu0 %v22405_v33 }
 0xb16   :  { %14229 = vmatmul.mubr.bf16.vlgmr.msra.gmra.mrb[196].mxu0 %v14171_v56 }
 0xbe9   :  { %v15093_v53 = vpop.f32.mrb[196].mxu0 }
 0xbea   :  { %v15094_v44 = vpop.f32.mrb[197].mxu0 }
 0xbeb   :  { %v15095_v17 = vadd.f32 %v15094_v44, %v15093_v53  ;;  %v15096_v59 = vpop.f32.mrb[198].mxu0 }
 0xbec   :  { %v15097_v31 = vpop.f32.mrb[199].mxu0 }
 0xbed   :  { %v14231_v32 = vadd.f32 %v15095_v17, %v14789_v5 }
 0xbef   :  { %14236 = vst [vmem:[#allocation9] sm:$0x3] %v14231_v32 }
 0xbf0   :  { %16299 = shalt.err (!%p16296_p4)
}
 0xbf1   :  { %s16300_s11 = scalar_lea.hbm %s21646_s12, 32 }
 0xbf2   :  { %p16301_p5 = scmp.ne.s32.totalorder %s21646_s12, %s16300_s11  ;;  %p16304_p6 = scmp.lt.u32.totalorder %s16300_s11, %s21646_s12 }
 0xbf4   :  { %p16306_p7 = pnand %p16304_p6, %p16301_p5 }
 0xbf6   :  { %16309 = shalt.err (!%p16306_p7)
}
 0xbf7   :  { %14246 = dma.vmem_to_hbm [thread:$0]  %s14244_s13, 32, %s21646_s12, [#allocation10]  }
 0xbf8   :  { %16316 = dma.done.wait [#allocation10], 32  }
 0xbf9   :  { %16317 = vsyncadd [#allocation10], 4294967264 }
 0xbfa   :  { %14250 = vsyncpa [#allocation10], 1 }
 0xbfb   :  { %14251 = vsyncmov [#allocation5] }
 0xbfe   :  { %s14252_s21 = vpop.sfrf %14251 }
 0xbff   :  { %p14790_p8 = scmp.ne.s32.totalorder %s14252_s21, 0 }
 0xc01   :  { %14256 = shalt.err (%p14790_p8)  }
 0xc02   :  { %14258 = vsyncmov [#allocation5 + $0x1] }
 0xc05   :  { %s14259_s22 = vpop.sfrf %14258 }
 0xc06   :  { %p14791_p9 = scmp.ne.s32.totalorder %s14259_s22, 0 }
 0xc08   :  { %14263 = shalt.err (%p14791_p9)  }
 0xc09   :  { %14265 = vsyncmov [#allocation5 + $0x2] }
 0xc0c   :  { %s14266_s23 = vpop.sfrf %14265 }
 0xc0d   :  { %p14792_p10 = scmp.ne.s32.totalorder %s14266_s23, 0 }
 0xc0f   :  { %14270 = shalt.err (%p14792_p10)  }

</bundles_post_ra>
